<compile_context>
chip_gen: v7x
topology: tpu7x:2x2x1
jax: 0.10.0
libtpu: 0.0.40
codegen_flags: <defaults>
</compile_context>

<pallas_src>
import math
import functools

import jax
import jax.numpy as jnp
from jax import lax
from jax.experimental import pallas as pl
from jax.experimental.pallas import tpu as pltpu

# ----------------------- model hyper-parameters (small) -----------------------
D_MODEL = 32
N_HEAD = 4
D_HEAD = D_MODEL // N_HEAD
D_FF = 64
N_LAYER_ENC = 2
N_LAYER_DEC = 2
VOCAB_SRC = 16
VOCAB_TGT = 16
V_PAD = 128            # generator columns padded to one full lane width
MAX_LEN = 16
PAD_IDX = 0
LN_EPS = 1e-5
NEG_INF = -1e9
MXU_DT = jnp.bfloat16  # MXU operand dtype (f32 accumulation everywhere)


# ============================ in-kernel helper math ============================
def _add_ln(x, sub, g, b):
    """LayerNorm(x + sub), PyTorch semantics (biased var, eps=1e-5), f32."""
    h = x + sub
    mu = jnp.mean(h, axis=-1, keepdims=True)
    d = h - mu
    var = jnp.mean(d * d, axis=-1, keepdims=True)
    return d * lax.rsqrt(var + LN_EPS) * g + b


def _mha(q, k, v, bias, wo, B, Sq, Sk):
    """Multi-head attention + output projection.

    q: (B*Sq, D) f32, k/v: (B*Sk, D) f32, bias: additive mask (B, 1|Sq, Sk) f32
    (0 = attend, -1e9 = masked), wo: (D, D) bf16.  Batched over B with 3-D
    einsums; heads are a short unrolled loop; head outputs are concatenated on
    the lane axis and projected with a single matmul.
    """
    scale = 1.0 / math.sqrt(D_HEAD)
    q3 = q.reshape(B, Sq, D_MODEL)
    k3 = k.reshape(B, Sk, D_MODEL)
    v3 = v.reshape(B, Sk, D_MODEL)
    heads = []
    for h in range(N_HEAD):
        lo, hi = h * D_HEAD, (h + 1) * D_HEAD
        s = jnp.einsum('bqd,bkd->bqk', q3[:, :, lo:hi], k3[:, :, lo:hi],
                       preferred_element_type=jnp.float32) * scale + bias
        m = jnp.max(s, axis=-1, keepdims=True)
        e = jnp.exp(s - m)
        p = e * pl.reciprocal(jnp.sum(e, axis=-1, keepdims=True), approx=True)
        heads.append(jnp.einsum('bqk,bkd->bqd', p, v3[:, :, lo:hi],
                                preferred_element_type=jnp.float32))
    o = jnp.concatenate(heads, axis=-1).reshape(B * Sq, D_MODEL)      # (B*Sq, D)
    return jnp.dot(o.astype(MXU_DT), wo, preferred_element_type=jnp.float32)


def _enc_layer(x, bias, wqkv, bqkv, wo, bo, ln1g, ln1b,
               w1, b1, w2, b2, ln2g, ln2b, B, S):
    qkv = jnp.dot(x.astype(MXU_DT), wqkv, preferred_element_type=jnp.float32) + bqkv
    q = qkv[:, :D_MODEL]
    k = qkv[:, D_MODEL:2 * D_MODEL]
    v = qkv[:, 2 * D_MODEL:]
    a = _mha(q, k, v, bias, wo, B, S, S) + bo
    h = _add_ln(x, a, ln1g, ln1b)
    f = jnp.maximum(
        jnp.dot(h.astype(MXU_DT), w1, preferred_element_type=jnp.float32) + b1, 0.0)
    f = jnp.dot(f.astype(MXU_DT), w2, preferred_element_type=jnp.float32) + b2
    return _add_ln(h, f, ln2g, ln2b)


def _dec_layer(y, enc, self_bias, cross_bias,
               s_wqkv, s_bqkv, s_wo, s_bo, ln1g, ln1b,
               c_wq, c_bq, c_wkv, c_bkv, c_wo, c_bo, ln2g, ln2b,
               w1, b1, w2, b2, ln3g, ln3b, B, St, Ss):
    # masked self-attention
    qkv = jnp.dot(y.astype(MXU_DT), s_wqkv, preferred_element_type=jnp.float32) + s_bqkv
    q = qkv[:, :D_MODEL]
    k = qkv[:, D_MODEL:2 * D_MODEL]
    v = qkv[:, 2 * D_MODEL:]
    a = _mha(q, k, v, self_bias, s_wo, B, St, St) + s_bo
    h1 = _add_ln(y, a, ln1g, ln1b)
    # cross-attention (fused KV projection of encoder output)
    q = jnp.dot(h1.astype(MXU_DT), c_wq, preferred_element_type=jnp.float32) + c_bq
    kv = jnp.dot(enc.astype(MXU_DT), c_wkv, preferred_element_type=jnp.float32) + c_bkv
    k = kv[:, :D_MODEL]
    v = kv[:, D_MODEL:]
    c = _mha(q, k, v, cross_bias, c_wo, B, St, Ss) + c_bo
    h2 = _add_ln(h1, c, ln2g, ln2b)
    # FFN
    f = jnp.maximum(
        jnp.dot(h2.astype(MXU_DT), w1, preferred_element_type=jnp.float32) + b1, 0.0)
    f = jnp.dot(f.astype(MXU_DT), w2, preferred_element_type=jnp.float32) + b2
    return _add_ln(h2, f, ln3g, ln3b)


# ======================= single fused whole-forward kernel =====================
def _transformer_kernel(
        x_ref, y_ref, src_bias_ref, tgt_bias_ref,
        # encoder weights, stacked on a leading layer axis (N_LAYER_ENC, ...)
        e_wqkv, e_bqkv, e_wo, e_bo, e_ln1g, e_ln1b,
        e_w1, e_b1, e_w2, e_b2, e_ln2g, e_ln2b,
        # decoder weights, stacked on a leading layer axis (N_LAYER_DEC, ...)
        d_swqkv, d_sbqkv, d_swo, d_sbo, d_ln1g, d_ln1b,
        d_cwq, d_cbq, d_cwkv, d_cbkv, d_cwo, d_cbo, d_ln2g, d_ln2b,
        d_w1, d_b1, d_w2, d_b2, d_ln3g, d_ln3b,
        gen_w_ref, gen_b_ref,
        out_ref, *, B, Ss, St):
    x = x_ref[...]                        # (B*Ss, D) f32
    y = y_ref[...]                        # (B*St, D) f32
    src_bias = src_bias_ref[...]          # (B, 1, Ss) additive (broadcast over queries)
    tgt_bias = tgt_bias_ref[...]          # (B, St, St) additive (pad + causal)

    # ----- encoder stack (unrolled layer loop, leading-dim weight loads) -----
    for l in range(N_LAYER_ENC):
        x = _enc_layer(x, src_bias,
                       e_wqkv[l], e_bqkv[l], e_wo[l], e_bo[l], e_ln1g[l], e_ln1b[l],
                       e_w1[l], e_b1[l], e_w2[l], e_b2[l], e_ln2g[l], e_ln2b[l],
                       B, Ss)

    # ----- decoder stack -----
    for l in range(N_LAYER_DEC):
        y = _dec_layer(y, x, tgt_bias, src_bias,
                       d_swqkv[l], d_sbqkv[l], d_swo[l], d_sbo[l],
                       d_ln1g[l], d_ln1b[l],
                       d_cwq[l], d_cbq[l], d_cwkv[l], d_cbkv[l],
                       d_cwo[l], d_cbo[l], d_ln2g[l], d_ln2b[l],
                       d_w1[l], d_b1[l], d_w2[l], d_b2[l], d_ln3g[l], d_ln3b[l],
                       B, St, Ss)

    # ----- generator (tied weight, bias=False) + exact log_softmax -----
    # weight is lane-padded to 128 cols; padded cols have zero weight and -1e9
    # bias so they contribute exactly 0 to the softmax sum (lane-dense store).
    logits = jnp.dot(y.astype(MXU_DT), gen_w_ref[...],
                     preferred_element_type=jnp.float32) + gen_b_ref[...]
    m = jnp.max(logits, axis=-1, keepdims=True)
    lse = jnp.log(jnp.sum(jnp.exp(logits - m), axis=-1, keepdims=True)) + m
    out_ref[...] = logits - lse


# ============================= parameter construction ==========================
def _sinusoid_pe(max_len, d):
    pos = jnp.arange(max_len, dtype=jnp.float32)[:, None]
    i2 = jnp.arange(0, d, 2, dtype=jnp.float32)[None, :]
    ang = pos / jnp.power(10000.0, i2 / d)
    pe = jnp.zeros((max_len, d), jnp.float32)
    pe = pe.at[:, 0::2].set(jnp.sin(ang))
    pe = pe.at[:, 1::2].set(jnp.cos(ang))
    return pe


def _dense(key, fan_in, fan_out):
    w = jax.random.normal(key, (fan_in, fan_out), jnp.float32) * 0.02
    b = jnp.zeros((1, fan_out), jnp.float32)
    return w, b


def _ln():
    return jnp.ones((1, D_MODEL), jnp.float32), jnp.zeros((1, D_MODEL), jnp.float32)


def _init_enc_layer(key):
    ks = jax.random.split(key, 6)
    wq, bq = _dense(ks[0], D_MODEL, D_MODEL)
    wk, bk = _dense(ks[1], D_MODEL, D_MODEL)
    wv, bv = _dense(ks[2], D_MODEL, D_MODEL)
    wo, bo = _dense(ks[3], D_MODEL, D_MODEL)
    w1, b1 = _dense(ks[4], D_MODEL, D_FF)
    w2, b2 = _dense(ks[5], D_FF, D_MODEL)
    g1, z1 = _ln()
    g2, z2 = _ln()
    return {"wqkv": jnp.concatenate([wq, wk, wv], 1).astype(MXU_DT),
            "bqkv": jnp.concatenate([bq, bk, bv], 1),
            "wo": wo.astype(MXU_DT), "bo": bo,
            "ln1_g": g1, "ln1_b": z1,
            "w1": w1.astype(MXU_DT), "b1": b1,
            "w2": w2.astype(MXU_DT), "b2": b2,
            "ln2_g": g2, "ln2_b": z2}


def _init_dec_layer(key):
    ks = jax.random.split(key, 10)
    wq, bq = _dense(ks[0], D_MODEL, D_MODEL)
    wk, bk = _dense(ks[1], D_MODEL, D_MODEL)
    wv, bv = _dense(ks[2], D_MODEL, D_MODEL)
    wo, bo = _dense(ks[3], D_MODEL, D_MODEL)
    cwq, cbq = _dense(ks[4], D_MODEL, D_MODEL)
    cwk, cbk = _dense(ks[5], D_MODEL, D_MODEL)
    cwv, cbv = _dense(ks[6], D_MODEL, D_MODEL)
    cwo, cbo = _dense(ks[7], D_MODEL, D_MODEL)
    w1, b1 = _dense(ks[8], D_MODEL, D_FF)
    w2, b2 = _dense(ks[9], D_FF, D_MODEL)
    g1, z1 = _ln()
    g2, z2 = _ln()
    g3, z3 = _ln()
    return {"s_wqkv": jnp.concatenate([wq, wk, wv], 1).astype(MXU_DT),
            "s_bqkv": jnp.concatenate([bq, bk, bv], 1),
            "s_wo": wo.astype(MXU_DT), "s_bo": bo,
            "ln1_g": g1, "ln1_b": z1,
            "c_wq": cwq.astype(MXU_DT), "c_bq": cbq,
            "c_wkv": jnp.concatenate([cwk, cwv], 1).astype(MXU_DT),
            "c_bkv": jnp.concatenate([cbk, cbv], 1),
            "c_wo": cwo.astype(MXU_DT), "c_bo": cbo,
            "ln2_g": g2, "ln2_b": z2,
            "w1": w1.astype(MXU_DT), "b1": b1,
            "w2": w2.astype(MXU_DT), "b2": b2,
            "ln3_g": g3, "ln3_b": z3}


def _stack_layers(layer_dicts):
    return {k: jnp.stack([d[k] for d in layer_dicts], axis=0)
            for k in layer_dicts[0].keys()}


def init_params(key):
    keys = jax.random.split(key, 2 + N_LAYER_ENC + N_LAYER_DEC)
    ki = iter(keys)
    p = {}
    src_emb = jax.random.normal(next(ki), (VOCAB_SRC, D_MODEL), jnp.float32) * 0.02
    tgt_emb = jax.random.normal(next(ki), (VOCAB_TGT, D_MODEL), jnp.float32) * 0.02
    p["src_emb"] = src_emb.at[PAD_IDX].set(0.0)          # padding_idx row zeroed
    p["tgt_emb"] = tgt_emb.at[PAD_IDX].set(0.0)
    p["pe"] = _sinusoid_pe(MAX_LEN, D_MODEL)
    # tied generator weight (tgt embedding^T), pre-transposed, lane-padded to 128
    gen_w = jnp.zeros((D_MODEL, V_PAD), MXU_DT)
    gen_w = gen_w.at[:, :VOCAB_TGT].set(p["tgt_emb"].T.astype(MXU_DT))
    gen_b = jnp.full((1, V_PAD), NEG_INF, jnp.float32).at[:, :VOCAB_TGT].set(0.0)
    p["gen_w"] = gen_w
    p["gen_b"] = gen_b
    p["encoder"] = _stack_layers([_init_enc_layer(next(ki))
                                  for _ in range(N_LAYER_ENC)])
    p["decoder"] = _stack_layers([_init_dec_layer(next(ki))
                                  for _ in range(N_LAYER_DEC)])
    return p


# ================================= forward pass ================================
ENC_KEYS = ["wqkv", "bqkv", "wo", "bo", "ln1_g", "ln1_b",
            "w1", "b1", "w2", "b2", "ln2_g", "ln2_b"]
DEC_KEYS = ["s_wqkv", "s_bqkv", "s_wo", "s_bo", "ln1_g", "ln1_b",
            "c_wq", "c_bq", "c_wkv", "c_bkv", "c_wo", "c_bo", "ln2_g", "ln2_b",
            "w1", "b1", "w2", "b2", "ln3_g", "ln3_b"]


def _embed_pos(tokens, emb_table, pe, B, S):
    # plain-JAX glue: gather + sqrt(d)*emb + positional encoding (tiny elementwise)
    x = jnp.take(emb_table, tokens, axis=0) * math.sqrt(D_MODEL) + pe[None, :S]
    return x.reshape(B * S, D_MODEL)


def transformer_forward(params, src, tgt, src_mask, tgt_mask):
    B, Ss = src.shape
    _, St = tgt.shape

    # additive attention biases (0 = attend, -1e9 = masked), built once outside
    # the kernel (no per-head where(), no float-equality compares in-kernel)
    src_bias = jnp.where(src_mask[:, 0, 0, :] > 0, 0.0, NEG_INF)
    src_bias = src_bias.astype(jnp.float32).reshape(B, 1, Ss)          # key mask
    tgt_bias = jnp.where(tgt_mask[:, 0] > 0, 0.0, NEG_INF).astype(jnp.float32)

    # embeddings + positional encoding
    x = _embed_pos(src, params["src_emb"], params["pe"], B, Ss)        # (B*Ss, D)
    y = _embed_pos(tgt, params["tgt_emb"], params["pe"], B, St)        # (B*St, D)

    args = [x, y, src_bias, tgt_bias]
    args += [params["encoder"][k] for k in ENC_KEYS]
    args += [params["decoder"][k] for k in DEC_KEYS]
    args += [params["gen_w"], params["gen_b"]]

    kern = functools.partial(_transformer_kernel, B=B, Ss=Ss, St=St)
    out_pad = pl.pallas_call(
        kern,
        out_shape=jax.ShapeDtypeStruct((B * St, V_PAD), jnp.float32),
        compiler_params=pltpu.CompilerParams(vmem_limit_bytes=32 * 1024 * 1024),
    )(*args)
    # drop padded vocab columns (exactly zero probability mass) and reshape
    return out_pad[:, :VOCAB_TGT].reshape(B, St, VOCAB_TGT)


# ===================================== main ====================================
if __name__ == "__main__":
    key = jax.random.PRNGKey(0)
    kp, ksrc, ktgt = jax.random.split(key, 3)
    params = init_params(kp)

    B, Ss, St = 2, 8, 8
    src = jax.random.randint(ksrc, (B, Ss), 1, VOCAB_SRC, dtype=jnp.int32)
    tgt = jax.random.randint(ktgt, (B, St), 1, VOCAB_TGT, dtype=jnp.int32)
    src = src.at[:, -2:].set(PAD_IDX)                  # padding to exercise masks
    tgt = tgt.at[:, -1:].set(PAD_IDX)

    src_mask = (src != PAD_IDX)[:, None, None, :].astype(jnp.float32)      # (B,1,1,Ss)
    causal = jnp.tril(jnp.ones((St, St), jnp.float32))
    tgt_mask = (tgt != PAD_IDX)[:, None, None, :].astype(jnp.float32) * causal[None, None]

    fwd = jax.jit(transformer_forward)
    out = fwd(params, src, tgt, src_mask, tgt_mask)
    jax.block_until_ready(out)

    assert out.shape == (B, St, VOCAB_TGT), out.shape
    assert bool(jnp.all(jnp.isfinite(out)))
    # rows of log_softmax must (log-)sum to 1
    assert bool(jnp.allclose(jnp.sum(jnp.exp(out), axis=-1), 1.0, atol=1e-4))
    print("KERNEL_OK")
</pallas_src>

<mosaic_0001>
module attributes {stable_mosaic.version = 11 : i64} {
  func.func @_transformer_kernel(%arg0: memref<16x32xf32, #tpu.memory_space<vmem>>, %arg1: memref<16x32xf32, #tpu.memory_space<vmem>>, %arg2: memref<2x1x8xf32, #tpu.memory_space<vmem>>, %arg3: memref<2x8x8xf32, #tpu.memory_space<vmem>>, %arg4: memref<2x32x96xbf16, #tpu.memory_space<vmem>>, %arg5: memref<2x1x96xf32, #tpu.memory_space<vmem>>, %arg6: memref<2x32x32xbf16, #tpu.memory_space<vmem>>, %arg7: memref<2x1x32xf32, #tpu.memory_space<vmem>>, %arg8: memref<2x1x32xf32, #tpu.memory_space<vmem>>, %arg9: memref<2x1x32xf32, #tpu.memory_space<vmem>>, %arg10: memref<2x32x64xbf16, #tpu.memory_space<vmem>>, %arg11: memref<2x1x64xf32, #tpu.memory_space<vmem>>, %arg12: memref<2x64x32xbf16, #tpu.memory_space<vmem>>, %arg13: memref<2x1x32xf32, #tpu.memory_space<vmem>>, %arg14: memref<2x1x32xf32, #tpu.memory_space<vmem>>, %arg15: memref<2x1x32xf32, #tpu.memory_space<vmem>>, %arg16: memref<2x32x96xbf16, #tpu.memory_space<vmem>>, %arg17: memref<2x1x96xf32, #tpu.memory_space<vmem>>, %arg18: memref<2x32x32xbf16, #tpu.memory_space<vmem>>, %arg19: memref<2x1x32xf32, #tpu.memory_space<vmem>>, %arg20: memref<2x1x32xf32, #tpu.memory_space<vmem>>, %arg21: memref<2x1x32xf32, #tpu.memory_space<vmem>>, %arg22: memref<2x32x32xbf16, #tpu.memory_space<vmem>>, %arg23: memref<2x1x32xf32, #tpu.memory_space<vmem>>, %arg24: memref<2x32x64xbf16, #tpu.memory_space<vmem>>, %arg25: memref<2x1x64xf32, #tpu.memory_space<vmem>>, %arg26: memref<2x32x32xbf16, #tpu.memory_space<vmem>>, %arg27: memref<2x1x32xf32, #tpu.memory_space<vmem>>, %arg28: memref<2x1x32xf32, #tpu.memory_space<vmem>>, %arg29: memref<2x1x32xf32, #tpu.memory_space<vmem>>, %arg30: memref<2x32x64xbf16, #tpu.memory_space<vmem>>, %arg31: memref<2x1x64xf32, #tpu.memory_space<vmem>>, %arg32: memref<2x64x32xbf16, #tpu.memory_space<vmem>>, %arg33: memref<2x1x32xf32, #tpu.memory_space<vmem>>, %arg34: memref<2x1x32xf32, #tpu.memory_space<vmem>>, %arg35: memref<2x1x32xf32, #tpu.memory_space<vmem>>, %arg36: memref<32x128xbf16, #tpu.memory_space<vmem>>, %arg37: memref<1x128xf32, #tpu.memory_space<vmem>>, %arg38: memref<16x128xf32, #tpu.memory_space<vmem>>) attributes {dimension_semantics = [], scalar_prefetch = 0 : i64, scratch_operands = 0 : i64, tpu.core_type = #tpu.core_type<tc>} {
    %c0 = arith.constant 0 : index
    %c0_0 = arith.constant 0 : index
    %0 = vector.load %arg0[%c0, %c0_0] : memref<16x32xf32, #tpu.memory_space<vmem>>, vector<16x32xf32>
    %c0_1 = arith.constant 0 : index
    %c0_2 = arith.constant 0 : index
    %1 = vector.load %arg1[%c0_1, %c0_2] : memref<16x32xf32, #tpu.memory_space<vmem>>, vector<16x32xf32>
    %c0_3 = arith.constant 0 : index
    %c0_4 = arith.constant 0 : index
    %c0_5 = arith.constant 0 : index
    %2 = vector.load %arg2[%c0_3, %c0_4, %c0_5] : memref<2x1x8xf32, #tpu.memory_space<vmem>>, vector<2x1x8xf32>
    %c0_6 = arith.constant 0 : index
    %c0_7 = arith.constant 0 : index
    %c0_8 = arith.constant 0 : index
    %3 = vector.load %arg3[%c0_6, %c0_7, %c0_8] : memref<2x8x8xf32, #tpu.memory_space<vmem>>, vector<2x8x8xf32>
    %c0_9 = arith.constant 0 : index
    %c0_10 = arith.constant 0 : index
    %c0_11 = arith.constant 0 : index
    %4 = vector.load %arg4[%c0_9, %c0_10, %c0_11] : memref<2x32x96xbf16, #tpu.memory_space<vmem>>, vector<1x32x96xbf16>
    %5 = vector.shape_cast %4 : vector<1x32x96xbf16> to vector<32x96xbf16>
    %c0_12 = arith.constant 0 : index
    %c0_13 = arith.constant 0 : index
    %c0_14 = arith.constant 0 : index
    %6 = vector.load %arg5[%c0_12, %c0_13, %c0_14] : memref<2x1x96xf32, #tpu.memory_space<vmem>>, vector<1x1x96xf32>
    %7 = vector.shape_cast %6 : vector<1x1x96xf32> to vector<1x96xf32>
    %c0_15 = arith.constant 0 : index
    %c0_16 = arith.constant 0 : index
    %c0_17 = arith.constant 0 : index
    %8 = vector.load %arg6[%c0_15, %c0_16, %c0_17] : memref<2x32x32xbf16, #tpu.memory_space<vmem>>, vector<1x32x32xbf16>
    %9 = vector.shape_cast %8 : vector<1x32x32xbf16> to vector<32x32xbf16>
    %c0_18 = arith.constant 0 : index
    %c0_19 = arith.constant 0 : index
    %c0_20 = arith.constant 0 : index
    %10 = vector.load %arg7[%c0_18, %c0_19, %c0_20] : memref<2x1x32xf32, #tpu.memory_space<vmem>>, vector<1x1x32xf32>
    %11 = vector.shape_cast %10 : vector<1x1x32xf32> to vector<1x32xf32>
    %c0_21 = arith.constant 0 : index
    %c0_22 = arith.constant 0 : index
    %c0_23 = arith.constant 0 : index
    %12 = vector.load %arg8[%c0_21, %c0_22, %c0_23] : memref<2x1x32xf32, #tpu.memory_space<vmem>>, vector<1x1x32xf32>
    %13 = vector.shape_cast %12 : vector<1x1x32xf32> to vector<1x32xf32>
    %c0_24 = arith.constant 0 : index
    %c0_25 = arith.constant 0 : index
    %c0_26 = arith.constant 0 : index
    %14 = vector.load %arg9[%c0_24, %c0_25, %c0_26] : memref<2x1x32xf32, #tpu.memory_space<vmem>>, vector<1x1x32xf32>
    %15 = vector.shape_cast %14 : vector<1x1x32xf32> to vector<1x32xf32>
    %c0_27 = arith.constant 0 : index
    %c0_28 = arith.constant 0 : index
    %c0_29 = arith.constant 0 : index
    %16 = vector.load %arg10[%c0_27, %c0_28, %c0_29] : memref<2x32x64xbf16, #tpu.memory_space<vmem>>, vector<1x32x64xbf16>
    %17 = vector.shape_cast %16 : vector<1x32x64xbf16> to vector<32x64xbf16>
    %c0_30 = arith.constant 0 : index
    %c0_31 = arith.constant 0 : index
    %c0_32 = arith.constant 0 : index
    %18 = vector.load %arg11[%c0_30, %c0_31, %c0_32] : memref<2x1x64xf32, #tpu.memory_space<vmem>>, vector<1x1x64xf32>
    %19 = vector.shape_cast %18 : vector<1x1x64xf32> to vector<1x64xf32>
    %c0_33 = arith.constant 0 : index
    %c0_34 = arith.constant 0 : index
    %c0_35 = arith.constant 0 : index
    %20 = vector.load %arg12[%c0_33, %c0_34, %c0_35] : memref<2x64x32xbf16, #tpu.memory_space<vmem>>, vector<1x64x32xbf16>
    %21 = vector.shape_cast %20 : vector<1x64x32xbf16> to vector<64x32xbf16>
    %c0_36 = arith.constant 0 : index
    %c0_37 = arith.constant 0 : index
    %c0_38 = arith.constant 0 : index
    %22 = vector.load %arg13[%c0_36, %c0_37, %c0_38] : memref<2x1x32xf32, #tpu.memory_space<vmem>>, vector<1x1x32xf32>
    %23 = vector.shape_cast %22 : vector<1x1x32xf32> to vector<1x32xf32>
    %c0_39 = arith.constant 0 : index
    %c0_40 = arith.constant 0 : index
    %c0_41 = arith.constant 0 : index
    %24 = vector.load %arg14[%c0_39, %c0_40, %c0_41] : memref<2x1x32xf32, #tpu.memory_space<vmem>>, vector<1x1x32xf32>
    %25 = vector.shape_cast %24 : vector<1x1x32xf32> to vector<1x32xf32>
    %c0_42 = arith.constant 0 : index
    %c0_43 = arith.constant 0 : index
    %c0_44 = arith.constant 0 : index
    %26 = vector.load %arg15[%c0_42, %c0_43, %c0_44] : memref<2x1x32xf32, #tpu.memory_space<vmem>>, vector<1x1x32xf32>
    %27 = vector.shape_cast %26 : vector<1x1x32xf32> to vector<1x32xf32>
    %28 = arith.truncf %0 : vector<16x32xf32> to vector<16x32xbf16>
    %cst = arith.constant dense<0.000000e+00> : vector<16x96xf32>
    %29 = tpu.matmul %28, %5, %cst {dimension_numbers = #tpu.dot_dimension_numbers<[1], [0], [0], [1], [0, 0, 1, 1], [], []>} : vector<16x32xbf16>, vector<32x96xbf16>, vector<16x96xf32> -> vector<16x96xf32>
    %30 = vector.broadcast %7 : vector<1x96xf32> to vector<16x96xf32>
    %31 = arith.addf %29, %30 : vector<16x96xf32>
    %32 = vector.extract_strided_slice %31 {offsets = [0, 0], sizes = [16, 32], strides = [1, 1]} : vector<16x96xf32> to vector<16x32xf32>
    %33 = vector.extract_strided_slice %31 {offsets = [0, 32], sizes = [16, 32], strides = [1, 1]} : vector<16x96xf32> to vector<16x32xf32>
    %34 = vector.extract_strided_slice %31 {offsets = [0, 64], sizes = [16, 32], strides = [1, 1]} : vector<16x96xf32> to vector<16x32xf32>
    %35 = vector.shape_cast %32 : vector<16x32xf32> to vector<2x8x32xf32>
    %36 = vector.shape_cast %33 : vector<16x32xf32> to vector<2x8x32xf32>
    %37 = vector.shape_cast %34 : vector<16x32xf32> to vector<2x8x32xf32>
    %38 = vector.extract_strided_slice %35 {offsets = [0, 0, 0], sizes = [2, 8, 8], strides = [1, 1, 1]} : vector<2x8x32xf32> to vector<2x8x8xf32>
    %39 = vector.extract_strided_slice %36 {offsets = [0, 0, 0], sizes = [2, 8, 8], strides = [1, 1, 1]} : vector<2x8x32xf32> to vector<2x8x8xf32>
    "tpu.trace_start"() <{level = 10 : i32, message = "bqd,bkd->bqk"}> : () -> ()
    %cst_45 = arith.constant dense<0.000000e+00> : vector<2x8x8xf32>
    %40 = tpu.matmul %38, %39, %cst_45 {dimension_numbers = #tpu.dot_dimension_numbers<[2], [2], [1], [1], [0, 0, 0, 1, 1, 1], [0], [0]>} : vector<2x8x8xf32>, vector<2x8x8xf32>, vector<2x8x8xf32> -> vector<2x8x8xf32>
    "tpu.trace_stop"() : () -> ()
    %cst_46 = arith.constant 0.353553385 : f32
    %41 = vector.broadcast %cst_46 : f32 to vector<2x8x8xf32>
    %42 = arith.mulf %40, %41 : vector<2x8x8xf32>
    %43 = vector.broadcast %2 : vector<2x1x8xf32> to vector<2x8x8xf32>
    %44 = arith.addf %42, %43 : vector<2x8x8xf32>
    %cst_47 = arith.constant dense<0xFF800000> : vector<2x8xf32>
    %45 = vector.multi_reduction <maximumf>, %44, %cst_47 [2] : vector<2x8x8xf32> to vector<2x8xf32>
    %46 = vector.shape_cast %45 : vector<2x8xf32> to vector<2x8x1xf32>
    %47 = vector.broadcast %46 : vector<2x8x1xf32> to vector<2x8x8xf32>
    %48 = arith.subf %44, %47 : vector<2x8x8xf32>
    %49 = math.exp %48 : vector<2x8x8xf32>
    %cst_48 = arith.constant dense<0.000000e+00> : vector<2x8xf32>
    %50 = vector.multi_reduction <add>, %49, %cst_48 [2] : vector<2x8x8xf32> to vector<2x8xf32>
    %51 = vector.shape_cast %50 : vector<2x8xf32> to vector<2x8x1xf32>
    %52 = tpu.reciprocal %51 {approx = true} : vector<2x8x1xf32> -> vector<2x8x1xf32>
    %53 = vector.broadcast %52 : vector<2x8x1xf32> to vector<2x8x8xf32>
    %54 = arith.mulf %49, %53 : vector<2x8x8xf32>
    %55 = vector.extract_strided_slice %37 {offsets = [0, 0, 0], sizes = [2, 8, 8], strides = [1, 1, 1]} : vector<2x8x32xf32> to vector<2x8x8xf32>
    "tpu.trace_start"() <{level = 10 : i32, message = "bqk,bkd->bqd"}> : () -> ()
    %cst_49 = arith.constant dense<0.000000e+00> : vector<2x8x8xf32>
    %56 = tpu.matmul %54, %55, %cst_49 {dimension_numbers = #tpu.dot_dimension_numbers<[2], [1], [1], [2], [0, 0, 0, 1, 1, 2], [0], [0]>} : vector<2x8x8xf32>, vector<2x8x8xf32>, vector<2x8x8xf32> -> vector<2x8x8xf32>
    "tpu.trace_stop"() : () -> ()
    %57 = vector.extract_strided_slice %35 {offsets = [0, 0, 8], sizes = [2, 8, 8], strides = [1, 1, 1]} : vector<2x8x32xf32> to vector<2x8x8xf32>
    %58 = vector.extract_strided_slice %36 {offsets = [0, 0, 8], sizes = [2, 8, 8], strides = [1, 1, 1]} : vector<2x8x32xf32> to vector<2x8x8xf32>
    "tpu.trace_start"() <{level = 10 : i32, message = "bqd,bkd->bqk"}> : () -> ()
    %cst_50 = arith.constant dense<0.000000e+00> : vector<2x8x8xf32>
    %59 = tpu.matmul %57, %58, %cst_50 {dimension_numbers = #tpu.dot_dimension_numbers<[2], [2], [1], [1], [0, 0, 0, 1, 1, 1], [0], [0]>} : vector<2x8x8xf32>, vector<2x8x8xf32>, vector<2x8x8xf32> -> vector<2x8x8xf32>
    "tpu.trace_stop"() : () -> ()
    %cst_51 = arith.constant 0.353553385 : f32
    %60 = vector.broadcast %cst_51 : f32 to vector<2x8x8xf32>
    %61 = arith.mulf %59, %60 : vector<2x8x8xf32>
    %62 = vector.broadcast %2 : vector<2x1x8xf32> to vector<2x8x8xf32>
    %63 = arith.addf %61, %62 : vector<2x8x8xf32>
    %cst_52 = arith.constant dense<0xFF800000> : vector<2x8xf32>
    %64 = vector.multi_reduction <maximumf>, %63, %cst_52 [2] : vector<2x8x8xf32> to vector<2x8xf32>
    %65 = vector.shape_cast %64 : vector<2x8xf32> to vector<2x8x1xf32>
    %66 = vector.broadcast %65 : vector<2x8x1xf32> to vector<2x8x8xf32>
    %67 = arith.subf %63, %66 : vector<2x8x8xf32>
    %68 = math.exp %67 : vector<2x8x8xf32>
    %cst_53 = arith.constant dense<0.000000e+00> : vector<2x8xf32>
    %69 = vector.multi_reduction <add>, %68, %cst_53 [2] : vector<2x8x8xf32> to vector<2x8xf32>
    %70 = vector.shape_cast %69 : vector<2x8xf32> to vector<2x8x1xf32>
    %71 = tpu.reciprocal %70 {approx = true} : vector<2x8x1xf32> -> vector<2x8x1xf32>
    %72 = vector.broadcast %71 : vector<2x8x1xf32> to vector<2x8x8xf32>
    %73 = arith.mulf %68, %72 : vector<2x8x8xf32>
    %74 = vector.extract_strided_slice %37 {offsets = [0, 0, 8], sizes = [2, 8, 8], strides = [1, 1, 1]} : vector<2x8x32xf32> to vector<2x8x8xf32>
    "tpu.trace_start"() <{level = 10 : i32, message = "bqk,bkd->bqd"}> : () -> ()
    %cst_54 = arith.constant dense<0.000000e+00> : vector<2x8x8xf32>
    %75 = tpu.matmul %73, %74, %cst_54 {dimension_numbers = #tpu.dot_dimension_numbers<[2], [1], [1], [2], [0, 0, 0, 1, 1, 2], [0], [0]>} : vector<2x8x8xf32>, vector<2x8x8xf32>, vector<2x8x8xf32> -> vector<2x8x8xf32>
    "tpu.trace_stop"() : () -> ()
    %76 = vector.extract_strided_slice %35 {offsets = [0, 0, 16], sizes = [2, 8, 8], strides = [1, 1, 1]} : vector<2x8x32xf32> to vector<2x8x8xf32>
    %77 = vector.extract_strided_slice %36 {offsets = [0, 0, 16], sizes = [2, 8, 8], strides = [1, 1, 1]} : vector<2x8x32xf32> to vector<2x8x8xf32>
    "tpu.trace_start"() <{level = 10 : i32, message = "bqd,bkd->bqk"}> : () -> ()
    %cst_55 = arith.constant dense<0.000000e+00> : vector<2x8x8xf32>
    %78 = tpu.matmul %76, %77, %cst_55 {dimension_numbers = #tpu.dot_dimension_numbers<[2], [2], [1], [1], [0, 0, 0, 1, 1, 1], [0], [0]>} : vector<2x8x8xf32>, vector<2x8x8xf32>, vector<2x8x8xf32> -> vector<2x8x8xf32>
    "tpu.trace_stop"() : () -> ()
    %cst_56 = arith.constant 0.353553385 : f32
    %79 = vector.broadcast %cst_56 : f32 to vector<2x8x8xf32>
    %80 = arith.mulf %78, %79 : vector<2x8x8xf32>
    %81 = vector.broadcast %2 : vector<2x1x8xf32> to vector<2x8x8xf32>
    %82 = arith.addf %80, %81 : vector<2x8x8xf32>
    %cst_57 = arith.constant dense<0xFF800000> : vector<2x8xf32>
    %83 = vector.multi_reduction <maximumf>, %82, %cst_57 [2] : vector<2x8x8xf32> to vector<2x8xf32>
    %84 = vector.shape_cast %83 : vector<2x8xf32> to vector<2x8x1xf32>
    %85 = vector.broadcast %84 : vector<2x8x1xf32> to vector<2x8x8xf32>
    %86 = arith.subf %82, %85 : vector<2x8x8xf32>
    %87 = math.exp %86 : vector<2x8x8xf32>
    %cst_58 = arith.constant dense<0.000000e+00> : vector<2x8xf32>
    %88 = vector.multi_reduction <add>, %87, %cst_58 [2] : vector<2x8x8xf32> to vector<2x8xf32>
    %89 = vector.shape_cast %88 : vector<2x8xf32> to vector<2x8x1xf32>
    %90 = tpu.reciprocal %89 {approx = true} : vector<2x8x1xf32> -> vector<2x8x1xf32>
    %91 = vector.broadcast %90 : vector<2x8x1xf32> to vector<2x8x8xf32>
    %92 = arith.mulf %87, %91 : vector<2x8x8xf32>
    %93 = vector.extract_strided_slice %37 {offsets = [0, 0, 16], sizes = [2, 8, 8], strides = [1, 1, 1]} : vector<2x8x32xf32> to vector<2x8x8xf32>
    "tpu.trace_start"() <{level = 10 : i32, message = "bqk,bkd->bqd"}> : () -> ()
    %cst_59 = arith.constant dense<0.000000e+00> : vector<2x8x8xf32>
    %94 = tpu.matmul %92, %93, %cst_59 {dimension_numbers = #tpu.dot_dimension_numbers<[2], [1], [1], [2], [0, 0, 0, 1, 1, 2], [0], [0]>} : vector<2x8x8xf32>, vector<2x8x8xf32>, vector<2x8x8xf32> -> vector<2x8x8xf32>
    "tpu.trace_stop"() : () -> ()
    %95 = vector.extract_strided_slice %35 {offsets = [0, 0, 24], sizes = [2, 8, 8], strides = [1, 1, 1]} : vector<2x8x32xf32> to vector<2x8x8xf32>
    %96 = vector.extract_strided_slice %36 {offsets = [0, 0, 24], sizes = [2, 8, 8], strides = [1, 1, 1]} : vector<2x8x32xf32> to vector<2x8x8xf32>
    "tpu.trace_start"() <{level = 10 : i32, message = "bqd,bkd->bqk"}> : () -> ()
    %cst_60 = arith.constant dense<0.000000e+00> : vector<2x8x8xf32>
    %97 = tpu.matmul %95, %96, %cst_60 {dimension_numbers = #tpu.dot_dimension_numbers<[2], [2], [1], [1], [0, 0, 0, 1, 1, 1], [0], [0]>} : vector<2x8x8xf32>, vector<2x8x8xf32>, vector<2x8x8xf32> -> vector<2x8x8xf32>
    "tpu.trace_stop"() : () -> ()
    %cst_61 = arith.constant 0.353553385 : f32
    %98 = vector.broadcast %cst_61 : f32 to vector<2x8x8xf32>
    %99 = arith.mulf %97, %98 : vector<2x8x8xf32>
    %100 = vector.broadcast %2 : vector<2x1x8xf32> to vector<2x8x8xf32>
    %101 = arith.addf %99, %100 : vector<2x8x8xf32>
    %cst_62 = arith.constant dense<0xFF800000> : vector<2x8xf32>
    %102 = vector.multi_reduction <maximumf>, %101, %cst_62 [2] : vector<2x8x8xf32> to vector<2x8xf32>
    %103 = vector.shape_cast %102 : vector<2x8xf32> to vector<2x8x1xf32>
    %104 = vector.broadcast %103 : vector<2x8x1xf32> to vector<2x8x8xf32>
    %105 = arith.subf %101, %104 : vector<2x8x8xf32>
    %106 = math.exp %105 : vector<2x8x8xf32>
    %cst_63 = arith.constant dense<0.000000e+00> : vector<2x8xf32>
    %107 = vector.multi_reduction <add>, %106, %cst_63 [2] : vector<2x8x8xf32> to vector<2x8xf32>
    %108 = vector.shape_cast %107 : vector<2x8xf32> to vector<2x8x1xf32>
    %109 = tpu.reciprocal %108 {approx = true} : vector<2x8x1xf32> -> vector<2x8x1xf32>
    %110 = vector.broadcast %109 : vector<2x8x1xf32> to vector<2x8x8xf32>
    %111 = arith.mulf %106, %110 : vector<2x8x8xf32>
    %112 = vector.extract_strided_slice %37 {offsets = [0, 0, 24], sizes = [2, 8, 8], strides = [1, 1, 1]} : vector<2x8x32xf32> to vector<2x8x8xf32>
    "tpu.trace_start"() <{level = 10 : i32, message = "bqk,bkd->bqd"}> : () -> ()
    %cst_64 = arith.constant dense<0.000000e+00> : vector<2x8x8xf32>
    %113 = tpu.matmul %111, %112, %cst_64 {dimension_numbers = #tpu.dot_dimension_numbers<[2], [1], [1], [2], [0, 0, 0, 1, 1, 2], [0], [0]>} : vector<2x8x8xf32>, vector<2x8x8xf32>, vector<2x8x8xf32> -> vector<2x8x8xf32>
    "tpu.trace_stop"() : () -> ()
    %114 = tpu.concatenate %56, %75, %94, %113 in 2 : vector<2x8x8xf32>, vector<2x8x8xf32>, vector<2x8x8xf32>, vector<2x8x8xf32> -> vector<2x8x32xf32>
    %115 = vector.shape_cast %114 : vector<2x8x32xf32> to vector<16x32xf32>
    %116 = arith.truncf %115 : vector<16x32xf32> to vector<16x32xbf16>
    %cst_65 = arith.constant dense<0.000000e+00> : vector<16x32xf32>
    %117 = tpu.matmul %116, %9, %cst_65 {dimension_numbers = #tpu.dot_dimension_numbers<[1], [0], [0], [1], [0, 0, 1, 1], [], []>} : vector<16x32xbf16>, vector<32x32xbf16>, vector<16x32xf32> -> vector<16x32xf32>
    %118 = vector.broadcast %11 : vector<1x32xf32> to vector<16x32xf32>
    %119 = arith.addf %117, %118 : vector<16x32xf32>
    %120 = arith.addf %0, %119 : vector<16x32xf32>
    %cst_66 = arith.constant dense<0.000000e+00> : vector<16xf32>
    %121 = vector.multi_reduction <add>, %120, %cst_66 [1] : vector<16x32xf32> to vector<16xf32>
    %122 = vector.shape_cast %121 : vector<16xf32> to vector<16x1xf32>
    %cst_67 = arith.constant 3.200000e+01 : f32
    %123 = vector.broadcast %cst_67 : f32 to vector<16x1xf32>
    %124 = arith.divf %122, %123 : vector<16x1xf32>
    %125 = vector.broadcast %124 : vector<16x1xf32> to vector<16x32xf32>
    %126 = arith.subf %120, %125 : vector<16x32xf32>
    %127 = arith.mulf %126, %126 : vector<16x32xf32>
    %cst_68 = arith.constant dense<0.000000e+00> : vector<16xf32>
    %128 = vector.multi_reduction <add>, %127, %cst_68 [1] : vector<16x32xf32> to vector<16xf32>
    %129 = vector.shape_cast %128 : vector<16xf32> to vector<16x1xf32>
    %cst_69 = arith.constant 3.200000e+01 : f32
    %130 = vector.broadcast %cst_69 : f32 to vector<16x1xf32>
    %131 = arith.divf %129, %130 : vector<16x1xf32>
    %cst_70 = arith.constant 9.99999974E-6 : f32
    %132 = vector.broadcast %cst_70 : f32 to vector<16x1xf32>
    %133 = arith.addf %131, %132 : vector<16x1xf32>
    %134 = math.rsqrt %133 : vector<16x1xf32>
    %135 = vector.broadcast %134 : vector<16x1xf32> to vector<16x32xf32>
    %136 = arith.mulf %126, %135 : vector<16x32xf32>
    %137 = vector.broadcast %13 : vector<1x32xf32> to vector<16x32xf32>
    %138 = arith.mulf %136, %137 : vector<16x32xf32>
    %139 = vector.broadcast %15 : vector<1x32xf32> to vector<16x32xf32>
    %140 = arith.addf %138, %139 : vector<16x32xf32>
    %141 = arith.truncf %140 : vector<16x32xf32> to vector<16x32xbf16>
    %cst_71 = arith.constant dense<0.000000e+00> : vector<16x64xf32>
    %142 = tpu.matmul %141, %17, %cst_71 {dimension_numbers = #tpu.dot_dimension_numbers<[1], [0], [0], [1], [0, 0, 1, 1], [], []>} : vector<16x32xbf16>, vector<32x64xbf16>, vector<16x64xf32> -> vector<16x64xf32>
    %143 = vector.broadcast %19 : vector<1x64xf32> to vector<16x64xf32>
    %144 = arith.addf %142, %143 : vector<16x64xf32>
    %cst_72 = arith.constant 0.000000e+00 : f32
    %145 = vector.broadcast %cst_72 : f32 to vector<16x64xf32>
    %146 = arith.maximumf %144, %145 : vector<16x64xf32>
    %147 = arith.truncf %146 : vector<16x64xf32> to vector<16x64xbf16>
    %cst_73 = arith.constant dense<0.000000e+00> : vector<16x32xf32>
    %148 = tpu.matmul %147, %21, %cst_73 {dimension_numbers = #tpu.dot_dimension_numbers<[1], [0], [0], [1], [0, 0, 1, 1], [], []>} : vector<16x64xbf16>, vector<64x32xbf16>, vector<16x32xf32> -> vector<16x32xf32>
    %149 = vector.broadcast %23 : vector<1x32xf32> to vector<16x32xf32>
    %150 = arith.addf %148, %149 : vector<16x32xf32>
    %151 = arith.addf %140, %150 : vector<16x32xf32>
    %cst_74 = arith.constant dense<0.000000e+00> : vector<16xf32>
    %152 = vector.multi_reduction <add>, %151, %cst_74 [1] : vector<16x32xf32> to vector<16xf32>
    %153 = vector.shape_cast %152 : vector<16xf32> to vector<16x1xf32>
    %cst_75 = arith.constant 3.200000e+01 : f32
    %154 = vector.broadcast %cst_75 : f32 to vector<16x1xf32>
    %155 = arith.divf %153, %154 : vector<16x1xf32>
    %156 = vector.broadcast %155 : vector<16x1xf32> to vector<16x32xf32>
    %157 = arith.subf %151, %156 : vector<16x32xf32>
    %158 = arith.mulf %157, %157 : vector<16x32xf32>
    %cst_76 = arith.constant dense<0.000000e+00> : vector<16xf32>
    %159 = vector.multi_reduction <add>, %158, %cst_76 [1] : vector<16x32xf32> to vector<16xf32>
    %160 = vector.shape_cast %159 : vector<16xf32> to vector<16x1xf32>
    %cst_77 = arith.constant 3.200000e+01 : f32
    %161 = vector.broadcast %cst_77 : f32 to vector<16x1xf32>
    %162 = arith.divf %160, %161 : vector<16x1xf32>
    %cst_78 = arith.constant 9.99999974E-6 : f32
    %163 = vector.broadcast %cst_78 : f32 to vector<16x1xf32>
    %164 = arith.addf %162, %163 : vector<16x1xf32>
    %165 = math.rsqrt %164 : vector<16x1xf32>
    %166 = vector.broadcast %165 : vector<16x1xf32> to vector<16x32xf32>
    %167 = arith.mulf %157, %166 : vector<16x32xf32>
    %168 = vector.broadcast %25 : vector<1x32xf32> to vector<16x32xf32>
    %169 = arith.mulf %167, %168 : vector<16x32xf32>
    %170 = vector.broadcast %27 : vector<1x32xf32> to vector<16x32xf32>
    %171 = arith.addf %169, %170 : vector<16x32xf32>
    %c1 = arith.constant 1 : index
    %c0_79 = arith.constant 0 : index
    %c0_80 = arith.constant 0 : index
    %172 = vector.load %arg4[%c1, %c0_79, %c0_80] : memref<2x32x96xbf16, #tpu.memory_space<vmem>>, vector<1x32x96xbf16>
    %173 = vector.shape_cast %172 : vector<1x32x96xbf16> to vector<32x96xbf16>
    %c1_81 = arith.constant 1 : index
    %c0_82 = arith.constant 0 : index
    %c0_83 = arith.constant 0 : index
    %174 = vector.load %arg5[%c1_81, %c0_82, %c0_83] : memref<2x1x96xf32, #tpu.memory_space<vmem>>, vector<1x1x96xf32>
    %175 = vector.shape_cast %174 : vector<1x1x96xf32> to vector<1x96xf32>
    %c1_84 = arith.constant 1 : index
    %c0_85 = arith.constant 0 : index
    %c0_86 = arith.constant 0 : index
    %176 = vector.load %arg6[%c1_84, %c0_85, %c0_86] : memref<2x32x32xbf16, #tpu.memory_space<vmem>>, vector<1x32x32xbf16>
    %177 = vector.shape_cast %176 : vector<1x32x32xbf16> to vector<32x32xbf16>
    %c1_87 = arith.constant 1 : index
    %c0_88 = arith.constant 0 : index
    %c0_89 = arith.constant 0 : index
    %178 = vector.load %arg7[%c1_87, %c0_88, %c0_89] : memref<2x1x32xf32, #tpu.memory_space<vmem>>, vector<1x1x32xf32>
    %179 = vector.shape_cast %178 : vector<1x1x32xf32> to vector<1x32xf32>
    %c1_90 = arith.constant 1 : index
    %c0_91 = arith.constant 0 : index
    %c0_92 = arith.constant 0 : index
    %180 = vector.load %arg8[%c1_90, %c0_91, %c0_92] : memref<2x1x32xf32, #tpu.memory_space<vmem>>, vector<1x1x32xf32>
    %181 = vector.shape_cast %180 : vector<1x1x32xf32> to vector<1x32xf32>
    %c1_93 = arith.constant 1 : index
    %c0_94 = arith.constant 0 : index
    %c0_95 = arith.constant 0 : index
    %182 = vector.load %arg9[%c1_93, %c0_94, %c0_95] : memref<2x1x32xf32, #tpu.memory_space<vmem>>, vector<1x1x32xf32>
    %183 = vector.shape_cast %182 : vector<1x1x32xf32> to vector<1x32xf32>
    %c1_96 = arith.constant 1 : index
    %c0_97 = arith.constant 0 : index
    %c0_98 = arith.constant 0 : index
    %184 = vector.load %arg10[%c1_96, %c0_97, %c0_98] : memref<2x32x64xbf16, #tpu.memory_space<vmem>>, vector<1x32x64xbf16>
    %185 = vector.shape_cast %184 : vector<1x32x64xbf16> to vector<32x64xbf16>
    %c1_99 = arith.constant 1 : index
    %c0_100 = arith.constant 0 : index
    %c0_101 = arith.constant 0 : index
    %186 = vector.load %arg11[%c1_99, %c0_100, %c0_101] : memref<2x1x64xf32, #tpu.memory_space<vmem>>, vector<1x1x64xf32>
    %187 = vector.shape_cast %186 : vector<1x1x64xf32> to vector<1x64xf32>
    %c1_102 = arith.constant 1 : index
    %c0_103 = arith.constant 0 : index
    %c0_104 = arith.constant 0 : index
    %188 = vector.load %arg12[%c1_102, %c0_103, %c0_104] : memref<2x64x32xbf16, #tpu.memory_space<vmem>>, vector<1x64x32xbf16>
    %189 = vector.shape_cast %188 : vector<1x64x32xbf16> to vector<64x32xbf16>
    %c1_105 = arith.constant 1 : index
    %c0_106 = arith.constant 0 : index
    %c0_107 = arith.constant 0 : index
    %190 = vector.load %arg13[%c1_105, %c0_106, %c0_107] : memref<2x1x32xf32, #tpu.memory_space<vmem>>, vector<1x1x32xf32>
    %191 = vector.shape_cast %190 : vector<1x1x32xf32> to vector<1x32xf32>
    %c1_108 = arith.constant 1 : index
    %c0_109 = arith.constant 0 : index
    %c0_110 = arith.constant 0 : index
    %192 = vector.load %arg14[%c1_108, %c0_109, %c0_110] : memref<2x1x32xf32, #tpu.memory_space<vmem>>, vector<1x1x32xf32>
    %193 = vector.shape_cast %192 : vector<1x1x32xf32> to vector<1x32xf32>
    %c1_111 = arith.constant 1 : index
    %c0_112 = arith.constant 0 : index
    %c0_113 = arith.constant 0 : index
    %194 = vector.load %arg15[%c1_111, %c0_112, %c0_113] : memref<2x1x32xf32, #tpu.memory_space<vmem>>, vector<1x1x32xf32>
    %195 = vector.shape_cast %194 : vector<1x1x32xf32> to vector<1x32xf32>
    %196 = arith.truncf %171 : vector<16x32xf32> to vector<16x32xbf16>
    %cst_114 = arith.constant dense<0.000000e+00> : vector<16x96xf32>
    %197 = tpu.matmul %196, %173, %cst_114 {dimension_numbers = #tpu.dot_dimension_numbers<[1], [0], [0], [1], [0, 0, 1, 1], [], []>} : vector<16x32xbf16>, vector<32x96xbf16>, vector<16x96xf32> -> vector<16x96xf32>
    %198 = vector.broadcast %175 : vector<1x96xf32> to vector<16x96xf32>
    %199 = arith.addf %197, %198 : vector<16x96xf32>
    %200 = vector.extract_strided_slice %199 {offsets = [0, 0], sizes = [16, 32], strides = [1, 1]} : vector<16x96xf32> to vector<16x32xf32>
    %201 = vector.extract_strided_slice %199 {offsets = [0, 32], sizes = [16, 32], strides = [1, 1]} : vector<16x96xf32> to vector<16x32xf32>
    %202 = vector.extract_strided_slice %199 {offsets = [0, 64], sizes = [16, 32], strides = [1, 1]} : vector<16x96xf32> to vector<16x32xf32>
    %203 = vector.shape_cast %200 : vector<16x32xf32> to vector<2x8x32xf32>
    %204 = vector.shape_cast %201 : vector<16x32xf32> to vector<2x8x32xf32>
    %205 = vector.shape_cast %202 : vector<16x32xf32> to vector<2x8x32xf32>
    %206 = vector.extract_strided_slice %203 {offsets = [0, 0, 0], sizes = [2, 8, 8], strides = [1, 1, 1]} : vector<2x8x32xf32> to vector<2x8x8xf32>
    %207 = vector.extract_strided_slice %204 {offsets = [0, 0, 0], sizes = [2, 8, 8], strides = [1, 1, 1]} : vector<2x8x32xf32> to vector<2x8x8xf32>
    "tpu.trace_start"() <{level = 10 : i32, message = "bqd,bkd->bqk"}> : () -> ()
    %cst_115 = arith.constant dense<0.000000e+00> : vector<2x8x8xf32>
    %208 = tpu.matmul %206, %207, %cst_115 {dimension_numbers = #tpu.dot_dimension_numbers<[2], [2], [1], [1], [0, 0, 0, 1, 1, 1], [0], [0]>} : vector<2x8x8xf32>, vector<2x8x8xf32>, vector<2x8x8xf32> -> vector<2x8x8xf32>
    "tpu.trace_stop"() : () -> ()
    %cst_116 = arith.constant 0.353553385 : f32
    %209 = vector.broadcast %cst_116 : f32 to vector<2x8x8xf32>
    %210 = arith.mulf %208, %209 : vector<2x8x8xf32>
    %211 = vector.broadcast %2 : vector<2x1x8xf32> to vector<2x8x8xf32>
    %212 = arith.addf %210, %211 : vector<2x8x8xf32>
    %cst_117 = arith.constant dense<0xFF800000> : vector<2x8xf32>
    %213 = vector.multi_reduction <maximumf>, %212, %cst_117 [2] : vector<2x8x8xf32> to vector<2x8xf32>
    %214 = vector.shape_cast %213 : vector<2x8xf32> to vector<2x8x1xf32>
    %215 = vector.broadcast %214 : vector<2x8x1xf32> to vector<2x8x8xf32>
    %216 = arith.subf %212, %215 : vector<2x8x8xf32>
    %217 = math.exp %216 : vector<2x8x8xf32>
    %cst_118 = arith.constant dense<0.000000e+00> : vector<2x8xf32>
    %218 = vector.multi_reduction <add>, %217, %cst_118 [2] : vector<2x8x8xf32> to vector<2x8xf32>
    %219 = vector.shape_cast %218 : vector<2x8xf32> to vector<2x8x1xf32>
    %220 = tpu.reciprocal %219 {approx = true} : vector<2x8x1xf32> -> vector<2x8x1xf32>
    %221 = vector.broadcast %220 : vector<2x8x1xf32> to vector<2x8x8xf32>
    %222 = arith.mulf %217, %221 : vector<2x8x8xf32>
    %223 = vector.extract_strided_slice %205 {offsets = [0, 0, 0], sizes = [2, 8, 8], strides = [1, 1, 1]} : vector<2x8x32xf32> to vector<2x8x8xf32>
    "tpu.trace_start"() <{level = 10 : i32, message = "bqk,bkd->bqd"}> : () -> ()
    %cst_119 = arith.constant dense<0.000000e+00> : vector<2x8x8xf32>
    %224 = tpu.matmul %222, %223, %cst_119 {dimension_numbers = #tpu.dot_dimension_numbers<[2], [1], [1], [2], [0, 0, 0, 1, 1, 2], [0], [0]>} : vector<2x8x8xf32>, vector<2x8x8xf32>, vector<2x8x8xf32> -> vector<2x8x8xf32>
    "tpu.trace_stop"() : () -> ()
    %225 = vector.extract_strided_slice %203 {offsets = [0, 0, 8], sizes = [2, 8, 8], strides = [1, 1, 1]} : vector<2x8x32xf32> to vector<2x8x8xf32>
    %226 = vector.extract_strided_slice %204 {offsets = [0, 0, 8], sizes = [2, 8, 8], strides = [1, 1, 1]} : vector<2x8x32xf32> to vector<2x8x8xf32>
    "tpu.trace_start"() <{level = 10 : i32, message = "bqd,bkd->bqk"}> : () -> ()
    %cst_120 = arith.constant dense<0.000000e+00> : vector<2x8x8xf32>
    %227 = tpu.matmul %225, %226, %cst_120 {dimension_numbers = #tpu.dot_dimension_numbers<[2], [2], [1], [1], [0, 0, 0, 1, 1, 1], [0], [0]>} : vector<2x8x8xf32>, vector<2x8x8xf32>, vector<2x8x8xf32> -> vector<2x8x8xf32>
    "tpu.trace_stop"() : () -> ()
    %cst_121 = arith.constant 0.353553385 : f32
    %228 = vector.broadcast %cst_121 : f32 to vector<2x8x8xf32>
    %229 = arith.mulf %227, %228 : vector<2x8x8xf32>
    %230 = vector.broadcast %2 : vector<2x1x8xf32> to vector<2x8x8xf32>
    %231 = arith.addf %229, %230 : vector<2x8x8xf32>
    %cst_122 = arith.constant dense<0xFF800000> : vector<2x8xf32>
    %232 = vector.multi_reduction <maximumf>, %231, %cst_122 [2] : vector<2x8x8xf32> to vector<2x8xf32>
    %233 = vector.shape_cast %232 : vector<2x8xf32> to vector<2x8x1xf32>
    %234 = vector.broadcast %233 : vector<2x8x1xf32> to vector<2x8x8xf32>
    %235 = arith.subf %231, %234 : vector<2x8x8xf32>
    %236 = math.exp %235 : vector<2x8x8xf32>
    %cst_123 = arith.constant dense<0.000000e+00> : vector<2x8xf32>
    %237 = vector.multi_reduction <add>, %236, %cst_123 [2] : vector<2x8x8xf32> to vector<2x8xf32>
    %238 = vector.shape_cast %237 : vector<2x8xf32> to vector<2x8x1xf32>
    %239 = tpu.reciprocal %238 {approx = true} : vector<2x8x1xf32> -> vector<2x8x1xf32>
    %240 = vector.broadcast %239 : vector<2x8x1xf32> to vector<2x8x8xf32>
    %241 = arith.mulf %236, %240 : vector<2x8x8xf32>
    %242 = vector.extract_strided_slice %205 {offsets = [0, 0, 8], sizes = [2, 8, 8], strides = [1, 1, 1]} : vector<2x8x32xf32> to vector<2x8x8xf32>
    "tpu.trace_start"() <{level = 10 : i32, message = "bqk,bkd->bqd"}> : () -> ()
    %cst_124 = arith.constant dense<0.000000e+00> : vector<2x8x8xf32>
    %243 = tpu.matmul %241, %242, %cst_124 {dimension_numbers = #tpu.dot_dimension_numbers<[2], [1], [1], [2], [0, 0, 0, 1, 1, 2], [0], [0]>} : vector<2x8x8xf32>, vector<2x8x8xf32>, vector<2x8x8xf32> -> vector<2x8x8xf32>
    "tpu.trace_stop"() : () -> ()
    %244 = vector.extract_strided_slice %203 {offsets = [0, 0, 16], sizes = [2, 8, 8], strides = [1, 1, 1]} : vector<2x8x32xf32> to vector<2x8x8xf32>
    %245 = vector.extract_strided_slice %204 {offsets = [0, 0, 16], sizes = [2, 8, 8], strides = [1, 1, 1]} : vector<2x8x32xf32> to vector<2x8x8xf32>
    "tpu.trace_start"() <{level = 10 : i32, message = "bqd,bkd->bqk"}> : () -> ()
    %cst_125 = arith.constant dense<0.000000e+00> : vector<2x8x8xf32>
    %246 = tpu.matmul %244, %245, %cst_125 {dimension_numbers = #tpu.dot_dimension_numbers<[2], [2], [1], [1], [0, 0, 0, 1, 1, 1], [0], [0]>} : vector<2x8x8xf32>, vector<2x8x8xf32>, vector<2x8x8xf32> -> vector<2x8x8xf32>
    "tpu.trace_stop"() : () -> ()
    %cst_126 = arith.constant 0.353553385 : f32
    %247 = vector.broadcast %cst_126 : f32 to vector<2x8x8xf32>
    %248 = arith.mulf %246, %247 : vector<2x8x8xf32>
    %249 = vector.broadcast %2 : vector<2x1x8xf32> to vector<2x8x8xf32>
    %250 = arith.addf %248, %249 : vector<2x8x8xf32>
    %cst_127 = arith.constant dense<0xFF800000> : vector<2x8xf32>
    %251 = vector.multi_reduction <maximumf>, %250, %cst_127 [2] : vector<2x8x8xf32> to vector<2x8xf32>
    %252 = vector.shape_cast %251 : vector<2x8xf32> to vector<2x8x1xf32>
    %253 = vector.broadcast %252 : vector<2x8x1xf32> to vector<2x8x8xf32>
    %254 = arith.subf %250, %253 : vector<2x8x8xf32>
    %255 = math.exp %254 : vector<2x8x8xf32>
    %cst_128 = arith.constant dense<0.000000e+00> : vector<2x8xf32>
    %256 = vector.multi_reduction <add>, %255, %cst_128 [2] : vector<2x8x8xf32> to vector<2x8xf32>
    %257 = vector.shape_cast %256 : vector<2x8xf32> to vector<2x8x1xf32>
    %258 = tpu.reciprocal %257 {approx = true} : vector<2x8x1xf32> -> vector<2x8x1xf32>
    %259 = vector.broadcast %258 : vector<2x8x1xf32> to vector<2x8x8xf32>
    %260 = arith.mulf %255, %259 : vector<2x8x8xf32>
    %261 = vector.extract_strided_slice %205 {offsets = [0, 0, 16], sizes = [2, 8, 8], strides = [1, 1, 1]} : vector<2x8x32xf32> to vector<2x8x8xf32>
    "tpu.trace_start"() <{level = 10 : i32, message = "bqk,bkd->bqd"}> : () -> ()
    %cst_129 = arith.constant dense<0.000000e+00> : vector<2x8x8xf32>
    %262 = tpu.matmul %260, %261, %cst_129 {dimension_numbers = #tpu.dot_dimension_numbers<[2], [1], [1], [2], [0, 0, 0, 1, 1, 2], [0], [0]>} : vector<2x8x8xf32>, vector<2x8x8xf32>, vector<2x8x8xf32> -> vector<2x8x8xf32>
    "tpu.trace_stop"() : () -> ()
    %263 = vector.extract_strided_slice %203 {offsets = [0, 0, 24], sizes = [2, 8, 8], strides = [1, 1, 1]} : vector<2x8x32xf32> to vector<2x8x8xf32>
    %264 = vector.extract_strided_slice %204 {offsets = [0, 0, 24], sizes = [2, 8, 8], strides = [1, 1, 1]} : vector<2x8x32xf32> to vector<2x8x8xf32>
    "tpu.trace_start"() <{level = 10 : i32, message = "bqd,bkd->bqk"}> : () -> ()
    %cst_130 = arith.constant dense<0.000000e+00> : vector<2x8x8xf32>
    %265 = tpu.matmul %263, %264, %cst_130 {dimension_numbers = #tpu.dot_dimension_numbers<[2], [2], [1], [1], [0, 0, 0, 1, 1, 1], [0], [0]>} : vector<2x8x8xf32>, vector<2x8x8xf32>, vector<2x8x8xf32> -> vector<2x8x8xf32>
    "tpu.trace_stop"() : () -> ()
    %cst_131 = arith.constant 0.353553385 : f32
    %266 = vector.broadcast %cst_131 : f32 to vector<2x8x8xf32>
    %267 = arith.mulf %265, %266 : vector<2x8x8xf32>
    %268 = vector.broadcast %2 : vector<2x1x8xf32> to vector<2x8x8xf32>
    %269 = arith.addf %267, %268 : vector<2x8x8xf32>
    %cst_132 = arith.constant dense<0xFF800000> : vector<2x8xf32>
    %270 = vector.multi_reduction <maximumf>, %269, %cst_132 [2] : vector<2x8x8xf32> to vector<2x8xf32>
    %271 = vector.shape_cast %270 : vector<2x8xf32> to vector<2x8x1xf32>
    %272 = vector.broadcast %271 : vector<2x8x1xf32> to vector<2x8x8xf32>
    %273 = arith.subf %269, %272 : vector<2x8x8xf32>
    %274 = math.exp %273 : vector<2x8x8xf32>
    %cst_133 = arith.constant dense<0.000000e+00> : vector<2x8xf32>
    %275 = vector.multi_reduction <add>, %274, %cst_133 [2] : vector<2x8x8xf32> to vector<2x8xf32>
    %276 = vector.shape_cast %275 : vector<2x8xf32> to vector<2x8x1xf32>
    %277 = tpu.reciprocal %276 {approx = true} : vector<2x8x1xf32> -> vector<2x8x1xf32>
    %278 = vector.broadcast %277 : vector<2x8x1xf32> to vector<2x8x8xf32>
    %279 = arith.mulf %274, %278 : vector<2x8x8xf32>
    %280 = vector.extract_strided_slice %205 {offsets = [0, 0, 24], sizes = [2, 8, 8], strides = [1, 1, 1]} : vector<2x8x32xf32> to vector<2x8x8xf32>
    "tpu.trace_start"() <{level = 10 : i32, message = "bqk,bkd->bqd"}> : () -> ()
    %cst_134 = arith.constant dense<0.000000e+00> : vector<2x8x8xf32>
    %281 = tpu.matmul %279, %280, %cst_134 {dimension_numbers = #tpu.dot_dimension_numbers<[2], [1], [1], [2], [0, 0, 0, 1, 1, 2], [0], [0]>} : vector<2x8x8xf32>, vector<2x8x8xf32>, vector<2x8x8xf32> -> vector<2x8x8xf32>
    "tpu.trace_stop"() : () -> ()
    %282 = tpu.concatenate %224, %243, %262, %281 in 2 : vector<2x8x8xf32>, vector<2x8x8xf32>, vector<2x8x8xf32>, vector<2x8x8xf32> -> vector<2x8x32xf32>
    %283 = vector.shape_cast %282 : vector<2x8x32xf32> to vector<16x32xf32>
    %284 = arith.truncf %283 : vector<16x32xf32> to vector<16x32xbf16>
    %cst_135 = arith.constant dense<0.000000e+00> : vector<16x32xf32>
    %285 = tpu.matmul %284, %177, %cst_135 {dimension_numbers = #tpu.dot_dimension_numbers<[1], [0], [0], [1], [0, 0, 1, 1], [], []>} : vector<16x32xbf16>, vector<32x32xbf16>, vector<16x32xf32> -> vector<16x32xf32>
    %286 = vector.broadcast %179 : vector<1x32xf32> to vector<16x32xf32>
    %287 = arith.addf %285, %286 : vector<16x32xf32>
    %288 = arith.addf %171, %287 : vector<16x32xf32>
    %cst_136 = arith.constant dense<0.000000e+00> : vector<16xf32>
    %289 = vector.multi_reduction <add>, %288, %cst_136 [1] : vector<16x32xf32> to vector<16xf32>
    %290 = vector.shape_cast %289 : vector<16xf32> to vector<16x1xf32>
    %cst_137 = arith.constant 3.200000e+01 : f32
    %291 = vector.broadcast %cst_137 : f32 to vector<16x1xf32>
    %292 = arith.divf %290, %291 : vector<16x1xf32>
    %293 = vector.broadcast %292 : vector<16x1xf32> to vector<16x32xf32>
    %294 = arith.subf %288, %293 : vector<16x32xf32>
    %295 = arith.mulf %294, %294 : vector<16x32xf32>
    %cst_138 = arith.constant dense<0.000000e+00> : vector<16xf32>
    %296 = vector.multi_reduction <add>, %295, %cst_138 [1] : vector<16x32xf32> to vector<16xf32>
    %297 = vector.shape_cast %296 : vector<16xf32> to vector<16x1xf32>
    %cst_139 = arith.constant 3.200000e+01 : f32
    %298 = vector.broadcast %cst_139 : f32 to vector<16x1xf32>
    %299 = arith.divf %297, %298 : vector<16x1xf32>
    %cst_140 = arith.constant 9.99999974E-6 : f32
    %300 = vector.broadcast %cst_140 : f32 to vector<16x1xf32>
    %301 = arith.addf %299, %300 : vector<16x1xf32>
    %302 = math.rsqrt %301 : vector<16x1xf32>
    %303 = vector.broadcast %302 : vector<16x1xf32> to vector<16x32xf32>
    %304 = arith.mulf %294, %303 : vector<16x32xf32>
    %305 = vector.broadcast %181 : vector<1x32xf32> to vector<16x32xf32>
    %306 = arith.mulf %304, %305 : vector<16x32xf32>
    %307 = vector.broadcast %183 : vector<1x32xf32> to vector<16x32xf32>
    %308 = arith.addf %306, %307 : vector<16x32xf32>
    %309 = arith.truncf %308 : vector<16x32xf32> to vector<16x32xbf16>
    %cst_141 = arith.constant dense<0.000000e+00> : vector<16x64xf32>
    %310 = tpu.matmul %309, %185, %cst_141 {dimension_numbers = #tpu.dot_dimension_numbers<[1], [0], [0], [1], [0, 0, 1, 1], [], []>} : vector<16x32xbf16>, vector<32x64xbf16>, vector<16x64xf32> -> vector<16x64xf32>
    %311 = vector.broadcast %187 : vector<1x64xf32> to vector<16x64xf32>
    %312 = arith.addf %310, %311 : vector<16x64xf32>
    %cst_142 = arith.constant 0.000000e+00 : f32
    %313 = vector.broadcast %cst_142 : f32 to vector<16x64xf32>
    %314 = arith.maximumf %312, %313 : vector<16x64xf32>
    %315 = arith.truncf %314 : vector<16x64xf32> to vector<16x64xbf16>
    %cst_143 = arith.constant dense<0.000000e+00> : vector<16x32xf32>
    %316 = tpu.matmul %315, %189, %cst_143 {dimension_numbers = #tpu.dot_dimension_numbers<[1], [0], [0], [1], [0, 0, 1, 1], [], []>} : vector<16x64xbf16>, vector<64x32xbf16>, vector<16x32xf32> -> vector<16x32xf32>
    %317 = vector.broadcast %191 : vector<1x32xf32> to vector<16x32xf32>
    %318 = arith.addf %316, %317 : vector<16x32xf32>
    %319 = arith.addf %308, %318 : vector<16x32xf32>
    %cst_144 = arith.constant dense<0.000000e+00> : vector<16xf32>
    %320 = vector.multi_reduction <add>, %319, %cst_144 [1] : vector<16x32xf32> to vector<16xf32>
    %321 = vector.shape_cast %320 : vector<16xf32> to vector<16x1xf32>
    %cst_145 = arith.constant 3.200000e+01 : f32
    %322 = vector.broadcast %cst_145 : f32 to vector<16x1xf32>
    %323 = arith.divf %321, %322 : vector<16x1xf32>
    %324 = vector.broadcast %323 : vector<16x1xf32> to vector<16x32xf32>
    %325 = arith.subf %319, %324 : vector<16x32xf32>
    %326 = arith.mulf %325, %325 : vector<16x32xf32>
    %cst_146 = arith.constant dense<0.000000e+00> : vector<16xf32>
    %327 = vector.multi_reduction <add>, %326, %cst_146 [1] : vector<16x32xf32> to vector<16xf32>
    %328 = vector.shape_cast %327 : vector<16xf32> to vector<16x1xf32>
    %cst_147 = arith.constant 3.200000e+01 : f32
    %329 = vector.broadcast %cst_147 : f32 to vector<16x1xf32>
    %330 = arith.divf %328, %329 : vector<16x1xf32>
    %cst_148 = arith.constant 9.99999974E-6 : f32
    %331 = vector.broadcast %cst_148 : f32 to vector<16x1xf32>
    %332 = arith.addf %330, %331 : vector<16x1xf32>
    %333 = math.rsqrt %332 : vector<16x1xf32>
    %334 = vector.broadcast %333 : vector<16x1xf32> to vector<16x32xf32>
    %335 = arith.mulf %325, %334 : vector<16x32xf32>
    %336 = vector.broadcast %193 : vector<1x32xf32> to vector<16x32xf32>
    %337 = arith.mulf %335, %336 : vector<16x32xf32>
    %338 = vector.broadcast %195 : vector<1x32xf32> to vector<16x32xf32>
    %339 = arith.addf %337, %338 : vector<16x32xf32>
    %c0_149 = arith.constant 0 : index
    %c0_150 = arith.constant 0 : index
    %c0_151 = arith.constant 0 : index
    %340 = vector.load %arg16[%c0_149, %c0_150, %c0_151] : memref<2x32x96xbf16, #tpu.memory_space<vmem>>, vector<1x32x96xbf16>
    %341 = vector.shape_cast %340 : vector<1x32x96xbf16> to vector<32x96xbf16>
    %c0_152 = arith.constant 0 : index
    %c0_153 = arith.constant 0 : index
    %c0_154 = arith.constant 0 : index
    %342 = vector.load %arg17[%c0_152, %c0_153, %c0_154] : memref<2x1x96xf32, #tpu.memory_space<vmem>>, vector<1x1x96xf32>
    %343 = vector.shape_cast %342 : vector<1x1x96xf32> to vector<1x96xf32>
    %c0_155 = arith.constant 0 : index
    %c0_156 = arith.constant 0 : index
    %c0_157 = arith.constant 0 : index
    %344 = vector.load %arg18[%c0_155, %c0_156, %c0_157] : memref<2x32x32xbf16, #tpu.memory_space<vmem>>, vector<1x32x32xbf16>
    %345 = vector.shape_cast %344 : vector<1x32x32xbf16> to vector<32x32xbf16>
    %c0_158 = arith.constant 0 : index
    %c0_159 = arith.constant 0 : index
    %c0_160 = arith.constant 0 : index
    %346 = vector.load %arg19[%c0_158, %c0_159, %c0_160] : memref<2x1x32xf32, #tpu.memory_space<vmem>>, vector<1x1x32xf32>
    %347 = vector.shape_cast %346 : vector<1x1x32xf32> to vector<1x32xf32>
    %c0_161 = arith.constant 0 : index
    %c0_162 = arith.constant 0 : index
    %c0_163 = arith.constant 0 : index
    %348 = vector.load %arg20[%c0_161, %c0_162, %c0_163] : memref<2x1x32xf32, #tpu.memory_space<vmem>>, vector<1x1x32xf32>
    %349 = vector.shape_cast %348 : vector<1x1x32xf32> to vector<1x32xf32>
    %c0_164 = arith.constant 0 : index
    %c0_165 = arith.constant 0 : index
    %c0_166 = arith.constant 0 : index
    %350 = vector.load %arg21[%c0_164, %c0_165, %c0_166] : memref<2x1x32xf32, #tpu.memory_space<vmem>>, vector<1x1x32xf32>
    %351 = vector.shape_cast %350 : vector<1x1x32xf32> to vector<1x32xf32>
    %c0_167 = arith.constant 0 : index
    %c0_168 = arith.constant 0 : index
    %c0_169 = arith.constant 0 : index
    %352 = vector.load %arg22[%c0_167, %c0_168, %c0_169] : memref<2x32x32xbf16, #tpu.memory_space<vmem>>, vector<1x32x32xbf16>
    %353 = vector.shape_cast %352 : vector<1x32x32xbf16> to vector<32x32xbf16>
    %c0_170 = arith.constant 0 : index
    %c0_171 = arith.constant 0 : index
    %c0_172 = arith.constant 0 : index
    %354 = vector.load %arg23[%c0_170, %c0_171, %c0_172] : memref<2x1x32xf32, #tpu.memory_space<vmem>>, vector<1x1x32xf32>
    %355 = vector.shape_cast %354 : vector<1x1x32xf32> to vector<1x32xf32>
    %c0_173 = arith.constant 0 : index
    %c0_174 = arith.constant 0 : index
    %c0_175 = arith.constant 0 : index
    %356 = vector.load %arg24[%c0_173, %c0_174, %c0_175] : memref<2x32x64xbf16, #tpu.memory_space<vmem>>, vector<1x32x64xbf16>
    %357 = vector.shape_cast %356 : vector<1x32x64xbf16> to vector<32x64xbf16>
    %c0_176 = arith.constant 0 : index
    %c0_177 = arith.constant 0 : index
    %c0_178 = arith.constant 0 : index
    %358 = vector.load %arg25[%c0_176, %c0_177, %c0_178] : memref<2x1x64xf32, #tpu.memory_space<vmem>>, vector<1x1x64xf32>
    %359 = vector.shape_cast %358 : vector<1x1x64xf32> to vector<1x64xf32>
    %c0_179 = arith.constant 0 : index
    %c0_180 = arith.constant 0 : index
    %c0_181 = arith.constant 0 : index
    %360 = vector.load %arg26[%c0_179, %c0_180, %c0_181] : memref<2x32x32xbf16, #tpu.memory_space<vmem>>, vector<1x32x32xbf16>
    %361 = vector.shape_cast %360 : vector<1x32x32xbf16> to vector<32x32xbf16>
    %c0_182 = arith.constant 0 : index
    %c0_183 = arith.constant 0 : index
    %c0_184 = arith.constant 0 : index
    %362 = vector.load %arg27[%c0_182, %c0_183, %c0_184] : memref<2x1x32xf32, #tpu.memory_space<vmem>>, vector<1x1x32xf32>
    %363 = vector.shape_cast %362 : vector<1x1x32xf32> to vector<1x32xf32>
    %c0_185 = arith.constant 0 : index
    %c0_186 = arith.constant 0 : index
    %c0_187 = arith.constant 0 : index
    %364 = vector.load %arg28[%c0_185, %c0_186, %c0_187] : memref<2x1x32xf32, #tpu.memory_space<vmem>>, vector<1x1x32xf32>
    %365 = vector.shape_cast %364 : vector<1x1x32xf32> to vector<1x32xf32>
    %c0_188 = arith.constant 0 : index
    %c0_189 = arith.constant 0 : index
    %c0_190 = arith.constant 0 : index
    %366 = vector.load %arg29[%c0_188, %c0_189, %c0_190] : memref<2x1x32xf32, #tpu.memory_space<vmem>>, vector<1x1x32xf32>
    %367 = vector.shape_cast %366 : vector<1x1x32xf32> to vector<1x32xf32>
    %c0_191 = arith.constant 0 : index
    %c0_192 = arith.constant 0 : index
    %c0_193 = arith.constant 0 : index
    %368 = vector.load %arg30[%c0_191, %c0_192, %c0_193] : memref<2x32x64xbf16, #tpu.memory_space<vmem>>, vector<1x32x64xbf16>
    %369 = vector.shape_cast %368 : vector<1x32x64xbf16> to vector<32x64xbf16>
    %c0_194 = arith.constant 0 : index
    %c0_195 = arith.constant 0 : index
    %c0_196 = arith.constant 0 : index
    %370 = vector.load %arg31[%c0_194, %c0_195, %c0_196] : memref<2x1x64xf32, #tpu.memory_space<vmem>>, vector<1x1x64xf32>
    %371 = vector.shape_cast %370 : vector<1x1x64xf32> to vector<1x64xf32>
    %c0_197 = arith.constant 0 : index
    %c0_198 = arith.constant 0 : index
    %c0_199 = arith.constant 0 : index
    %372 = vector.load %arg32[%c0_197, %c0_198, %c0_199] : memref<2x64x32xbf16, #tpu.memory_space<vmem>>, vector<1x64x32xbf16>
    %373 = vector.shape_cast %372 : vector<1x64x32xbf16> to vector<64x32xbf16>
    %c0_200 = arith.constant 0 : index
    %c0_201 = arith.constant 0 : index
    %c0_202 = arith.constant 0 : index
    %374 = vector.load %arg33[%c0_200, %c0_201, %c0_202] : memref<2x1x32xf32, #tpu.memory_space<vmem>>, vector<1x1x32xf32>
    %375 = vector.shape_cast %374 : vector<1x1x32xf32> to vector<1x32xf32>
    %c0_203 = arith.constant 0 : index
    %c0_204 = arith.constant 0 : index
    %c0_205 = arith.constant 0 : index
    %376 = vector.load %arg34[%c0_203, %c0_204, %c0_205] : memref<2x1x32xf32, #tpu.memory_space<vmem>>, vector<1x1x32xf32>
    %377 = vector.shape_cast %376 : vector<1x1x32xf32> to vector<1x32xf32>
    %c0_206 = arith.constant 0 : index
    %c0_207 = arith.constant 0 : index
    %c0_208 = arith.constant 0 : index
    %378 = vector.load %arg35[%c0_206, %c0_207, %c0_208] : memref<2x1x32xf32, #tpu.memory_space<vmem>>, vector<1x1x32xf32>
    %379 = vector.shape_cast %378 : vector<1x1x32xf32> to vector<1x32xf32>
    %380 = arith.truncf %1 : vector<16x32xf32> to vector<16x32xbf16>
    %cst_209 = arith.constant dense<0.000000e+00> : vector<16x96xf32>
    %381 = tpu.matmul %380, %341, %cst_209 {dimension_numbers = #tpu.dot_dimension_numbers<[1], [0], [0], [1], [0, 0, 1, 1], [], []>} : vector<16x32xbf16>, vector<32x96xbf16>, vector<16x96xf32> -> vector<16x96xf32>
    %382 = vector.broadcast %343 : vector<1x96xf32> to vector<16x96xf32>
    %383 = arith.addf %381, %382 : vector<16x96xf32>
    %384 = vector.extract_strided_slice %383 {offsets = [0, 0], sizes = [16, 32], strides = [1, 1]} : vector<16x96xf32> to vector<16x32xf32>
    %385 = vector.extract_strided_slice %383 {offsets = [0, 32], sizes = [16, 32], strides = [1, 1]} : vector<16x96xf32> to vector<16x32xf32>
    %386 = vector.extract_strided_slice %383 {offsets = [0, 64], sizes = [16, 32], strides = [1, 1]} : vector<16x96xf32> to vector<16x32xf32>
    %387 = vector.shape_cast %384 : vector<16x32xf32> to vector<2x8x32xf32>
    %388 = vector.shape_cast %385 : vector<16x32xf32> to vector<2x8x32xf32>
    %389 = vector.shape_cast %386 : vector<16x32xf32> to vector<2x8x32xf32>
    %390 = vector.extract_strided_slice %387 {offsets = [0, 0, 0], sizes = [2, 8, 8], strides = [1, 1, 1]} : vector<2x8x32xf32> to vector<2x8x8xf32>
    %391 = vector.extract_strided_slice %388 {offsets = [0, 0, 0], sizes = [2, 8, 8], strides = [1, 1, 1]} : vector<2x8x32xf32> to vector<2x8x8xf32>
    "tpu.trace_start"() <{level = 10 : i32, message = "bqd,bkd->bqk"}> : () -> ()
    %cst_210 = arith.constant dense<0.000000e+00> : vector<2x8x8xf32>
    %392 = tpu.matmul %390, %391, %cst_210 {dimension_numbers = #tpu.dot_dimension_numbers<[2], [2], [1], [1], [0, 0, 0, 1, 1, 1], [0], [0]>} : vector<2x8x8xf32>, vector<2x8x8xf32>, vector<2x8x8xf32> -> vector<2x8x8xf32>
    "tpu.trace_stop"() : () -> ()
    %cst_211 = arith.constant 0.353553385 : f32
    %393 = vector.broadcast %cst_211 : f32 to vector<2x8x8xf32>
    %394 = arith.mulf %392, %393 : vector<2x8x8xf32>
    %395 = arith.addf %394, %3 : vector<2x8x8xf32>
    %cst_212 = arith.constant dense<0xFF800000> : vector<2x8xf32>
    %396 = vector.multi_reduction <maximumf>, %395, %cst_212 [2] : vector<2x8x8xf32> to vector<2x8xf32>
    %397 = vector.shape_cast %396 : vector<2x8xf32> to vector<2x8x1xf32>
    %398 = vector.broadcast %397 : vector<2x8x1xf32> to vector<2x8x8xf32>
    %399 = arith.subf %395, %398 : vector<2x8x8xf32>
    %400 = math.exp %399 : vector<2x8x8xf32>
    %cst_213 = arith.constant dense<0.000000e+00> : vector<2x8xf32>
    %401 = vector.multi_reduction <add>, %400, %cst_213 [2] : vector<2x8x8xf32> to vector<2x8xf32>
    %402 = vector.shape_cast %401 : vector<2x8xf32> to vector<2x8x1xf32>
    %403 = tpu.reciprocal %402 {approx = true} : vector<2x8x1xf32> -> vector<2x8x1xf32>
    %404 = vector.broadcast %403 : vector<2x8x1xf32> to vector<2x8x8xf32>
    %405 = arith.mulf %400, %404 : vector<2x8x8xf32>
    %406 = vector.extract_strided_slice %389 {offsets = [0, 0, 0], sizes = [2, 8, 8], strides = [1, 1, 1]} : vector<2x8x32xf32> to vector<2x8x8xf32>
    "tpu.trace_start"() <{level = 10 : i32, message = "bqk,bkd->bqd"}> : () -> ()
    %cst_214 = arith.constant dense<0.000000e+00> : vector<2x8x8xf32>
    %407 = tpu.matmul %405, %406, %cst_214 {dimension_numbers = #tpu.dot_dimension_numbers<[2], [1], [1], [2], [0, 0, 0, 1, 1, 2], [0], [0]>} : vector<2x8x8xf32>, vector<2x8x8xf32>, vector<2x8x8xf32> -> vector<2x8x8xf32>
    "tpu.trace_stop"() : () -> ()
    %408 = vector.extract_strided_slice %387 {offsets = [0, 0, 8], sizes = [2, 8, 8], strides = [1, 1, 1]} : vector<2x8x32xf32> to vector<2x8x8xf32>
    %409 = vector.extract_strided_slice %388 {offsets = [0, 0, 8], sizes = [2, 8, 8], strides = [1, 1, 1]} : vector<2x8x32xf32> to vector<2x8x8xf32>
    "tpu.trace_start"() <{level = 10 : i32, message = "bqd,bkd->bqk"}> : () -> ()
    %cst_215 = arith.constant dense<0.000000e+00> : vector<2x8x8xf32>
    %410 = tpu.matmul %408, %409, %cst_215 {dimension_numbers = #tpu.dot_dimension_numbers<[2], [2], [1], [1], [0, 0, 0, 1, 1, 1], [0], [0]>} : vector<2x8x8xf32>, vector<2x8x8xf32>, vector<2x8x8xf32> -> vector<2x8x8xf32>
    "tpu.trace_stop"() : () -> ()
    %cst_216 = arith.constant 0.353553385 : f32
    %411 = vector.broadcast %cst_216 : f32 to vector<2x8x8xf32>
    %412 = arith.mulf %410, %411 : vector<2x8x8xf32>
    %413 = arith.addf %412, %3 : vector<2x8x8xf32>
    %cst_217 = arith.constant dense<0xFF800000> : vector<2x8xf32>
    %414 = vector.multi_reduction <maximumf>, %413, %cst_217 [2] : vector<2x8x8xf32> to vector<2x8xf32>
    %415 = vector.shape_cast %414 : vector<2x8xf32> to vector<2x8x1xf32>
    %416 = vector.broadcast %415 : vector<2x8x1xf32> to vector<2x8x8xf32>
    %417 = arith.subf %413, %416 : vector<2x8x8xf32>
    %418 = math.exp %417 : vector<2x8x8xf32>
    %cst_218 = arith.constant dense<0.000000e+00> : vector<2x8xf32>
    %419 = vector.multi_reduction <add>, %418, %cst_218 [2] : vector<2x8x8xf32> to vector<2x8xf32>
    %420 = vector.shape_cast %419 : vector<2x8xf32> to vector<2x8x1xf32>
    %421 = tpu.reciprocal %420 {approx = true} : vector<2x8x1xf32> -> vector<2x8x1xf32>
    %422 = vector.broadcast %421 : vector<2x8x1xf32> to vector<2x8x8xf32>
    %423 = arith.mulf %418, %422 : vector<2x8x8xf32>
    %424 = vector.extract_strided_slice %389 {offsets = [0, 0, 8], sizes = [2, 8, 8], strides = [1, 1, 1]} : vector<2x8x32xf32> to vector<2x8x8xf32>
    "tpu.trace_start"() <{level = 10 : i32, message = "bqk,bkd->bqd"}> : () -> ()
    %cst_219 = arith.constant dense<0.000000e+00> : vector<2x8x8xf32>
    %425 = tpu.matmul %423, %424, %cst_219 {dimension_numbers = #tpu.dot_dimension_numbers<[2], [1], [1], [2], [0, 0, 0, 1, 1, 2], [0], [0]>} : vector<2x8x8xf32>, vector<2x8x8xf32>, vector<2x8x8xf32> -> vector<2x8x8xf32>
    "tpu.trace_stop"() : () -> ()
    %426 = vector.extract_strided_slice %387 {offsets = [0, 0, 16], sizes = [2, 8, 8], strides = [1, 1, 1]} : vector<2x8x32xf32> to vector<2x8x8xf32>
    %427 = vector.extract_strided_slice %388 {offsets = [0, 0, 16], sizes = [2, 8, 8], strides = [1, 1, 1]} : vector<2x8x32xf32> to vector<2x8x8xf32>
    "tpu.trace_start"() <{level = 10 : i32, message = "bqd,bkd->bqk"}> : () -> ()
    %cst_220 = arith.constant dense<0.000000e+00> : vector<2x8x8xf32>
    %428 = tpu.matmul %426, %427, %cst_220 {dimension_numbers = #tpu.dot_dimension_numbers<[2], [2], [1], [1], [0, 0, 0, 1, 1, 1], [0], [0]>} : vector<2x8x8xf32>, vector<2x8x8xf32>, vector<2x8x8xf32> -> vector<2x8x8xf32>
    "tpu.trace_stop"() : () -> ()
    %cst_221 = arith.constant 0.353553385 : f32
    %429 = vector.broadcast %cst_221 : f32 to vector<2x8x8xf32>
    %430 = arith.mulf %428, %429 : vector<2x8x8xf32>
    %431 = arith.addf %430, %3 : vector<2x8x8xf32>
    %cst_222 = arith.constant dense<0xFF800000> : vector<2x8xf32>
    %432 = vector.multi_reduction <maximumf>, %431, %cst_222 [2] : vector<2x8x8xf32> to vector<2x8xf32>
    %433 = vector.shape_cast %432 : vector<2x8xf32> to vector<2x8x1xf32>
    %434 = vector.broadcast %433 : vector<2x8x1xf32> to vector<2x8x8xf32>
    %435 = arith.subf %431, %434 : vector<2x8x8xf32>
    %436 = math.exp %435 : vector<2x8x8xf32>
    %cst_223 = arith.constant dense<0.000000e+00> : vector<2x8xf32>
    %437 = vector.multi_reduction <add>, %436, %cst_223 [2] : vector<2x8x8xf32> to vector<2x8xf32>
    %438 = vector.shape_cast %437 : vector<2x8xf32> to vector<2x8x1xf32>
    %439 = tpu.reciprocal %438 {approx = true} : vector<2x8x1xf32> -> vector<2x8x1xf32>
    %440 = vector.broadcast %439 : vector<2x8x1xf32> to vector<2x8x8xf32>
    %441 = arith.mulf %436, %440 : vector<2x8x8xf32>
    %442 = vector.extract_strided_slice %389 {offsets = [0, 0, 16], sizes = [2, 8, 8], strides = [1, 1, 1]} : vector<2x8x32xf32> to vector<2x8x8xf32>
    "tpu.trace_start"() <{level = 10 : i32, message = "bqk,bkd->bqd"}> : () -> ()
    %cst_224 = arith.constant dense<0.000000e+00> : vector<2x8x8xf32>
    %443 = tpu.matmul %441, %442, %cst_224 {dimension_numbers = #tpu.dot_dimension_numbers<[2], [1], [1], [2], [0, 0, 0, 1, 1, 2], [0], [0]>} : vector<2x8x8xf32>, vector<2x8x8xf32>, vector<2x8x8xf32> -> vector<2x8x8xf32>
    "tpu.trace_stop"() : () -> ()
    %444 = vector.extract_strided_slice %387 {offsets = [0, 0, 24], sizes = [2, 8, 8], strides = [1, 1, 1]} : vector<2x8x32xf32> to vector<2x8x8xf32>
    %445 = vector.extract_strided_slice %388 {offsets = [0, 0, 24], sizes = [2, 8, 8], strides = [1, 1, 1]} : vector<2x8x32xf32> to vector<2x8x8xf32>
    "tpu.trace_start"() <{level = 10 : i32, message = "bqd,bkd->bqk"}> : () -> ()
    %cst_225 = arith.constant dense<0.000000e+00> : vector<2x8x8xf32>
    %446 = tpu.matmul %444, %445, %cst_225 {dimension_numbers = #tpu.dot_dimension_numbers<[2], [2], [1], [1], [0, 0, 0, 1, 1, 1], [0], [0]>} : vector<2x8x8xf32>, vector<2x8x8xf32>, vector<2x8x8xf32> -> vector<2x8x8xf32>
    "tpu.trace_stop"() : () -> ()
    %cst_226 = arith.constant 0.353553385 : f32
    %447 = vector.broadcast %cst_226 : f32 to vector<2x8x8xf32>
    %448 = arith.mulf %446, %447 : vector<2x8x8xf32>
    %449 = arith.addf %448, %3 : vector<2x8x8xf32>
    %cst_227 = arith.constant dense<0xFF800000> : vector<2x8xf32>
    %450 = vector.multi_reduction <maximumf>, %449, %cst_227 [2] : vector<2x8x8xf32> to vector<2x8xf32>
    %451 = vector.shape_cast %450 : vector<2x8xf32> to vector<2x8x1xf32>
    %452 = vector.broadcast %451 : vector<2x8x1xf32> to vector<2x8x8xf32>
    %453 = arith.subf %449, %452 : vector<2x8x8xf32>
    %454 = math.exp %453 : vector<2x8x8xf32>
    %cst_228 = arith.constant dense<0.000000e+00> : vector<2x8xf32>
    %455 = vector.multi_reduction <add>, %454, %cst_228 [2] : vector<2x8x8xf32> to vector<2x8xf32>
    %456 = vector.shape_cast %455 : vector<2x8xf32> to vector<2x8x1xf32>
    %457 = tpu.reciprocal %456 {approx = true} : vector<2x8x1xf32> -> vector<2x8x1xf32>
    %458 = vector.broadcast %457 : vector<2x8x1xf32> to vector<2x8x8xf32>
    %459 = arith.mulf %454, %458 : vector<2x8x8xf32>
    %460 = vector.extract_strided_slice %389 {offsets = [0, 0, 24], sizes = [2, 8, 8], strides = [1, 1, 1]} : vector<2x8x32xf32> to vector<2x8x8xf32>
    "tpu.trace_start"() <{level = 10 : i32, message = "bqk,bkd->bqd"}> : () -> ()
    %cst_229 = arith.constant dense<0.000000e+00> : vector<2x8x8xf32>
    %461 = tpu.matmul %459, %460, %cst_229 {dimension_numbers = #tpu.dot_dimension_numbers<[2], [1], [1], [2], [0, 0, 0, 1, 1, 2], [0], [0]>} : vector<2x8x8xf32>, vector<2x8x8xf32>, vector<2x8x8xf32> -> vector<2x8x8xf32>
    "tpu.trace_stop"() : () -> ()
    %462 = tpu.concatenate %407, %425, %443, %461 in 2 : vector<2x8x8xf32>, vector<2x8x8xf32>, vector<2x8x8xf32>, vector<2x8x8xf32> -> vector<2x8x32xf32>
    %463 = vector.shape_cast %462 : vector<2x8x32xf32> to vector<16x32xf32>
    %464 = arith.truncf %463 : vector<16x32xf32> to vector<16x32xbf16>
    %cst_230 = arith.constant dense<0.000000e+00> : vector<16x32xf32>
    %465 = tpu.matmul %464, %345, %cst_230 {dimension_numbers = #tpu.dot_dimension_numbers<[1], [0], [0], [1], [0, 0, 1, 1], [], []>} : vector<16x32xbf16>, vector<32x32xbf16>, vector<16x32xf32> -> vector<16x32xf32>
    %466 = vector.broadcast %347 : vector<1x32xf32> to vector<16x32xf32>
    %467 = arith.addf %465, %466 : vector<16x32xf32>
    %468 = arith.addf %1, %467 : vector<16x32xf32>
    %cst_231 = arith.constant dense<0.000000e+00> : vector<16xf32>
    %469 = vector.multi_reduction <add>, %468, %cst_231 [1] : vector<16x32xf32> to vector<16xf32>
    %470 = vector.shape_cast %469 : vector<16xf32> to vector<16x1xf32>
    %cst_232 = arith.constant 3.200000e+01 : f32
    %471 = vector.broadcast %cst_232 : f32 to vector<16x1xf32>
    %472 = arith.divf %470, %471 : vector<16x1xf32>
    %473 = vector.broadcast %472 : vector<16x1xf32> to vector<16x32xf32>
    %474 = arith.subf %468, %473 : vector<16x32xf32>
    %475 = arith.mulf %474, %474 : vector<16x32xf32>
    %cst_233 = arith.constant dense<0.000000e+00> : vector<16xf32>
    %476 = vector.multi_reduction <add>, %475, %cst_233 [1] : vector<16x32xf32> to vector<16xf32>
    %477 = vector.shape_cast %476 : vector<16xf32> to vector<16x1xf32>
    %cst_234 = arith.constant 3.200000e+01 : f32
    %478 = vector.broadcast %cst_234 : f32 to vector<16x1xf32>
    %479 = arith.divf %477, %478 : vector<16x1xf32>
    %cst_235 = arith.constant 9.99999974E-6 : f32
    %480 = vector.broadcast %cst_235 : f32 to vector<16x1xf32>
    %481 = arith.addf %479, %480 : vector<16x1xf32>
    %482 = math.rsqrt %481 : vector<16x1xf32>
    %483 = vector.broadcast %482 : vector<16x1xf32> to vector<16x32xf32>
    %484 = arith.mulf %474, %483 : vector<16x32xf32>
    %485 = vector.broadcast %349 : vector<1x32xf32> to vector<16x32xf32>
    %486 = arith.mulf %484, %485 : vector<16x32xf32>
    %487 = vector.broadcast %351 : vector<1x32xf32> to vector<16x32xf32>
    %488 = arith.addf %486, %487 : vector<16x32xf32>
    %489 = arith.truncf %488 : vector<16x32xf32> to vector<16x32xbf16>
    %cst_236 = arith.constant dense<0.000000e+00> : vector<16x32xf32>
    %490 = tpu.matmul %489, %353, %cst_236 {dimension_numbers = #tpu.dot_dimension_numbers<[1], [0], [0], [1], [0, 0, 1, 1], [], []>} : vector<16x32xbf16>, vector<32x32xbf16>, vector<16x32xf32> -> vector<16x32xf32>
    %491 = vector.broadcast %355 : vector<1x32xf32> to vector<16x32xf32>
    %492 = arith.addf %490, %491 : vector<16x32xf32>
    %493 = arith.truncf %339 : vector<16x32xf32> to vector<16x32xbf16>
    %cst_237 = arith.constant dense<0.000000e+00> : vector<16x64xf32>
    %494 = tpu.matmul %493, %357, %cst_237 {dimension_numbers = #tpu.dot_dimension_numbers<[1], [0], [0], [1], [0, 0, 1, 1], [], []>} : vector<16x32xbf16>, vector<32x64xbf16>, vector<16x64xf32> -> vector<16x64xf32>
    %495 = vector.broadcast %359 : vector<1x64xf32> to vector<16x64xf32>
    %496 = arith.addf %494, %495 : vector<16x64xf32>
    %497 = vector.extract_strided_slice %496 {offsets = [0, 0], sizes = [16, 32], strides = [1, 1]} : vector<16x64xf32> to vector<16x32xf32>
    %498 = vector.extract_strided_slice %496 {offsets = [0, 32], sizes = [16, 32], strides = [1, 1]} : vector<16x64xf32> to vector<16x32xf32>
    %499 = vector.shape_cast %492 : vector<16x32xf32> to vector<2x8x32xf32>
    %500 = vector.shape_cast %497 : vector<16x32xf32> to vector<2x8x32xf32>
    %501 = vector.shape_cast %498 : vector<16x32xf32> to vector<2x8x32xf32>
    %502 = vector.extract_strided_slice %499 {offsets = [0, 0, 0], sizes = [2, 8, 8], strides = [1, 1, 1]} : vector<2x8x32xf32> to vector<2x8x8xf32>
    %503 = vector.extract_strided_slice %500 {offsets = [0, 0, 0], sizes = [2, 8, 8], strides = [1, 1, 1]} : vector<2x8x32xf32> to vector<2x8x8xf32>
    "tpu.trace_start"() <{level = 10 : i32, message = "bqd,bkd->bqk"}> : () -> ()
    %cst_238 = arith.constant dense<0.000000e+00> : vector<2x8x8xf32>
    %504 = tpu.matmul %502, %503, %cst_238 {dimension_numbers = #tpu.dot_dimension_numbers<[2], [2], [1], [1], [0, 0, 0, 1, 1, 1], [0], [0]>} : vector<2x8x8xf32>, vector<2x8x8xf32>, vector<2x8x8xf32> -> vector<2x8x8xf32>
    "tpu.trace_stop"() : () -> ()
    %cst_239 = arith.constant 0.353553385 : f32
    %505 = vector.broadcast %cst_239 : f32 to vector<2x8x8xf32>
    %506 = arith.mulf %504, %505 : vector<2x8x8xf32>
    %507 = vector.broadcast %2 : vector<2x1x8xf32> to vector<2x8x8xf32>
    %508 = arith.addf %506, %507 : vector<2x8x8xf32>
    %cst_240 = arith.constant dense<0xFF800000> : vector<2x8xf32>
    %509 = vector.multi_reduction <maximumf>, %508, %cst_240 [2] : vector<2x8x8xf32> to vector<2x8xf32>
    %510 = vector.shape_cast %509 : vector<2x8xf32> to vector<2x8x1xf32>
    %511 = vector.broadcast %510 : vector<2x8x1xf32> to vector<2x8x8xf32>
    %512 = arith.subf %508, %511 : vector<2x8x8xf32>
    %513 = math.exp %512 : vector<2x8x8xf32>
    %cst_241 = arith.constant dense<0.000000e+00> : vector<2x8xf32>
    %514 = vector.multi_reduction <add>, %513, %cst_241 [2] : vector<2x8x8xf32> to vector<2x8xf32>
    %515 = vector.shape_cast %514 : vector<2x8xf32> to vector<2x8x1xf32>
    %516 = tpu.reciprocal %515 {approx = true} : vector<2x8x1xf32> -> vector<2x8x1xf32>
    %517 = vector.broadcast %516 : vector<2x8x1xf32> to vector<2x8x8xf32>
    %518 = arith.mulf %513, %517 : vector<2x8x8xf32>
    %519 = vector.extract_strided_slice %501 {offsets = [0, 0, 0], sizes = [2, 8, 8], strides = [1, 1, 1]} : vector<2x8x32xf32> to vector<2x8x8xf32>
    "tpu.trace_start"() <{level = 10 : i32, message = "bqk,bkd->bqd"}> : () -> ()
    %cst_242 = arith.constant dense<0.000000e+00> : vector<2x8x8xf32>
    %520 = tpu.matmul %518, %519, %cst_242 {dimension_numbers = #tpu.dot_dimension_numbers<[2], [1], [1], [2], [0, 0, 0, 1, 1, 2], [0], [0]>} : vector<2x8x8xf32>, vector<2x8x8xf32>, vector<2x8x8xf32> -> vector<2x8x8xf32>
    "tpu.trace_stop"() : () -> ()
    %521 = vector.extract_strided_slice %499 {offsets = [0, 0, 8], sizes = [2, 8, 8], strides = [1, 1, 1]} : vector<2x8x32xf32> to vector<2x8x8xf32>
    %522 = vector.extract_strided_slice %500 {offsets = [0, 0, 8], sizes = [2, 8, 8], strides = [1, 1, 1]} : vector<2x8x32xf32> to vector<2x8x8xf32>
    "tpu.trace_start"() <{level = 10 : i32, message = "bqd,bkd->bqk"}> : () -> ()
    %cst_243 = arith.constant dense<0.000000e+00> : vector<2x8x8xf32>
    %523 = tpu.matmul %521, %522, %cst_243 {dimension_numbers = #tpu.dot_dimension_numbers<[2], [2], [1], [1], [0, 0, 0, 1, 1, 1], [0], [0]>} : vector<2x8x8xf32>, vector<2x8x8xf32>, vector<2x8x8xf32> -> vector<2x8x8xf32>
    "tpu.trace_stop"() : () -> ()
    %cst_244 = arith.constant 0.353553385 : f32
    %524 = vector.broadcast %cst_244 : f32 to vector<2x8x8xf32>
    %525 = arith.mulf %523, %524 : vector<2x8x8xf32>
    %526 = vector.broadcast %2 : vector<2x1x8xf32> to vector<2x8x8xf32>
    %527 = arith.addf %525, %526 : vector<2x8x8xf32>
    %cst_245 = arith.constant dense<0xFF800000> : vector<2x8xf32>
    %528 = vector.multi_reduction <maximumf>, %527, %cst_245 [2] : vector<2x8x8xf32> to vector<2x8xf32>
    %529 = vector.shape_cast %528 : vector<2x8xf32> to vector<2x8x1xf32>
    %530 = vector.broadcast %529 : vector<2x8x1xf32> to vector<2x8x8xf32>
    %531 = arith.subf %527, %530 : vector<2x8x8xf32>
    %532 = math.exp %531 : vector<2x8x8xf32>
    %cst_246 = arith.constant dense<0.000000e+00> : vector<2x8xf32>
    %533 = vector.multi_reduction <add>, %532, %cst_246 [2] : vector<2x8x8xf32> to vector<2x8xf32>
    %534 = vector.shape_cast %533 : vector<2x8xf32> to vector<2x8x1xf32>
    %535 = tpu.reciprocal %534 {approx = true} : vector<2x8x1xf32> -> vector<2x8x1xf32>
    %536 = vector.broadcast %535 : vector<2x8x1xf32> to vector<2x8x8xf32>
    %537 = arith.mulf %532, %536 : vector<2x8x8xf32>
    %538 = vector.extract_strided_slice %501 {offsets = [0, 0, 8], sizes = [2, 8, 8], strides = [1, 1, 1]} : vector<2x8x32xf32> to vector<2x8x8xf32>
    "tpu.trace_start"() <{level = 10 : i32, message = "bqk,bkd->bqd"}> : () -> ()
    %cst_247 = arith.constant dense<0.000000e+00> : vector<2x8x8xf32>
    %539 = tpu.matmul %537, %538, %cst_247 {dimension_numbers = #tpu.dot_dimension_numbers<[2], [1], [1], [2], [0, 0, 0, 1, 1, 2], [0], [0]>} : vector<2x8x8xf32>, vector<2x8x8xf32>, vector<2x8x8xf32> -> vector<2x8x8xf32>
    "tpu.trace_stop"() : () -> ()
    %540 = vector.extract_strided_slice %499 {offsets = [0, 0, 16], sizes = [2, 8, 8], strides = [1, 1, 1]} : vector<2x8x32xf32> to vector<2x8x8xf32>
    %541 = vector.extract_strided_slice %500 {offsets = [0, 0, 16], sizes = [2, 8, 8], strides = [1, 1, 1]} : vector<2x8x32xf32> to vector<2x8x8xf32>
    "tpu.trace_start"() <{level = 10 : i32, message = "bqd,bkd->bqk"}> : () -> ()
    %cst_248 = arith.constant dense<0.000000e+00> : vector<2x8x8xf32>
    %542 = tpu.matmul %540, %541, %cst_248 {dimension_numbers = #tpu.dot_dimension_numbers<[2], [2], [1], [1], [0, 0, 0, 1, 1, 1], [0], [0]>} : vector<2x8x8xf32>, vector<2x8x8xf32>, vector<2x8x8xf32> -> vector<2x8x8xf32>
    "tpu.trace_stop"() : () -> ()
    %cst_249 = arith.constant 0.353553385 : f32
    %543 = vector.broadcast %cst_249 : f32 to vector<2x8x8xf32>
    %544 = arith.mulf %542, %543 : vector<2x8x8xf32>
    %545 = vector.broadcast %2 : vector<2x1x8xf32> to vector<2x8x8xf32>
    %546 = arith.addf %544, %545 : vector<2x8x8xf32>
    %cst_250 = arith.constant dense<0xFF800000> : vector<2x8xf32>
    %547 = vector.multi_reduction <maximumf>, %546, %cst_250 [2] : vector<2x8x8xf32> to vector<2x8xf32>
    %548 = vector.shape_cast %547 : vector<2x8xf32> to vector<2x8x1xf32>
    %549 = vector.broadcast %548 : vector<2x8x1xf32> to vector<2x8x8xf32>
    %550 = arith.subf %546, %549 : vector<2x8x8xf32>
    %551 = math.exp %550 : vector<2x8x8xf32>
    %cst_251 = arith.constant dense<0.000000e+00> : vector<2x8xf32>
    %552 = vector.multi_reduction <add>, %551, %cst_251 [2] : vector<2x8x8xf32> to vector<2x8xf32>
    %553 = vector.shape_cast %552 : vector<2x8xf32> to vector<2x8x1xf32>
    %554 = tpu.reciprocal %553 {approx = true} : vector<2x8x1xf32> -> vector<2x8x1xf32>
    %555 = vector.broadcast %554 : vector<2x8x1xf32> to vector<2x8x8xf32>
    %556 = arith.mulf %551, %555 : vector<2x8x8xf32>
    %557 = vector.extract_strided_slice %501 {offsets = [0, 0, 16], sizes = [2, 8, 8], strides = [1, 1, 1]} : vector<2x8x32xf32> to vector<2x8x8xf32>
    "tpu.trace_start"() <{level = 10 : i32, message = "bqk,bkd->bqd"}> : () -> ()
    %cst_252 = arith.constant dense<0.000000e+00> : vector<2x8x8xf32>
    %558 = tpu.matmul %556, %557, %cst_252 {dimension_numbers = #tpu.dot_dimension_numbers<[2], [1], [1], [2], [0, 0, 0, 1, 1, 2], [0], [0]>} : vector<2x8x8xf32>, vector<2x8x8xf32>, vector<2x8x8xf32> -> vector<2x8x8xf32>
    "tpu.trace_stop"() : () -> ()
    %559 = vector.extract_strided_slice %499 {offsets = [0, 0, 24], sizes = [2, 8, 8], strides = [1, 1, 1]} : vector<2x8x32xf32> to vector<2x8x8xf32>
    %560 = vector.extract_strided_slice %500 {offsets = [0, 0, 24], sizes = [2, 8, 8], strides = [1, 1, 1]} : vector<2x8x32xf32> to vector<2x8x8xf32>
    "tpu.trace_start"() <{level = 10 : i32, message = "bqd,bkd->bqk"}> : () -> ()
    %cst_253 = arith.constant dense<0.000000e+00> : vector<2x8x8xf32>
    %561 = tpu.matmul %559, %560, %cst_253 {dimension_numbers = #tpu.dot_dimension_numbers<[2], [2], [1], [1], [0, 0, 0, 1, 1, 1], [0], [0]>} : vector<2x8x8xf32>, vector<2x8x8xf32>, vector<2x8x8xf32> -> vector<2x8x8xf32>
    "tpu.trace_stop"() : () -> ()
    %cst_254 = arith.constant 0.353553385 : f32
    %562 = vector.broadcast %cst_254 : f32 to vector<2x8x8xf32>
    %563 = arith.mulf %561, %562 : vector<2x8x8xf32>
    %564 = vector.broadcast %2 : vector<2x1x8xf32> to vector<2x8x8xf32>
    %565 = arith.addf %563, %564 : vector<2x8x8xf32>
    %cst_255 = arith.constant dense<0xFF800000> : vector<2x8xf32>
    %566 = vector.multi_reduction <maximumf>, %565, %cst_255 [2] : vector<2x8x8xf32> to vector<2x8xf32>
    %567 = vector.shape_cast %566 : vector<2x8xf32> to vector<2x8x1xf32>
    %568 = vector.broadcast %567 : vector<2x8x1xf32> to vector<2x8x8xf32>
    %569 = arith.subf %565, %568 : vector<2x8x8xf32>
    %570 = math.exp %569 : vector<2x8x8xf32>
    %cst_256 = arith.constant dense<0.000000e+00> : vector<2x8xf32>
    %571 = vector.multi_reduction <add>, %570, %cst_256 [2] : vector<2x8x8xf32> to vector<2x8xf32>
    %572 = vector.shape_cast %571 : vector<2x8xf32> to vector<2x8x1xf32>
    %573 = tpu.reciprocal %572 {approx = true} : vector<2x8x1xf32> -> vector<2x8x1xf32>
    %574 = vector.broadcast %573 : vector<2x8x1xf32> to vector<2x8x8xf32>
    %575 = arith.mulf %570, %574 : vector<2x8x8xf32>
    %576 = vector.extract_strided_slice %501 {offsets = [0, 0, 24], sizes = [2, 8, 8], strides = [1, 1, 1]} : vector<2x8x32xf32> to vector<2x8x8xf32>
    "tpu.trace_start"() <{level = 10 : i32, message = "bqk,bkd->bqd"}> : () -> ()
    %cst_257 = arith.constant dense<0.000000e+00> : vector<2x8x8xf32>
    %577 = tpu.matmul %575, %576, %cst_257 {dimension_numbers = #tpu.dot_dimension_numbers<[2], [1], [1], [2], [0, 0, 0, 1, 1, 2], [0], [0]>} : vector<2x8x8xf32>, vector<2x8x8xf32>, vector<2x8x8xf32> -> vector<2x8x8xf32>
    "tpu.trace_stop"() : () -> ()
    %578 = tpu.concatenate %520, %539, %558, %577 in 2 : vector<2x8x8xf32>, vector<2x8x8xf32>, vector<2x8x8xf32>, vector<2x8x8xf32> -> vector<2x8x32xf32>
    %579 = vector.shape_cast %578 : vector<2x8x32xf32> to vector<16x32xf32>
    %580 = arith.truncf %579 : vector<16x32xf32> to vector<16x32xbf16>
    %cst_258 = arith.constant dense<0.000000e+00> : vector<16x32xf32>
    %581 = tpu.matmul %580, %361, %cst_258 {dimension_numbers = #tpu.dot_dimension_numbers<[1], [0], [0], [1], [0, 0, 1, 1], [], []>} : vector<16x32xbf16>, vector<32x32xbf16>, vector<16x32xf32> -> vector<16x32xf32>
    %582 = vector.broadcast %363 : vector<1x32xf32> to vector<16x32xf32>
    %583 = arith.addf %581, %582 : vector<16x32xf32>
    %584 = arith.addf %488, %583 : vector<16x32xf32>
    %cst_259 = arith.constant dense<0.000000e+00> : vector<16xf32>
    %585 = vector.multi_reduction <add>, %584, %cst_259 [1] : vector<16x32xf32> to vector<16xf32>
    %586 = vector.shape_cast %585 : vector<16xf32> to vector<16x1xf32>
    %cst_260 = arith.constant 3.200000e+01 : f32
    %587 = vector.broadcast %cst_260 : f32 to vector<16x1xf32>
    %588 = arith.divf %586, %587 : vector<16x1xf32>
    %589 = vector.broadcast %588 : vector<16x1xf32> to vector<16x32xf32>
    %590 = arith.subf %584, %589 : vector<16x32xf32>
    %591 = arith.mulf %590, %590 : vector<16x32xf32>
    %cst_261 = arith.constant dense<0.000000e+00> : vector<16xf32>
    %592 = vector.multi_reduction <add>, %591, %cst_261 [1] : vector<16x32xf32> to vector<16xf32>
    %593 = vector.shape_cast %592 : vector<16xf32> to vector<16x1xf32>
    %cst_262 = arith.constant 3.200000e+01 : f32
    %594 = vector.broadcast %cst_262 : f32 to vector<16x1xf32>
    %595 = arith.divf %593, %594 : vector<16x1xf32>
    %cst_263 = arith.constant 9.99999974E-6 : f32
    %596 = vector.broadcast %cst_263 : f32 to vector<16x1xf32>
    %597 = arith.addf %595, %596 : vector<16x1xf32>
    %598 = math.rsqrt %597 : vector<16x1xf32>
    %599 = vector.broadcast %598 : vector<16x1xf32> to vector<16x32xf32>
    %600 = arith.mulf %590, %599 : vector<16x32xf32>
    %601 = vector.broadcast %365 : vector<1x32xf32> to vector<16x32xf32>
    %602 = arith.mulf %600, %601 : vector<16x32xf32>
    %603 = vector.broadcast %367 : vector<1x32xf32> to vector<16x32xf32>
    %604 = arith.addf %602, %603 : vector<16x32xf32>
    %605 = arith.truncf %604 : vector<16x32xf32> to vector<16x32xbf16>
    %cst_264 = arith.constant dense<0.000000e+00> : vector<16x64xf32>
    %606 = tpu.matmul %605, %369, %cst_264 {dimension_numbers = #tpu.dot_dimension_numbers<[1], [0], [0], [1], [0, 0, 1, 1], [], []>} : vector<16x32xbf16>, vector<32x64xbf16>, vector<16x64xf32> -> vector<16x64xf32>
    %607 = vector.broadcast %371 : vector<1x64xf32> to vector<16x64xf32>
    %608 = arith.addf %606, %607 : vector<16x64xf32>
    %cst_265 = arith.constant 0.000000e+00 : f32
    %609 = vector.broadcast %cst_265 : f32 to vector<16x64xf32>
    %610 = arith.maximumf %608, %609 : vector<16x64xf32>
    %611 = arith.truncf %610 : vector<16x64xf32> to vector<16x64xbf16>
    %cst_266 = arith.constant dense<0.000000e+00> : vector<16x32xf32>
    %612 = tpu.matmul %611, %373, %cst_266 {dimension_numbers = #tpu.dot_dimension_numbers<[1], [0], [0], [1], [0, 0, 1, 1], [], []>} : vector<16x64xbf16>, vector<64x32xbf16>, vector<16x32xf32> -> vector<16x32xf32>
    %613 = vector.broadcast %375 : vector<1x32xf32> to vector<16x32xf32>
    %614 = arith.addf %612, %613 : vector<16x32xf32>
    %615 = arith.addf %604, %614 : vector<16x32xf32>
    %cst_267 = arith.constant dense<0.000000e+00> : vector<16xf32>
    %616 = vector.multi_reduction <add>, %615, %cst_267 [1] : vector<16x32xf32> to vector<16xf32>
    %617 = vector.shape_cast %616 : vector<16xf32> to vector<16x1xf32>
    %cst_268 = arith.constant 3.200000e+01 : f32
    %618 = vector.broadcast %cst_268 : f32 to vector<16x1xf32>
    %619 = arith.divf %617, %618 : vector<16x1xf32>
    %620 = vector.broadcast %619 : vector<16x1xf32> to vector<16x32xf32>
    %621 = arith.subf %615, %620 : vector<16x32xf32>
    %622 = arith.mulf %621, %621 : vector<16x32xf32>
    %cst_269 = arith.constant dense<0.000000e+00> : vector<16xf32>
    %623 = vector.multi_reduction <add>, %622, %cst_269 [1] : vector<16x32xf32> to vector<16xf32>
    %624 = vector.shape_cast %623 : vector<16xf32> to vector<16x1xf32>
    %cst_270 = arith.constant 3.200000e+01 : f32
    %625 = vector.broadcast %cst_270 : f32 to vector<16x1xf32>
    %626 = arith.divf %624, %625 : vector<16x1xf32>
    %cst_271 = arith.constant 9.99999974E-6 : f32
    %627 = vector.broadcast %cst_271 : f32 to vector<16x1xf32>
    %628 = arith.addf %626, %627 : vector<16x1xf32>
    %629 = math.rsqrt %628 : vector<16x1xf32>
    %630 = vector.broadcast %629 : vector<16x1xf32> to vector<16x32xf32>
    %631 = arith.mulf %621, %630 : vector<16x32xf32>
    %632 = vector.broadcast %377 : vector<1x32xf32> to vector<16x32xf32>
    %633 = arith.mulf %631, %632 : vector<16x32xf32>
    %634 = vector.broadcast %379 : vector<1x32xf32> to vector<16x32xf32>
    %635 = arith.addf %633, %634 : vector<16x32xf32>
    %c1_272 = arith.constant 1 : index
    %c0_273 = arith.constant 0 : index
    %c0_274 = arith.constant 0 : index
    %636 = vector.load %arg16[%c1_272, %c0_273, %c0_274] : memref<2x32x96xbf16, #tpu.memory_space<vmem>>, vector<1x32x96xbf16>
    %637 = vector.shape_cast %636 : vector<1x32x96xbf16> to vector<32x96xbf16>
    %c1_275 = arith.constant 1 : index
    %c0_276 = arith.constant 0 : index
    %c0_277 = arith.constant 0 : index
    %638 = vector.load %arg17[%c1_275, %c0_276, %c0_277] : memref<2x1x96xf32, #tpu.memory_space<vmem>>, vector<1x1x96xf32>
    %639 = vector.shape_cast %638 : vector<1x1x96xf32> to vector<1x96xf32>
    %c1_278 = arith.constant 1 : index
    %c0_279 = arith.constant 0 : index
    %c0_280 = arith.constant 0 : index
    %640 = vector.load %arg18[%c1_278, %c0_279, %c0_280] : memref<2x32x32xbf16, #tpu.memory_space<vmem>>, vector<1x32x32xbf16>
    %641 = vector.shape_cast %640 : vector<1x32x32xbf16> to vector<32x32xbf16>
    %c1_281 = arith.constant 1 : index
    %c0_282 = arith.constant 0 : index
    %c0_283 = arith.constant 0 : index
    %642 = vector.load %arg19[%c1_281, %c0_282, %c0_283] : memref<2x1x32xf32, #tpu.memory_space<vmem>>, vector<1x1x32xf32>
    %643 = vector.shape_cast %642 : vector<1x1x32xf32> to vector<1x32xf32>
    %c1_284 = arith.constant 1 : index
    %c0_285 = arith.constant 0 : index
    %c0_286 = arith.constant 0 : index
    %644 = vector.load %arg20[%c1_284, %c0_285, %c0_286] : memref<2x1x32xf32, #tpu.memory_space<vmem>>, vector<1x1x32xf32>
    %645 = vector.shape_cast %644 : vector<1x1x32xf32> to vector<1x32xf32>
    %c1_287 = arith.constant 1 : index
    %c0_288 = arith.constant 0 : index
    %c0_289 = arith.constant 0 : index
    %646 = vector.load %arg21[%c1_287, %c0_288, %c0_289] : memref<2x1x32xf32, #tpu.memory_space<vmem>>, vector<1x1x32xf32>
    %647 = vector.shape_cast %646 : vector<1x1x32xf32> to vector<1x32xf32>
    %c1_290 = arith.constant 1 : index
    %c0_291 = arith.constant 0 : index
    %c0_292 = arith.constant 0 : index
    %648 = vector.load %arg22[%c1_290, %c0_291, %c0_292] : memref<2x32x32xbf16, #tpu.memory_space<vmem>>, vector<1x32x32xbf16>
    %649 = vector.shape_cast %648 : vector<1x32x32xbf16> to vector<32x32xbf16>
    %c1_293 = arith.constant 1 : index
    %c0_294 = arith.constant 0 : index
    %c0_295 = arith.constant 0 : index
    %650 = vector.load %arg23[%c1_293, %c0_294, %c0_295] : memref<2x1x32xf32, #tpu.memory_space<vmem>>, vector<1x1x32xf32>
    %651 = vector.shape_cast %650 : vector<1x1x32xf32> to vector<1x32xf32>
    %c1_296 = arith.constant 1 : index
    %c0_297 = arith.constant 0 : index
    %c0_298 = arith.constant 0 : index
    %652 = vector.load %arg24[%c1_296, %c0_297, %c0_298] : memref<2x32x64xbf16, #tpu.memory_space<vmem>>, vector<1x32x64xbf16>
    %653 = vector.shape_cast %652 : vector<1x32x64xbf16> to vector<32x64xbf16>
    %c1_299 = arith.constant 1 : index
    %c0_300 = arith.constant 0 : index
    %c0_301 = arith.constant 0 : index
    %654 = vector.load %arg25[%c1_299, %c0_300, %c0_301] : memref<2x1x64xf32, #tpu.memory_space<vmem>>, vector<1x1x64xf32>
    %655 = vector.shape_cast %654 : vector<1x1x64xf32> to vector<1x64xf32>
    %c1_302 = arith.constant 1 : index
    %c0_303 = arith.constant 0 : index
    %c0_304 = arith.constant 0 : index
    %656 = vector.load %arg26[%c1_302, %c0_303, %c0_304] : memref<2x32x32xbf16, #tpu.memory_space<vmem>>, vector<1x32x32xbf16>
    %657 = vector.shape_cast %656 : vector<1x32x32xbf16> to vector<32x32xbf16>
    %c1_305 = arith.constant 1 : index
    %c0_306 = arith.constant 0 : index
    %c0_307 = arith.constant 0 : index
    %658 = vector.load %arg27[%c1_305, %c0_306, %c0_307] : memref<2x1x32xf32, #tpu.memory_space<vmem>>, vector<1x1x32xf32>
    %659 = vector.shape_cast %658 : vector<1x1x32xf32> to vector<1x32xf32>
    %c1_308 = arith.constant 1 : index
    %c0_309 = arith.constant 0 : index
    %c0_310 = arith.constant 0 : index
    %660 = vector.load %arg28[%c1_308, %c0_309, %c0_310] : memref<2x1x32xf32, #tpu.memory_space<vmem>>, vector<1x1x32xf32>
    %661 = vector.shape_cast %660 : vector<1x1x32xf32> to vector<1x32xf32>
    %c1_311 = arith.constant 1 : index
    %c0_312 = arith.constant 0 : index
    %c0_313 = arith.constant 0 : index
    %662 = vector.load %arg29[%c1_311, %c0_312, %c0_313] : memref<2x1x32xf32, #tpu.memory_space<vmem>>, vector<1x1x32xf32>
    %663 = vector.shape_cast %662 : vector<1x1x32xf32> to vector<1x32xf32>
    %c1_314 = arith.constant 1 : index
    %c0_315 = arith.constant 0 : index
    %c0_316 = arith.constant 0 : index
    %664 = vector.load %arg30[%c1_314, %c0_315, %c0_316] : memref<2x32x64xbf16, #tpu.memory_space<vmem>>, vector<1x32x64xbf16>
    %665 = vector.shape_cast %664 : vector<1x32x64xbf16> to vector<32x64xbf16>
    %c1_317 = arith.constant 1 : index
    %c0_318 = arith.constant 0 : index
    %c0_319 = arith.constant 0 : index
    %666 = vector.load %arg31[%c1_317, %c0_318, %c0_319] : memref<2x1x64xf32, #tpu.memory_space<vmem>>, vector<1x1x64xf32>
    %667 = vector.shape_cast %666 : vector<1x1x64xf32> to vector<1x64xf32>
    %c1_320 = arith.constant 1 : index
    %c0_321 = arith.constant 0 : index
    %c0_322 = arith.constant 0 : index
    %668 = vector.load %arg32[%c1_320, %c0_321, %c0_322] : memref<2x64x32xbf16, #tpu.memory_space<vmem>>, vector<1x64x32xbf16>
    %669 = vector.shape_cast %668 : vector<1x64x32xbf16> to vector<64x32xbf16>
    %c1_323 = arith.constant 1 : index
    %c0_324 = arith.constant 0 : index
    %c0_325 = arith.constant 0 : index
    %670 = vector.load %arg33[%c1_323, %c0_324, %c0_325] : memref<2x1x32xf32, #tpu.memory_space<vmem>>, vector<1x1x32xf32>
    %671 = vector.shape_cast %670 : vector<1x1x32xf32> to vector<1x32xf32>
    %c1_326 = arith.constant 1 : index
    %c0_327 = arith.constant 0 : index
    %c0_328 = arith.constant 0 : index
    %672 = vector.load %arg34[%c1_326, %c0_327, %c0_328] : memref<2x1x32xf32, #tpu.memory_space<vmem>>, vector<1x1x32xf32>
    %673 = vector.shape_cast %672 : vector<1x1x32xf32> to vector<1x32xf32>
    %c1_329 = arith.constant 1 : index
    %c0_330 = arith.constant 0 : index
    %c0_331 = arith.constant 0 : index
    %674 = vector.load %arg35[%c1_329, %c0_330, %c0_331] : memref<2x1x32xf32, #tpu.memory_space<vmem>>, vector<1x1x32xf32>
    %675 = vector.shape_cast %674 : vector<1x1x32xf32> to vector<1x32xf32>
    %676 = arith.truncf %635 : vector<16x32xf32> to vector<16x32xbf16>
    %cst_332 = arith.constant dense<0.000000e+00> : vector<16x96xf32>
    %677 = tpu.matmul %676, %637, %cst_332 {dimension_numbers = #tpu.dot_dimension_numbers<[1], [0], [0], [1], [0, 0, 1, 1], [], []>} : vector<16x32xbf16>, vector<32x96xbf16>, vector<16x96xf32> -> vector<16x96xf32>
    %678 = vector.broadcast %639 : vector<1x96xf32> to vector<16x96xf32>
    %679 = arith.addf %677, %678 : vector<16x96xf32>
    %680 = vector.extract_strided_slice %679 {offsets = [0, 0], sizes = [16, 32], strides = [1, 1]} : vector<16x96xf32> to vector<16x32xf32>
    %681 = vector.extract_strided_slice %679 {offsets = [0, 32], sizes = [16, 32], strides = [1, 1]} : vector<16x96xf32> to vector<16x32xf32>
    %682 = vector.extract_strided_slice %679 {offsets = [0, 64], sizes = [16, 32], strides = [1, 1]} : vector<16x96xf32> to vector<16x32xf32>
    %683 = vector.shape_cast %680 : vector<16x32xf32> to vector<2x8x32xf32>
    %684 = vector.shape_cast %681 : vector<16x32xf32> to vector<2x8x32xf32>
    %685 = vector.shape_cast %682 : vector<16x32xf32> to vector<2x8x32xf32>
    %686 = vector.extract_strided_slice %683 {offsets = [0, 0, 0], sizes = [2, 8, 8], strides = [1, 1, 1]} : vector<2x8x32xf32> to vector<2x8x8xf32>
    %687 = vector.extract_strided_slice %684 {offsets = [0, 0, 0], sizes = [2, 8, 8], strides = [1, 1, 1]} : vector<2x8x32xf32> to vector<2x8x8xf32>
    "tpu.trace_start"() <{level = 10 : i32, message = "bqd,bkd->bqk"}> : () -> ()
    %cst_333 = arith.constant dense<0.000000e+00> : vector<2x8x8xf32>
    %688 = tpu.matmul %686, %687, %cst_333 {dimension_numbers = #tpu.dot_dimension_numbers<[2], [2], [1], [1], [0, 0, 0, 1, 1, 1], [0], [0]>} : vector<2x8x8xf32>, vector<2x8x8xf32>, vector<2x8x8xf32> -> vector<2x8x8xf32>
    "tpu.trace_stop"() : () -> ()
    %cst_334 = arith.constant 0.353553385 : f32
    %689 = vector.broadcast %cst_334 : f32 to vector<2x8x8xf32>
    %690 = arith.mulf %688, %689 : vector<2x8x8xf32>
    %691 = arith.addf %690, %3 : vector<2x8x8xf32>
    %cst_335 = arith.constant dense<0xFF800000> : vector<2x8xf32>
    %692 = vector.multi_reduction <maximumf>, %691, %cst_335 [2] : vector<2x8x8xf32> to vector<2x8xf32>
    %693 = vector.shape_cast %692 : vector<2x8xf32> to vector<2x8x1xf32>
    %694 = vector.broadcast %693 : vector<2x8x1xf32> to vector<2x8x8xf32>
    %695 = arith.subf %691, %694 : vector<2x8x8xf32>
    %696 = math.exp %695 : vector<2x8x8xf32>
    %cst_336 = arith.constant dense<0.000000e+00> : vector<2x8xf32>
    %697 = vector.multi_reduction <add>, %696, %cst_336 [2] : vector<2x8x8xf32> to vector<2x8xf32>
    %698 = vector.shape_cast %697 : vector<2x8xf32> to vector<2x8x1xf32>
    %699 = tpu.reciprocal %698 {approx = true} : vector<2x8x1xf32> -> vector<2x8x1xf32>
    %700 = vector.broadcast %699 : vector<2x8x1xf32> to vector<2x8x8xf32>
    %701 = arith.mulf %696, %700 : vector<2x8x8xf32>
    %702 = vector.extract_strided_slice %685 {offsets = [0, 0, 0], sizes = [2, 8, 8], strides = [1, 1, 1]} : vector<2x8x32xf32> to vector<2x8x8xf32>
    "tpu.trace_start"() <{level = 10 : i32, message = "bqk,bkd->bqd"}> : () -> ()
    %cst_337 = arith.constant dense<0.000000e+00> : vector<2x8x8xf32>
    %703 = tpu.matmul %701, %702, %cst_337 {dimension_numbers = #tpu.dot_dimension_numbers<[2], [1], [1], [2], [0, 0, 0, 1, 1, 2], [0], [0]>} : vector<2x8x8xf32>, vector<2x8x8xf32>, vector<2x8x8xf32> -> vector<2x8x8xf32>
    "tpu.trace_stop"() : () -> ()
    %704 = vector.extract_strided_slice %683 {offsets = [0, 0, 8], sizes = [2, 8, 8], strides = [1, 1, 1]} : vector<2x8x32xf32> to vector<2x8x8xf32>
    %705 = vector.extract_strided_slice %684 {offsets = [0, 0, 8], sizes = [2, 8, 8], strides = [1, 1, 1]} : vector<2x8x32xf32> to vector<2x8x8xf32>
    "tpu.trace_start"() <{level = 10 : i32, message = "bqd,bkd->bqk"}> : () -> ()
    %cst_338 = arith.constant dense<0.000000e+00> : vector<2x8x8xf32>
    %706 = tpu.matmul %704, %705, %cst_338 {dimension_numbers = #tpu.dot_dimension_numbers<[2], [2], [1], [1], [0, 0, 0, 1, 1, 1], [0], [0]>} : vector<2x8x8xf32>, vector<2x8x8xf32>, vector<2x8x8xf32> -> vector<2x8x8xf32>
    "tpu.trace_stop"() : () -> ()
    %cst_339 = arith.constant 0.353553385 : f32
    %707 = vector.broadcast %cst_339 : f32 to vector<2x8x8xf32>
    %708 = arith.mulf %706, %707 : vector<2x8x8xf32>
    %709 = arith.addf %708, %3 : vector<2x8x8xf32>
    %cst_340 = arith.constant dense<0xFF800000> : vector<2x8xf32>
    %710 = vector.multi_reduction <maximumf>, %709, %cst_340 [2] : vector<2x8x8xf32> to vector<2x8xf32>
    %711 = vector.shape_cast %710 : vector<2x8xf32> to vector<2x8x1xf32>
    %712 = vector.broadcast %711 : vector<2x8x1xf32> to vector<2x8x8xf32>
    %713 = arith.subf %709, %712 : vector<2x8x8xf32>
    %714 = math.exp %713 : vector<2x8x8xf32>
    %cst_341 = arith.constant dense<0.000000e+00> : vector<2x8xf32>
    %715 = vector.multi_reduction <add>, %714, %cst_341 [2] : vector<2x8x8xf32> to vector<2x8xf32>
    %716 = vector.shape_cast %715 : vector<2x8xf32> to vector<2x8x1xf32>
    %717 = tpu.reciprocal %716 {approx = true} : vector<2x8x1xf32> -> vector<2x8x1xf32>
    %718 = vector.broadcast %717 : vector<2x8x1xf32> to vector<2x8x8xf32>
    %719 = arith.mulf %714, %718 : vector<2x8x8xf32>
    %720 = vector.extract_strided_slice %685 {offsets = [0, 0, 8], sizes = [2, 8, 8], strides = [1, 1, 1]} : vector<2x8x32xf32> to vector<2x8x8xf32>
    "tpu.trace_start"() <{level = 10 : i32, message = "bqk,bkd->bqd"}> : () -> ()
    %cst_342 = arith.constant dense<0.000000e+00> : vector<2x8x8xf32>
    %721 = tpu.matmul %719, %720, %cst_342 {dimension_numbers = #tpu.dot_dimension_numbers<[2], [1], [1], [2], [0, 0, 0, 1, 1, 2], [0], [0]>} : vector<2x8x8xf32>, vector<2x8x8xf32>, vector<2x8x8xf32> -> vector<2x8x8xf32>
    "tpu.trace_stop"() : () -> ()
    %722 = vector.extract_strided_slice %683 {offsets = [0, 0, 16], sizes = [2, 8, 8], strides = [1, 1, 1]} : vector<2x8x32xf32> to vector<2x8x8xf32>
    %723 = vector.extract_strided_slice %684 {offsets = [0, 0, 16], sizes = [2, 8, 8], strides = [1, 1, 1]} : vector<2x8x32xf32> to vector<2x8x8xf32>
    "tpu.trace_start"() <{level = 10 : i32, message = "bqd,bkd->bqk"}> : () -> ()
    %cst_343 = arith.constant dense<0.000000e+00> : vector<2x8x8xf32>
    %724 = tpu.matmul %722, %723, %cst_343 {dimension_numbers = #tpu.dot_dimension_numbers<[2], [2], [1], [1], [0, 0, 0, 1, 1, 1], [0], [0]>} : vector<2x8x8xf32>, vector<2x8x8xf32>, vector<2x8x8xf32> -> vector<2x8x8xf32>
    "tpu.trace_stop"() : () -> ()
    %cst_344 = arith.constant 0.353553385 : f32
    %725 = vector.broadcast %cst_344 : f32 to vector<2x8x8xf32>
    %726 = arith.mulf %724, %725 : vector<2x8x8xf32>
    %727 = arith.addf %726, %3 : vector<2x8x8xf32>
    %cst_345 = arith.constant dense<0xFF800000> : vector<2x8xf32>
    %728 = vector.multi_reduction <maximumf>, %727, %cst_345 [2] : vector<2x8x8xf32> to vector<2x8xf32>
    %729 = vector.shape_cast %728 : vector<2x8xf32> to vector<2x8x1xf32>
    %730 = vector.broadcast %729 : vector<2x8x1xf32> to vector<2x8x8xf32>
    %731 = arith.subf %727, %730 : vector<2x8x8xf32>
    %732 = math.exp %731 : vector<2x8x8xf32>
    %cst_346 = arith.constant dense<0.000000e+00> : vector<2x8xf32>
    %733 = vector.multi_reduction <add>, %732, %cst_346 [2] : vector<2x8x8xf32> to vector<2x8xf32>
    %734 = vector.shape_cast %733 : vector<2x8xf32> to vector<2x8x1xf32>
    %735 = tpu.reciprocal %734 {approx = true} : vector<2x8x1xf32> -> vector<2x8x1xf32>
    %736 = vector.broadcast %735 : vector<2x8x1xf32> to vector<2x8x8xf32>
    %737 = arith.mulf %732, %736 : vector<2x8x8xf32>
    %738 = vector.extract_strided_slice %685 {offsets = [0, 0, 16], sizes = [2, 8, 8], strides = [1, 1, 1]} : vector<2x8x32xf32> to vector<2x8x8xf32>
    "tpu.trace_start"() <{level = 10 : i32, message = "bqk,bkd->bqd"}> : () -> ()
    %cst_347 = arith.constant dense<0.000000e+00> : vector<2x8x8xf32>
    %739 = tpu.matmul %737, %738, %cst_347 {dimension_numbers = #tpu.dot_dimension_numbers<[2], [1], [1], [2], [0, 0, 0, 1, 1, 2], [0], [0]>} : vector<2x8x8xf32>, vector<2x8x8xf32>, vector<2x8x8xf32> -> vector<2x8x8xf32>
    "tpu.trace_stop"() : () -> ()
    %740 = vector.extract_strided_slice %683 {offsets = [0, 0, 24], sizes = [2, 8, 8], strides = [1, 1, 1]} : vector<2x8x32xf32> to vector<2x8x8xf32>
    %741 = vector.extract_strided_slice %684 {offsets = [0, 0, 24], sizes = [2, 8, 8], strides = [1, 1, 1]} : vector<2x8x32xf32> to vector<2x8x8xf32>
    "tpu.trace_start"() <{level = 10 : i32, message = "bqd,bkd->bqk"}> : () -> ()
    %cst_348 = arith.constant dense<0.000000e+00> : vector<2x8x8xf32>
    %742 = tpu.matmul %740, %741, %cst_348 {dimension_numbers = #tpu.dot_dimension_numbers<[2], [2], [1], [1], [0, 0, 0, 1, 1, 1], [0], [0]>} : vector<2x8x8xf32>, vector<2x8x8xf32>, vector<2x8x8xf32> -> vector<2x8x8xf32>
    "tpu.trace_stop"() : () -> ()
    %cst_349 = arith.constant 0.353553385 : f32
    %743 = vector.broadcast %cst_349 : f32 to vector<2x8x8xf32>
    %744 = arith.mulf %742, %743 : vector<2x8x8xf32>
    %745 = arith.addf %744, %3 : vector<2x8x8xf32>
    %cst_350 = arith.constant dense<0xFF800000> : vector<2x8xf32>
    %746 = vector.multi_reduction <maximumf>, %745, %cst_350 [2] : vector<2x8x8xf32> to vector<2x8xf32>
    %747 = vector.shape_cast %746 : vector<2x8xf32> to vector<2x8x1xf32>
    %748 = vector.broadcast %747 : vector<2x8x1xf32> to vector<2x8x8xf32>
    %749 = arith.subf %745, %748 : vector<2x8x8xf32>
    %750 = math.exp %749 : vector<2x8x8xf32>
    %cst_351 = arith.constant dense<0.000000e+00> : vector<2x8xf32>
    %751 = vector.multi_reduction <add>, %750, %cst_351 [2] : vector<2x8x8xf32> to vector<2x8xf32>
    %752 = vector.shape_cast %751 : vector<2x8xf32> to vector<2x8x1xf32>
    %753 = tpu.reciprocal %752 {approx = true} : vector<2x8x1xf32> -> vector<2x8x1xf32>
    %754 = vector.broadcast %753 : vector<2x8x1xf32> to vector<2x8x8xf32>
    %755 = arith.mulf %750, %754 : vector<2x8x8xf32>
    %756 = vector.extract_strided_slice %685 {offsets = [0, 0, 24], sizes = [2, 8, 8], strides = [1, 1, 1]} : vector<2x8x32xf32> to vector<2x8x8xf32>
    "tpu.trace_start"() <{level = 10 : i32, message = "bqk,bkd->bqd"}> : () -> ()
    %cst_352 = arith.constant dense<0.000000e+00> : vector<2x8x8xf32>
    %757 = tpu.matmul %755, %756, %cst_352 {dimension_numbers = #tpu.dot_dimension_numbers<[2], [1], [1], [2], [0, 0, 0, 1, 1, 2], [0], [0]>} : vector<2x8x8xf32>, vector<2x8x8xf32>, vector<2x8x8xf32> -> vector<2x8x8xf32>
    "tpu.trace_stop"() : () -> ()
    %758 = tpu.concatenate %703, %721, %739, %757 in 2 : vector<2x8x8xf32>, vector<2x8x8xf32>, vector<2x8x8xf32>, vector<2x8x8xf32> -> vector<2x8x32xf32>
    %759 = vector.shape_cast %758 : vector<2x8x32xf32> to vector<16x32xf32>
    %760 = arith.truncf %759 : vector<16x32xf32> to vector<16x32xbf16>
    %cst_353 = arith.constant dense<0.000000e+00> : vector<16x32xf32>
    %761 = tpu.matmul %760, %641, %cst_353 {dimension_numbers = #tpu.dot_dimension_numbers<[1], [0], [0], [1], [0, 0, 1, 1], [], []>} : vector<16x32xbf16>, vector<32x32xbf16>, vector<16x32xf32> -> vector<16x32xf32>
    %762 = vector.broadcast %643 : vector<1x32xf32> to vector<16x32xf32>
    %763 = arith.addf %761, %762 : vector<16x32xf32>
    %764 = arith.addf %635, %763 : vector<16x32xf32>
    %cst_354 = arith.constant dense<0.000000e+00> : vector<16xf32>
    %765 = vector.multi_reduction <add>, %764, %cst_354 [1] : vector<16x32xf32> to vector<16xf32>
    %766 = vector.shape_cast %765 : vector<16xf32> to vector<16x1xf32>
    %cst_355 = arith.constant 3.200000e+01 : f32
    %767 = vector.broadcast %cst_355 : f32 to vector<16x1xf32>
    %768 = arith.divf %766, %767 : vector<16x1xf32>
    %769 = vector.broadcast %768 : vector<16x1xf32> to vector<16x32xf32>
    %770 = arith.subf %764, %769 : vector<16x32xf32>
    %771 = arith.mulf %770, %770 : vector<16x32xf32>
    %cst_356 = arith.constant dense<0.000000e+00> : vector<16xf32>
    %772 = vector.multi_reduction <add>, %771, %cst_356 [1] : vector<16x32xf32> to vector<16xf32>
    %773 = vector.shape_cast %772 : vector<16xf32> to vector<16x1xf32>
    %cst_357 = arith.constant 3.200000e+01 : f32
    %774 = vector.broadcast %cst_357 : f32 to vector<16x1xf32>
    %775 = arith.divf %773, %774 : vector<16x1xf32>
    %cst_358 = arith.constant 9.99999974E-6 : f32
    %776 = vector.broadcast %cst_358 : f32 to vector<16x1xf32>
    %777 = arith.addf %775, %776 : vector<16x1xf32>
    %778 = math.rsqrt %777 : vector<16x1xf32>
    %779 = vector.broadcast %778 : vector<16x1xf32> to vector<16x32xf32>
    %780 = arith.mulf %770, %779 : vector<16x32xf32>
    %781 = vector.broadcast %645 : vector<1x32xf32> to vector<16x32xf32>
    %782 = arith.mulf %780, %781 : vector<16x32xf32>
    %783 = vector.broadcast %647 : vector<1x32xf32> to vector<16x32xf32>
    %784 = arith.addf %782, %783 : vector<16x32xf32>
    %785 = arith.truncf %784 : vector<16x32xf32> to vector<16x32xbf16>
    %cst_359 = arith.constant dense<0.000000e+00> : vector<16x32xf32>
    %786 = tpu.matmul %785, %649, %cst_359 {dimension_numbers = #tpu.dot_dimension_numbers<[1], [0], [0], [1], [0, 0, 1, 1], [], []>} : vector<16x32xbf16>, vector<32x32xbf16>, vector<16x32xf32> -> vector<16x32xf32>
    %787 = vector.broadcast %651 : vector<1x32xf32> to vector<16x32xf32>
    %788 = arith.addf %786, %787 : vector<16x32xf32>
    %789 = arith.truncf %339 : vector<16x32xf32> to vector<16x32xbf16>
    %cst_360 = arith.constant dense<0.000000e+00> : vector<16x64xf32>
    %790 = tpu.matmul %789, %653, %cst_360 {dimension_numbers = #tpu.dot_dimension_numbers<[1], [0], [0], [1], [0, 0, 1, 1], [], []>} : vector<16x32xbf16>, vector<32x64xbf16>, vector<16x64xf32> -> vector<16x64xf32>
    %791 = vector.broadcast %655 : vector<1x64xf32> to vector<16x64xf32>
    %792 = arith.addf %790, %791 : vector<16x64xf32>
    %793 = vector.extract_strided_slice %792 {offsets = [0, 0], sizes = [16, 32], strides = [1, 1]} : vector<16x64xf32> to vector<16x32xf32>
    %794 = vector.extract_strided_slice %792 {offsets = [0, 32], sizes = [16, 32], strides = [1, 1]} : vector<16x64xf32> to vector<16x32xf32>
    %795 = vector.shape_cast %788 : vector<16x32xf32> to vector<2x8x32xf32>
    %796 = vector.shape_cast %793 : vector<16x32xf32> to vector<2x8x32xf32>
    %797 = vector.shape_cast %794 : vector<16x32xf32> to vector<2x8x32xf32>
    %798 = vector.extract_strided_slice %795 {offsets = [0, 0, 0], sizes = [2, 8, 8], strides = [1, 1, 1]} : vector<2x8x32xf32> to vector<2x8x8xf32>
    %799 = vector.extract_strided_slice %796 {offsets = [0, 0, 0], sizes = [2, 8, 8], strides = [1, 1, 1]} : vector<2x8x32xf32> to vector<2x8x8xf32>
    "tpu.trace_start"() <{level = 10 : i32, message = "bqd,bkd->bqk"}> : () -> ()
    %cst_361 = arith.constant dense<0.000000e+00> : vector<2x8x8xf32>
    %800 = tpu.matmul %798, %799, %cst_361 {dimension_numbers = #tpu.dot_dimension_numbers<[2], [2], [1], [1], [0, 0, 0, 1, 1, 1], [0], [0]>} : vector<2x8x8xf32>, vector<2x8x8xf32>, vector<2x8x8xf32> -> vector<2x8x8xf32>
    "tpu.trace_stop"() : () -> ()
    %cst_362 = arith.constant 0.353553385 : f32
    %801 = vector.broadcast %cst_362 : f32 to vector<2x8x8xf32>
    %802 = arith.mulf %800, %801 : vector<2x8x8xf32>
    %803 = vector.broadcast %2 : vector<2x1x8xf32> to vector<2x8x8xf32>
    %804 = arith.addf %802, %803 : vector<2x8x8xf32>
    %cst_363 = arith.constant dense<0xFF800000> : vector<2x8xf32>
    %805 = vector.multi_reduction <maximumf>, %804, %cst_363 [2] : vector<2x8x8xf32> to vector<2x8xf32>
    %806 = vector.shape_cast %805 : vector<2x8xf32> to vector<2x8x1xf32>
    %807 = vector.broadcast %806 : vector<2x8x1xf32> to vector<2x8x8xf32>
    %808 = arith.subf %804, %807 : vector<2x8x8xf32>
    %809 = math.exp %808 : vector<2x8x8xf32>
    %cst_364 = arith.constant dense<0.000000e+00> : vector<2x8xf32>
    %810 = vector.multi_reduction <add>, %809, %cst_364 [2] : vector<2x8x8xf32> to vector<2x8xf32>
    %811 = vector.shape_cast %810 : vector<2x8xf32> to vector<2x8x1xf32>
    %812 = tpu.reciprocal %811 {approx = true} : vector<2x8x1xf32> -> vector<2x8x1xf32>
    %813 = vector.broadcast %812 : vector<2x8x1xf32> to vector<2x8x8xf32>
    %814 = arith.mulf %809, %813 : vector<2x8x8xf32>
    %815 = vector.extract_strided_slice %797 {offsets = [0, 0, 0], sizes = [2, 8, 8], strides = [1, 1, 1]} : vector<2x8x32xf32> to vector<2x8x8xf32>
    "tpu.trace_start"() <{level = 10 : i32, message = "bqk,bkd->bqd"}> : () -> ()
    %cst_365 = arith.constant dense<0.000000e+00> : vector<2x8x8xf32>
    %816 = tpu.matmul %814, %815, %cst_365 {dimension_numbers = #tpu.dot_dimension_numbers<[2], [1], [1], [2], [0, 0, 0, 1, 1, 2], [0], [0]>} : vector<2x8x8xf32>, vector<2x8x8xf32>, vector<2x8x8xf32> -> vector<2x8x8xf32>
    "tpu.trace_stop"() : () -> ()
    %817 = vector.extract_strided_slice %795 {offsets = [0, 0, 8], sizes = [2, 8, 8], strides = [1, 1, 1]} : vector<2x8x32xf32> to vector<2x8x8xf32>
    %818 = vector.extract_strided_slice %796 {offsets = [0, 0, 8], sizes = [2, 8, 8], strides = [1, 1, 1]} : vector<2x8x32xf32> to vector<2x8x8xf32>
    "tpu.trace_start"() <{level = 10 : i32, message = "bqd,bkd->bqk"}> : () -> ()
    %cst_366 = arith.constant dense<0.000000e+00> : vector<2x8x8xf32>
    %819 = tpu.matmul %817, %818, %cst_366 {dimension_numbers = #tpu.dot_dimension_numbers<[2], [2], [1], [1], [0, 0, 0, 1, 1, 1], [0], [0]>} : vector<2x8x8xf32>, vector<2x8x8xf32>, vector<2x8x8xf32> -> vector<2x8x8xf32>
    "tpu.trace_stop"() : () -> ()
    %cst_367 = arith.constant 0.353553385 : f32
    %820 = vector.broadcast %cst_367 : f32 to vector<2x8x8xf32>
    %821 = arith.mulf %819, %820 : vector<2x8x8xf32>
    %822 = vector.broadcast %2 : vector<2x1x8xf32> to vector<2x8x8xf32>
    %823 = arith.addf %821, %822 : vector<2x8x8xf32>
    %cst_368 = arith.constant dense<0xFF800000> : vector<2x8xf32>
    %824 = vector.multi_reduction <maximumf>, %823, %cst_368 [2] : vector<2x8x8xf32> to vector<2x8xf32>
    %825 = vector.shape_cast %824 : vector<2x8xf32> to vector<2x8x1xf32>
    %826 = vector.broadcast %825 : vector<2x8x1xf32> to vector<2x8x8xf32>
    %827 = arith.subf %823, %826 : vector<2x8x8xf32>
    %828 = math.exp %827 : vector<2x8x8xf32>
    %cst_369 = arith.constant dense<0.000000e+00> : vector<2x8xf32>
    %829 = vector.multi_reduction <add>, %828, %cst_369 [2] : vector<2x8x8xf32> to vector<2x8xf32>
    %830 = vector.shape_cast %829 : vector<2x8xf32> to vector<2x8x1xf32>
    %831 = tpu.reciprocal %830 {approx = true} : vector<2x8x1xf32> -> vector<2x8x1xf32>
    %832 = vector.broadcast %831 : vector<2x8x1xf32> to vector<2x8x8xf32>
    %833 = arith.mulf %828, %832 : vector<2x8x8xf32>
    %834 = vector.extract_strided_slice %797 {offsets = [0, 0, 8], sizes = [2, 8, 8], strides = [1, 1, 1]} : vector<2x8x32xf32> to vector<2x8x8xf32>
    "tpu.trace_start"() <{level = 10 : i32, message = "bqk,bkd->bqd"}> : () -> ()
    %cst_370 = arith.constant dense<0.000000e+00> : vector<2x8x8xf32>
    %835 = tpu.matmul %833, %834, %cst_370 {dimension_numbers = #tpu.dot_dimension_numbers<[2], [1], [1], [2], [0, 0, 0, 1, 1, 2], [0], [0]>} : vector<2x8x8xf32>, vector<2x8x8xf32>, vector<2x8x8xf32> -> vector<2x8x8xf32>
    "tpu.trace_stop"() : () -> ()
    %836 = vector.extract_strided_slice %795 {offsets = [0, 0, 16], sizes = [2, 8, 8], strides = [1, 1, 1]} : vector<2x8x32xf32> to vector<2x8x8xf32>
    %837 = vector.extract_strided_slice %796 {offsets = [0, 0, 16], sizes = [2, 8, 8], strides = [1, 1, 1]} : vector<2x8x32xf32> to vector<2x8x8xf32>
    "tpu.trace_start"() <{level = 10 : i32, message = "bqd,bkd->bqk"}> : () -> ()
    %cst_371 = arith.constant dense<0.000000e+00> : vector<2x8x8xf32>
    %838 = tpu.matmul %836, %837, %cst_371 {dimension_numbers = #tpu.dot_dimension_numbers<[2], [2], [1], [1], [0, 0, 0, 1, 1, 1], [0], [0]>} : vector<2x8x8xf32>, vector<2x8x8xf32>, vector<2x8x8xf32> -> vector<2x8x8xf32>
    "tpu.trace_stop"() : () -> ()
    %cst_372 = arith.constant 0.353553385 : f32
    %839 = vector.broadcast %cst_372 : f32 to vector<2x8x8xf32>
    %840 = arith.mulf %838, %839 : vector<2x8x8xf32>
    %841 = vector.broadcast %2 : vector<2x1x8xf32> to vector<2x8x8xf32>
    %842 = arith.addf %840, %841 : vector<2x8x8xf32>
    %cst_373 = arith.constant dense<0xFF800000> : vector<2x8xf32>
    %843 = vector.multi_reduction <maximumf>, %842, %cst_373 [2] : vector<2x8x8xf32> to vector<2x8xf32>
    %844 = vector.shape_cast %843 : vector<2x8xf32> to vector<2x8x1xf32>
    %845 = vector.broadcast %844 : vector<2x8x1xf32> to vector<2x8x8xf32>
    %846 = arith.subf %842, %845 : vector<2x8x8xf32>
    %847 = math.exp %846 : vector<2x8x8xf32>
    %cst_374 = arith.constant dense<0.000000e+00> : vector<2x8xf32>
    %848 = vector.multi_reduction <add>, %847, %cst_374 [2] : vector<2x8x8xf32> to vector<2x8xf32>
    %849 = vector.shape_cast %848 : vector<2x8xf32> to vector<2x8x1xf32>
    %850 = tpu.reciprocal %849 {approx = true} : vector<2x8x1xf32> -> vector<2x8x1xf32>
    %851 = vector.broadcast %850 : vector<2x8x1xf32> to vector<2x8x8xf32>
    %852 = arith.mulf %847, %851 : vector<2x8x8xf32>
    %853 = vector.extract_strided_slice %797 {offsets = [0, 0, 16], sizes = [2, 8, 8], strides = [1, 1, 1]} : vector<2x8x32xf32> to vector<2x8x8xf32>
    "tpu.trace_start"() <{level = 10 : i32, message = "bqk,bkd->bqd"}> : () -> ()
    %cst_375 = arith.constant dense<0.000000e+00> : vector<2x8x8xf32>
    %854 = tpu.matmul %852, %853, %cst_375 {dimension_numbers = #tpu.dot_dimension_numbers<[2], [1], [1], [2], [0, 0, 0, 1, 1, 2], [0], [0]>} : vector<2x8x8xf32>, vector<2x8x8xf32>, vector<2x8x8xf32> -> vector<2x8x8xf32>
    "tpu.trace_stop"() : () -> ()
    %855 = vector.extract_strided_slice %795 {offsets = [0, 0, 24], sizes = [2, 8, 8], strides = [1, 1, 1]} : vector<2x8x32xf32> to vector<2x8x8xf32>
    %856 = vector.extract_strided_slice %796 {offsets = [0, 0, 24], sizes = [2, 8, 8], strides = [1, 1, 1]} : vector<2x8x32xf32> to vector<2x8x8xf32>
    "tpu.trace_start"() <{level = 10 : i32, message = "bqd,bkd->bqk"}> : () -> ()
    %cst_376 = arith.constant dense<0.000000e+00> : vector<2x8x8xf32>
    %857 = tpu.matmul %855, %856, %cst_376 {dimension_numbers = #tpu.dot_dimension_numbers<[2], [2], [1], [1], [0, 0, 0, 1, 1, 1], [0], [0]>} : vector<2x8x8xf32>, vector<2x8x8xf32>, vector<2x8x8xf32> -> vector<2x8x8xf32>
    "tpu.trace_stop"() : () -> ()
    %cst_377 = arith.constant 0.353553385 : f32
    %858 = vector.broadcast %cst_377 : f32 to vector<2x8x8xf32>
    %859 = arith.mulf %857, %858 : vector<2x8x8xf32>
    %860 = vector.broadcast %2 : vector<2x1x8xf32> to vector<2x8x8xf32>
    %861 = arith.addf %859, %860 : vector<2x8x8xf32>
    %cst_378 = arith.constant dense<0xFF800000> : vector<2x8xf32>
    %862 = vector.multi_reduction <maximumf>, %861, %cst_378 [2] : vector<2x8x8xf32> to vector<2x8xf32>
    %863 = vector.shape_cast %862 : vector<2x8xf32> to vector<2x8x1xf32>
    %864 = vector.broadcast %863 : vector<2x8x1xf32> to vector<2x8x8xf32>
    %865 = arith.subf %861, %864 : vector<2x8x8xf32>
    %866 = math.exp %865 : vector<2x8x8xf32>
    %cst_379 = arith.constant dense<0.000000e+00> : vector<2x8xf32>
    %867 = vector.multi_reduction <add>, %866, %cst_379 [2] : vector<2x8x8xf32> to vector<2x8xf32>
    %868 = vector.shape_cast %867 : vector<2x8xf32> to vector<2x8x1xf32>
    %869 = tpu.reciprocal %868 {approx = true} : vector<2x8x1xf32> -> vector<2x8x1xf32>
    %870 = vector.broadcast %869 : vector<2x8x1xf32> to vector<2x8x8xf32>
    %871 = arith.mulf %866, %870 : vector<2x8x8xf32>
    %872 = vector.extract_strided_slice %797 {offsets = [0, 0, 24], sizes = [2, 8, 8], strides = [1, 1, 1]} : vector<2x8x32xf32> to vector<2x8x8xf32>
    "tpu.trace_start"() <{level = 10 : i32, message = "bqk,bkd->bqd"}> : () -> ()
    %cst_380 = arith.constant dense<0.000000e+00> : vector<2x8x8xf32>
    %873 = tpu.matmul %871, %872, %cst_380 {dimension_numbers = #tpu.dot_dimension_numbers<[2], [1], [1], [2], [0, 0, 0, 1, 1, 2], [0], [0]>} : vector<2x8x8xf32>, vector<2x8x8xf32>, vector<2x8x8xf32> -> vector<2x8x8xf32>
    "tpu.trace_stop"() : () -> ()
    %874 = tpu.concatenate %816, %835, %854, %873 in 2 : vector<2x8x8xf32>, vector<2x8x8xf32>, vector<2x8x8xf32>, vector<2x8x8xf32> -> vector<2x8x32xf32>
    %875 = vector.shape_cast %874 : vector<2x8x32xf32> to vector<16x32xf32>
    %876 = arith.truncf %875 : vector<16x32xf32> to vector<16x32xbf16>
    %cst_381 = arith.constant dense<0.000000e+00> : vector<16x32xf32>
    %877 = tpu.matmul %876, %657, %cst_381 {dimension_numbers = #tpu.dot_dimension_numbers<[1], [0], [0], [1], [0, 0, 1, 1], [], []>} : vector<16x32xbf16>, vector<32x32xbf16>, vector<16x32xf32> -> vector<16x32xf32>
    %878 = vector.broadcast %659 : vector<1x32xf32> to vector<16x32xf32>
    %879 = arith.addf %877, %878 : vector<16x32xf32>
    %880 = arith.addf %784, %879 : vector<16x32xf32>
    %cst_382 = arith.constant dense<0.000000e+00> : vector<16xf32>
    %881 = vector.multi_reduction <add>, %880, %cst_382 [1] : vector<16x32xf32> to vector<16xf32>
    %882 = vector.shape_cast %881 : vector<16xf32> to vector<16x1xf32>
    %cst_383 = arith.constant 3.200000e+01 : f32
    %883 = vector.broadcast %cst_383 : f32 to vector<16x1xf32>
    %884 = arith.divf %882, %883 : vector<16x1xf32>
    %885 = vector.broadcast %884 : vector<16x1xf32> to vector<16x32xf32>
    %886 = arith.subf %880, %885 : vector<16x32xf32>
    %887 = arith.mulf %886, %886 : vector<16x32xf32>
    %cst_384 = arith.constant dense<0.000000e+00> : vector<16xf32>
    %888 = vector.multi_reduction <add>, %887, %cst_384 [1] : vector<16x32xf32> to vector<16xf32>
    %889 = vector.shape_cast %888 : vector<16xf32> to vector<16x1xf32>
    %cst_385 = arith.constant 3.200000e+01 : f32
    %890 = vector.broadcast %cst_385 : f32 to vector<16x1xf32>
    %891 = arith.divf %889, %890 : vector<16x1xf32>
    %cst_386 = arith.constant 9.99999974E-6 : f32
    %892 = vector.broadcast %cst_386 : f32 to vector<16x1xf32>
    %893 = arith.addf %891, %892 : vector<16x1xf32>
    %894 = math.rsqrt %893 : vector<16x1xf32>
    %895 = vector.broadcast %894 : vector<16x1xf32> to vector<16x32xf32>
    %896 = arith.mulf %886, %895 : vector<16x32xf32>
    %897 = vector.broadcast %661 : vector<1x32xf32> to vector<16x32xf32>
    %898 = arith.mulf %896, %897 : vector<16x32xf32>
    %899 = vector.broadcast %663 : vector<1x32xf32> to vector<16x32xf32>
    %900 = arith.addf %898, %899 : vector<16x32xf32>
    %901 = arith.truncf %900 : vector<16x32xf32> to vector<16x32xbf16>
    %cst_387 = arith.constant dense<0.000000e+00> : vector<16x64xf32>
    %902 = tpu.matmul %901, %665, %cst_387 {dimension_numbers = #tpu.dot_dimension_numbers<[1], [0], [0], [1], [0, 0, 1, 1], [], []>} : vector<16x32xbf16>, vector<32x64xbf16>, vector<16x64xf32> -> vector<16x64xf32>
    %903 = vector.broadcast %667 : vector<1x64xf32> to vector<16x64xf32>
    %904 = arith.addf %902, %903 : vector<16x64xf32>
    %cst_388 = arith.constant 0.000000e+00 : f32
    %905 = vector.broadcast %cst_388 : f32 to vector<16x64xf32>
    %906 = arith.maximumf %904, %905 : vector<16x64xf32>
    %907 = arith.truncf %906 : vector<16x64xf32> to vector<16x64xbf16>
    %cst_389 = arith.constant dense<0.000000e+00> : vector<16x32xf32>
    %908 = tpu.matmul %907, %669, %cst_389 {dimension_numbers = #tpu.dot_dimension_numbers<[1], [0], [0], [1], [0, 0, 1, 1], [], []>} : vector<16x64xbf16>, vector<64x32xbf16>, vector<16x32xf32> -> vector<16x32xf32>
    %909 = vector.broadcast %671 : vector<1x32xf32> to vector<16x32xf32>
    %910 = arith.addf %908, %909 : vector<16x32xf32>
    %911 = arith.addf %900, %910 : vector<16x32xf32>
    %cst_390 = arith.constant dense<0.000000e+00> : vector<16xf32>
    %912 = vector.multi_reduction <add>, %911, %cst_390 [1] : vector<16x32xf32> to vector<16xf32>
    %913 = vector.shape_cast %912 : vector<16xf32> to vector<16x1xf32>
    %cst_391 = arith.constant 3.200000e+01 : f32
    %914 = vector.broadcast %cst_391 : f32 to vector<16x1xf32>
    %915 = arith.divf %913, %914 : vector<16x1xf32>
    %916 = vector.broadcast %915 : vector<16x1xf32> to vector<16x32xf32>
    %917 = arith.subf %911, %916 : vector<16x32xf32>
    %918 = arith.mulf %917, %917 : vector<16x32xf32>
    %cst_392 = arith.constant dense<0.000000e+00> : vector<16xf32>
    %919 = vector.multi_reduction <add>, %918, %cst_392 [1] : vector<16x32xf32> to vector<16xf32>
    %920 = vector.shape_cast %919 : vector<16xf32> to vector<16x1xf32>
    %cst_393 = arith.constant 3.200000e+01 : f32
    %921 = vector.broadcast %cst_393 : f32 to vector<16x1xf32>
    %922 = arith.divf %920, %921 : vector<16x1xf32>
    %cst_394 = arith.constant 9.99999974E-6 : f32
    %923 = vector.broadcast %cst_394 : f32 to vector<16x1xf32>
    %924 = arith.addf %922, %923 : vector<16x1xf32>
    %925 = math.rsqrt %924 : vector<16x1xf32>
    %926 = vector.broadcast %925 : vector<16x1xf32> to vector<16x32xf32>
    %927 = arith.mulf %917, %926 : vector<16x32xf32>
    %928 = vector.broadcast %673 : vector<1x32xf32> to vector<16x32xf32>
    %929 = arith.mulf %927, %928 : vector<16x32xf32>
    %930 = vector.broadcast %675 : vector<1x32xf32> to vector<16x32xf32>
    %931 = arith.addf %929, %930 : vector<16x32xf32>
    %932 = arith.truncf %931 : vector<16x32xf32> to vector<16x32xbf16>
    %c0_395 = arith.constant 0 : index
    %c0_396 = arith.constant 0 : index
    %933 = vector.load %arg36[%c0_395, %c0_396] : memref<32x128xbf16, #tpu.memory_space<vmem>>, vector<32x128xbf16>
    %cst_397 = arith.constant dense<0.000000e+00> : vector<16x128xf32>
    %934 = tpu.matmul %932, %933, %cst_397 {dimension_numbers = #tpu.dot_dimension_numbers<[1], [0], [0], [1], [0, 0, 1, 1], [], []>} : vector<16x32xbf16>, vector<32x128xbf16>, vector<16x128xf32> -> vector<16x128xf32>
    %c0_398 = arith.constant 0 : index
    %c0_399 = arith.constant 0 : index
    %935 = vector.load %arg37[%c0_398, %c0_399] : memref<1x128xf32, #tpu.memory_space<vmem>>, vector<1x128xf32>
    %936 = vector.broadcast %935 : vector<1x128xf32> to vector<16x128xf32>
    %937 = arith.addf %934, %936 : vector<16x128xf32>
    %cst_400 = arith.constant dense<0xFF800000> : vector<16xf32>
    %938 = vector.multi_reduction <maximumf>, %937, %cst_400 [1] : vector<16x128xf32> to vector<16xf32>
    %939 = vector.shape_cast %938 : vector<16xf32> to vector<16x1xf32>
    %940 = vector.broadcast %939 : vector<16x1xf32> to vector<16x128xf32>
    %941 = arith.subf %937, %940 : vector<16x128xf32>
    %942 = math.exp %941 : vector<16x128xf32>
    %cst_401 = arith.constant dense<0.000000e+00> : vector<16xf32>
    %943 = vector.multi_reduction <add>, %942, %cst_401 [1] : vector<16x128xf32> to vector<16xf32>
    %944 = vector.shape_cast %943 : vector<16xf32> to vector<16x1xf32>
    %945 = math.log %944 : vector<16x1xf32>
    %946 = arith.addf %945, %939 : vector<16x1xf32>
    %947 = vector.broadcast %946 : vector<16x1xf32> to vector<16x128xf32>
    %948 = arith.subf %937, %947 : vector<16x128xf32>
    %c0_402 = arith.constant 0 : index
    %c0_403 = arith.constant 0 : index
    %949 = vector.load %arg38[%c0_402, %c0_403] : memref<16x128xf32, #tpu.memory_space<vmem>>, vector<16x128xf32>
    tpu.vector_store %arg38[%c0_402, %c0_403], %948 {strides = array<i32>} : memref<16x128xf32, #tpu.memory_space<vmem>>, vector<16x128xf32>,
    return
  }
}

</mosaic_0001>

<bundles_post_ra>
// kernel: transformer_forward.1
= control target key start
LH: loop header
LB: loop body
LE: loop exit
PB: predicated region body
PF: predicated region fallthrough
CT: control target
= control target key end

     0   :  { %v12286_v0 = vmov 0.0   ;;  %s12287_s3 = smov 4   ;;  %vm12288_vm0 = vmmov 0   ;;  %vm214_vm1 = vcmask 261120   ;;  %s12289_s10 = smov 5   ;;  %vm262_vm2 = vcmask 64512   ;;  %s13921_s0 = inlined_call_operand.smem [shape: u32[39], index: -1, kind: input, shape index: {}] }
   0x1   :  { %11163 = vmatprep.subr.bf16.mxu0 %v12286_v0  ;;  %s12346_s6 = sld [smem:[%s13921_s0 + %s12287_s3]]   ;;  %11167 = vmatprep.mubr.msk.bf16.mxu0 %vm12288_vm0, %v12286_v0  ;;  %s13948_s14 = smov 96   ;;  %vm1632_vm3 = vcmask 130048   ;;  %vm1635_vm4 = vcmask 195584   ;;  %vm1842_vm5 = vcmask 523264  }
   0x2   :  { %s1_s9 = sld [smem:[%s13921_s0]]   ;;  %11171 = vmatprep.subr.mxu1 %v12286_v0  ;;  %11173 = vmatprep.mubr.msk.f32.mxu1 %vm12288_vm0, %v12286_v0  ;;  %s12291_s15 = smov 2  }
   0x3   :  { %s12372_s13 = sld [smem:[%s13921_s0 + %s12289_s10]]   ;;  %s13946_s19 = smov 64  }
   0x4   :  { %s12398_s18 = sld [smem:[%s13921_s0 + %s12291_s15]]   ;;  %s13944_s20 = smov 88  }
   0x5   :  { %s13942_s21 = smov 120   ;;  %s13940_s22 = smov 56  }
   0x6   :  { %s13938_s23 = smov 80   ;;  %s13936_s24 = smov 112  }
   0x7   :  { %v11984_v1 = vld [vmem:[%s12346_s6] sm:$0xff]   ;;  %v11985_v2 = vld [vmem:[%s12346_s6 + $0x8] sm:$0xff]   ;;  %s13934_s25 = smov 48   ;;  %s13932_s26 = smov 72  }
   0x8   :  { %11164 = vmatpush3.bf16.msra.mxu0 %v11984_v1  ;;  %v12358_v3 = vld [vmem:[%s1_s9] sm:$0xff]  ;;  %v12360_v4 = vld [vmem:[%s1_s9 + $0x8] sm:$0xff]  ;;  %s13930_s27 = smov 104   ;;  %s13924_s28 = smov 16  }
   0x9   :  { %11165 = vmatprep.subr.bf16.mxu0 %v12286_v0  ;;  %v195_v5 = vpack.c.bf16 %v12360_v4, %v12358_v3  ;;  %v10555_v6 = vld [vmem:[%s12372_s13] ss:$0 sm:$0xff]  ;;  %s12528_s1 = sld [smem:[%s13921_s0 + %s13924_s28]]   ;;  %s13928_s2 = smov 40  }
   0xa   :  { %v12401_v16 = vld [vmem:[%s12398_s18] ss:$0 sm:$0xff]  ;;  %v12405_v21 = vld [vmem:[%s12398_s18 + $0x1] ss:$0 sm:$0xff]  ;;  %s13926_s3 = smov 8   ;;  %s13922_s4 = smov 24  }
   0xb   :  { %s12557_s8 = sld [smem:[%s13921_s0 + %s13922_s4]]   ;;  %s12305_s9 = smov 6  }
   0xc   :  { %11166 = vmatpush3.bf16.msra.mxu0 %v11985_v2  ;;  %s12562_s12 = sld [smem:[%s13921_s0 + %s12305_s9]]   ;;  %s12306_s15 = smov 7  }
   0xd   :  { %11186 = vmatprep.subr.mxu0 %v12286_v0  ;;  %s12583_s29 = sld [smem:[%s13921_s0 + %s12306_s15]]   ;;  %s12307_s30 = smov 10  }
   0xe   :  { %s12595_s9 = sld [smem:[%s13921_s0 + %s12307_s30]]   ;;  %s12308_s10 = smov 12  }
   0xf   :  { %11168 = vmatmul.mubr.msk.bf16.vlgmr.msra.gmra.mrb[0].mxu0 %vm214_vm1, %v195_v5  ;;  %s12604_s16 = sld [smem:[%s13921_s0 + %s12308_s10]]   ;;  %s12309_s7 = smov 9  }
  0x10   :  { %11188 = vmatprep.mubr.msk.f32.mxu0 %vm12288_vm0, %v12286_v0  ;;  %s12614_s5 = sld [smem:[%s13921_s0 + %s13926_s3]]   ;;  %s12310_s17 = smov 11  }
  0x11   :  { %s12619_s15 = sld [smem:[%s13921_s0 + %s12309_s7]]   ;;  %s12311_s11 = smov 13  }
  0x12   :  { %s12633_s10 = sld [smem:[%s13921_s0 + %s12310_s17]]  }
  0x13   :  { %s12642_s7 = sld [smem:[%s13921_s0 + %s12311_s11]]   ;;  %s12312_s11 = smov 14  }
  0xe2   :  { %v252_v7 = vpop.f32.mrb[0].mxu0 }
  0xe3   :  { %v12375_v8 = vadd.f32 %v10555_v6, %v252_v7  ;;  %v11169_v9 = vpop.f32.mrb[1].mxu0 }
  0xe4   :  { %v255_v10 = vpop.f32.mrb[2].mxu0 }
  0xe5   :  { %260 = vrot.lane.b32.xlu0 %v12375_v8, %s13948_s14  ;;  %v11170_v11 = vpop.f32.mrb[3].mxu0  ;;  %v12379_v12 = vadd.f32 %v10555_v6, %v255_v10 }
  0xe9   :  { %338 = vrot.lane.b32.xlu0 %v12379_v12, %s13948_s14 }
 0x157   :  { %v261_v13 = vpop.permute.xlu0 %260 }
 0x158   :  { %11172 = vmatpush3.xpose.msk.msra.mxu1 %vm262_vm2, %v261_v13 }
 0x159   :  { %11176 = vmatprep.subr.mxu1 %v12286_v0 }
 0x15b   :  { %11174 = vmatmul.mubr.msk.f32.vlgmr.msra.gmra.mrb[0].mxu1 %vm262_vm2, %v12375_v8  ;;  %v339_v14 = vpop.permute.xlu0 %338 }
 0x15c   :  { %11177 = vmatpush3.xpose.msk.msra.mxu1 %vm262_vm2, %v339_v14  ;;  %11178 = vmatprep.mubr.msk.f32.mxu1 %vm12288_vm0, %v12286_v0 }
 0x15d   :  { %11181 = vmatprep.subr.mxu1 %v12286_v0 }
 0x15f   :  { %11179 = vmatmul.mubr.msk.f32.vlgmr.msra.gmra.mrb[2].mxu1 %vm262_vm2, %v12379_v12 }
 0x160   :  { %11183 = vmatprep.mubr.msk.f32.mxu1 %vm12288_vm0, %v12286_v0 }
 0x22e   :  { %v333_v15 = vpop.f32.mrb[0].mxu1 }
 0x22f   :  { %v414_v17 = vmul.f32 0.35355338, %v333_v15  ;;  %v11175_v18 = vpop.f32.mrb[1].mxu1 }
 0x231   :  { %v428_v19 = vadd.f32 %v12401_v16, %v414_v17 }
 0x232   :  { %v410_v20 = vpop.f32.mrb[2].mxu1 }
 0x233   :  { %v415_v22 = vmul.f32 0.35355338, %v410_v20  ;;  %v11180_v23 = vpop.f32.mrb[3].mxu1  ;;  %v430_v24 = vsel %vm262_vm2, %v428_v19, -inf }
 0x234   :  { %431 = vmax.xlane.f32.xlu1 %v430_v24 }
 0x235   :  { %v429_v25 = vadd.f32 %v12405_v21, %v415_v22 }
 0x237   :  { %v433_v26 = vsel %vm262_vm2, %v429_v25, -inf }
 0x238   :  { %434 = vmax.xlane.f32.xlu1 %v433_v26 }
 0x249   :  { %452 = vrot.lane.b32.xlu1 %v12375_v8, %s13946_s19 }
 0x24d   :  { %528 = vrot.lane.b32.xlu1 %v12379_v12, %s13946_s19 }
 0x251   :  { %606 = vrot.lane.b32.xlu1 %v12375_v8, %s13944_s20 }
 0x255   :  { %684 = vrot.lane.b32.xlu1 %v12379_v12, %s13944_s20 }
 0x2c1   :  { %v432_v27 = vpop.xlane.xlu1 %431 }
 0x2c2   :  { %v436_v28 = vsub.f32 %v428_v19, %v432_v27 }
 0x2c4   :  { %v438_v29 = vmul.f32 1.442695, %v436_v28 }
 0x2c5   :  { %v435_v30 = vpop.xlane.xlu1 %434 }
 0x2c6   :  { %12038 = vpow2.f32 %v438_v29  ;;  %v437_v31 = vsub.f32 %v429_v25, %v435_v30 }
 0x2c8   :  { %v440_v32 = vmul.f32 1.442695, %v437_v31 }
 0x2c9   :  { %v453_v33 = vpop.permute.xlu1 %452 }
 0x2ca   :  { %12040 = vpow2.f32 %v440_v32  ;;  %11182 = vmatpush3.msra.mxu1 %v453_v33 }
 0x2cb   :  { %11191 = vmatprep.subr.mxu1 %v12286_v0 }
 0x2cd   :  { %v529_v34 = vpop.permute.xlu1 %528 }
 0x2ce   :  { %11187 = vmatpush3.msra.mxu0 %v529_v34 }
 0x2cf   :  { %11196 = vmatprep.subr.mxu0 %v12286_v0 }
 0x2d0   :  { %v12039_v35 = vpop.eup %12038 }
 0x2d1   :  { %v442_v36 = vsel %vm262_vm2, %v12039_v35, 0.0  ;;  %v607_v39 = vpop.permute.xlu1 %606 }
 0x2d2   :  { %443 = vadd.xlane.f32.xlu0 %v442_v36 }
 0x2d4   :  { %v12041_v37 = vpop.eup %12040 }
 0x2d5   :  { %v445_v38 = vsel %vm262_vm2, %v12041_v37, 0.0  ;;  %v685_v40 = vpop.permute.xlu1 %684 }
 0x2d6   :  { %446 = vadd.xlane.f32.xlu1 %v445_v38 }
 0x2e7   :  { %682 = vrot.lane.b32.xlu1 %v12379_v12, %s13942_s21 }
 0x2e8   :  { %604 = vrot.lane.b32.xlu0 %v12375_v8, %s13942_s21 }
 0x35f   :  { %v444_v41 = vpop.xlane.xlu0 %443 }
 0x360   :  { %12042 = vrcp.f32 %v444_v41 }
 0x363   :  { %v447_v42 = vpop.xlane.xlu1 %446  ;;  %v605_v47 = vpop.permute.xlu0 %604 }
 0x364   :  { %12044 = vrcp.f32 %v447_v42 }
 0x367   :  { %v683_v48 = vpop.permute.xlu1 %682 }
 0x36a   :  { %v12043_v43 = vpop.eup %12042 }
 0x36b   :  { %v450_v44 = vmul.f32 %v12043_v43, %v12039_v35 }
 0x36d   :  { %11184 = vmatmul.mubr.msk.f32.vlgmr.msra.gmra.mrb[4].mxu1 %vm262_vm2, %v450_v44 }
 0x36e   :  { %v12045_v45 = vpop.eup %12044  ;;  %11192 = vmatpush3.xpose.msk.msra.mxu1 %vm262_vm2, %v607_v39  ;;  %11193 = vmatprep.mubr.msk.f32.mxu1 %vm12288_vm0, %v12286_v0 }
 0x36f   :  { %v451_v46 = vmul.f32 %v12045_v45, %v12041_v37  ;;  %11201 = vmatprep.subr.mxu1 %v12286_v0 }
 0x371   :  { %11189 = vmatmul.mubr.msk.f32.vlgmr.msra.gmra.mrb[4].mxu0 %vm262_vm2, %v451_v46  ;;  %11194 = vmatmul.mubr.msk.f32.vlgmr.msra.gmra.mrb[6].mxu1 %vm262_vm2, %v605_v47 }
 0x372   :  { %11197 = vmatpush3.xpose.msk.msra.mxu0 %vm262_vm2, %v685_v40  ;;  %11198 = vmatprep.mubr.msk.f32.mxu0 %vm12288_vm0, %v12286_v0 }
 0x373   :  { %11206 = vmatprep.subr.mxu0 %v12286_v0  ;;  %11203 = vmatprep.mubr.msk.f32.mxu1 %vm12288_vm0, %v12286_v0 }
 0x375   :  { %11199 = vmatmul.mubr.msk.f32.vlgmr.msra.gmra.mrb[6].mxu0 %vm262_vm2, %v683_v48 }
 0x376   :  { %11208 = vmatprep.mubr.msk.f32.mxu0 %vm12288_vm0, %v12286_v0 }
 0x440   :  { %v12442_v49 = vpop.f32.mrb[4].mxu1 }
 0x441   :  { %v11185_v50 = vpop.f32.mrb[5].mxu1 }
 0x444   :  { %v12444_v51 = vpop.f32.mrb[4].mxu0  ;;  %v678_v52 = vpop.f32.mrb[6].mxu1 }
 0x445   :  { %v760_v53 = vmul.f32 0.35355338, %v678_v52  ;;  %v11190_v54 = vpop.f32.mrb[5].mxu0  ;;  %v11195_v55 = vpop.f32.mrb[7].mxu1 }
 0x447   :  { %v762_v56 = vadd.f32 %v12401_v16, %v760_v53 }
 0x448   :  { %v756_v57 = vpop.f32.mrb[6].mxu0 }
 0x449   :  { %v761_v58 = vmul.f32 0.35355338, %v756_v57  ;;  %v11200_v59 = vpop.f32.mrb[7].mxu0  ;;  %v764_v60 = vsel %vm262_vm2, %v762_v56, -inf }
 0x44a   :  { %765 = vmax.xlane.f32.xlu1 %v764_v60 }
 0x44b   :  { %v763_v61 = vadd.f32 %v12405_v21, %v761_v58 }
 0x44d   :  { %v767_v62 = vsel %vm262_vm2, %v763_v61, -inf }
 0x44e   :  { %768 = vmax.xlane.f32.xlu0 %v767_v62 }
 0x45b   :  { %786 = vrot.lane.b32.xlu1 %v12375_v8, %s13940_s22 }
 0x45f   :  { %940 = vrot.lane.b32.xlu1 %v12375_v8, %s13938_s23 }
 0x463   :  { %1018 = vrot.lane.b32.xlu1 %v12379_v12, %s13938_s23 }
 0x464   :  { %862 = vrot.lane.b32.xlu0 %v12379_v12, %s13940_s22 }
 0x468   :  { %938 = vrot.lane.b32.xlu0 %v12375_v8, %s13936_s24 }
 0x4d7   :  { %v766_v63 = vpop.xlane.xlu1 %765 }
 0x4d8   :  { %v770_v1 = vsub.f32 %v762_v56, %v766_v63 }
 0x4da   :  { %v772_v2 = vmul.f32 1.442695, %v770_v1 }
 0x4db   :  { %v787_v5 = vpop.permute.xlu1 %786  ;;  %v769_v6 = vpop.xlane.xlu0 %768 }
 0x4dc   :  { %12046 = vpow2.f32 %v772_v2  ;;  %v771_v7 = vsub.f32 %v763_v61, %v769_v6  ;;  %11202 = vmatpush3.msra.mxu1 %v787_v5 }
 0x4dd   :  { %11211 = vmatprep.subr.mxu1 %v12286_v0 }
 0x4de   :  { %v774_v9 = vmul.f32 1.442695, %v771_v7 }
 0x4df   :  { %v863_v10 = vpop.permute.xlu0 %862  ;;  %v941_v17 = vpop.permute.xlu1 %940 }
 0x4e0   :  { %12048 = vpow2.f32 %v774_v9  ;;  %11207 = vmatpush3.msra.mxu0 %v863_v10 }
 0x4e1   :  { %11216 = vmatprep.subr.mxu0 %v12286_v0 }
 0x4e3   :  { %v1019_v18 = vpop.permute.xlu1 %1018  ;;  %v939_v26 = vpop.permute.xlu0 %938 }
 0x4e6   :  { %v12047_v11 = vpop.eup %12046 }
 0x4e7   :  { %v776_v13 = vsel %vm262_vm2, %v12047_v11, 0.0 }
 0x4e8   :  { %777 = vadd.xlane.f32.xlu1 %v776_v13 }
 0x4ea   :  { %v12049_v14 = vpop.eup %12048 }
 0x4eb   :  { %v779_v15 = vsel %vm262_vm2, %v12049_v14, 0.0 }
 0x4ec   :  { %780 = vadd.xlane.f32.xlu1 %v779_v15 }
 0x4fd   :  { %1016 = vrot.lane.b32.xlu1 %v12379_v12, %s13936_s24 }
 0x575   :  { %v778_v19 = vpop.xlane.xlu1 %777 }
 0x576   :  { %12050 = vrcp.f32 %v778_v19 }
 0x579   :  { %v781_v20 = vpop.xlane.xlu1 %780 }
 0x57a   :  { %12052 = vrcp.f32 %v781_v20 }
 0x57d   :  { %v1017_v27 = vpop.permute.xlu1 %1016 }
 0x580   :  { %v12051_v22 = vpop.eup %12050 }
 0x581   :  { %v784_v23 = vmul.f32 %v12051_v22, %v12047_v11 }
 0x583   :  { %11204 = vmatmul.mubr.msk.f32.vlgmr.msra.gmra.mrb[8].mxu1 %vm262_vm2, %v784_v23 }
 0x584   :  { %v12053_v24 = vpop.eup %12052  ;;  %11212 = vmatpush3.xpose.msk.msra.mxu1 %vm262_vm2, %v941_v17  ;;  %11213 = vmatprep.mubr.msk.f32.mxu1 %vm12288_vm0, %v12286_v0 }
 0x585   :  { %v785_v25 = vmul.f32 %v12053_v24, %v12049_v14  ;;  %11221 = vmatprep.subr.mxu1 %v12286_v0 }
 0x587   :  { %11209 = vmatmul.mubr.msk.f32.vlgmr.msra.gmra.mrb[8].mxu0 %vm262_vm2, %v785_v25  ;;  %11214 = vmatmul.mubr.msk.f32.vlgmr.msra.gmra.mrb[10].mxu1 %vm262_vm2, %v939_v26 }
 0x588   :  { %11217 = vmatpush3.xpose.msk.msra.mxu0 %vm262_vm2, %v1019_v18  ;;  %11218 = vmatprep.mubr.msk.f32.mxu0 %vm12288_vm0, %v12286_v0 }
 0x589   :  { %11226 = vmatprep.subr.mxu0 %v12286_v0  ;;  %11223 = vmatprep.mubr.msk.f32.mxu1 %vm12288_vm0, %v12286_v0 }
 0x58b   :  { %11219 = vmatmul.mubr.msk.f32.vlgmr.msra.gmra.mrb[10].mxu0 %vm262_vm2, %v1017_v27 }
 0x58c   :  { %11228 = vmatprep.mubr.msk.f32.mxu0 %vm12288_vm0, %v12286_v0 }
 0x656   :  { %v12482_v28 = vpop.f32.mrb[8].mxu1 }
 0x657   :  { %v11205_v29 = vpop.f32.mrb[9].mxu1 }
 0x65a   :  { %v12484_v30 = vpop.f32.mrb[8].mxu0  ;;  %v1012_v31 = vpop.f32.mrb[10].mxu1 }
 0x65b   :  { %v11894_v32 = vpack.i.bf16 %v12484_v30, %v12482_v28  ;;  %v1094_v33 = vmul.f32 0.35355338, %v1012_v31  ;;  %v11210_v34 = vpop.f32.mrb[9].mxu0  ;;  %v11215_v35 = vpop.f32.mrb[11].mxu1 }
 0x65d   :  { %v1096_v36 = vadd.f32 %v12401_v16, %v1094_v33 }
 0x65e   :  { %v1090_v37 = vpop.f32.mrb[10].mxu0 }
 0x65f   :  { %v1095_v38 = vmul.f32 0.35355338, %v1090_v37  ;;  %v11220_v39 = vpop.f32.mrb[11].mxu0  ;;  %v1098_v40 = vsel %vm262_vm2, %v1096_v36, -inf }
 0x660   :  { %1099 = vmax.xlane.f32.xlu0 %v1098_v40  ;;  %v11987_v40 = vld [vmem:[%s12562_s12 + $0x8] sm:$0xff]  }
 0x661   :  { %v1097_v41 = vadd.f32 %v12405_v21, %v1095_v38 }
 0x663   :  { %v1101_v42 = vsel %vm262_vm2, %v1097_v41, -inf }
 0x664   :  { %1102 = vmax.xlane.f32.xlu1 %v1101_v42 }
 0x675   :  { %1120 = vrot.lane.b32.xlu1 %v12375_v8, %s13934_s25 }
 0x676   :  { %1196 = vrot.lane.b32.xlu0 %v12379_v12, %s13934_s25 }
 0x679   :  { %1274 = vrot.lane.b32.xlu1 %v12375_v8, %s13932_s26 }
 0x67d   :  { %1352 = vrot.lane.b32.xlu1 %v12379_v12, %s13932_s26 }
 0x681   :  { %1350 = vrot.lane.b32.xlu1 %v12379_v12, %s13930_s27 }
 0x6ed   :  { %v1100_v43 = vpop.xlane.xlu0 %1099 }
 0x6ee   :  { %v1104_v44 = vsub.f32 %v1096_v36, %v1100_v43 }
 0x6f0   :  { %v1106_v45 = vmul.f32 1.442695, %v1104_v44 }
 0x6f1   :  { %v1197_v46 = vpop.permute.xlu0 %1196  ;;  %v1103_v47 = vpop.xlane.xlu1 %1102 }
 0x6f2   :  { %12054 = vpow2.f32 %v1106_v45  ;;  %v1105_v48 = vsub.f32 %v1097_v41, %v1103_v47  ;;  %11227 = vmatpush3.msra.mxu0 %v1197_v46 }
 0x6f3   :  { %11236 = vmatprep.subr.mxu0 %v12286_v0 }
 0x6f4   :  { %v1108_v50 = vmul.f32 1.442695, %v1105_v48 }
 0x6f5   :  { %v1121_v52 = vpop.permute.xlu1 %1120 }
 0x6f6   :  { %12056 = vpow2.f32 %v1108_v50  ;;  %11222 = vmatpush3.msra.mxu1 %v1121_v52 }
 0x6f7   :  { %11231 = vmatprep.subr.mxu1 %v12286_v0 }
 0x6f9   :  { %v1275_v59 = vpop.permute.xlu1 %1274 }
 0x6fc   :  { %v12055_v53 = vpop.eup %12054 }
 0x6fd   :  { %v1110_v54 = vsel %vm262_vm2, %v12055_v53, 0.0  ;;  %v1353_v63 = vpop.permute.xlu1 %1352 }
 0x6fe   :  { %1111 = vadd.xlane.f32.xlu0 %v1110_v54 }
 0x700   :  { %v12057_v55 = vpop.eup %12056 }
 0x701   :  { %v1113_v56 = vsel %vm262_vm2, %v12057_v55, 0.0  ;;  %v1351_v5 = vpop.permute.xlu1 %1350 }
 0x702   :  { %1114 = vadd.xlane.f32.xlu0 %v1113_v56 }
 0x718   :  { %1272 = vrot.lane.b32.xlu0 %v12375_v8, %s13930_s27 }
 0x78b   :  { %v1112_v57 = vpop.xlane.xlu0 %1111 }
 0x78c   :  { %12058 = vrcp.f32 %v1112_v57 }
 0x78f   :  { %v1115_v58 = vpop.xlane.xlu0 %1114 }
 0x790   :  { %12060 = vrcp.f32 %v1115_v58 }
 0x793   :  { %v1273_v2 = vpop.permute.xlu0 %1272 }
 0x796   :  { %v12059_v60 = vpop.eup %12058 }
 0x797   :  { %v1118_v61 = vmul.f32 %v12059_v60, %v12055_v53 }
 0x799   :  { %11224 = vmatmul.mubr.msk.f32.vlgmr.msra.gmra.mrb[12].mxu1 %vm262_vm2, %v1118_v61 }
 0x79a   :  { %v12061_v62 = vpop.eup %12060  ;;  %11232 = vmatpush3.xpose.msk.msra.mxu1 %vm262_vm2, %v1275_v59  ;;  %11233 = vmatprep.mubr.msk.f32.mxu1 %vm12288_vm0, %v12286_v0 }
 0x79b   :  { %v1119_v1 = vmul.f32 %v12061_v62, %v12057_v55  ;;  %11241 = vmatprep.subr.mxu1 %v12286_v0 }
 0x79d   :  { %11229 = vmatmul.mubr.msk.f32.vlgmr.msra.gmra.mrb[12].mxu0 %vm262_vm2, %v1119_v1  ;;  %11234 = vmatmul.mubr.msk.f32.vlgmr.msra.gmra.mrb[14].mxu1 %vm262_vm2, %v1273_v2 }
 0x79e   :  { %11237 = vmatpush3.xpose.msk.msra.mxu0 %vm262_vm2, %v1353_v63  ;;  %11238 = vmatprep.mubr.msk.f32.mxu0 %vm12288_vm0, %v12286_v0 }
 0x79f   :  { %11246 = vmatprep.subr.mxu0 %v12286_v0  ;;  %11243 = vmatprep.mubr.msk.f32.mxu1 %vm12288_vm0, %v12286_v0 }
 0x7a1   :  { %11239 = vmatmul.mubr.msk.f32.vlgmr.msra.gmra.mrb[14].mxu0 %vm262_vm2, %v1351_v5 }
 0x7a2   :  { %11248 = vmatprep.mubr.msk.f32.mxu0 %vm12288_vm0, %v12286_v0 }
 0x86c   :  { %v1192_v6 = vpop.f32.mrb[12].mxu1 }
 0x86d   :  { %v11225_v7 = vpop.f32.mrb[13].mxu1 }
 0x870   :  { %v1268_v9 = vpop.f32.mrb[12].mxu0  ;;  %v1346_v10 = vpop.f32.mrb[14].mxu1 }
 0x871   :  { %v11899_v11 = vpack.i.bf16 %v1268_v9, %v1192_v6  ;;  %v1428_v13 = vmul.f32 0.35355338, %v1346_v10  ;;  %v11230_v14 = vpop.f32.mrb[13].mxu0  ;;  %v11235_v15 = vpop.f32.mrb[15].mxu1 }
 0x873   :  { %v1430_v17 = vadd.f32 %v12401_v16, %v1428_v13 }
 0x874   :  { %v1424_v18 = vpop.f32.mrb[14].mxu0 }
 0x875   :  { %v1429_v19 = vmul.f32 0.35355338, %v1424_v18  ;;  %v11240_v20 = vpop.f32.mrb[15].mxu0  ;;  %v1432_v22 = vsel %vm262_vm2, %v1430_v17, -inf }
 0x876   :  { %1433 = vmax.xlane.f32.xlu0 %v1432_v22 }
 0x877   :  { %v1431_v23 = vadd.f32 %v12405_v21, %v1429_v19 }
 0x879   :  { %v1435_v24 = vsel %vm262_vm2, %v1431_v23, -inf }
 0x87a   :  { %1436 = vmax.xlane.f32.xlu1 %v1435_v24 }
 0x88b   :  { %1454 = vrot.lane.b32.xlu1 %v12375_v8, %s13928_s2 }
 0x88f   :  { %11895 = vrot.lane.b32.xlu1 %v11894_v32, %s13926_s3  ;;  %s13953_s3 = smov 16  }
 0x893   :  { %11900 = vrot.lane.b32.xlu1 %v11899_v11, %s13924_s28  ;;  %s13952_s28 = smov 8  }
 0x903   :  { %v1434_v16 = vpop.xlane.xlu0 %1433 }
 0x904   :  { %v1438_v25 = vsub.f32 %v1430_v17, %v1434_v16  ;;  %v11989_v16 = vld [vmem:[%s12595_s9 + $0x8] sm:$0xff]  }
 0x906   :  { %v1440_v26 = vmul.f32 1.442695, %v1438_v25  ;;  %v11990_v25 = vld [vmem:[%s12604_s16] sm:$0xff]  }
 0x907   :  { %v1437_v27 = vpop.xlane.xlu1 %1436 }
 0x908   :  { %12062 = vpow2.f32 %v1440_v26  ;;  %v1439_v21 = vsub.f32 %v1431_v23, %v1437_v27  ;;  %v11991_v26 = vld [vmem:[%s12604_s16 + $0x8] sm:$0xff]  }
 0x90a   :  { %v1442_v29 = vmul.f32 1.442695, %v1439_v21 }
 0x90b   :  { %v1455_v31 = vpop.permute.xlu1 %1454 }
 0x90c   :  { %12064 = vpow2.f32 %v1442_v29  ;;  %11242 = vmatpush3.msra.mxu1 %v1455_v31 }
 0x90d   :  { %11251 = vmatprep.subr.bf16.mxu1 %v12286_v0 }
 0x90f   :  { %v11896_v46 = vpop.permute.xlu1 %11895 }
 0x910   :  { %v11898_v48 = vunpack.i.h.bf16 %v11896_v46  ;;  %v11897_v50 = vunpack.i.l.bf16 %v11896_v46 }
 0x912   :  { %v12063_v8 = vpop.eup %12062  ;;  %v1631_v55 = vsel %vm262_vm2, %v12444_v51, %v11898_v48  ;;  %v1630_v56 = vsel %vm262_vm2, %v12442_v49, %v11897_v50  ;;  %v10585_v49 = vld [vmem:[%s12583_s29] ss:$0 sm:$0xff] }
 0x913   :  { %v1444_v33 = vsel %vm262_vm2, %v12063_v8, 0.0  ;;  %v11901_v47 = vpop.permute.xlu1 %11900 }
 0x914   :  { %1445 = vadd.xlane.f32.xlu0 %v1444_v33  ;;  %v11903_v52 = vunpack.i.h.bf16 %v11901_v47  ;;  %v11902_v53 = vunpack.i.l.bf16 %v11901_v47 }
 0x916   :  { %v12065_v28 = vpop.eup %12064  ;;  %v1633_v59 = vsel %vm1632_vm3, %v1630_v56, %v11902_v53  ;;  %v1634_v60 = vsel %vm1632_vm3, %v1631_v55, %v11903_v52  ;;  %v10595_v55 = vld [vmem:[%s12642_s7] ss:$0 sm:$0xff] }
 0x917   :  { %v1447_v30 = vsel %vm262_vm2, %v12065_v28, 0.0 }
 0x918   :  { %1448 = vadd.xlane.f32.xlu0 %v1447_v30  ;;  %v10589_v30 = vld [vmem:[%s12614_s5] ss:$0 sm:$0xff] }
 0x92e   :  { %1530 = vrot.lane.b32.xlu0 %v12379_v12, %s13928_s2  ;;  %v11986_v12 = vld [vmem:[%s12562_s12] sm:$0xff]  }
 0x9a1   :  { %v1446_v32 = vpop.xlane.xlu0 %1445 }
 0x9a2   :  { %12066 = vrcp.f32 %v1446_v32 }
 0x9a5   :  { %v1449_v34 = vpop.xlane.xlu0 %1448 }
 0x9a6   :  { %12068 = vrcp.f32 %v1449_v34 }
 0x9a9   :  { %v1531_v35 = vpop.permute.xlu0 %1530 }
 0x9aa   :  { %11247 = vmatpush3.msra.mxu0 %v1531_v35 }
 0x9ab   :  { %11259 = vmatprep.subr.bf16.mxu0 %v12286_v0 }
 0x9ac   :  { %v12067_v36 = vpop.eup %12066 }
 0x9ad   :  { %v1452_v37 = vmul.f32 %v12067_v36, %v12063_v8 }
 0x9af   :  { %11244 = vmatmul.mubr.msk.f32.vlgmr.msra.gmra.mrb[16].mxu1 %vm262_vm2, %v1452_v37  ;;  %v10590_v37 = vld [vmem:[%s12619_s15] ss:$0 sm:$0xff] }
 0x9b0   :  { %v12069_v38 = vpop.eup %12068  ;;  %11255 = vmatprep.mubr.msk.bf16.mxu1 %vm12288_vm0, %v12286_v0  ;;  %11252 = vmatpush3.bf16.msra.mxu1 %v11986_v12 }
 0x9b1   :  { %v1453_v39 = vmul.f32 %v12069_v38, %v12065_v28  ;;  %11253 = vmatprep.subr.bf16.mxu1 %v12286_v0 }
 0x9b3   :  { %11249 = vmatmul.mubr.msk.f32.vlgmr.msra.gmra.mrb[16].mxu0 %vm262_vm2, %v1453_v39 }
 0x9b4   :  { %11263 = vmatprep.mubr.msk.bf16.mxu0 %vm12288_vm0, %v12286_v0  ;;  %11254 = vmatpush3.bf16.msra.mxu1 %v11987_v40 }
 0x9b5   :  { %11267 = vmatprep.subr.bf16.mxu1 %v12286_v0 }
 0xa82   :  { %v1526_v41 = vpop.f32.mrb[16].mxu1 }
 0xa83   :  { %v11245_v42 = vpop.f32.mrb[17].mxu1 }
 0xa84   :  { %v11993_v42 = vld [vmem:[%s12604_s16 + $0x18] sm:$0xff]  }
 0xa86   :  { %v1602_v43 = vpop.f32.mrb[16].mxu0 }
 0xa87   :  { %v11904_v44 = vpack.i.bf16 %v1602_v43, %v1526_v41  ;;  %v11250_v45 = vpop.f32.mrb[17].mxu0  ;;  %v11992_v41 = vld [vmem:[%s12604_s16 + $0x10] sm:$0xff]   ;;  %v10591_v43 = vld [vmem:[%s12633_s10] ss:$0 sm:$0xff] }
 0xa89   :  { %11905 = vrot.lane.b32.xlu0 %v11904_v44, %s13922_s4  ;;  %s12656_s4 = sld [smem:[%s13921_s0 + %s12312_s11]]   ;;  %s13954_s11 = smov 24  }
 0xafb   :  { %v11906_v54 = vpop.permute.xlu0 %11905 }
 0xafc   :  { %v11908_v57 = vunpack.i.h.bf16 %v11906_v54  ;;  %v11907_v58 = vunpack.i.l.bf16 %v11906_v54 }
 0xafe   :  { %v1637_v61 = vsel %vm1635_vm4, %v1634_v60, %v11908_v57  ;;  %v1636_v62 = vsel %vm1635_vm4, %v1633_v59, %v11907_v58 }
 0xaff   :  { %v1638_v63 = vpack.c.bf16 %v1637_v61, %v1636_v62 }
 0xb01   :  { %11256 = vmatmul.mubr.msk.bf16.vlgmr.msra.gmra.mrb[20].mxu1 %vm214_vm1, %v1638_v63 }
 0xb02   :  { %11275 = vmatprep.mubr.msk.bf16.mxu1 %vm12288_vm0, %v12286_v0  ;;  %11268 = vmatpush3.bf16.msra.mxu1 %v11990_v25 }
 0xb03   :  { %11269 = vmatprep.subr.bf16.mxu1 %v12286_v0 }
 0xb06   :  { %11270 = vmatpush3.bf16.msra.mxu1 %v11991_v26 }
 0xb07   :  { %11271 = vmatprep.subr.bf16.mxu1 %v12286_v0 }
 0xb0a   :  { %11272 = vmatpush3.bf16.msra.mxu1 %v11992_v41 }
 0xb0b   :  { %11273 = vmatprep.subr.bf16.mxu1 %v12286_v0 }
 0xb0e   :  { %11274 = vmatpush3.bf16.msra.mxu1 %v11993_v42  ;;  %v12696_v42 = vld [vmem:[%s12398_s18] ss:$0 sm:$0xff] }
 0xb0f   :  { %11297 = vmatprep.subr.mxu1 %v12286_v0 }
 0xbd4   :  { %v1694_v51 = vpop.f32.mrb[20].mxu1 }
 0xbd5   :  { %v1695_v1 = vadd.f32 %v10585_v49, %v1694_v51  ;;  %v11257_v2 = vpop.f32.mrb[21].mxu1 }
 0xbd6   :  { %v1697_v5 = vpop.f32.mrb[22].mxu1 }
 0xbd7   :  { %v1698_v6 = vadd.f32 %v10585_v49, %v1697_v5  ;;  %v11258_v7 = vpop.f32.mrb[23].mxu1  ;;  %v1701_v9 = vadd.f32 %v1695_v1, %v12358_v3 }
 0xbd9   :  { %v1703_v10 = vsel %vm214_vm1, %v1701_v9, 0.0  ;;  %v1702_v11 = vadd.f32 %v1698_v6, %v12360_v4  ;;  %v11988_v4 = vld [vmem:[%s12595_s9] sm:$0xff]  }
 0xbda   :  { %1704 = vadd.xlane.f32.xlu1 %v1703_v10  ;;  %11260 = vmatpush3.bf16.msra.mxu0 %v11988_v4  ;;  %v10601_v4 = vld [vmem:[%s12656_s4] ss:$0 sm:$0xff] }
 0xbdb   :  { %v1706_v13 = vsel %vm214_vm1, %v1702_v11, 0.0  ;;  %11261 = vmatprep.subr.bf16.mxu0 %v12286_v0 }
 0xbdc   :  { %1707 = vadd.xlane.f32.xlu0 %v1706_v13 }
 0xbde   :  { %11262 = vmatpush3.bf16.msra.mxu0 %v11989_v16 }
 0xbdf   :  { %11279 = vmatprep.subr.bf16.mxu0 %v12286_v0 }
 0xc67   :  { %v1705_v14 = vpop.xlane.xlu1 %1704 }
 0xc68   :  { %v1710_v15 = vmul.f32 0.03125, %v1705_v14 }
 0xc69   :  { %v1708_v17 = vpop.xlane.xlu0 %1707 }
 0xc6a   :  { %v1712_v18 = vsub.f32 %v1701_v9, %v1710_v15  ;;  %v1711_v19 = vmul.f32 0.03125, %v1708_v17  ;;  %v11994_v15 = vld [vmem:[%s12346_s6 + $0x10] sm:$0xff]   ;;  %v11995_v17 = vld [vmem:[%s12346_s6 + $0x18] sm:$0xff]   ;;  %s12313_s6 = smov 15  }
 0xc6b   :  { %s12661_s2 = sld [smem:[%s13921_s0 + %s12313_s6]]  }
 0xc6c   :  { %v1713_v20 = vsub.f32 %v1702_v11, %v1711_v19  ;;  %v1714_v22 = vmul.f32 %v1712_v18, %v1712_v18 }
 0xc6e   :  { %v1716_v23 = vsel %vm214_vm1, %v1714_v22, 0.0  ;;  %v1715_v24 = vmul.f32 %v1713_v20, %v1713_v20 }
 0xc6f   :  { %1717 = vadd.xlane.f32.xlu0 %v1716_v23 }
 0xc70   :  { %v1719_v3 = vsel %vm214_vm1, %v1715_v24, 0.0 }
 0xc71   :  { %1720 = vadd.xlane.f32.xlu1 %v1719_v3 }
 0xcfc   :  { %v1718_v27 = vpop.xlane.xlu0 %1717 }
 0xcfd   :  { %v1722_v21 = vmul.f32 0.03125, %v1718_v27 }
 0xcfe   :  { %v1721_v29 = vpop.xlane.xlu1 %1720 }
 0xcff   :  { %v1724_v31 = vadd.f32 1e-05, %v1722_v21  ;;  %v1723_v8 = vmul.f32 0.03125, %v1721_v29  ;;  %v10602_v21 = vld [vmem:[%s12661_s2] ss:$0 sm:$0xff] }
 0xd01   :  { %12070 = vrsqrt.f32 %v1724_v31  ;;  %v1725_v33 = vadd.f32 1e-05, %v1723_v8 }
 0xd03   :  { %12072 = vrsqrt.f32 %v1725_v33 }
 0xd0b   :  { %v12071_v28 = vpop.eup %12070 }
 0xd0c   :  { %v1728_v32 = vmul.f32 %v12071_v28, %v1712_v18  ;;  %v10631_v28 = vld [vmem:[%s12372_s13 + $0x1] ss:$0 sm:$0xff]  ;;  %s13951_s13 = smov 40  }
 0xd0d   :  { %v12073_v34 = vpop.eup %12072 }
 0xd0e   :  { %v1736_v35 = vmul.f32 %v10589_v30, %v1728_v32  ;;  %v1729_v36 = vmul.f32 %v12073_v34, %v1713_v20 }
 0xd10   :  { %v1737_v38 = vmul.f32 %v10589_v30, %v1729_v36  ;;  %v1744_v39 = vadd.f32 %v10590_v37, %v1736_v35 }
 0xd12   :  { %v1745_v12 = vadd.f32 %v10590_v37, %v1737_v38 }
 0xd14   :  { %v1746_v40 = vpack.c.bf16 %v1745_v12, %v1744_v39 }
 0xd16   :  { %11264 = vmatmul.mubr.msk.bf16.vlgmr.msra.gmra.mrb[20].mxu0 %vm214_vm1, %v1746_v40 }
 0xd17   :  { %11283 = vmatprep.mubr.msk.bf16.mxu0 %vm12288_vm0, %v12286_v0  ;;  %11280 = vmatpush3.bf16.msra.mxu0 %v11994_v15 }
 0xd18   :  { %11281 = vmatprep.subr.bf16.mxu0 %v12286_v0 }
 0xd1b   :  { %11282 = vmatpush3.bf16.msra.mxu0 %v11995_v17 }
 0xd1c   :  { %11287 = vmatprep.subr.mxu0 %v12286_v0 }
 0xde9   :  { %v1802_v44 = vpop.f32.mrb[20].mxu0 }
 0xdea   :  { %v1803_v45 = vadd.f32 %v10591_v43, %v1802_v44  ;;  %v11265_v46 = vpop.f32.mrb[21].mxu0 }
 0xdeb   :  { %v1805_v47 = vpop.f32.mrb[22].mxu0 }
 0xdec   :  { %v1806_v48 = vadd.f32 %v10591_v43, %v1805_v47  ;;  %v11266_v50 = vpop.f32.mrb[23].mxu0  ;;  %v1809_v52 = vmax.f32 %v1803_v45, 0.0 }
 0xdee   :  { %v1810_v53 = vmax.f32 %v1806_v48, 0.0  ;;  %v12701_v48 = vld [vmem:[%s12398_s18 + $0x1] ss:$0 sm:$0xff] }
 0xdf0   :  { %v1811_v54 = vpack.c.bf16 %v1810_v53, %v1809_v52 }
 0xdf2   :  { %11276 = vmatmul.mubr.msk.bf16.vlgmr.msra.gmra.mrb[24].mxu1 %vm1842_vm5, %v1811_v54 }
 0xdf3   :  { %11299 = vmatprep.mubr.msk.f32.mxu1 %vm12288_vm0, %v12286_v0 }
 0xec5   :  { %v1880_v56 = vpop.f32.mrb[24].mxu1 }
 0xec6   :  { %v1881_v57 = vadd.f32 %v10595_v55, %v1880_v56  ;;  %v11277_v58 = vpop.f32.mrb[25].mxu1 }
 0xec7   :  { %v1883_v59 = vpop.f32.mrb[26].mxu1 }
 0xec8   :  { %v1884_v60 = vadd.f32 %v10595_v55, %v1883_v59  ;;  %v11278_v61 = vpop.f32.mrb[27].mxu1  ;;  %v1887_v62 = vadd.f32 %v1881_v57, %v1744_v39 }
 0xeca   :  { %v1889_v63 = vsel %vm214_vm1, %v1887_v62, 0.0  ;;  %v1888_v49 = vadd.f32 %v1884_v60, %v1745_v12 }
 0xecb   :  { %1890 = vadd.xlane.f32.xlu0 %v1889_v63 }
 0xecc   :  { %v1892_v51 = vsel %vm214_vm1, %v1888_v49, 0.0 }
 0xecd   :  { %1893 = vadd.xlane.f32.xlu1 %v1892_v51 }
 0xf58   :  { %v1891_v1 = vpop.xlane.xlu0 %1890 }
 0xf59   :  { %v1895_v2 = vmul.f32 0.03125, %v1891_v1 }
 0xf5a   :  { %v1894_v5 = vpop.xlane.xlu1 %1893 }
 0xf5b   :  { %v1897_v6 = vsub.f32 %v1887_v62, %v1895_v2  ;;  %v1896_v7 = vmul.f32 0.03125, %v1894_v5 }
 0xf5d   :  { %v1898_v9 = vsub.f32 %v1888_v49, %v1896_v7  ;;  %v1899_v10 = vmul.f32 %v1897_v6, %v1897_v6 }
 0xf5f   :  { %v1901_v11 = vsel %vm214_vm1, %v1899_v10, 0.0  ;;  %v1900_v13 = vmul.f32 %v1898_v9, %v1898_v9 }
 0xf60   :  { %1902 = vadd.xlane.f32.xlu0 %v1901_v11 }
 0xf61   :  { %v1904_v14 = vsel %vm214_vm1, %v1900_v13, 0.0 }
 0xf62   :  { %1905 = vadd.xlane.f32.xlu1 %v1904_v14 }
 0xfed   :  { %v1903_v18 = vpop.xlane.xlu0 %1902 }
 0xfee   :  { %v1907_v19 = vmul.f32 0.03125, %v1903_v18 }
 0xfef   :  { %v1906_v20 = vpop.xlane.xlu1 %1905 }
 0xff0   :  { %v1909_v22 = vadd.f32 1e-05, %v1907_v19  ;;  %v1908_v23 = vmul.f32 0.03125, %v1906_v20 }
 0xff2   :  { %12074 = vrsqrt.f32 %v1909_v22  ;;  %v1910_v24 = vadd.f32 1e-05, %v1908_v23 }
 0xff4   :  { %12076 = vrsqrt.f32 %v1910_v24 }
 0xffc   :  { %v12075_v3 = vpop.eup %12074 }
 0xffd   :  { %v1913_v16 = vmul.f32 %v12075_v3, %v1897_v6 }
 0xffe   :  { %v12077_v25 = vpop.eup %12076 }
 0xfff   :  { %v1921_v26 = vmul.f32 %v10601_v4, %v1913_v16  ;;  %v1914_v27 = vmul.f32 %v12077_v25, %v1898_v9 }
0x1001   :  { %v1922_v29 = vmul.f32 %v10601_v4, %v1914_v27  ;;  %v12665_v31 = vadd.f32 %v10602_v21, %v1921_v26 }
0x1003   :  { %v12667_v8 = vadd.f32 %v10602_v21, %v1922_v29 }
0x1005   :  { %v1971_v33 = vpack.c.bf16 %v12667_v8, %v12665_v31 }
0x1007   :  { %11284 = vmatmul.mubr.msk.bf16.vlgmr.msra.gmra.mrb[24].mxu0 %vm214_vm1, %v1971_v33 }
0x1008   :  { %11289 = vmatprep.mubr.msk.f32.mxu0 %vm12288_vm0, %v12286_v0 }
0x10da   :  { %v2027_v30 = vpop.f32.mrb[24].mxu0 }
0x10db   :  { %v12675_v32 = vadd.f32 %v10631_v28, %v2027_v30  ;;  %v11285_v34 = vpop.f32.mrb[25].mxu0 }
0x10dc   :  { %v2030_v35 = vpop.f32.mrb[26].mxu0 }
0x10dd   :  { %v12677_v36 = vadd.f32 %v10631_v28, %v2030_v35  ;;  %2035 = vrot.lane.b32.xlu0 %v12675_v32, %s13948_s14  ;;  %v11286_v37 = vpop.f32.mrb[27].mxu0 }
0x10df   :  { %2112 = vrot.lane.b32.xlu1 %v12677_v36, %s13948_s14 }
0x114f   :  { %v2036_v38 = vpop.permute.xlu0 %2035 }
0x1150   :  { %11288 = vmatpush3.xpose.msk.msra.mxu0 %vm262_vm2, %v2036_v38 }
0x1151   :  { %11292 = vmatprep.subr.mxu0 %v12286_v0  ;;  %v2113_v39 = vpop.permute.xlu1 %2112 }
0x1153   :  { %11290 = vmatmul.mubr.msk.f32.vlgmr.msra.gmra.mrb[18].mxu0 %vm262_vm2, %v12675_v32 }
0x1154   :  { %11293 = vmatpush3.xpose.msk.msra.mxu0 %vm262_vm2, %v2113_v39  ;;  %11294 = vmatprep.mubr.msk.f32.mxu0 %vm12288_vm0, %v12286_v0 }
0x1155   :  { %11302 = vmatprep.subr.mxu0 %v12286_v0 }
0x1157   :  { %11295 = vmatmul.mubr.msk.f32.vlgmr.msra.gmra.mrb[28].mxu0 %vm262_vm2, %v12677_v36 }
0x1158   :  { %11304 = vmatprep.mubr.msk.f32.mxu0 %vm12288_vm0, %v12286_v0 }
0x1226   :  { %v2107_v12 = vpop.f32.mrb[18].mxu0 }
0x1227   :  { %v2188_v40 = vmul.f32 0.35355338, %v2107_v12  ;;  %v11291_v41 = vpop.f32.mrb[19].mxu0 }
0x1229   :  { %v2190_v43 = vadd.f32 %v12696_v42, %v2188_v40 }
0x122a   :  { %v2184_v44 = vpop.f32.mrb[28].mxu0 }
0x122b   :  { %v2189_v45 = vmul.f32 0.35355338, %v2184_v44  ;;  %v11296_v46 = vpop.f32.mrb[29].mxu0  ;;  %v2192_v47 = vsel %vm262_vm2, %v2190_v43, -inf }
0x122c   :  { %2193 = vmax.xlane.f32.xlu1 %v2192_v47 }
0x122d   :  { %v2191_v50 = vadd.f32 %v12701_v48, %v2189_v45 }
0x122f   :  { %v2195_v52 = vsel %vm262_vm2, %v2191_v50, -inf }
0x1230   :  { %2196 = vmax.xlane.f32.xlu0 %v2195_v52 }
0x123d   :  { %2290 = vrot.lane.b32.xlu1 %v12677_v36, %s13946_s19 }
0x1241   :  { %2368 = vrot.lane.b32.xlu1 %v12675_v32, %s13944_s20 }
0x1246   :  { %2214 = vrot.lane.b32.xlu0 %v12675_v32, %s13946_s19 }
0x124a   :  { %2446 = vrot.lane.b32.xlu0 %v12677_v36, %s13944_s20 }
0x12b9   :  { %v2194_v53 = vpop.xlane.xlu1 %2193 }
0x12ba   :  { %v2198_v54 = vsub.f32 %v2190_v43, %v2194_v53 }
0x12bc   :  { %v2200_v55 = vmul.f32 1.442695, %v2198_v54 }
0x12bd   :  { %v2291_v56 = vpop.permute.xlu1 %2290  ;;  %v2197_v57 = vpop.xlane.xlu0 %2196 }
0x12be   :  { %12078 = vpow2.f32 %v2200_v55  ;;  %v2199_v58 = vsub.f32 %v2191_v50, %v2197_v57  ;;  %11303 = vmatpush3.msra.mxu0 %v2291_v56 }
0x12bf   :  { %11312 = vmatprep.subr.mxu0 %v12286_v0 }
0x12c0   :  { %v2202_v59 = vmul.f32 1.442695, %v2199_v58 }
0x12c1   :  { %v2215_v60 = vpop.permute.xlu0 %2214  ;;  %v2369_v1 = vpop.permute.xlu1 %2368 }
0x12c2   :  { %12080 = vpow2.f32 %v2202_v59  ;;  %11298 = vmatpush3.msra.mxu1 %v2215_v60 }
0x12c3   :  { %11307 = vmatprep.subr.mxu1 %v12286_v0 }
0x12c5   :  { %v2447_v51 = vpop.permute.xlu0 %2446 }
0x12c8   :  { %v12079_v61 = vpop.eup %12078 }
0x12c9   :  { %v2204_v62 = vsel %vm262_vm2, %v12079_v61, 0.0 }
0x12ca   :  { %2205 = vadd.xlane.f32.xlu0 %v2204_v62 }
0x12cc   :  { %v12081_v63 = vpop.eup %12080 }
0x12cd   :  { %v2207_v49 = vsel %vm262_vm2, %v12081_v63, 0.0 }
0x12ce   :  { %2208 = vadd.xlane.f32.xlu1 %v2207_v49 }
0x12df   :  { %2366 = vrot.lane.b32.xlu1 %v12675_v32, %s13942_s21 }
0x12e0   :  { %2444 = vrot.lane.b32.xlu0 %v12677_v36, %s13942_s21 }
0x1357   :  { %v2206_v2 = vpop.xlane.xlu0 %2205 }
0x1358   :  { %12082 = vrcp.f32 %v2206_v2 }
0x135b   :  { %v2209_v5 = vpop.xlane.xlu1 %2208  ;;  %v2445_v13 = vpop.permute.xlu0 %2444 }
0x135c   :  { %12084 = vrcp.f32 %v2209_v5 }
0x135f   :  { %v2367_v11 = vpop.permute.xlu1 %2366 }
0x1362   :  { %v12083_v6 = vpop.eup %12082 }
0x1363   :  { %v2212_v7 = vmul.f32 %v12083_v6, %v12079_v61 }
0x1365   :  { %11300 = vmatmul.mubr.msk.f32.vlgmr.msra.gmra.mrb[18].mxu1 %vm262_vm2, %v2212_v7 }
0x1366   :  { %v12085_v9 = vpop.eup %12084  ;;  %11308 = vmatpush3.xpose.msk.msra.mxu1 %vm262_vm2, %v2369_v1  ;;  %11309 = vmatprep.mubr.msk.f32.mxu1 %vm12288_vm0, %v12286_v0 }
0x1367   :  { %v2213_v10 = vmul.f32 %v12085_v9, %v12081_v63  ;;  %11317 = vmatprep.subr.mxu1 %v12286_v0 }
0x1369   :  { %11305 = vmatmul.mubr.msk.f32.vlgmr.msra.gmra.mrb[30].mxu0 %vm262_vm2, %v2213_v10  ;;  %11310 = vmatmul.mubr.msk.f32.vlgmr.msra.gmra.mrb[28].mxu1 %vm262_vm2, %v2367_v11 }
0x136a   :  { %11313 = vmatpush3.xpose.msk.msra.mxu0 %vm262_vm2, %v2447_v51  ;;  %11314 = vmatprep.mubr.msk.f32.mxu0 %vm12288_vm0, %v12286_v0 }
0x136b   :  { %11322 = vmatprep.subr.mxu0 %v12286_v0  ;;  %11319 = vmatprep.mubr.msk.f32.mxu1 %vm12288_vm0, %v12286_v0 }
0x136d   :  { %11315 = vmatmul.mubr.msk.f32.vlgmr.msra.gmra.mrb[32].mxu0 %vm262_vm2, %v2445_v13 }
0x136e   :  { %11324 = vmatprep.mubr.msk.f32.mxu0 %vm12288_vm0, %v12286_v0 }
0x1438   :  { %v12737_v14 = vpop.f32.mrb[18].mxu1 }
0x1439   :  { %v11301_v15 = vpop.f32.mrb[19].mxu1 }
0x143c   :  { %v12739_v17 = vpop.f32.mrb[30].mxu0  ;;  %v2440_v18 = vpop.f32.mrb[28].mxu1 }
0x143d   :  { %v2522_v19 = vmul.f32 0.35355338, %v2440_v18  ;;  %v11306_v20 = vpop.f32.mrb[31].mxu0  ;;  %v11311_v22 = vpop.f32.mrb[29].mxu1 }
0x143f   :  { %v2524_v23 = vadd.f32 %v12696_v42, %v2522_v19 }
0x1440   :  { %v2518_v24 = vpop.f32.mrb[32].mxu0 }
0x1441   :  { %v2523_v3 = vmul.f32 0.35355338, %v2518_v24  ;;  %v11316_v4 = vpop.f32.mrb[33].mxu0  ;;  %v2526_v16 = vsel %vm262_vm2, %v2524_v23, -inf }
0x1442   :  { %2527 = vmax.xlane.f32.xlu1 %v2526_v16 }
0x1443   :  { %v2525_v25 = vadd.f32 %v12701_v48, %v2523_v3 }
0x1445   :  { %v2529_v26 = vsel %vm262_vm2, %v2525_v25, -inf }
0x1446   :  { %2530 = vmax.xlane.f32.xlu0 %v2529_v26 }
0x1453   :  { %2624 = vrot.lane.b32.xlu1 %v12677_v36, %s13940_s22 }
0x1457   :  { %2702 = vrot.lane.b32.xlu1 %v12675_v32, %s13938_s23 }
0x145c   :  { %2548 = vrot.lane.b32.xlu0 %v12675_v32, %s13940_s22 }
0x1460   :  { %2780 = vrot.lane.b32.xlu0 %v12677_v36, %s13938_s23 }
0x14cf   :  { %v2528_v27 = vpop.xlane.xlu1 %2527 }
0x14d0   :  { %v2532_v21 = vsub.f32 %v2524_v23, %v2528_v27 }
0x14d2   :  { %v2534_v29 = vmul.f32 1.442695, %v2532_v21 }
0x14d3   :  { %v2625_v33 = vpop.permute.xlu1 %2624  ;;  %v2531_v28 = vpop.xlane.xlu0 %2530 }
0x14d4   :  { %12086 = vpow2.f32 %v2534_v29  ;;  %v2533_v30 = vsub.f32 %v2525_v25, %v2531_v28  ;;  %11323 = vmatpush3.msra.mxu0 %v2625_v33 }
0x14d5   :  { %11332 = vmatprep.subr.mxu0 %v12286_v0 }
0x14d6   :  { %v2536_v34 = vmul.f32 1.442695, %v2533_v30 }
0x14d7   :  { %v2549_v35 = vpop.permute.xlu0 %2548  ;;  %v2703_v41 = vpop.permute.xlu1 %2702 }
0x14d8   :  { %12088 = vpow2.f32 %v2536_v34  ;;  %11318 = vmatpush3.msra.mxu1 %v2549_v35 }
0x14d9   :  { %11327 = vmatprep.subr.mxu1 %v12286_v0 }
0x14db   :  { %v2781_v40 = vpop.permute.xlu0 %2780 }
0x14de   :  { %v12087_v37 = vpop.eup %12086 }
0x14df   :  { %v2538_v38 = vsel %vm262_vm2, %v12087_v37, 0.0 }
0x14e0   :  { %2539 = vadd.xlane.f32.xlu0 %v2538_v38 }
0x14e2   :  { %v12089_v39 = vpop.eup %12088 }
0x14e3   :  { %v2541_v12 = vsel %vm262_vm2, %v12089_v39, 0.0 }
0x14e4   :  { %2542 = vadd.xlane.f32.xlu1 %v2541_v12 }
0x14f5   :  { %2700 = vrot.lane.b32.xlu1 %v12675_v32, %s13936_s24 }
0x14f6   :  { %2778 = vrot.lane.b32.xlu0 %v12677_v36, %s13936_s24 }
0x156d   :  { %v2540_v43 = vpop.xlane.xlu0 %2539 }
0x156e   :  { %12090 = vrcp.f32 %v2540_v43 }
0x1571   :  { %v2543_v44 = vpop.xlane.xlu1 %2542  ;;  %v2779_v53 = vpop.permute.xlu0 %2778 }
0x1572   :  { %12092 = vrcp.f32 %v2543_v44 }
0x1575   :  { %v2701_v52 = vpop.permute.xlu1 %2700 }
0x1578   :  { %v12091_v45 = vpop.eup %12090 }
0x1579   :  { %v2546_v46 = vmul.f32 %v12091_v45, %v12087_v37 }
0x157b   :  { %11320 = vmatmul.mubr.msk.f32.vlgmr.msra.gmra.mrb[30].mxu1 %vm262_vm2, %v2546_v46 }
0x157c   :  { %v12093_v47 = vpop.eup %12092  ;;  %11328 = vmatpush3.xpose.msk.msra.mxu1 %vm262_vm2, %v2703_v41  ;;  %11329 = vmatprep.mubr.msk.f32.mxu1 %vm12288_vm0, %v12286_v0 }
0x157d   :  { %v2547_v50 = vmul.f32 %v12093_v47, %v12089_v39  ;;  %11337 = vmatprep.subr.mxu1 %v12286_v0 }
0x157f   :  { %11325 = vmatmul.mubr.msk.f32.vlgmr.msra.gmra.mrb[34].mxu0 %vm262_vm2, %v2547_v50  ;;  %11330 = vmatmul.mubr.msk.f32.vlgmr.msra.gmra.mrb[32].mxu1 %vm262_vm2, %v2701_v52 }
0x1580   :  { %11333 = vmatpush3.xpose.msk.msra.mxu0 %vm262_vm2, %v2781_v40  ;;  %11334 = vmatprep.mubr.msk.f32.mxu0 %vm12288_vm0, %v12286_v0 }
0x1581   :  { %11342 = vmatprep.subr.mxu0 %v12286_v0  ;;  %11339 = vmatprep.mubr.msk.f32.mxu1 %vm12288_vm0, %v12286_v0 }
0x1583   :  { %11335 = vmatmul.mubr.msk.f32.vlgmr.msra.gmra.mrb[36].mxu0 %vm262_vm2, %v2779_v53 }
0x1584   :  { %11344 = vmatprep.mubr.msk.f32.mxu0 %vm12288_vm0, %v12286_v0 }
0x164e   :  { %v12777_v54 = vpop.f32.mrb[30].mxu1 }
0x164f   :  { %v11321_v55 = vpop.f32.mrb[31].mxu1 }
0x1652   :  { %v12779_v56 = vpop.f32.mrb[34].mxu0  ;;  %v2774_v57 = vpop.f32.mrb[32].mxu1 }
0x1653   :  { %v11909_v58 = vpack.i.bf16 %v12779_v56, %v12777_v54  ;;  %v2856_v59 = vmul.f32 0.35355338, %v2774_v57  ;;  %v11326_v60 = vpop.f32.mrb[35].mxu0  ;;  %v11331_v61 = vpop.f32.mrb[33].mxu1 }
0x1655   :  { %v2858_v62 = vadd.f32 %v12696_v42, %v2856_v59 }
0x1656   :  { %v2852_v63 = vpop.f32.mrb[36].mxu0 }
0x1657   :  { %v2857_v49 = vmul.f32 0.35355338, %v2852_v63  ;;  %v11336_v51 = vpop.f32.mrb[37].mxu0  ;;  %v2860_v1 = vsel %vm262_vm2, %v2858_v62, -inf }
0x1658   :  { %2861 = vmax.xlane.f32.xlu1 %v2860_v1  ;;  %v11997_v1 = vld [vmem:[%s12562_s12 + $0x18] sm:$0xff]  }
0x1659   :  { %v2859_v2 = vadd.f32 %v12701_v48, %v2857_v49 }
0x165b   :  { %v2863_v5 = vsel %vm262_vm2, %v2859_v2, -inf }
0x165c   :  { %2864 = vmax.xlane.f32.xlu0 %v2863_v5 }
0x1669   :  { %2958 = vrot.lane.b32.xlu1 %v12677_v36, %s13934_s25 }
0x166d   :  { %3036 = vrot.lane.b32.xlu1 %v12675_v32, %s13932_s26 }
0x1672   :  { %2882 = vrot.lane.b32.xlu0 %v12675_v32, %s13934_s25 }
0x1676   :  { %3114 = vrot.lane.b32.xlu0 %v12677_v36, %s13932_s26 }
0x16e5   :  { %v2862_v6 = vpop.xlane.xlu1 %2861 }
0x16e6   :  { %v2866_v7 = vsub.f32 %v2858_v62, %v2862_v6 }
0x16e8   :  { %v2868_v9 = vmul.f32 1.442695, %v2866_v7 }
0x16e9   :  { %v2959_v10 = vpop.permute.xlu1 %2958  ;;  %v2865_v11 = vpop.xlane.xlu0 %2864 }
0x16ea   :  { %12094 = vpow2.f32 %v2868_v9  ;;  %v2867_v13 = vsub.f32 %v2859_v2, %v2865_v11  ;;  %11343 = vmatpush3.msra.mxu0 %v2959_v10 }
0x16eb   :  { %11352 = vmatprep.subr.mxu0 %v12286_v0 }
0x16ec   :  { %v2870_v15 = vmul.f32 1.442695, %v2867_v13 }
0x16ed   :  { %v2883_v18 = vpop.permute.xlu0 %2882  ;;  %v3037_v3 = vpop.permute.xlu1 %3036 }
0x16ee   :  { %12096 = vpow2.f32 %v2870_v15  ;;  %11338 = vmatpush3.msra.mxu1 %v2883_v18 }
0x16ef   :  { %11347 = vmatprep.subr.mxu1 %v12286_v0 }
0x16f1   :  { %v3115_v24 = vpop.permute.xlu0 %3114 }
0x16f4   :  { %v12095_v19 = vpop.eup %12094 }
0x16f5   :  { %v2872_v20 = vsel %vm262_vm2, %v12095_v19, 0.0 }
0x16f6   :  { %2873 = vadd.xlane.f32.xlu0 %v2872_v20 }
0x16f8   :  { %v12097_v22 = vpop.eup %12096 }
0x16f9   :  { %v2875_v23 = vsel %vm262_vm2, %v12097_v22, 0.0 }
0x16fa   :  { %2876 = vadd.xlane.f32.xlu1 %v2875_v23 }
0x170b   :  { %3034 = vrot.lane.b32.xlu1 %v12675_v32, %s13930_s27 }
0x170c   :  { %3112 = vrot.lane.b32.xlu0 %v12677_v36, %s13930_s27 }
0x1783   :  { %v2874_v4 = vpop.xlane.xlu0 %2873 }
0x1784   :  { %12098 = vrcp.f32 %v2874_v4 }
0x1787   :  { %v2877_v16 = vpop.xlane.xlu1 %2876  ;;  %v3113_v33 = vpop.permute.xlu0 %3112 }
0x1788   :  { %12100 = vrcp.f32 %v2877_v16 }
0x178b   :  { %v3035_v29 = vpop.permute.xlu1 %3034 }
0x178e   :  { %v12099_v25 = vpop.eup %12098 }
0x178f   :  { %v2880_v26 = vmul.f32 %v12099_v25, %v12095_v19 }
0x1791   :  { %11340 = vmatmul.mubr.msk.f32.vlgmr.msra.gmra.mrb[34].mxu1 %vm262_vm2, %v2880_v26 }
0x1792   :  { %v12101_v27 = vpop.eup %12100  ;;  %11348 = vmatpush3.xpose.msk.msra.mxu1 %vm262_vm2, %v3037_v3  ;;  %11349 = vmatprep.mubr.msk.f32.mxu1 %vm12288_vm0, %v12286_v0 }
0x1793   :  { %v2881_v21 = vmul.f32 %v12101_v27, %v12097_v22  ;;  %11357 = vmatprep.subr.mxu1 %v12286_v0 }
0x1795   :  { %11345 = vmatmul.mubr.msk.f32.vlgmr.msra.gmra.mrb[38].mxu0 %vm262_vm2, %v2881_v21  ;;  %11350 = vmatmul.mubr.msk.f32.vlgmr.msra.gmra.mrb[36].mxu1 %vm262_vm2, %v3035_v29 }
0x1796   :  { %11353 = vmatpush3.xpose.msk.msra.mxu0 %vm262_vm2, %v3115_v24  ;;  %11354 = vmatprep.mubr.msk.f32.mxu0 %vm12288_vm0, %v12286_v0 }
0x1797   :  { %11362 = vmatprep.subr.mxu0 %v12286_v0  ;;  %11359 = vmatprep.mubr.msk.f32.mxu1 %vm12288_vm0, %v12286_v0 }
0x1799   :  { %11355 = vmatmul.mubr.msk.f32.vlgmr.msra.gmra.mrb[40].mxu0 %vm262_vm2, %v3113_v33 }
0x179a   :  { %11364 = vmatprep.mubr.msk.f32.mxu0 %vm12288_vm0, %v12286_v0 }
0x1864   :  { %v2954_v28 = vpop.f32.mrb[34].mxu1 }
0x1865   :  { %v11341_v30 = vpop.f32.mrb[35].mxu1 }
0x1868   :  { %v3030_v34 = vpop.f32.mrb[38].mxu0  ;;  %v3108_v35 = vpop.f32.mrb[36].mxu1 }
0x1869   :  { %v11914_v37 = vpack.i.bf16 %v3030_v34, %v2954_v28  ;;  %v3190_v38 = vmul.f32 0.35355338, %v3108_v35  ;;  %v11346_v39 = vpop.f32.mrb[39].mxu0  ;;  %v11351_v12 = vpop.f32.mrb[37].mxu1 }
0x186b   :  { %v3192_v40 = vadd.f32 %v12696_v42, %v3190_v38 }
0x186c   :  { %v3186_v41 = vpop.f32.mrb[40].mxu0 }
0x186d   :  { %v3191_v43 = vmul.f32 0.35355338, %v3186_v41  ;;  %v11356_v44 = vpop.f32.mrb[41].mxu0  ;;  %v3194_v45 = vsel %vm262_vm2, %v3192_v40, -inf }
0x186e   :  { %3195 = vmax.xlane.f32.xlu1 %v3194_v45 }
0x186f   :  { %v3193_v46 = vadd.f32 %v12701_v48, %v3191_v43 }
0x1871   :  { %v3197_v47 = vsel %vm262_vm2, %v3193_v46, -inf }
0x1872   :  { %3198 = vmax.xlane.f32.xlu0 %v3197_v47  ;;  %v11998_v47 = vld [vmem:[%s12595_s9 + $0x10] sm:$0xff]  }
0x18fb   :  { %v3196_v50 = vpop.xlane.xlu1 %3195 }
0x18fc   :  { %v3200_v52 = vsub.f32 %v3192_v40, %v3196_v50  ;;  %v11999_v50 = vld [vmem:[%s12595_s9 + $0x18] sm:$0xff]  }
0x18fe   :  { %v3202_v53 = vmul.f32 1.442695, %v3200_v52  ;;  %v12002_v52 = vld [vmem:[%s12604_s16 + $0x20] sm:$0xff]  }
0x18ff   :  { %v3199_v55 = vpop.xlane.xlu0 %3198 }
0x1900   :  { %12102 = vpow2.f32 %v3202_v53  ;;  %v3201_v57 = vsub.f32 %v3193_v46, %v3199_v55  ;;  %v12003_v53 = vld [vmem:[%s12604_s16 + $0x28] sm:$0xff]  }
0x1902   :  { %v3204_v59 = vmul.f32 1.442695, %v3201_v57 }
0x1904   :  { %12104 = vpow2.f32 %v3204_v59 }
0x190a   :  { %v12103_v42 = vpop.eup %12102 }
0x190b   :  { %v3206_v60 = vsel %vm262_vm2, %v12103_v42, 0.0 }
0x190c   :  { %3207 = vadd.xlane.f32.xlu0 %v3206_v60 }
0x190e   :  { %v12105_v61 = vpop.eup %12104 }
0x190f   :  { %v3209_v62 = vsel %vm262_vm2, %v12105_v61, 0.0 }
0x1910   :  { %3210 = vadd.xlane.f32.xlu1 %v3209_v62 }
0x1921   :  { %3292 = vrot.lane.b32.xlu1 %v12677_v36, %s13951_s13 }
0x1922   :  { %3216 = vrot.lane.b32.xlu0 %v12675_v32, %s13951_s13 }
0x1925   :  { %11910 = vrot.lane.b32.xlu1 %v11909_v58, %s13952_s28  ;;  %v11996_v58 = vld [vmem:[%s12562_s12 + $0x10] sm:$0xff]   ;;  %s12314_s12 = smov 1  }
0x1926   :  { %11915 = vrot.lane.b32.xlu0 %v11914_v37, %s13953_s3  ;;  %s10517_s17 = sld [smem:[%s13921_s0 + %s12314_s12]]   ;;  %s12319_s12 = smov 22  }
0x1999   :  { %v3208_v48 = vpop.xlane.xlu0 %3207 }
0x199a   :  { %12106 = vrcp.f32 %v3208_v48 }
0x199d   :  { %v3211_v63 = vpop.xlane.xlu1 %3210  ;;  %v3217_v49 = vpop.permute.xlu0 %3216 }
0x199e   :  { %12108 = vrcp.f32 %v3211_v63  ;;  %11358 = vmatpush3.msra.mxu1 %v3217_v49  ;;  %v10663_v63 = vld [vmem:[%s12614_s5 + $0x1] ss:$0 sm:$0xff]  ;;  %s12315_s5 = smov 17  }
0x199f   :  { %11367 = vmatprep.subr.bf16.mxu1 %v12286_v0  ;;  %s12908_s6 = sld [smem:[%s13921_s0 + %s12315_s5]]  }
0x19a1   :  { %v3293_v36 = vpop.permute.xlu1 %3292  ;;  %v11916_v15 = vpop.permute.xlu0 %11915 }
0x19a2   :  { %11363 = vmatpush3.msra.mxu0 %v3293_v36  ;;  %v11918_v20 = vunpack.i.h.bf16 %v11916_v15  ;;  %v11917_v22 = vunpack.i.l.bf16 %v11916_v15 }
0x19a3   :  { %11375 = vmatprep.subr.bf16.mxu0 %v12286_v0 }
0x19a4   :  { %v12107_v32 = vpop.eup %12106 }
0x19a5   :  { %v3214_v51 = vmul.f32 %v12107_v32, %v12103_v42  ;;  %v11911_v10 = vpop.permute.xlu1 %11910 }
0x19a6   :  { %v11913_v11 = vunpack.i.h.bf16 %v11911_v10  ;;  %v11912_v13 = vunpack.i.l.bf16 %v11911_v10  ;;  %v12004_v10 = vld [vmem:[%s12604_s16 + $0x30] sm:$0xff]  }
0x19a7   :  { %11360 = vmatmul.mubr.msk.f32.vlgmr.msra.gmra.mrb[38].mxu1 %vm262_vm2, %v3214_v51  ;;  %v10664_v51 = vld [vmem:[%s12619_s15 + $0x1] ss:$0 sm:$0xff]  ;;  %s12318_s15 = smov 19  }
0x19a8   :  { %v12109_v54 = vpop.eup %12108  ;;  %11371 = vmatprep.mubr.msk.bf16.mxu1 %vm12288_vm0, %v12286_v0  ;;  %11368 = vmatpush3.bf16.msra.mxu1 %v11996_v58  ;;  %v3393_v18 = vsel %vm262_vm2, %v12739_v17, %v11913_v11  ;;  %v3392_v19 = vsel %vm262_vm2, %v12737_v14, %v11912_v13  ;;  %v10659_v14 = vld [vmem:[%s12583_s29 + $0x1] ss:$0 sm:$0xff]  ;;  %v12005_v11 = vld [vmem:[%s12604_s16 + $0x38] sm:$0xff]   ;;  %s12316_s16 = smov 3  }
0x19a9   :  { %v3215_v56 = vmul.f32 %v12109_v54, %v12105_v61  ;;  %11369 = vmatprep.subr.bf16.mxu1 %v12286_v0  ;;  %v3394_v4 = vsel %vm1632_vm3, %v3392_v19, %v11917_v22  ;;  %v3395_v16 = vsel %vm1632_vm3, %v3393_v18, %v11918_v20  ;;  %v10665_v13 = vld [vmem:[%s12633_s10 + $0x1] ss:$0 sm:$0xff]  ;;  %s12945_s29 = sld [smem:[%s13921_s0 + %s12316_s16]]   ;;  %s12321_s16 = smov 21  }
0x19aa   :  { %s13128_s10 = sld [smem:[%s13921_s0 + %s12318_s15]]   ;;  %s12324_s15 = smov 26  }
0x19ab   :  { %11365 = vmatmul.mubr.msk.f32.vlgmr.msra.gmra.mrb[42].mxu0 %vm262_vm2, %v3215_v56  ;;  %s13169_s9 = sld [smem:[%s13921_s0 + %s12321_s16]]  }
0x19ac   :  { %11379 = vmatprep.mubr.msk.bf16.mxu0 %vm12288_vm0, %v12286_v0  ;;  %11370 = vmatpush3.bf16.msra.mxu1 %v11997_v1  ;;  %v12000_v1 = vld [vmem:[%s12528_s1] sm:$0xff]  }
0x19ad   :  { %11383 = vmatprep.subr.bf16.mxu1 %v12286_v0  ;;  %11376 = vmatpush3.bf16.msra.mxu0 %v11998_v47 }
0x19ae   :  { %11377 = vmatprep.subr.bf16.mxu0 %v12286_v0 }
0x19b1   :  { %11378 = vmatpush3.bf16.msra.mxu0 %v11999_v50 }
0x19b2   :  { %11395 = vmatprep.subr.bf16.mxu0 %v12286_v0 }
0x1a7a   :  { %v3288_v2 = vpop.f32.mrb[38].mxu1 }
0x1a7b   :  { %v11361_v5 = vpop.f32.mrb[39].mxu1 }
0x1a7c   :  { %v12001_v5 = vld [vmem:[%s12528_s1 + $0x8] sm:$0xff]  }
0x1a7e   :  { %v3364_v6 = vpop.f32.mrb[42].mxu0 }
0x1a7f   :  { %v11919_v7 = vpack.i.bf16 %v3364_v6, %v3288_v2  ;;  %v11366_v9 = vpop.f32.mrb[43].mxu0  ;;  %v12889_v6 = vld [vmem:[%s10517_s17] sm:$0xff] }
0x1a81   :  { %11920 = vrot.lane.b32.xlu1 %v11919_v7, %s13954_s11  ;;  %v12891_v7 = vld [vmem:[%s10517_s17 + $0x8] sm:$0xff]  ;;  %s13366_s17 = sld [smem:[%s13921_s0 + %s12324_s15]]   ;;  %s12325_s15 = smov 27  }
0x1a82   :  { %v3734_v9 = vpack.c.bf16 %v12891_v7, %v12889_v6 }
0x1af3   :  { %v11921_v23 = vpop.permute.xlu1 %11920 }
0x1af4   :  { %v11923_v24 = vunpack.i.h.bf16 %v11921_v23  ;;  %v11922_v3 = vunpack.i.l.bf16 %v11921_v23 }
0x1af6   :  { %v3397_v25 = vsel %vm1635_vm4, %v3395_v16, %v11923_v24  ;;  %v3396_v26 = vsel %vm1635_vm4, %v3394_v4, %v11922_v3  ;;  %v10677_v4 = vld [vmem:[%s12908_s6] ss:$0 sm:$0xff] }
0x1af7   :  { %v3398_v27 = vpack.c.bf16 %v3397_v25, %v3396_v26 }
0x1af9   :  { %11372 = vmatmul.mubr.msk.bf16.vlgmr.msra.gmra.mrb[40].mxu1 %vm214_vm1, %v3398_v27 }
0x1afa   :  { %11391 = vmatprep.mubr.msk.bf16.mxu1 %vm12288_vm0, %v12286_v0  ;;  %11384 = vmatpush3.bf16.msra.mxu1 %v12002_v52 }
0x1afb   :  { %11385 = vmatprep.subr.bf16.mxu1 %v12286_v0 }
0x1afe   :  { %11386 = vmatpush3.bf16.msra.mxu1 %v12003_v53 }
0x1aff   :  { %11387 = vmatprep.subr.bf16.mxu1 %v12286_v0 }
0x1b02   :  { %11388 = vmatpush3.bf16.msra.mxu1 %v12004_v10 }
0x1b03   :  { %11389 = vmatprep.subr.bf16.mxu1 %v12286_v0 }
0x1b06   :  { %11390 = vmatpush3.bf16.msra.mxu1 %v12005_v11 }
0x1b07   :  { %11413 = vmatprep.subr.mxu1 %v12286_v0 }
0x1bcc   :  { %v3454_v17 = vpop.f32.mrb[40].mxu1 }
0x1bcd   :  { %v3455_v21 = vadd.f32 %v10659_v14, %v3454_v17  ;;  %v11373_v29 = vpop.f32.mrb[41].mxu1 }
0x1bce   :  { %v3457_v33 = vpop.f32.mrb[42].mxu1 }
0x1bcf   :  { %v3458_v28 = vadd.f32 %v10659_v14, %v3457_v33  ;;  %v11374_v30 = vpop.f32.mrb[43].mxu1  ;;  %v3461_v34 = vadd.f32 %v3455_v21, %v12665_v31 }
0x1bd1   :  { %v3462_v35 = vadd.f32 %v3458_v28, %v12667_v8  ;;  %v3463_v37 = vsel %vm214_vm1, %v3461_v34, 0.0 }
0x1bd2   :  { %3464 = vadd.xlane.f32.xlu0 %v3463_v37 }
0x1bd3   :  { %v3466_v38 = vsel %vm214_vm1, %v3462_v35, 0.0 }
0x1bd4   :  { %3467 = vadd.xlane.f32.xlu1 %v3466_v38 }
0x1c5f   :  { %v3465_v39 = vpop.xlane.xlu0 %3464 }
0x1c60   :  { %v3469_v12 = vmul.f32 0.03125, %v3465_v39  ;;  %v12948_v39 = vld [vmem:[%s12945_s29] sm:$0xff] }
0x1c61   :  { %v3468_v40 = vpop.xlane.xlu1 %3467 }
0x1c62   :  { %v3471_v41 = vsub.f32 %v3461_v34, %v3469_v12  ;;  %v3470_v43 = vmul.f32 0.03125, %v3468_v40  ;;  %v12937_v34 = vld [vmem:[%s12642_s7 + $0x1] ss:$0 sm:$0xff]  ;;  %s12317_s7 = smov 18  }
0x1c63   :  { %s13104_s5 = sld [smem:[%s13921_s0 + %s12317_s7]]   ;;  %s13962_s7 = smov 112  }
0x1c64   :  { %v3472_v44 = vsub.f32 %v3462_v35, %v3470_v43  ;;  %v3473_v45 = vmul.f32 %v3471_v41, %v3471_v41 }
0x1c66   :  { %v3475_v31 = vsel %vm214_vm1, %v3473_v45, 0.0  ;;  %v3474_v8 = vmul.f32 %v3472_v44, %v3472_v44  ;;  %v12952_v45 = vld [vmem:[%s12945_s29 + $0x8] sm:$0xff] }
0x1c67   :  { %3476 = vadd.xlane.f32.xlu0 %v3475_v31 }
0x1c68   :  { %v3478_v46 = vsel %vm214_vm1, %v3474_v8, 0.0 }
0x1c6b   :  { %3479 = vadd.xlane.f32.xlu0 %v3478_v46 }
0x1cf4   :  { %v3477_v55 = vpop.xlane.xlu0 %3476 }
0x1cf5   :  { %v3481_v57 = vmul.f32 0.03125, %v3477_v55 }
0x1cf7   :  { %v3483_v59 = vadd.f32 1e-05, %v3481_v57 }
0x1cf8   :  { %v3480_v42 = vpop.xlane.xlu0 %3479 }
0x1cf9   :  { %12110 = vrsqrt.f32 %v3483_v59  ;;  %v3482_v60 = vmul.f32 0.03125, %v3480_v42 }
0x1cfb   :  { %v3484_v61 = vadd.f32 1e-05, %v3482_v60 }
0x1cfd   :  { %12112 = vrsqrt.f32 %v3484_v61 }
0x1d03   :  { %v12111_v62 = vpop.eup %12110 }
0x1d04   :  { %v3487_v48 = vmul.f32 %v12111_v62, %v3471_v41 }
0x1d06   :  { %v3495_v36 = vmul.f32 %v10663_v63, %v3487_v48 }
0x1d07   :  { %v12113_v49 = vpop.eup %12112 }
0x1d08   :  { %v3488_v32 = vmul.f32 %v12113_v49, %v3472_v44  ;;  %v12878_v56 = vadd.f32 %v10664_v51, %v3495_v36 }
0x1d0a   :  { %v3496_v54 = vmul.f32 %v10663_v63, %v3488_v32 }
0x1d0c   :  { %v12880_v58 = vadd.f32 %v10664_v51, %v3496_v54 }
0x1d0e   :  { %v3505_v2 = vpack.c.bf16 %v12880_v58, %v12878_v56 }
0x1d10   :  { %11380 = vmatmul.mubr.msk.bf16.vlgmr.msra.gmra.mrb[44].mxu0 %vm214_vm1, %v3505_v2 }
0x1d11   :  { %11396 = vmatpush3.bf16.msra.mxu0 %v12000_v1  ;;  %11399 = vmatprep.mubr.msk.bf16.mxu0 %vm12288_vm0, %v12286_v0 }
0x1d12   :  { %11397 = vmatprep.subr.bf16.mxu0 %v12286_v0 }
0x1d15   :  { %11398 = vmatpush3.bf16.msra.mxu0 %v12001_v5 }
0x1d16   :  { %11403 = vmatprep.subr.mxu0 %v12286_v0 }
0x1d18   :  { %11400 = vmatmul.mubr.msk.bf16.vlgmr.msra.gmra.mrb[48].mxu0 %vm214_vm1, %v3734_v9 }
0x1d19   :  { %11405 = vmatprep.mubr.msk.f32.mxu0 %vm12288_vm0, %v12286_v0 }
0x1de3   :  { %v3561_v15 = vpop.f32.mrb[44].mxu0 }
0x1de4   :  { %v3562_v18 = vadd.f32 %v10665_v13, %v3561_v15  ;;  %v11381_v19 = vpop.f32.mrb[45].mxu0 }
0x1de5   :  { %v3564_v20 = vpop.f32.mrb[46].mxu0 }
0x1de6   :  { %v3565_v22 = vadd.f32 %v10665_v13, %v3564_v20  ;;  %v11382_v23 = vpop.f32.mrb[47].mxu0  ;;  %v3568_v24 = vmax.f32 %v3562_v18, 0.0 }
0x1de8   :  { %v3569_v3 = vmax.f32 %v3565_v22, 0.0 }
0x1dea   :  { %v3570_v16 = vpack.c.bf16 %v3569_v3, %v3568_v24 }
0x1deb   :  { %v3790_v25 = vpop.f32.mrb[48].mxu0 }
0x1dec   :  { %v12911_v26 = vadd.f32 %v10677_v4, %v3790_v25  ;;  %11392 = vmatmul.mubr.msk.bf16.vlgmr.msra.gmra.mrb[44].mxu1 %vm1842_vm5, %v3570_v16  ;;  %v11401_v27 = vpop.f32.mrb[49].mxu0 }
0x1ded   :  { %v3793_v14 = vpop.f32.mrb[50].mxu0  ;;  %11415 = vmatprep.mubr.msk.f32.mxu1 %vm12288_vm0, %v12286_v0 }
0x1dee   :  { %v12916_v17 = vadd.f32 %v10677_v4, %v3793_v14  ;;  %3798 = vrot.lane.b32.xlu1 %v12911_v26, %s13948_s14  ;;  %v11402_v21 = vpop.f32.mrb[51].mxu0 }
0x1df0   :  { %3875 = vrot.lane.b32.xlu0 %v12916_v17, %s13948_s14 }
0x1e60   :  { %v3799_v29 = vpop.permute.xlu1 %3798 }
0x1e61   :  { %11404 = vmatpush3.xpose.msk.msra.mxu0 %vm262_vm2, %v3799_v29 }
0x1e62   :  { %11408 = vmatprep.subr.mxu0 %v12286_v0  ;;  %v3876_v33 = vpop.permute.xlu0 %3875 }
0x1e64   :  { %11406 = vmatmul.mubr.msk.f32.vlgmr.msra.gmra.mrb[52].mxu0 %vm262_vm2, %v12911_v26 }
0x1e65   :  { %11409 = vmatpush3.xpose.msk.msra.mxu0 %vm262_vm2, %v3876_v33  ;;  %11410 = vmatprep.mubr.msk.f32.mxu0 %vm12288_vm0, %v12286_v0 }
0x1e66   :  { %11418 = vmatprep.subr.mxu0 %v12286_v0 }
0x1e68   :  { %11411 = vmatmul.mubr.msk.f32.vlgmr.msra.gmra.mrb[54].mxu0 %vm262_vm2, %v12916_v17 }
0x1e69   :  { %11420 = vmatprep.mubr.msk.f32.mxu0 %vm12288_vm0, %v12286_v0 }
0x1ebf   :  { %v12934_v28 = vpop.f32.mrb[44].mxu1 }
0x1ec0   :  { %v11393_v30 = vpop.f32.mrb[45].mxu1 }
0x1ec1   :  { %v3641_v35 = vpop.f32.mrb[46].mxu1 }
0x1ec2   :  { %v12940_v37 = vadd.f32 %v12937_v34, %v3641_v35  ;;  %v11394_v38 = vpop.f32.mrb[47].mxu1 }
0x1f37   :  { %v3870_v12 = vpop.f32.mrb[52].mxu0 }
0x1f38   :  { %v3951_v40 = vmul.f32 0.35355338, %v3870_v12  ;;  %v11407_v41 = vpop.f32.mrb[53].mxu0 }
0x1f3a   :  { %v3953_v43 = vadd.f32 %v3951_v40, %v12948_v39 }
0x1f3b   :  { %v3947_v44 = vpop.f32.mrb[54].mxu0 }
0x1f3c   :  { %v3952_v31 = vmul.f32 0.35355338, %v3947_v44  ;;  %v11412_v8 = vpop.f32.mrb[55].mxu0  ;;  %v3955_v46 = vsel %vm262_vm2, %v3953_v43, -inf }
0x1f3d   :  { %3956 = vmax.xlane.f32.xlu1 %v3955_v46 }
0x1f3e   :  { %v3954_v47 = vadd.f32 %v3952_v31, %v12952_v45 }
0x1f40   :  { %v3958_v50 = vsel %vm262_vm2, %v3954_v47, -inf }
0x1f41   :  { %3959 = vmax.xlane.f32.xlu0 %v3958_v50 }
0x1f4e   :  { %3977 = vrot.lane.b32.xlu1 %v12911_v26, %s13946_s19 }
0x1f52   :  { %4131 = vrot.lane.b32.xlu1 %v12911_v26, %s13944_s20 }
0x1f56   :  { %4209 = vrot.lane.b32.xlu1 %v12916_v17, %s13944_s20 }
0x1f57   :  { %4053 = vrot.lane.b32.xlu0 %v12916_v17, %s13946_s19  ;;  %s13957_s19 = smov 64  }
0x1fca   :  { %v3957_v52 = vpop.xlane.xlu1 %3956 }
0x1fcb   :  { %v3961_v53 = vsub.f32 %v3953_v43, %v3957_v52 }
0x1fcd   :  { %v3963_v55 = vmul.f32 1.442695, %v3961_v53 }
0x1fce   :  { %v3978_v57 = vpop.permute.xlu1 %3977  ;;  %v3960_v59 = vpop.xlane.xlu0 %3959 }
0x1fcf   :  { %12114 = vpow2.f32 %v3963_v55  ;;  %v3962_v42 = vsub.f32 %v3954_v47, %v3960_v59  ;;  %11414 = vmatpush3.msra.mxu1 %v3978_v57 }
0x1fd0   :  { %11423 = vmatprep.subr.mxu1 %v12286_v0 }
0x1fd1   :  { %v3965_v60 = vmul.f32 1.442695, %v3962_v42 }
0x1fd2   :  { %v4054_v61 = vpop.permute.xlu0 %4053  ;;  %v4132_v36 = vpop.permute.xlu1 %4131 }
0x1fd3   :  { %12116 = vpow2.f32 %v3965_v60  ;;  %11419 = vmatpush3.msra.mxu0 %v4054_v61 }
0x1fd4   :  { %11428 = vmatprep.subr.mxu0 %v12286_v0 }
0x1fd6   :  { %v4210_v32 = vpop.permute.xlu1 %4209 }
0x1fd9   :  { %v12115_v62 = vpop.eup %12114 }
0x1fda   :  { %v3967_v48 = vsel %vm262_vm2, %v12115_v62, 0.0 }
0x1fdb   :  { %3968 = vadd.xlane.f32.xlu1 %v3967_v48 }
0x1fdd   :  { %v12117_v63 = vpop.eup %12116 }
0x1fde   :  { %v3970_v49 = vsel %vm262_vm2, %v12117_v63, 0.0 }
0x1fdf   :  { %3971 = vadd.xlane.f32.xlu0 %v3970_v49 }
0x1fec   :  { %4207 = vrot.lane.b32.xlu1 %v12916_v17, %s13942_s21 }
0x1ff5   :  { %4129 = vrot.lane.b32.xlu0 %v12911_v26, %s13942_s21 }
0x2068   :  { %v3969_v51 = vpop.xlane.xlu1 %3968 }
0x2069   :  { %12118 = vrcp.f32 %v3969_v51 }
0x206c   :  { %v3972_v54 = vpop.xlane.xlu0 %3971  ;;  %v4208_v11 = vpop.permute.xlu1 %4207 }
0x206d   :  { %12120 = vrcp.f32 %v3972_v54 }
0x2070   :  { %v4130_v10 = vpop.permute.xlu0 %4129 }
0x2073   :  { %v12119_v1 = vpop.eup %12118 }
0x2074   :  { %v3975_v2 = vmul.f32 %v12119_v1, %v12115_v62 }
0x2076   :  { %11416 = vmatmul.mubr.msk.f32.vlgmr.msra.gmra.mrb[48].mxu1 %vm262_vm2, %v3975_v2 }
0x2077   :  { %v12121_v5 = vpop.eup %12120  ;;  %11424 = vmatpush3.xpose.msk.msra.mxu1 %vm262_vm2, %v4132_v36  ;;  %11425 = vmatprep.mubr.msk.f32.mxu1 %vm12288_vm0, %v12286_v0 }
0x2078   :  { %v3976_v9 = vmul.f32 %v12121_v5, %v12117_v63  ;;  %11433 = vmatprep.subr.mxu1 %v12286_v0 }
0x207a   :  { %11421 = vmatmul.mubr.msk.f32.vlgmr.msra.gmra.mrb[56].mxu0 %vm262_vm2, %v3976_v9  ;;  %11426 = vmatmul.mubr.msk.f32.vlgmr.msra.gmra.mrb[50].mxu1 %vm262_vm2, %v4130_v10 }
0x207b   :  { %11429 = vmatpush3.xpose.msk.msra.mxu0 %vm262_vm2, %v4210_v32  ;;  %11430 = vmatprep.mubr.msk.f32.mxu0 %vm12288_vm0, %v12286_v0 }
0x207c   :  { %11438 = vmatprep.subr.mxu0 %v12286_v0  ;;  %11435 = vmatprep.mubr.msk.f32.mxu1 %vm12288_vm0, %v12286_v0 }
0x207e   :  { %11431 = vmatmul.mubr.msk.f32.vlgmr.msra.gmra.mrb[58].mxu0 %vm262_vm2, %v4208_v11 }
0x207f   :  { %11440 = vmatprep.mubr.msk.f32.mxu0 %vm12288_vm0, %v12286_v0 }
0x2149   :  { %v12989_v13 = vpop.f32.mrb[48].mxu1 }
0x214a   :  { %v11417_v15 = vpop.f32.mrb[49].mxu1 }
0x214d   :  { %v12991_v18 = vpop.f32.mrb[56].mxu0  ;;  %v4203_v19 = vpop.f32.mrb[50].mxu1 }
0x214e   :  { %v4285_v20 = vmul.f32 0.35355338, %v4203_v19  ;;  %v11422_v22 = vpop.f32.mrb[57].mxu0  ;;  %v11427_v23 = vpop.f32.mrb[51].mxu1 }
0x2150   :  { %v4287_v24 = vadd.f32 %v4285_v20, %v12948_v39 }
0x2151   :  { %v4281_v3 = vpop.f32.mrb[58].mxu0 }
0x2152   :  { %v4286_v4 = vmul.f32 0.35355338, %v4281_v3  ;;  %v11432_v16 = vpop.f32.mrb[59].mxu0  ;;  %v4289_v25 = vsel %vm262_vm2, %v4287_v24, -inf }
0x2153   :  { %4290 = vmax.xlane.f32.xlu0 %v4289_v25 }
0x2154   :  { %v4288_v27 = vadd.f32 %v4286_v4, %v12952_v45 }
0x2156   :  { %v4292_v14 = vsel %vm262_vm2, %v4288_v27, -inf }
0x2157   :  { %4293 = vmax.xlane.f32.xlu1 %v4292_v14 }
0x2168   :  { %4311 = vrot.lane.b32.xlu1 %v12911_v26, %s13940_s22 }
0x2169   :  { %4387 = vrot.lane.b32.xlu0 %v12916_v17, %s13940_s22 }
0x216c   :  { %4465 = vrot.lane.b32.xlu1 %v12911_v26, %s13938_s23 }
0x2170   :  { %4543 = vrot.lane.b32.xlu1 %v12916_v17, %s13938_s23 }
0x2174   :  { %4541 = vrot.lane.b32.xlu1 %v12916_v17, %s13936_s24 }
0x21e0   :  { %v4291_v21 = vpop.xlane.xlu0 %4290 }
0x21e1   :  { %v4295_v29 = vsub.f32 %v4287_v24, %v4291_v21 }
0x21e3   :  { %v4297_v33 = vmul.f32 1.442695, %v4295_v29 }
0x21e4   :  { %v4388_v30 = vpop.permute.xlu0 %4387  ;;  %v4294_v35 = vpop.xlane.xlu1 %4293 }
0x21e5   :  { %12122 = vpow2.f32 %v4297_v33  ;;  %v4296_v38 = vsub.f32 %v4288_v27, %v4294_v35  ;;  %11439 = vmatpush3.msra.mxu0 %v4388_v30 }
0x21e6   :  { %11448 = vmatprep.subr.mxu0 %v12286_v0 }
0x21e7   :  { %v4299_v12 = vmul.f32 1.442695, %v4296_v38 }
0x21e8   :  { %v4312_v40 = vpop.permute.xlu1 %4311 }
0x21e9   :  { %12124 = vpow2.f32 %v4299_v12  ;;  %11434 = vmatpush3.msra.mxu1 %v4312_v40 }
0x21ea   :  { %11443 = vmatprep.subr.mxu1 %v12286_v0 }
0x21ec   :  { %v4466_v47 = vpop.permute.xlu1 %4465 }
0x21ef   :  { %v12123_v41 = vpop.eup %12122 }
0x21f0   :  { %v4301_v43 = vsel %vm262_vm2, %v12123_v41, 0.0  ;;  %v4544_v55 = vpop.permute.xlu1 %4543 }
0x21f1   :  { %4302 = vadd.xlane.f32.xlu0 %v4301_v43 }
0x21f3   :  { %v12125_v44 = vpop.eup %12124 }
0x21f4   :  { %v4304_v31 = vsel %vm262_vm2, %v12125_v44, 0.0  ;;  %v4542_v42 = vpop.permute.xlu1 %4541 }
0x21f5   :  { %4305 = vadd.xlane.f32.xlu0 %v4304_v31 }
0x220b   :  { %4463 = vrot.lane.b32.xlu0 %v12911_v26, %s13936_s24 }
0x227e   :  { %v4303_v8 = vpop.xlane.xlu0 %4302 }
0x227f   :  { %12126 = vrcp.f32 %v4303_v8 }
0x2282   :  { %v4306_v46 = vpop.xlane.xlu0 %4305 }
0x2283   :  { %12128 = vrcp.f32 %v4306_v46 }
0x2286   :  { %v4464_v59 = vpop.permute.xlu0 %4463 }
0x2289   :  { %v12127_v50 = vpop.eup %12126 }
0x228a   :  { %v4309_v52 = vmul.f32 %v12127_v50, %v12123_v41 }
0x228c   :  { %11436 = vmatmul.mubr.msk.f32.vlgmr.msra.gmra.mrb[52].mxu1 %vm262_vm2, %v4309_v52 }
0x228d   :  { %v12129_v53 = vpop.eup %12128  ;;  %11444 = vmatpush3.xpose.msk.msra.mxu1 %vm262_vm2, %v4466_v47  ;;  %11445 = vmatprep.mubr.msk.f32.mxu1 %vm12288_vm0, %v12286_v0 }
0x228e   :  { %v4310_v57 = vmul.f32 %v12129_v53, %v12125_v44  ;;  %11453 = vmatprep.subr.mxu1 %v12286_v0 }
0x2290   :  { %11441 = vmatmul.mubr.msk.f32.vlgmr.msra.gmra.mrb[60].mxu0 %vm262_vm2, %v4310_v57  ;;  %11446 = vmatmul.mubr.msk.f32.vlgmr.msra.gmra.mrb[54].mxu1 %vm262_vm2, %v4464_v59 }
0x2291   :  { %11449 = vmatpush3.xpose.msk.msra.mxu0 %vm262_vm2, %v4544_v55  ;;  %11450 = vmatprep.mubr.msk.f32.mxu0 %vm12288_vm0, %v12286_v0 }
0x2292   :  { %11458 = vmatprep.subr.mxu0 %v12286_v0  ;;  %11455 = vmatprep.mubr.msk.f32.mxu1 %vm12288_vm0, %v12286_v0 }
0x2294   :  { %11451 = vmatmul.mubr.msk.f32.vlgmr.msra.gmra.mrb[62].mxu0 %vm262_vm2, %v4542_v42 }
0x2295   :  { %11460 = vmatprep.mubr.msk.f32.mxu0 %vm12288_vm0, %v12286_v0 }
0x235f   :  { %v13029_v60 = vpop.f32.mrb[52].mxu1 }
0x2360   :  { %v11437_v61 = vpop.f32.mrb[53].mxu1 }
0x2363   :  { %v13031_v62 = vpop.f32.mrb[60].mxu0  ;;  %v4537_v48 = vpop.f32.mrb[54].mxu1 }
0x2364   :  { %v11924_v63 = vpack.i.bf16 %v13031_v62, %v13029_v60  ;;  %v4619_v49 = vmul.f32 0.35355338, %v4537_v48  ;;  %v11442_v36 = vpop.f32.mrb[61].mxu0  ;;  %v11447_v32 = vpop.f32.mrb[55].mxu1 }
0x2366   :  { %v4621_v51 = vadd.f32 %v4619_v49, %v12948_v39 }
0x2367   :  { %v4615_v54 = vpop.f32.mrb[62].mxu0 }
0x2368   :  { %v4620_v1 = vmul.f32 0.35355338, %v4615_v54  ;;  %v11452_v2 = vpop.f32.mrb[63].mxu0  ;;  %v4623_v5 = vsel %vm262_vm2, %v4621_v51, -inf }
0x2369   :  { %4624 = vmax.xlane.f32.xlu0 %v4623_v5 }
0x236a   :  { %v4622_v9 = vadd.f32 %v4620_v1, %v12952_v45 }
0x236c   :  { %v4626_v10 = vsel %vm262_vm2, %v4622_v9, -inf }
0x236d   :  { %4627 = vmax.xlane.f32.xlu1 %v4626_v10 }
0x237e   :  { %4645 = vrot.lane.b32.xlu1 %v12911_v26, %s13934_s25 }
0x237f   :  { %4721 = vrot.lane.b32.xlu0 %v12916_v17, %s13934_s25  ;;  %s12327_s25 = smov 32  }
0x2380   :  { %s13408_s22 = sld [smem:[%s13921_s0 + %s12327_s25]]  }
0x2382   :  { %4799 = vrot.lane.b32.xlu1 %v12911_v26, %s13932_s26 }
0x2386   :  { %4877 = vrot.lane.b32.xlu1 %v12916_v17, %s13932_s26 }
0x238a   :  { %4875 = vrot.lane.b32.xlu1 %v12916_v17, %s13930_s27 }
0x23f6   :  { %v4625_v11 = vpop.xlane.xlu0 %4624 }
0x23f7   :  { %v4629_v15 = vsub.f32 %v4621_v51, %v4625_v11 }
0x23f9   :  { %v4631_v19 = vmul.f32 1.442695, %v4629_v15 }
0x23fa   :  { %v4722_v20 = vpop.permute.xlu0 %4721  ;;  %v4628_v22 = vpop.xlane.xlu1 %4627 }
0x23fb   :  { %12130 = vpow2.f32 %v4631_v19  ;;  %v4630_v23 = vsub.f32 %v4622_v9, %v4628_v22  ;;  %11459 = vmatpush3.msra.mxu0 %v4722_v20  ;;  %v12007_v19 = vld [vmem:[%s13104_s5 + $0x8] sm:$0xff]  }
0x23fc   :  { %11468 = vmatprep.subr.mxu0 %v12286_v0 }
0x23fd   :  { %v4633_v24 = vmul.f32 1.442695, %v4630_v23 }
0x23fe   :  { %v4646_v3 = vpop.permute.xlu1 %4645 }
0x23ff   :  { %12132 = vpow2.f32 %v4633_v24  ;;  %11454 = vmatpush3.msra.mxu1 %v4646_v3 }
0x2400   :  { %11463 = vmatprep.subr.mxu1 %v12286_v0 }
0x2402   :  { %v4800_v29 = vpop.permute.xlu1 %4799 }
0x2405   :  { %v12131_v4 = vpop.eup %12130 }
0x2406   :  { %v4635_v16 = vsel %vm262_vm2, %v12131_v4, 0.0  ;;  %v4878_v38 = vpop.permute.xlu1 %4877 }
0x2407   :  { %4636 = vadd.xlane.f32.xlu0 %v4635_v16 }
0x2409   :  { %v12133_v25 = vpop.eup %12132 }
0x240a   :  { %v4638_v27 = vsel %vm262_vm2, %v12133_v25, 0.0  ;;  %v4876_v41 = vpop.permute.xlu1 %4875 }
0x240b   :  { %4639 = vadd.xlane.f32.xlu0 %v4638_v27 }
0x2421   :  { %4797 = vrot.lane.b32.xlu0 %v12911_v26, %s13930_s27 }
0x2494   :  { %v4637_v14 = vpop.xlane.xlu0 %4636 }
0x2495   :  { %12134 = vrcp.f32 %v4637_v14 }
0x2498   :  { %v4640_v21 = vpop.xlane.xlu0 %4639 }
0x2499   :  { %12136 = vrcp.f32 %v4640_v21 }
0x249c   :  { %v4798_v40 = vpop.permute.xlu0 %4797 }
0x249f   :  { %v12135_v33 = vpop.eup %12134 }
0x24a0   :  { %v4643_v30 = vmul.f32 %v12135_v33, %v12131_v4  ;;  %v3646_v4 = vadd.f32 %v12940_v37, %v12880_v58 }
0x24a2   :  { %11456 = vmatmul.mubr.msk.f32.vlgmr.msra.gmra.mrb[56].mxu1 %vm262_vm2, %v4643_v30  ;;  %v3650_v16 = vsel %vm214_vm1, %v3646_v4, 0.0 }
0x24a3   :  { %v12137_v35 = vpop.eup %12136  ;;  %11464 = vmatpush3.xpose.msk.msra.mxu1 %vm262_vm2, %v4800_v29  ;;  %11465 = vmatprep.mubr.msk.f32.mxu1 %vm12288_vm0, %v12286_v0 }
0x24a4   :  { %v4644_v12 = vmul.f32 %v12137_v35, %v12133_v25  ;;  %11473 = vmatprep.subr.mxu1 %v12286_v0 }
0x24a6   :  { %11461 = vmatmul.mubr.msk.f32.vlgmr.msra.gmra.mrb[64].mxu0 %vm262_vm2, %v4644_v12  ;;  %11466 = vmatmul.mubr.msk.f32.vlgmr.msra.gmra.mrb[58].mxu1 %vm262_vm2, %v4798_v40 }
0x24a7   :  { %11469 = vmatpush3.xpose.msk.msra.mxu0 %vm262_vm2, %v4878_v38  ;;  %11470 = vmatprep.mubr.msk.f32.mxu0 %vm12288_vm0, %v12286_v0 }
0x24a8   :  { %11478 = vmatprep.subr.mxu0 %v12286_v0  ;;  %11475 = vmatprep.mubr.msk.f32.mxu1 %vm12288_vm0, %v12286_v0 }
0x24aa   :  { %11471 = vmatmul.mubr.msk.f32.vlgmr.msra.gmra.mrb[66].mxu0 %vm262_vm2, %v4876_v41 }
0x24ab   :  { %11480 = vmatprep.mubr.msk.f32.mxu0 %vm12288_vm0, %v12286_v0 }
0x2575   :  { %v4717_v43 = vpop.f32.mrb[56].mxu1 }
0x2576   :  { %v11457_v44 = vpop.f32.mrb[57].mxu1 }
0x2579   :  { %v4793_v31 = vpop.f32.mrb[64].mxu0  ;;  %v4871_v8 = vpop.f32.mrb[58].mxu1 }
0x257a   :  { %v11929_v46 = vpack.i.bf16 %v4793_v31, %v4717_v43  ;;  %v4953_v47 = vmul.f32 0.35355338, %v4871_v8  ;;  %v11462_v50 = vpop.f32.mrb[65].mxu0  ;;  %v11467_v52 = vpop.f32.mrb[59].mxu1  ;;  %v10705_v8 = vld [vmem:[%s13128_s10] ss:$0 sm:$0xff] }
0x257c   :  { %v4955_v53 = vadd.f32 %v4953_v47, %v12948_v39  ;;  %v3639_v39 = vadd.f32 %v12937_v34, %v12934_v28 }
0x257d   :  { %v4949_v55 = vpop.f32.mrb[66].mxu0 }
0x257e   :  { %v4954_v57 = vmul.f32 0.35355338, %v4949_v55  ;;  %v11472_v59 = vpop.f32.mrb[67].mxu0  ;;  %v4957_v42 = vsel %vm262_vm2, %v4955_v53, -inf  ;;  %v13085_v49 = vadd.f32 %v3639_v39, %v12878_v56 }
0x257f   :  { %4958 = vmax.xlane.f32.xlu0 %v4957_v42 }
0x2580   :  { %v4956_v61 = vadd.f32 %v4954_v57, %v12952_v45  ;;  %v3647_v45 = vsel %vm214_vm1, %v13085_v49, 0.0 }
0x2582   :  { %v4960_v48 = vsel %vm262_vm2, %v4956_v61, -inf }
0x2583   :  { %4961 = vmax.xlane.f32.xlu1 %v4960_v48 }
0x2594   :  { %4979 = vrot.lane.b32.xlu1 %v12911_v26, %s13951_s13 }
0x2598   :  { %11925 = vrot.lane.b32.xlu1 %v11924_v63, %s13952_s28 }
0x259c   :  { %11930 = vrot.lane.b32.xlu1 %v11929_v46, %s13953_s3 }
0x25c0   :  { %3648 = vadd.xlane.f32.xlu1 %v3647_v45 }
0x260c   :  { %v4959_v36 = vpop.xlane.xlu0 %4958 }
0x260d   :  { %v4963_v32 = vsub.f32 %v4955_v53, %v4959_v36 }
0x260f   :  { %v4965_v26 = vmul.f32 1.442695, %v4963_v32 }
0x2610   :  { %v4962_v51 = vpop.xlane.xlu1 %4961 }
0x2611   :  { %12138 = vpow2.f32 %v4965_v26  ;;  %v4964_v54 = vsub.f32 %v4956_v61, %v4962_v51  ;;  %v12009_v51 = vld [vmem:[%s12557_s8 + $0x8] sm:$0xff]  }
0x2613   :  { %v4967_v60 = vmul.f32 1.442695, %v4964_v54 }
0x2614   :  { %v4980_v62 = vpop.permute.xlu1 %4979 }
0x2615   :  { %12140 = vpow2.f32 %v4967_v60  ;;  %11474 = vmatpush3.msra.mxu1 %v4980_v62 }
0x2616   :  { %11483 = vmatprep.subr.bf16.mxu1 %v12286_v0 }
0x2618   :  { %v11926_v25 = vpop.permute.xlu1 %11925 }
0x2619   :  { %v11928_v14 = vunpack.i.h.bf16 %v11926_v25  ;;  %v11927_v21 = vunpack.i.l.bf16 %v11926_v25 }
0x261b   :  { %v12139_v28 = vpop.eup %12138  ;;  %v5156_v35 = vsel %vm262_vm2, %v12991_v18, %v11928_v14  ;;  %v5155_v38 = vsel %vm262_vm2, %v12989_v13, %v11927_v21 }
0x261c   :  { %v4969_v56 = vsel %vm262_vm2, %v12139_v28, 0.0  ;;  %v11931_v27 = vpop.permute.xlu1 %11930 }
0x261d   :  { %4970 = vadd.xlane.f32.xlu0 %v4969_v56  ;;  %v11933_v29 = vunpack.i.h.bf16 %v11931_v27  ;;  %v11932_v33 = vunpack.i.l.bf16 %v11931_v27 }
0x261f   :  { %v12141_v34 = vpop.eup %12140  ;;  %v5157_v58 = vsel %vm1632_vm3, %v5155_v38, %v11932_v33  ;;  %v5158_v37 = vsel %vm1632_vm3, %v5156_v35, %v11933_v29 }
0x2620   :  { %v4972_v63 = vsel %vm262_vm2, %v12141_v34, 0.0 }
0x2621   :  { %4973 = vadd.xlane.f32.xlu0 %v4972_v63 }
0x2637   :  { %5055 = vrot.lane.b32.xlu0 %v12916_v17, %s13951_s13  ;;  %v12006_v17 = vld [vmem:[%s13104_s5] sm:$0xff]  }
0x264d   :  { %v3649_v13 = vpop.xlane.xlu1 %3648 }
0x264e   :  { %v3653_v31 = vmul.f32 0.03125, %v3649_v13 }
0x2650   :  { %v3655_v50 = vsub.f32 %v13085_v49, %v3653_v31 }
0x2652   :  { %v3657_v45 = vmul.f32 %v3655_v50, %v3655_v50 }
0x2654   :  { %v3659_v49 = vsel %vm214_vm1, %v3657_v45, 0.0 }
0x26aa   :  { %v4971_v1 = vpop.xlane.xlu0 %4970 }
0x26ab   :  { %12142 = vrcp.f32 %v4971_v1 }
0x26ae   :  { %v4974_v2 = vpop.xlane.xlu0 %4973 }
0x26af   :  { %12144 = vrcp.f32 %v4974_v2 }
0x26b2   :  { %v5056_v5 = vpop.permute.xlu0 %5055 }
0x26b3   :  { %11479 = vmatpush3.msra.mxu0 %v5056_v5 }
0x26b4   :  { %11491 = vmatprep.subr.bf16.mxu0 %v12286_v0 }
0x26b5   :  { %v12143_v9 = vpop.eup %12142 }
0x26b6   :  { %v4977_v10 = vmul.f32 %v12143_v9, %v12139_v28 }
0x26b8   :  { %11476 = vmatmul.mubr.msk.f32.vlgmr.msra.gmra.mrb[60].mxu1 %vm262_vm2, %v4977_v10 }
0x26b9   :  { %v12145_v11 = vpop.eup %12144  ;;  %11487 = vmatprep.mubr.msk.bf16.mxu1 %vm12288_vm0, %v12286_v0  ;;  %11484 = vmatpush3.bf16.msra.mxu1 %v12006_v17 }
0x26ba   :  { %v4978_v15 = vmul.f32 %v12145_v11, %v12141_v34  ;;  %11485 = vmatprep.subr.bf16.mxu1 %v12286_v0 }
0x26bc   :  { %11481 = vmatmul.mubr.msk.f32.vlgmr.msra.gmra.mrb[68].mxu0 %vm262_vm2, %v4978_v15 }
0x26bd   :  { %11495 = vmatprep.mubr.msk.bf16.mxu0 %vm12288_vm0, %v12286_v0  ;;  %11486 = vmatpush3.bf16.msra.mxu1 %v12007_v19 }
0x26be   :  { %11499 = vmatprep.subr.bf16.mxu1 %v12286_v0 }
0x278b   :  { %v5051_v20 = vpop.f32.mrb[60].mxu1 }
0x278c   :  { %v11477_v22 = vpop.f32.mrb[61].mxu1 }
0x278f   :  { %v5127_v23 = vpop.f32.mrb[68].mxu0 }
0x2790   :  { %v11934_v24 = vpack.i.bf16 %v5127_v23, %v5051_v20  ;;  %v11482_v3 = vpop.f32.mrb[69].mxu0  ;;  %v10675_v20 = vld [vmem:[%s12656_s4 + $0x1] ss:$0 sm:$0xff]  ;;  %s13155_s4 = sld [smem:[%s13921_s0 + %s12319_s12]]   ;;  %s12323_s12 = smov 23  }
0x2792   :  { %11935 = vrot.lane.b32.xlu0 %v11934_v24, %s13954_s11 }
0x2796   :  { %v12010_v21 = vld [vmem:[%s13155_s4] sm:$0xff]   ;;  %v12011_v29 = vld [vmem:[%s13155_s4 + $0x8] sm:$0xff]  }
0x2797   :  { %11492 = vmatpush3.bf16.msra.mxu0 %v12010_v21 }
0x2798   :  { %11493 = vmatprep.subr.bf16.mxu0 %v12286_v0 }
0x279b   :  { %11494 = vmatpush3.bf16.msra.mxu0 %v12011_v29 }
0x279c   :  { %11507 = vmatprep.subr.mxu0 %v12286_v0 }
0x27b1   :  { %3651 = vadd.xlane.f32.xlu0 %v3650_v16 }
0x2804   :  { %v11936_v30 = vpop.permute.xlu0 %11935 }
0x2805   :  { %v11938_v12 = vunpack.i.h.bf16 %v11936_v30  ;;  %v11937_v40 = vunpack.i.l.bf16 %v11936_v30 }
0x2807   :  { %v5160_v41 = vsel %vm1635_vm4, %v5158_v37, %v11938_v12  ;;  %v5159_v43 = vsel %vm1635_vm4, %v5157_v58, %v11937_v40 }
0x2808   :  { %v5161_v44 = vpack.c.bf16 %v5160_v41, %v5159_v43 }
0x280a   :  { %11488 = vmatmul.mubr.msk.bf16.vlgmr.msra.gmra.mrb[64].mxu1 %vm214_vm1, %v5161_v44 }
0x280b   :  { %11503 = vmatprep.mubr.msk.bf16.mxu1 %vm12288_vm0, %v12286_v0 }
0x283e   :  { %v3652_v18 = vpop.xlane.xlu0 %3651 }
0x283f   :  { %v3654_v46 = vmul.f32 0.03125, %v3652_v18  ;;  %v10710_v18 = vld [vmem:[%s13169_s9] ss:$0 sm:$0xff] }
0x2841   :  { %v3656_v57 = vsub.f32 %v3646_v4, %v3654_v46  ;;  %v10676_v4 = vld [vmem:[%s12661_s2 + $0x1] ss:$0 sm:$0xff]  ;;  %s12320_s2 = smov 20  }
0x2842   :  { %s13164_s30 = sld [smem:[%s13921_s0 + %s12320_s2]]   ;;  %s12322_s2 = smov 25  }
0x2843   :  { %v3658_v32 = vmul.f32 %v3656_v57, %v3656_v57  ;;  %s13185_s16 = sld [smem:[%s13921_s0 + %s12322_s2]]  }
0x2844   :  { %s13198_s2 = sld [smem:[%s13921_s0 + %s12323_s12]]   ;;  %s12329_s12 = smov 29  }
0x2845   :  { %v3662_v26 = vsel %vm214_vm1, %v3658_v32, 0.0 }
0x2848   :  { %v10709_v37 = vld [vmem:[%s13164_s30] ss:$0 sm:$0xff] }
0x28dd   :  { %v5217_v47 = vpop.f32.mrb[64].mxu1 }
0x28de   :  { %v5218_v52 = vadd.f32 %v10705_v8, %v5217_v47  ;;  %v11489_v53 = vpop.f32.mrb[65].mxu1 }
0x28df   :  { %v5220_v55 = vpop.f32.mrb[66].mxu1 }
0x28e0   :  { %v5224_v59 = vadd.f32 %v5218_v52, %v12889_v6  ;;  %v5221_v42 = vadd.f32 %v10705_v8, %v5220_v55  ;;  %v11490_v61 = vpop.f32.mrb[67].mxu1  ;;  %v12008_v6 = vld [vmem:[%s12557_s8] sm:$0xff]  }
0x28e1   :  { %11500 = vmatpush3.bf16.msra.mxu1 %v12008_v6  ;;  %v10711_v61 = vld [vmem:[%s13198_s2] ss:$0 sm:$0xff] }
0x28e2   :  { %v5225_v48 = vadd.f32 %v5221_v42, %v12891_v7  ;;  %v5226_v39 = vsel %vm214_vm1, %v5224_v59, 0.0  ;;  %11501 = vmatprep.subr.bf16.mxu1 %v12286_v0 }
0x28e3   :  { %5227 = vadd.xlane.f32.xlu0 %v5226_v39 }
0x28e4   :  { %v5229_v36 = vsel %vm214_vm1, %v5225_v48, 0.0 }
0x28e5   :  { %5230 = vadd.xlane.f32.xlu1 %v5229_v36  ;;  %11502 = vmatpush3.bf16.msra.mxu1 %v12009_v51 }
0x28e6   :  { %11517 = vmatprep.subr.mxu1 %v12286_v0 }
0x28e7   :  { %3660 = vadd.xlane.f32.xlu0 %v3659_v49 }
0x28e9   :  { %3663 = vadd.xlane.f32.xlu1 %v3662_v26 }
0x2970   :  { %v5228_v7 = vpop.xlane.xlu0 %5227 }
0x2971   :  { %v5232_v54 = vmul.f32 0.03125, %v5228_v7  ;;  %v13217_v7 = vld [vmem:[%s12398_s18] ss:$0 sm:$0xff] }
0x2972   :  { %v5231_v60 = vpop.xlane.xlu1 %5230 }
0x2973   :  { %v5234_v62 = vsub.f32 %v5224_v59, %v5232_v54  ;;  %v5233_v28 = vmul.f32 0.03125, %v5231_v60 }
0x2974   :  { %v3661_v56 = vpop.xlane.xlu0 %3660 }
0x2975   :  { %v5235_v34 = vsub.f32 %v5225_v48, %v5233_v28  ;;  %v3665_v63 = vmul.f32 0.03125, %v3661_v56  ;;  %v5236_v1 = vmul.f32 %v5234_v62, %v5234_v62 }
0x2976   :  { %v3664_v2 = vpop.xlane.xlu1 %3663 }
0x2977   :  { %v3667_v5 = vadd.f32 1e-05, %v3665_v63  ;;  %v3666_v9 = vmul.f32 0.03125, %v3664_v2  ;;  %v5238_v10 = vsel %vm214_vm1, %v5236_v1, 0.0  ;;  %v5237_v11 = vmul.f32 %v5235_v34, %v5235_v34 }
0x2978   :  { %5239 = vadd.xlane.f32.xlu0 %v5238_v10 }
0x2979   :  { %12146 = vrsqrt.f32 %v3667_v5  ;;  %v3668_v15 = vadd.f32 1e-05, %v3666_v9  ;;  %v5241_v17 = vsel %vm214_vm1, %v5237_v11, 0.0 }
0x297a   :  { %5242 = vadd.xlane.f32.xlu1 %v5241_v17 }
0x297b   :  { %12148 = vrsqrt.f32 %v3668_v15 }
0x2983   :  { %v12147_v19 = vpop.eup %12146 }
0x2984   :  { %v3671_v22 = vmul.f32 %v12147_v19, %v3655_v50  ;;  %v10715_v50 = vld [vmem:[%s13185_s16] ss:$0 sm:$0xff] }
0x2985   :  { %v12149_v23 = vpop.eup %12148 }
0x2986   :  { %v3679_v24 = vmul.f32 %v10675_v20, %v3671_v22  ;;  %v3672_v3 = vmul.f32 %v12149_v23, %v3656_v57 }
0x2988   :  { %v3680_v16 = vmul.f32 %v10675_v20, %v3672_v3  ;;  %v3687_v25 = vadd.f32 %v10676_v4, %v3679_v24 }
0x298a   :  { %v3688_v27 = vadd.f32 %v10676_v4, %v3680_v16 }
0x298c   :  { %v13146_v14 = vpack.c.bf16 %v3688_v27, %v3687_v25 }
0x298e   :  { %11504 = vmatmul.mubr.msk.bf16.vlgmr.msra.gmra.mrb[68].mxu1 %vm214_vm1, %v13146_v14 }
0x298f   :  { %11519 = vmatprep.mubr.msk.f32.mxu1 %vm12288_vm0, %v12286_v0 }
0x2a05   :  { %v5240_v33 = vpop.xlane.xlu0 %5239 }
0x2a06   :  { %v5244_v30 = vmul.f32 0.03125, %v5240_v33 }
0x2a07   :  { %v5243_v35 = vpop.xlane.xlu1 %5242 }
0x2a08   :  { %v5246_v38 = vadd.f32 1e-05, %v5244_v30  ;;  %v5245_v12 = vmul.f32 0.03125, %v5243_v35 }
0x2a0a   :  { %12150 = vrsqrt.f32 %v5246_v38  ;;  %v5247_v40 = vadd.f32 1e-05, %v5245_v12 }
0x2a0c   :  { %12152 = vrsqrt.f32 %v5247_v40 }
0x2a14   :  { %v12151_v58 = vpop.eup %12150 }
0x2a15   :  { %v5250_v41 = vmul.f32 %v12151_v58, %v5234_v62 }
0x2a16   :  { %v12153_v43 = vpop.eup %12152 }
0x2a17   :  { %v5258_v44 = vmul.f32 %v10709_v37, %v5250_v41  ;;  %v5251_v13 = vmul.f32 %v12153_v43, %v5235_v34  ;;  %v13222_v34 = vld [vmem:[%s12398_s18 + $0x1] ss:$0 sm:$0xff] }
0x2a19   :  { %v5259_v31 = vmul.f32 %v10709_v37, %v5251_v13  ;;  %v13173_v8 = vadd.f32 %v10710_v18, %v5258_v44 }
0x2a1b   :  { %v13175_v46 = vadd.f32 %v10710_v18, %v5259_v31 }
0x2a1d   :  { %v5268_v47 = vpack.c.bf16 %v13175_v46, %v13173_v8 }
0x2a1f   :  { %11496 = vmatmul.mubr.msk.bf16.vlgmr.msra.gmra.mrb[72].mxu0 %vm214_vm1, %v5268_v47 }
0x2a20   :  { %11509 = vmatprep.mubr.msk.f32.mxu0 %vm12288_vm0, %v12286_v0 }
0x2a61   :  { %v5387_v52 = vpop.f32.mrb[68].mxu1 }
0x2a62   :  { %v13188_v53 = vadd.f32 %v10715_v50, %v5387_v52  ;;  %v11505_v55 = vpop.f32.mrb[69].mxu1 }
0x2a63   :  { %v5390_v57 = vpop.f32.mrb[70].mxu1 }
0x2a64   :  { %v13190_v59 = vadd.f32 %v10715_v50, %v5390_v57  ;;  %v11506_v42 = vpop.f32.mrb[71].mxu1  ;;  %11508 = vmatpush3.xpose.msk.msra.mxu0 %vm262_vm2, %v13188_v53 }
0x2a65   :  { %11512 = vmatprep.subr.mxu0 %v12286_v0 }
0x2af2   :  { %v5324_v48 = vpop.f32.mrb[72].mxu0 }
0x2af3   :  { %v13201_v39 = vadd.f32 %v10711_v61, %v5324_v48  ;;  %v11497_v45 = vpop.f32.mrb[73].mxu0 }
0x2af4   :  { %v5327_v36 = vpop.f32.mrb[74].mxu0 }
0x2af5   :  { %v11498_v32 = vpop.f32.mrb[75].mxu0  ;;  %11510 = vmatmul.mubr.msk.f32.vlgmr.msra.gmra.mrb[70].mxu0 %vm262_vm2, %v13201_v39  ;;  %v13209_v49 = vadd.f32 %v10711_v61, %v5327_v36 }
0x2af6   :  { %11513 = vmatpush3.xpose.msk.msra.mxu0 %vm262_vm2, %v13190_v59  ;;  %11514 = vmatprep.mubr.msk.f32.mxu0 %vm12288_vm0, %v12286_v0 }
0x2af7   :  { %11522 = vmatprep.subr.mxu0 %v12286_v0 }
0x2af9   :  { %11515 = vmatmul.mubr.msk.f32.vlgmr.msra.gmra.mrb[76].mxu0 %vm262_vm2, %v13209_v49 }
0x2afa   :  { %11524 = vmatprep.mubr.msk.f32.mxu0 %vm12288_vm0, %v12286_v0 }
0x2bc8   :  { %v5466_v26 = vpop.f32.mrb[70].mxu0 }
0x2bc9   :  { %v5546_v6 = vmul.f32 0.35355338, %v5466_v26  ;;  %v11511_v51 = vpop.f32.mrb[71].mxu0 }
0x2bcb   :  { %v5548_v54 = vadd.f32 %v13217_v7, %v5546_v6 }
0x2bcc   :  { %v5542_v60 = vpop.f32.mrb[76].mxu0 }
0x2bcd   :  { %v5547_v62 = vmul.f32 0.35355338, %v5542_v60  ;;  %v11516_v28 = vpop.f32.mrb[77].mxu0  ;;  %v5550_v56 = vsel %vm262_vm2, %v5548_v54, -inf }
0x2bce   :  { %5551 = vmax.xlane.f32.xlu0 %v5550_v56 }
0x2bcf   :  { %v5549_v63 = vadd.f32 %v13222_v34, %v5547_v62 }
0x2bd1   :  { %v5553_v1 = vsel %vm262_vm2, %v5549_v63, -inf }
0x2bd2   :  { %5554 = vmax.xlane.f32.xlu1 %v5553_v1 }
0x2be3   :  { %5648 = vrot.lane.b32.xlu1 %v13190_v59, %s13948_s14 }
0x2be4   :  { %5572 = vrot.lane.b32.xlu0 %v13188_v53, %s13948_s14  ;;  %s13956_s14 = smov 96  }
0x2be7   :  { %5726 = vrot.lane.b32.xlu1 %v13188_v53, %s13942_s21 }
0x2be8   :  { %5804 = vrot.lane.b32.xlu0 %v13190_v59, %s13942_s21 }
0x2c5b   :  { %v5552_v2 = vpop.xlane.xlu0 %5551 }
0x2c5c   :  { %v5556_v5 = vsub.f32 %v5548_v54, %v5552_v2 }
0x2c5e   :  { %v5558_v9 = vmul.f32 1.442695, %v5556_v5 }
0x2c5f   :  { %v5573_v10 = vpop.permute.xlu0 %5572  ;;  %v5555_v11 = vpop.xlane.xlu1 %5554 }
0x2c60   :  { %12154 = vpow2.f32 %v5558_v9  ;;  %v5557_v15 = vsub.f32 %v5549_v63, %v5555_v11  ;;  %11518 = vmatpush3.msra.mxu1 %v5573_v10 }
0x2c61   :  { %11527 = vmatprep.subr.mxu1 %v12286_v0 }
0x2c62   :  { %v5560_v17 = vmul.f32 1.442695, %v5557_v15 }
0x2c63   :  { %v5649_v19 = vpop.permute.xlu1 %5648  ;;  %v5805_v3 = vpop.permute.xlu0 %5804 }
0x2c64   :  { %12156 = vpow2.f32 %v5560_v17  ;;  %11523 = vmatpush3.msra.mxu0 %v5649_v19 }
0x2c65   :  { %11532 = vmatprep.subr.mxu0 %v12286_v0 }
0x2c67   :  { %v5727_v4 = vpop.permute.xlu1 %5726 }
0x2c6a   :  { %v12155_v20 = vpop.eup %12154 }
0x2c6b   :  { %v5562_v22 = vsel %vm262_vm2, %v12155_v20, 0.0 }
0x2c6c   :  { %5563 = vadd.xlane.f32.xlu0 %v5562_v22 }
0x2c6e   :  { %v12157_v23 = vpop.eup %12156 }
0x2c6f   :  { %v5565_v24 = vsel %vm262_vm2, %v12157_v23, 0.0 }
0x2c70   :  { %5566 = vadd.xlane.f32.xlu1 %v5565_v24 }
0x2c81   :  { %5724 = vrot.lane.b32.xlu1 %v13201_v39, %s13942_s21 }
0x2c82   :  { %5802 = vrot.lane.b32.xlu0 %v13209_v49, %s13942_s21  ;;  %s12330_s21 = smov 31  }
0x2c83   :  { %s13436_s25 = sld [smem:[%s13921_s0 + %s12330_s21]]  }
0x2cf9   :  { %v5564_v16 = vpop.xlane.xlu0 %5563 }
0x2cfa   :  { %12158 = vrcp.f32 %v5564_v16 }
0x2cfd   :  { %v5567_v25 = vpop.xlane.xlu1 %5566  ;;  %v5803_v35 = vpop.permute.xlu0 %5802 }
0x2cfe   :  { %12160 = vrcp.f32 %v5567_v25 }
0x2d01   :  { %v5725_v30 = vpop.permute.xlu1 %5724 }
0x2d04   :  { %v12159_v27 = vpop.eup %12158 }
0x2d05   :  { %v5570_v21 = vmul.f32 %v12159_v27, %v12155_v20 }
0x2d07   :  { %11520 = vmatmul.mubr.msk.f32.vlgmr.msra.gmra.mrb[62].mxu1 %vm262_vm2, %v5570_v21 }
0x2d08   :  { %v12161_v29 = vpop.eup %12160  ;;  %11528 = vmatpush3.xpose.msk.msra.mxu1 %vm262_vm2, %v5727_v4  ;;  %11529 = vmatprep.mubr.msk.f32.mxu1 %vm12288_vm0, %v12286_v0 }
0x2d09   :  { %v5571_v33 = vmul.f32 %v12161_v29, %v12157_v23  ;;  %11537 = vmatprep.subr.mxu1 %v12286_v0 }
0x2d0b   :  { %11525 = vmatmul.mubr.msk.f32.vlgmr.msra.gmra.mrb[78].mxu0 %vm262_vm2, %v5571_v33  ;;  %11530 = vmatmul.mubr.msk.f32.vlgmr.msra.gmra.mrb[72].mxu1 %vm262_vm2, %v5725_v30 }
0x2d0c   :  { %11533 = vmatpush3.xpose.msk.msra.mxu0 %vm262_vm2, %v5805_v3  ;;  %11534 = vmatprep.mubr.msk.f32.mxu0 %vm12288_vm0, %v12286_v0 }
0x2d0d   :  { %11542 = vmatprep.subr.mxu0 %v12286_v0  ;;  %11539 = vmatprep.mubr.msk.f32.mxu1 %vm12288_vm0, %v12286_v0 }
0x2d0f   :  { %11535 = vmatmul.mubr.msk.f32.vlgmr.msra.gmra.mrb[80].mxu0 %vm262_vm2, %v5803_v35 }
0x2d10   :  { %11544 = vmatprep.mubr.msk.f32.mxu0 %vm12288_vm0, %v12286_v0 }
0x2dda   :  { %v13258_v38 = vpop.f32.mrb[62].mxu1 }
0x2ddb   :  { %v11521_v12 = vpop.f32.mrb[63].mxu1 }
0x2dde   :  { %v13260_v40 = vpop.f32.mrb[78].mxu0  ;;  %v5798_v58 = vpop.f32.mrb[72].mxu1 }
0x2ddf   :  { %v5880_v37 = vmul.f32 0.35355338, %v5798_v58  ;;  %v11526_v41 = vpop.f32.mrb[79].mxu0  ;;  %v11531_v43 = vpop.f32.mrb[73].mxu1 }
0x2de1   :  { %v5882_v44 = vadd.f32 %v13217_v7, %v5880_v37 }
0x2de2   :  { %v5876_v13 = vpop.f32.mrb[80].mxu0 }
0x2de3   :  { %v5881_v18 = vmul.f32 0.35355338, %v5876_v13  ;;  %v11536_v31 = vpop.f32.mrb[81].mxu0  ;;  %v5884_v47 = vsel %vm262_vm2, %v5882_v44, -inf }
0x2de4   :  { %5885 = vmax.xlane.f32.xlu1 %v5884_v47 }
0x2de5   :  { %v5883_v50 = vadd.f32 %v13222_v34, %v5881_v18 }
0x2de7   :  { %v5887_v52 = vsel %vm262_vm2, %v5883_v50, -inf }
0x2de8   :  { %5888 = vmax.xlane.f32.xlu0 %v5887_v52 }
0x2df5   :  { %5982 = vrot.lane.b32.xlu1 %v13190_v59, %s13944_s20 }
0x2df9   :  { %6060 = vrot.lane.b32.xlu1 %v13188_v53, %s13936_s24 }
0x2dfe   :  { %5906 = vrot.lane.b32.xlu0 %v13188_v53, %s13944_s20  ;;  %s13422_s20 = sld [smem:[%s13921_s0 + %s12329_s12]]   ;;  %s12331_s12 = smov 33  }
0x2e02   :  { %6138 = vrot.lane.b32.xlu0 %v13190_v59, %s13936_s24 }
0x2e71   :  { %v5886_v55 = vpop.xlane.xlu1 %5885 }
0x2e72   :  { %v5890_v57 = vsub.f32 %v5882_v44, %v5886_v55 }
0x2e74   :  { %v5892_v42 = vmul.f32 1.442695, %v5890_v57 }
0x2e75   :  { %v5983_v61 = vpop.permute.xlu1 %5982  ;;  %v5889_v48 = vpop.xlane.xlu0 %5888 }
0x2e76   :  { %12162 = vpow2.f32 %v5892_v42  ;;  %v5891_v45 = vsub.f32 %v5883_v50, %v5889_v48  ;;  %11543 = vmatpush3.msra.mxu0 %v5983_v61 }
0x2e77   :  { %11552 = vmatprep.subr.mxu0 %v12286_v0 }
0x2e78   :  { %v5894_v36 = vmul.f32 1.442695, %v5891_v45 }
0x2e79   :  { %v5907_v32 = vpop.permute.xlu0 %5906  ;;  %v6061_v62 = vpop.permute.xlu1 %6060 }
0x2e7a   :  { %12164 = vpow2.f32 %v5894_v36  ;;  %11538 = vmatpush3.msra.mxu1 %v5907_v32 }
0x2e7b   :  { %11547 = vmatprep.subr.mxu1 %v12286_v0 }
0x2e7d   :  { %v6139_v60 = vpop.permute.xlu0 %6138 }
0x2e80   :  { %v12163_v26 = vpop.eup %12162 }
0x2e81   :  { %v5896_v6 = vsel %vm262_vm2, %v12163_v26, 0.0 }
0x2e82   :  { %5897 = vadd.xlane.f32.xlu0 %v5896_v6 }
0x2e84   :  { %v12165_v51 = vpop.eup %12164 }
0x2e85   :  { %v5899_v54 = vsel %vm262_vm2, %v12165_v51, 0.0 }
0x2e86   :  { %5900 = vadd.xlane.f32.xlu1 %v5899_v54 }
0x2e97   :  { %6058 = vrot.lane.b32.xlu1 %v13201_v39, %s13936_s24 }
0x2e98   :  { %6136 = vrot.lane.b32.xlu0 %v13209_v49, %s13936_s24  ;;  %s12332_s24 = smov 34  }
0x2e99   :  { %s13459_s21 = sld [smem:[%s13921_s0 + %s12332_s24]]   ;;  %s13960_s24 = smov 56  }
0x2f0f   :  { %v5898_v28 = vpop.xlane.xlu0 %5897 }
0x2f10   :  { %12166 = vrcp.f32 %v5898_v28 }
0x2f13   :  { %v5901_v56 = vpop.xlane.xlu1 %5900  ;;  %v6137_v10 = vpop.permute.xlu0 %6136 }
0x2f14   :  { %12168 = vrcp.f32 %v5901_v56 }
0x2f17   :  { %v6059_v9 = vpop.permute.xlu1 %6058 }
0x2f1a   :  { %v12167_v63 = vpop.eup %12166 }
0x2f1b   :  { %v5904_v1 = vmul.f32 %v12167_v63, %v12163_v26 }
0x2f1d   :  { %11540 = vmatmul.mubr.msk.f32.vlgmr.msra.gmra.mrb[74].mxu1 %vm262_vm2, %v5904_v1 }
0x2f1e   :  { %v12169_v2 = vpop.eup %12168  ;;  %11548 = vmatpush3.xpose.msk.msra.mxu1 %vm262_vm2, %v6061_v62  ;;  %11549 = vmatprep.mubr.msk.f32.mxu1 %vm12288_vm0, %v12286_v0 }
0x2f1f   :  { %v5905_v5 = vmul.f32 %v12169_v2, %v12165_v51  ;;  %11557 = vmatprep.subr.mxu1 %v12286_v0 }
0x2f21   :  { %11545 = vmatmul.mubr.msk.f32.vlgmr.msra.gmra.mrb[82].mxu0 %vm262_vm2, %v5905_v5  ;;  %11550 = vmatmul.mubr.msk.f32.vlgmr.msra.gmra.mrb[76].mxu1 %vm262_vm2, %v6059_v9 }
0x2f22   :  { %11553 = vmatpush3.xpose.msk.msra.mxu0 %vm262_vm2, %v6139_v60  ;;  %11554 = vmatprep.mubr.msk.f32.mxu0 %vm12288_vm0, %v12286_v0 }
0x2f23   :  { %11562 = vmatprep.subr.mxu0 %v12286_v0  ;;  %11559 = vmatprep.mubr.msk.f32.mxu1 %vm12288_vm0, %v12286_v0 }
0x2f25   :  { %11555 = vmatmul.mubr.msk.f32.vlgmr.msra.gmra.mrb[84].mxu0 %vm262_vm2, %v6137_v10 }
0x2f26   :  { %11564 = vmatprep.mubr.msk.f32.mxu0 %vm12288_vm0, %v12286_v0 }
0x2ff0   :  { %v13298_v11 = vpop.f32.mrb[74].mxu1 }
0x2ff1   :  { %v11541_v15 = vpop.f32.mrb[75].mxu1 }
0x2ff4   :  { %v13300_v17 = vpop.f32.mrb[82].mxu0  ;;  %v6132_v19 = vpop.f32.mrb[76].mxu1 }
0x2ff5   :  { %v11939_v20 = vpack.i.bf16 %v13300_v17, %v13298_v11  ;;  %v6214_v22 = vmul.f32 0.35355338, %v6132_v19  ;;  %v11546_v23 = vpop.f32.mrb[83].mxu0  ;;  %v11551_v24 = vpop.f32.mrb[77].mxu1 }
0x2ff7   :  { %v6216_v3 = vadd.f32 %v13217_v7, %v6214_v22 }
0x2ff8   :  { %v6210_v4 = vpop.f32.mrb[84].mxu0 }
0x2ff9   :  { %v6215_v16 = vmul.f32 0.35355338, %v6210_v4  ;;  %v11556_v25 = vpop.f32.mrb[85].mxu0  ;;  %v6218_v27 = vsel %vm262_vm2, %v6216_v3, -inf }
0x2ffa   :  { %6219 = vmax.xlane.f32.xlu1 %v6218_v27 }
0x2ffb   :  { %v6217_v21 = vadd.f32 %v13222_v34, %v6215_v16 }
0x2ffd   :  { %v6221_v29 = vsel %vm262_vm2, %v6217_v21, -inf }
0x2ffe   :  { %6222 = vmax.xlane.f32.xlu0 %v6221_v29 }
0x300b   :  { %6316 = vrot.lane.b32.xlu1 %v13190_v59, %s13938_s23 }
0x300f   :  { %6394 = vrot.lane.b32.xlu1 %v13188_v53, %s13930_s27 }
0x3014   :  { %6240 = vrot.lane.b32.xlu0 %v13188_v53, %s13938_s23  ;;  %s12328_s23 = smov 28  }
0x3018   :  { %6472 = vrot.lane.b32.xlu0 %v13190_v59, %s13930_s27 }
0x3087   :  { %v6220_v33 = vpop.xlane.xlu1 %6219 }
0x3088   :  { %v6224_v30 = vsub.f32 %v6216_v3, %v6220_v33 }
0x308a   :  { %v6226_v35 = vmul.f32 1.442695, %v6224_v30 }
0x308b   :  { %v6317_v12 = vpop.permute.xlu1 %6316  ;;  %v6223_v58 = vpop.xlane.xlu0 %6222 }
0x308c   :  { %12170 = vpow2.f32 %v6226_v35  ;;  %v6225_v37 = vsub.f32 %v6217_v21, %v6223_v58  ;;  %11563 = vmatpush3.msra.mxu0 %v6317_v12  ;;  %v12013_v21 = vld [vmem:[%s13366_s17 + $0x8] sm:$0xff]  }
0x308d   :  { %11572 = vmatprep.subr.mxu0 %v12286_v0 }
0x308e   :  { %v6228_v41 = vmul.f32 1.442695, %v6225_v37 }
0x308f   :  { %v6241_v43 = vpop.permute.xlu0 %6240  ;;  %v6395_v50 = vpop.permute.xlu1 %6394 }
0x3090   :  { %12172 = vpow2.f32 %v6228_v41  ;;  %11558 = vmatpush3.msra.mxu1 %v6241_v43 }
0x3091   :  { %11567 = vmatprep.subr.mxu1 %v12286_v0 }
0x3093   :  { %v6473_v47 = vpop.permute.xlu0 %6472 }
0x3096   :  { %v12171_v44 = vpop.eup %12170 }
0x3097   :  { %v6230_v13 = vsel %vm262_vm2, %v12171_v44, 0.0 }
0x3098   :  { %6231 = vadd.xlane.f32.xlu0 %v6230_v13 }
0x309a   :  { %v12173_v18 = vpop.eup %12172 }
0x309b   :  { %v6233_v31 = vsel %vm262_vm2, %v12173_v18, 0.0 }
0x309c   :  { %6234 = vadd.xlane.f32.xlu1 %v6233_v31 }
0x30ad   :  { %6392 = vrot.lane.b32.xlu1 %v13201_v39, %s13930_s27 }
0x30ae   :  { %6470 = vrot.lane.b32.xlu0 %v13209_v49, %s13930_s27  ;;  %s13387_s27 = sld [smem:[%s13921_s0 + %s12325_s15]]   ;;  %s12326_s15 = smov 30  }
0x3125   :  { %v6232_v52 = vpop.xlane.xlu0 %6231 }
0x3126   :  { %12174 = vrcp.f32 %v6232_v52 }
0x3129   :  { %v6235_v55 = vpop.xlane.xlu1 %6234  ;;  %v6471_v48 = vpop.permute.xlu0 %6470 }
0x312a   :  { %12176 = vrcp.f32 %v6235_v55 }
0x312d   :  { %v6393_v49 = vpop.permute.xlu1 %6392 }
0x3130   :  { %v12175_v57 = vpop.eup %12174 }
0x3131   :  { %v6238_v42 = vmul.f32 %v12175_v57, %v12171_v44 }
0x3133   :  { %11560 = vmatmul.mubr.msk.f32.vlgmr.msra.gmra.mrb[78].mxu1 %vm262_vm2, %v6238_v42 }
0x3134   :  { %v12177_v61 = vpop.eup %12176  ;;  %11568 = vmatpush3.xpose.msk.msra.mxu1 %vm262_vm2, %v6395_v50  ;;  %11569 = vmatprep.mubr.msk.f32.mxu1 %vm12288_vm0, %v12286_v0 }
0x3135   :  { %v6239_v39 = vmul.f32 %v12177_v61, %v12173_v18  ;;  %11577 = vmatprep.subr.mxu1 %v12286_v0 }
0x3137   :  { %11565 = vmatmul.mubr.msk.f32.vlgmr.msra.gmra.mrb[86].mxu0 %vm262_vm2, %v6239_v39  ;;  %11570 = vmatmul.mubr.msk.f32.vlgmr.msra.gmra.mrb[80].mxu1 %vm262_vm2, %v6393_v49 }
0x3138   :  { %11573 = vmatpush3.xpose.msk.msra.mxu0 %vm262_vm2, %v6473_v47  ;;  %11574 = vmatprep.mubr.msk.f32.mxu0 %vm12288_vm0, %v12286_v0 }
0x3139   :  { %11582 = vmatprep.subr.mxu0 %v12286_v0  ;;  %11579 = vmatprep.mubr.msk.f32.mxu1 %vm12288_vm0, %v12286_v0 }
0x313b   :  { %11575 = vmatmul.mubr.msk.f32.vlgmr.msra.gmra.mrb[88].mxu0 %vm262_vm2, %v6471_v48 }
0x313c   :  { %11584 = vmatprep.mubr.msk.f32.mxu0 %vm12288_vm0, %v12286_v0 }
0x3206   :  { %v6312_v45 = vpop.f32.mrb[78].mxu1 }
0x3207   :  { %v11561_v36 = vpop.f32.mrb[79].mxu1 }
0x320a   :  { %v6388_v32 = vpop.f32.mrb[86].mxu0  ;;  %v6466_v26 = vpop.f32.mrb[80].mxu1 }
0x320b   :  { %v11944_v6 = vpack.i.bf16 %v6388_v32, %v6312_v45  ;;  %v6548_v51 = vmul.f32 0.35355338, %v6466_v26  ;;  %v11566_v54 = vpop.f32.mrb[87].mxu0  ;;  %v11571_v60 = vpop.f32.mrb[81].mxu1 }
0x320d   :  { %v6550_v62 = vadd.f32 %v13217_v7, %v6548_v51 }
0x320e   :  { %v6544_v28 = vpop.f32.mrb[88].mxu0 }
0x320f   :  { %v6549_v56 = vmul.f32 0.35355338, %v6544_v28  ;;  %v11576_v63 = vpop.f32.mrb[89].mxu0  ;;  %v6552_v1 = vsel %vm262_vm2, %v6550_v62, -inf }
0x3210   :  { %6553 = vmax.xlane.f32.xlu1 %v6552_v1 }
0x3211   :  { %v6551_v2 = vadd.f32 %v13222_v34, %v6549_v56 }
0x3213   :  { %v6555_v5 = vsel %vm262_vm2, %v6551_v2, -inf }
0x3214   :  { %6556 = vmax.xlane.f32.xlu0 %v6555_v5 }
0x329d   :  { %v6554_v9 = vpop.xlane.xlu1 %6553 }
0x329e   :  { %v6558_v10 = vsub.f32 %v6550_v62, %v6554_v9 }
0x32a0   :  { %v6560_v15 = vmul.f32 1.442695, %v6558_v10 }
0x32a1   :  { %v6557_v19 = vpop.xlane.xlu0 %6556 }
0x32a2   :  { %12178 = vpow2.f32 %v6560_v15  ;;  %v6559_v22 = vsub.f32 %v6551_v2, %v6557_v19  ;;  %v12016_v15 = vld [vmem:[%s13408_s22] sm:$0xff]   ;;  %v12017_v19 = vld [vmem:[%s13408_s22 + $0x8] sm:$0xff]  }
0x32a4   :  { %v6562_v23 = vmul.f32 1.442695, %v6559_v22 }
0x32a6   :  { %12180 = vpow2.f32 %v6562_v23 }
0x32ac   :  { %v12179_v7 = vpop.eup %12178 }
0x32ad   :  { %v6564_v24 = vsel %vm262_vm2, %v12179_v7, 0.0 }
0x32ae   :  { %6565 = vadd.xlane.f32.xlu0 %v6564_v24 }
0x32b0   :  { %v12181_v3 = vpop.eup %12180 }
0x32b1   :  { %v6567_v4 = vsel %vm262_vm2, %v12181_v3, 0.0 }
0x32b2   :  { %6568 = vadd.xlane.f32.xlu1 %v6567_v4 }
0x32c3   :  { %6650 = vrot.lane.b32.xlu1 %v13190_v59, %s13932_s26 }
0x32c4   :  { %6574 = vrot.lane.b32.xlu0 %v13188_v53, %s13932_s26  ;;  %s13399_s26 = sld [smem:[%s13921_s0 + %s12326_s15]]  }
0x32c5   :  { %s13417_s15 = sld [smem:[%s13921_s0 + %s12328_s23]]  }
0x32c6   :  { %s13445_s23 = sld [smem:[%s13921_s0 + %s12331_s12]]   ;;  %s13961_s12 = smov 80  }
0x32c7   :  { %11940 = vrot.lane.b32.xlu1 %v11939_v20, %s13952_s28  ;;  %v12012_v20 = vld [vmem:[%s13366_s17] sm:$0xff]  }
0x32c8   :  { %11945 = vrot.lane.b32.xlu0 %v11944_v6, %s13953_s3 }
0x32ca   :  { %v12015_v10 = vld [vmem:[%s13399_s26 + $0x8] sm:$0xff]  }
0x32cc   :  { %13955 = sst [smem:[#allocation2_spill]] %s13445_s23 }
0x333b   :  { %v6566_v34 = vpop.xlane.xlu0 %6565 }
0x333c   :  { %12182 = vrcp.f32 %v6566_v34 }
0x333f   :  { %v6569_v16 = vpop.xlane.xlu1 %6568  ;;  %v6575_v25 = vpop.permute.xlu0 %6574 }
0x3340   :  { %12184 = vrcp.f32 %v6569_v16  ;;  %11578 = vmatpush3.msra.mxu1 %v6575_v25  ;;  %v10747_v25 = vld [vmem:[%s13417_s15] ss:$0 sm:$0xff] }
0x3341   :  { %11587 = vmatprep.subr.bf16.mxu1 %v12286_v0 }
0x3343   :  { %v6651_v27 = vpop.permute.xlu1 %6650  ;;  %v11946_v43 = vpop.permute.xlu0 %11945 }
0x3344   :  { %11583 = vmatpush3.msra.mxu0 %v6651_v27  ;;  %v11948_v18 = vunpack.i.h.bf16 %v11946_v43  ;;  %v11947_v31 = vunpack.i.l.bf16 %v11946_v43 }
0x3345   :  { %11595 = vmatprep.subr.bf16.mxu0 %v12286_v0 }
0x3346   :  { %v12183_v53 = vpop.eup %12182 }
0x3347   :  { %v6572_v59 = vmul.f32 %v12183_v53, %v12179_v7  ;;  %v11941_v58 = vpop.permute.xlu1 %11940 }
0x3348   :  { %v11943_v37 = vunpack.i.h.bf16 %v11941_v58  ;;  %v11942_v41 = vunpack.i.l.bf16 %v11941_v58 }
0x3349   :  { %11580 = vmatmul.mubr.msk.f32.vlgmr.msra.gmra.mrb[82].mxu1 %vm262_vm2, %v6572_v59 }
0x334a   :  { %v12185_v11 = vpop.eup %12184  ;;  %11591 = vmatprep.mubr.msk.bf16.mxu1 %vm12288_vm0, %v12286_v0  ;;  %11588 = vmatpush3.bf16.msra.mxu1 %v12012_v20  ;;  %v6751_v44 = vsel %vm262_vm2, %v13260_v40, %v11943_v37  ;;  %v6750_v13 = vsel %vm262_vm2, %v13258_v38, %v11942_v41  ;;  %v10743_v38 = vld [vmem:[%s13387_s27] ss:$0 sm:$0xff] }
0x334b   :  { %v6573_v17 = vmul.f32 %v12185_v11, %v12181_v3  ;;  %11589 = vmatprep.subr.bf16.mxu1 %v12286_v0  ;;  %v6752_v55 = vsel %vm1632_vm3, %v6750_v13, %v11947_v31  ;;  %v6753_v57 = vsel %vm1632_vm3, %v6751_v44, %v11948_v18  ;;  %v10748_v11 = vld [vmem:[%s13422_s20] ss:$0 sm:$0xff] }
0x334d   :  { %11585 = vmatmul.mubr.msk.f32.vlgmr.msra.gmra.mrb[90].mxu0 %vm262_vm2, %v6573_v17 }
0x334e   :  { %11599 = vmatprep.mubr.msk.bf16.mxu0 %vm12288_vm0, %v12286_v0  ;;  %11590 = vmatpush3.bf16.msra.mxu1 %v12013_v21 }
0x334f   :  { %11603 = vmatprep.subr.bf16.mxu1 %v12286_v0 }
0x341c   :  { %v6646_v29 = vpop.f32.mrb[82].mxu1 }
0x341d   :  { %v11581_v33 = vpop.f32.mrb[83].mxu1 }
0x341e   :  { %v12018_v33 = vld [vmem:[%s13408_s22 + $0x10] sm:$0xff]  }
0x3420   :  { %v6722_v30 = vpop.f32.mrb[90].mxu0 }
0x3421   :  { %v11949_v35 = vpack.i.bf16 %v6722_v30, %v6646_v29  ;;  %v11586_v12 = vpop.f32.mrb[91].mxu0  ;;  %v12019_v30 = vld [vmem:[%s13408_s22 + $0x18] sm:$0xff]  }
0x3423   :  { %11950 = vrot.lane.b32.xlu1 %v11949_v35, %s13954_s11  ;;  %v10749_v35 = vld [vmem:[%s13436_s25] ss:$0 sm:$0xff] }
0x3495   :  { %v11951_v47 = vpop.permute.xlu1 %11950 }
0x3496   :  { %v11953_v50 = vunpack.i.h.bf16 %v11951_v47  ;;  %v11952_v52 = vunpack.i.l.bf16 %v11951_v47  ;;  %v10753_v47 = vld [vmem:[%s13445_s23] ss:$0 sm:$0xff] }
0x3498   :  { %v6755_v42 = vsel %vm1635_vm4, %v6753_v57, %v11953_v50  ;;  %v6754_v61 = vsel %vm1635_vm4, %v6752_v55, %v11952_v52 }
0x3499   :  { %v6756_v39 = vpack.c.bf16 %v6755_v42, %v6754_v61 }
0x349b   :  { %11592 = vmatmul.mubr.msk.bf16.vlgmr.msra.gmra.mrb[84].mxu1 %vm214_vm1, %v6756_v39 }
0x349c   :  { %11611 = vmatprep.mubr.msk.bf16.mxu1 %vm12288_vm0, %v12286_v0  ;;  %11604 = vmatpush3.bf16.msra.mxu1 %v12016_v15 }
0x349d   :  { %11605 = vmatprep.subr.bf16.mxu1 %v12286_v0 }
0x34a0   :  { %11606 = vmatpush3.bf16.msra.mxu1 %v12017_v19 }
0x34a1   :  { %11607 = vmatprep.subr.bf16.mxu1 %v12286_v0 }
0x34a4   :  { %11608 = vmatpush3.bf16.msra.mxu1 %v12018_v33 }
0x34a5   :  { %11609 = vmatprep.subr.bf16.mxu1 %v12286_v0 }
0x34a8   :  { %11610 = vmatpush3.bf16.msra.mxu1 %v12019_v30 }
0x34a9   :  { %11633 = vmatprep.subr.mxu1 %v12286_v0 }
0x356e   :  { %v6812_v40 = vpop.f32.mrb[84].mxu1 }
0x356f   :  { %v6813_v49 = vadd.f32 %v10743_v38, %v6812_v40  ;;  %v11593_v48 = vpop.f32.mrb[85].mxu1 }
0x3570   :  { %v6815_v45 = vpop.f32.mrb[86].mxu1 }
0x3571   :  { %v6819_v36 = vadd.f32 %v6813_v49, %v13173_v8  ;;  %v6816_v32 = vadd.f32 %v10743_v38, %v6815_v45  ;;  %v11594_v26 = vpop.f32.mrb[87].mxu1 }
0x3573   :  { %v6820_v6 = vadd.f32 %v6816_v32, %v13175_v46  ;;  %v6821_v51 = vsel %vm214_vm1, %v6819_v36, 0.0  ;;  %v12014_v46 = vld [vmem:[%s13399_s26] sm:$0xff]  }
0x3574   :  { %6822 = vadd.xlane.f32.xlu0 %v6821_v51  ;;  %11596 = vmatpush3.bf16.msra.mxu0 %v12014_v46 }
0x3575   :  { %v6824_v54 = vsel %vm214_vm1, %v6820_v6, 0.0  ;;  %11597 = vmatprep.subr.bf16.mxu0 %v12286_v0 }
0x3576   :  { %6825 = vadd.xlane.f32.xlu1 %v6824_v54 }
0x3578   :  { %11598 = vmatpush3.bf16.msra.mxu0 %v12015_v10  ;;  %v10759_v10 = vld [vmem:[%s13459_s21] ss:$0 sm:$0xff] }
0x3579   :  { %11615 = vmatprep.subr.bf16.mxu0 %v12286_v0 }
0x3601   :  { %v6823_v60 = vpop.xlane.xlu0 %6822 }
0x3602   :  { %v6827_v62 = vmul.f32 0.03125, %v6823_v60 }
0x3603   :  { %v6826_v28 = vpop.xlane.xlu1 %6825 }
0x3604   :  { %v6829_v56 = vsub.f32 %v6819_v36, %v6827_v62  ;;  %v6828_v63 = vmul.f32 0.03125, %v6826_v28  ;;  %v12020_v28 = vld [vmem:[%s12528_s1 + $0x10] sm:$0xff]  }
0x3606   :  { %v6830_v1 = vsub.f32 %v6820_v6, %v6828_v63  ;;  %v6831_v2 = vmul.f32 %v6829_v56, %v6829_v56 }
0x3608   :  { %v6833_v5 = vsel %vm214_vm1, %v6831_v2, 0.0  ;;  %v6832_v8 = vmul.f32 %v6830_v1, %v6830_v1 }
0x3609   :  { %6834 = vadd.xlane.f32.xlu0 %v6833_v5 }
0x360a   :  { %v6836_v9 = vsel %vm214_vm1, %v6832_v8, 0.0 }
0x360d   :  { %6837 = vadd.xlane.f32.xlu0 %v6836_v9 }
0x3696   :  { %v6835_v22 = vpop.xlane.xlu0 %6834 }
0x3697   :  { %v6839_v23 = vmul.f32 0.03125, %v6835_v22 }
0x3699   :  { %v6841_v7 = vadd.f32 1e-05, %v6839_v23 }
0x369a   :  { %v6838_v24 = vpop.xlane.xlu0 %6837 }
0x369b   :  { %12186 = vrsqrt.f32 %v6841_v7  ;;  %v6840_v3 = vmul.f32 0.03125, %v6838_v24 }
0x369d   :  { %v6842_v4 = vadd.f32 1e-05, %v6840_v3 }
0x369f   :  { %12188 = vrsqrt.f32 %v6842_v4 }
0x36a5   :  { %v12187_v34 = vpop.eup %12186 }
0x36a6   :  { %v6845_v16 = vmul.f32 %v12187_v34, %v6829_v56  ;;  %v12021_v56 = vld [vmem:[%s12528_s1 + $0x18] sm:$0xff]   ;;  %s12333_s1 = smov 35  }
0x36a7   :  { %s13464_s23 = sld [smem:[%s13921_s0 + %s12333_s1]]   ;;  %s13963_s1 = smov 48  }
0x36a8   :  { %v6853_v53 = vmul.f32 %v10747_v25, %v6845_v16  ;;  %v10806_v16 = vld [vmem:[%s12908_s6 + $0x1] ss:$0 sm:$0xff]  ;;  %s13958_s6 = smov 88  }
0x36a9   :  { %v12189_v27 = vpop.eup %12188 }
0x36aa   :  { %v6846_v59 = vmul.f32 %v12189_v27, %v6830_v1  ;;  %v6861_v20 = vadd.f32 %v10748_v11, %v6853_v53 }
0x36ac   :  { %v6854_v17 = vmul.f32 %v10747_v25, %v6846_v59 }
0x36ad   :  { %v10760_v7 = vld [vmem:[%s13464_s23] ss:$0 sm:$0xff] }
0x36ae   :  { %v6862_v21 = vadd.f32 %v10748_v11, %v6854_v17 }
0x36b0   :  { %v6863_v29 = vpack.c.bf16 %v6862_v21, %v6861_v20 }
0x36b2   :  { %11600 = vmatmul.mubr.msk.bf16.vlgmr.msra.gmra.mrb[92].mxu0 %vm214_vm1, %v6863_v29 }
0x36b3   :  { %11619 = vmatprep.mubr.msk.bf16.mxu0 %vm12288_vm0, %v12286_v0  ;;  %11616 = vmatpush3.bf16.msra.mxu0 %v12020_v28 }
0x36b4   :  { %11617 = vmatprep.subr.bf16.mxu0 %v12286_v0 }
0x36b7   :  { %11618 = vmatpush3.bf16.msra.mxu0 %v12021_v56 }
0x36b8   :  { %11623 = vmatprep.subr.mxu0 %v12286_v0 }
0x3785   :  { %v6919_v12 = vpop.f32.mrb[92].mxu0 }
0x3786   :  { %v6920_v58 = vadd.f32 %v10749_v35, %v6919_v12  ;;  %v11601_v37 = vpop.f32.mrb[93].mxu0 }
0x3787   :  { %v6922_v41 = vpop.f32.mrb[94].mxu0 }
0x3788   :  { %v6923_v43 = vadd.f32 %v10749_v35, %v6922_v41  ;;  %v11602_v44 = vpop.f32.mrb[95].mxu0  ;;  %v6926_v13 = vmax.f32 %v6920_v58, 0.0  ;;  %v13499_v35 = vld [vmem:[%s12945_s29] sm:$0xff] }
0x3789   :  { %v13504_v44 = vld [vmem:[%s12945_s29 + $0x8] sm:$0xff]  ;;  %s13959_s29 = smov 120  }
0x378a   :  { %v6927_v18 = vmax.f32 %v6923_v43, 0.0 }
0x378c   :  { %v6928_v31 = vpack.c.bf16 %v6927_v18, %v6926_v13 }
0x378e   :  { %11612 = vmatmul.mubr.msk.bf16.vlgmr.msra.gmra.mrb[88].mxu1 %vm1842_vm5, %v6928_v31 }
0x378f   :  { %11635 = vmatprep.mubr.msk.f32.mxu1 %vm12288_vm0, %v12286_v0 }
0x3861   :  { %v6996_v50 = vpop.f32.mrb[88].mxu1 }
0x3862   :  { %v6997_v52 = vadd.f32 %v10753_v47, %v6996_v50  ;;  %v11613_v55 = vpop.f32.mrb[89].mxu1 }
0x3863   :  { %v6999_v57 = vpop.f32.mrb[90].mxu1 }
0x3864   :  { %v7003_v42 = vadd.f32 %v6997_v52, %v6861_v20  ;;  %v7000_v61 = vadd.f32 %v10753_v47, %v6999_v57  ;;  %v11614_v39 = vpop.f32.mrb[91].mxu1 }
0x3866   :  { %v7004_v38 = vadd.f32 %v7000_v61, %v6862_v21  ;;  %v7005_v40 = vsel %vm214_vm1, %v7003_v42, 0.0 }
0x3867   :  { %7006 = vadd.xlane.f32.xlu1 %v7005_v40 }
0x3868   :  { %v7008_v49 = vsel %vm214_vm1, %v7004_v38, 0.0 }
0x3869   :  { %7009 = vadd.xlane.f32.xlu0 %v7008_v49 }
0x38f4   :  { %v7007_v48 = vpop.xlane.xlu1 %7006 }
0x38f5   :  { %v7011_v45 = vmul.f32 0.03125, %v7007_v48 }
0x38f6   :  { %v7010_v36 = vpop.xlane.xlu0 %7009 }
0x38f7   :  { %v7013_v32 = vsub.f32 %v7003_v42, %v7011_v45  ;;  %v7012_v26 = vmul.f32 0.03125, %v7010_v36 }
0x38f9   :  { %v7014_v6 = vsub.f32 %v7004_v38, %v7012_v26  ;;  %v7015_v51 = vmul.f32 %v7013_v32, %v7013_v32 }
0x38fb   :  { %v7017_v54 = vsel %vm214_vm1, %v7015_v51, 0.0  ;;  %v7016_v60 = vmul.f32 %v7014_v6, %v7014_v6 }
0x38fc   :  { %7018 = vadd.xlane.f32.xlu1 %v7017_v54 }
0x38fd   :  { %v7020_v62 = vsel %vm214_vm1, %v7016_v60, 0.0 }
0x38fe   :  { %7021 = vadd.xlane.f32.xlu0 %v7020_v62 }
0x3989   :  { %v7019_v63 = vpop.xlane.xlu1 %7018 }
0x398a   :  { %v7023_v1 = vmul.f32 0.03125, %v7019_v63 }
0x398b   :  { %v7022_v2 = vpop.xlane.xlu0 %7021 }
0x398c   :  { %v7025_v5 = vadd.f32 1e-05, %v7023_v1  ;;  %v7024_v8 = vmul.f32 0.03125, %v7022_v2 }
0x398e   :  { %12190 = vrsqrt.f32 %v7025_v5  ;;  %v7026_v9 = vadd.f32 1e-05, %v7024_v8 }
0x3990   :  { %12192 = vrsqrt.f32 %v7026_v9 }
0x3998   :  { %v12191_v46 = vpop.eup %12190 }
0x3999   :  { %v7029_v15 = vmul.f32 %v12191_v46, %v7013_v32 }
0x399a   :  { %v12193_v19 = vpop.eup %12192 }
0x399b   :  { %v7037_v22 = vmul.f32 %v10759_v10, %v7029_v15  ;;  %v7030_v23 = vmul.f32 %v12193_v19, %v7014_v6 }
0x399d   :  { %v7038_v24 = vmul.f32 %v10759_v10, %v7030_v23  ;;  %v13468_v3 = vadd.f32 %v10760_v7, %v7037_v22 }
0x399f   :  { %v13470_v4 = vadd.f32 %v10760_v7, %v7038_v24 }
0x39a1   :  { %v7112_v34 = vpack.c.bf16 %v13470_v4, %v13468_v3 }
0x39a3   :  { %11620 = vmatmul.mubr.msk.bf16.vlgmr.msra.gmra.mrb[96].mxu0 %vm214_vm1, %v7112_v34 }
0x39a4   :  { %11625 = vmatprep.mubr.msk.f32.mxu0 %vm12288_vm0, %v12286_v0 }
0x3a76   :  { %v7168_v25 = vpop.f32.mrb[96].mxu0 }
0x3a77   :  { %v13478_v27 = vadd.f32 %v10806_v16, %v7168_v25  ;;  %v11621_v53 = vpop.f32.mrb[97].mxu0 }
0x3a78   :  { %v7171_v59 = vpop.f32.mrb[98].mxu0 }
0x3a79   :  { %v13480_v11 = vadd.f32 %v10806_v16, %v7171_v59  ;;  %7176 = vrot.lane.b32.xlu1 %v13478_v27, %s13956_s14  ;;  %v11622_v17 = vpop.f32.mrb[99].mxu0 }
0x3a7b   :  { %7253 = vrot.lane.b32.xlu0 %v13480_v11, %s13956_s14 }
0x3aeb   :  { %v7177_v20 = vpop.permute.xlu1 %7176 }
0x3aec   :  { %11624 = vmatpush3.xpose.msk.msra.mxu0 %vm262_vm2, %v7177_v20 }
0x3aed   :  { %11628 = vmatprep.subr.mxu0 %v12286_v0  ;;  %v7254_v21 = vpop.permute.xlu0 %7253 }
0x3aef   :  { %11626 = vmatmul.mubr.msk.f32.vlgmr.msra.gmra.mrb[100].mxu0 %vm262_vm2, %v13478_v27 }
0x3af0   :  { %11629 = vmatpush3.xpose.msk.msra.mxu0 %vm262_vm2, %v7254_v21  ;;  %11630 = vmatprep.mubr.msk.f32.mxu0 %vm12288_vm0, %v12286_v0 }
0x3af1   :  { %11638 = vmatprep.subr.mxu0 %v12286_v0 }
0x3af3   :  { %11631 = vmatmul.mubr.msk.f32.vlgmr.msra.gmra.mrb[102].mxu0 %vm262_vm2, %v13480_v11 }
0x3af4   :  { %11640 = vmatprep.mubr.msk.f32.mxu0 %vm12288_vm0, %v12286_v0 }
0x3bc2   :  { %v7248_v29 = vpop.f32.mrb[100].mxu0 }
0x3bc3   :  { %v7329_v33 = vmul.f32 0.35355338, %v7248_v29  ;;  %v11627_v30 = vpop.f32.mrb[101].mxu0 }
0x3bc5   :  { %v7331_v12 = vadd.f32 %v13499_v35, %v7329_v33 }
0x3bc6   :  { %v7325_v58 = vpop.f32.mrb[102].mxu0 }
0x3bc7   :  { %v7330_v37 = vmul.f32 0.35355338, %v7325_v58  ;;  %v11632_v41 = vpop.f32.mrb[103].mxu0  ;;  %v7333_v43 = vsel %vm262_vm2, %v7331_v12, -inf }
0x3bc8   :  { %7334 = vmax.xlane.f32.xlu1 %v7333_v43 }
0x3bc9   :  { %v7332_v13 = vadd.f32 %v13504_v44, %v7330_v37 }
0x3bcb   :  { %v7336_v18 = vsel %vm262_vm2, %v7332_v13, -inf }
0x3bcc   :  { %7337 = vmax.xlane.f32.xlu0 %v7336_v18 }
0x3bd9   :  { %7355 = vrot.lane.b32.xlu1 %v13478_v27, %s13957_s19 }
0x3bdd   :  { %7509 = vrot.lane.b32.xlu1 %v13478_v27, %s13958_s6 }
0x3be1   :  { %7587 = vrot.lane.b32.xlu1 %v13480_v11, %s13958_s6 }
0x3be2   :  { %7431 = vrot.lane.b32.xlu0 %v13480_v11, %s13957_s19  ;;  %s13964_s19 = smov 72  }
0x3c55   :  { %v7335_v31 = vpop.xlane.xlu1 %7334 }
0x3c56   :  { %v7339_v47 = vsub.f32 %v7331_v12, %v7335_v31 }
0x3c58   :  { %v7341_v50 = vmul.f32 1.442695, %v7339_v47 }
0x3c59   :  { %v7356_v52 = vpop.permute.xlu1 %7355  ;;  %v7338_v55 = vpop.xlane.xlu0 %7337 }
0x3c5a   :  { %12194 = vpow2.f32 %v7341_v50  ;;  %v7340_v57 = vsub.f32 %v7332_v13, %v7338_v55  ;;  %11634 = vmatpush3.msra.mxu1 %v7356_v52 }
0x3c5b   :  { %11643 = vmatprep.subr.mxu1 %v12286_v0 }
0x3c5c   :  { %v7343_v42 = vmul.f32 1.442695, %v7340_v57 }
0x3c5d   :  { %v7432_v61 = vpop.permute.xlu0 %7431  ;;  %v7510_v48 = vpop.permute.xlu1 %7509 }
0x3c5e   :  { %12196 = vpow2.f32 %v7343_v42  ;;  %11639 = vmatpush3.msra.mxu0 %v7432_v61 }
0x3c5f   :  { %11648 = vmatprep.subr.mxu0 %v12286_v0 }
0x3c61   :  { %v7588_v45 = vpop.permute.xlu1 %7587 }
0x3c64   :  { %v12195_v39 = vpop.eup %12194 }
0x3c65   :  { %v7345_v38 = vsel %vm262_vm2, %v12195_v39, 0.0 }
0x3c66   :  { %7346 = vadd.xlane.f32.xlu1 %v7345_v38 }
0x3c68   :  { %v12197_v40 = vpop.eup %12196 }
0x3c69   :  { %v7348_v49 = vsel %vm262_vm2, %v12197_v40, 0.0 }
0x3c6a   :  { %7349 = vadd.xlane.f32.xlu0 %v7348_v49 }
0x3c77   :  { %7585 = vrot.lane.b32.xlu1 %v13480_v11, %s13959_s29 }
0x3c80   :  { %7507 = vrot.lane.b32.xlu0 %v13478_v27, %s13959_s29 }
0x3cf3   :  { %v7347_v36 = vpop.xlane.xlu1 %7346 }
0x3cf4   :  { %12198 = vrcp.f32 %v7347_v36 }
0x3cf7   :  { %v7350_v32 = vpop.xlane.xlu0 %7349  ;;  %v7586_v62 = vpop.permute.xlu1 %7585 }
0x3cf8   :  { %12200 = vrcp.f32 %v7350_v32 }
0x3cfb   :  { %v7508_v60 = vpop.permute.xlu0 %7507 }
0x3cfe   :  { %v12199_v26 = vpop.eup %12198 }
0x3cff   :  { %v7353_v6 = vmul.f32 %v12199_v26, %v12195_v39 }
0x3d01   :  { %11636 = vmatmul.mubr.msk.f32.vlgmr.msra.gmra.mrb[92].mxu1 %vm262_vm2, %v7353_v6 }
0x3d02   :  { %v12201_v51 = vpop.eup %12200  ;;  %11644 = vmatpush3.xpose.msk.msra.mxu1 %vm262_vm2, %v7510_v48  ;;  %11645 = vmatprep.mubr.msk.f32.mxu1 %vm12288_vm0, %v12286_v0 }
0x3d03   :  { %v7354_v54 = vmul.f32 %v12201_v51, %v12197_v40  ;;  %11653 = vmatprep.subr.mxu1 %v12286_v0 }
0x3d05   :  { %11641 = vmatmul.mubr.msk.f32.vlgmr.msra.gmra.mrb[104].mxu0 %vm262_vm2, %v7354_v54  ;;  %11646 = vmatmul.mubr.msk.f32.vlgmr.msra.gmra.mrb[94].mxu1 %vm262_vm2, %v7508_v60 }
0x3d06   :  { %11649 = vmatpush3.xpose.msk.msra.mxu0 %vm262_vm2, %v7588_v45  ;;  %11650 = vmatprep.mubr.msk.f32.mxu0 %vm12288_vm0, %v12286_v0 }
0x3d07   :  { %11658 = vmatprep.subr.mxu0 %v12286_v0  ;;  %11655 = vmatprep.mubr.msk.f32.mxu1 %vm12288_vm0, %v12286_v0 }
0x3d09   :  { %11651 = vmatmul.mubr.msk.f32.vlgmr.msra.gmra.mrb[106].mxu0 %vm262_vm2, %v7586_v62 }
0x3d0a   :  { %11660 = vmatprep.mubr.msk.f32.mxu0 %vm12288_vm0, %v12286_v0 }
0x3dd4   :  { %v13540_v28 = vpop.f32.mrb[92].mxu1 }
0x3dd5   :  { %v11637_v56 = vpop.f32.mrb[93].mxu1 }
0x3dd8   :  { %v13542_v63 = vpop.f32.mrb[104].mxu0  ;;  %v7581_v1 = vpop.f32.mrb[94].mxu1 }
0x3dd9   :  { %v7663_v2 = vmul.f32 0.35355338, %v7581_v1  ;;  %v11642_v5 = vpop.f32.mrb[105].mxu0  ;;  %v11647_v8 = vpop.f32.mrb[95].mxu1 }
0x3ddb   :  { %v7665_v9 = vadd.f32 %v13499_v35, %v7663_v2 }
0x3ddc   :  { %v7659_v46 = vpop.f32.mrb[106].mxu0 }
0x3ddd   :  { %v7664_v10 = vmul.f32 0.35355338, %v7659_v46  ;;  %v11652_v15 = vpop.f32.mrb[107].mxu0  ;;  %v7667_v19 = vsel %vm262_vm2, %v7665_v9, -inf }
0x3dde   :  { %7668 = vmax.xlane.f32.xlu0 %v7667_v19 }
0x3ddf   :  { %v7666_v22 = vadd.f32 %v13504_v44, %v7664_v10 }
0x3de1   :  { %v7670_v23 = vsel %vm262_vm2, %v7666_v22, -inf }
0x3de2   :  { %7671 = vmax.xlane.f32.xlu1 %v7670_v23 }
0x3df3   :  { %7689 = vrot.lane.b32.xlu1 %v13478_v27, %s13960_s24 }
0x3df4   :  { %7765 = vrot.lane.b32.xlu0 %v13480_v11, %s13960_s24  ;;  %s13965_s24 = smov 104  }
0x3df7   :  { %7843 = vrot.lane.b32.xlu1 %v13478_v27, %s13961_s12 }
0x3dfb   :  { %7921 = vrot.lane.b32.xlu1 %v13480_v11, %s13961_s12 }
0x3dff   :  { %7919 = vrot.lane.b32.xlu1 %v13480_v11, %s13962_s7 }
0x3e6b   :  { %v7669_v7 = vpop.xlane.xlu0 %7668 }
0x3e6c   :  { %v7673_v24 = vsub.f32 %v7665_v9, %v7669_v7 }
0x3e6e   :  { %v7675_v34 = vmul.f32 1.442695, %v7673_v24 }
0x3e6f   :  { %v7766_v16 = vpop.permute.xlu0 %7765  ;;  %v7672_v25 = vpop.xlane.xlu1 %7671 }
0x3e70   :  { %12202 = vpow2.f32 %v7675_v34  ;;  %v7674_v53 = vsub.f32 %v7666_v22, %v7672_v25  ;;  %11659 = vmatpush3.msra.mxu0 %v7766_v16 }
0x3e71   :  { %11668 = vmatprep.subr.mxu0 %v12286_v0 }
0x3e72   :  { %v7677_v59 = vmul.f32 1.442695, %v7674_v53 }
0x3e73   :  { %v7690_v17 = vpop.permute.xlu1 %7689 }
0x3e74   :  { %12204 = vpow2.f32 %v7677_v59  ;;  %11654 = vmatpush3.msra.mxu1 %v7690_v17 }
0x3e75   :  { %11663 = vmatprep.subr.mxu1 %v12286_v0 }
0x3e77   :  { %v7844_v58 = vpop.permute.xlu1 %7843 }
0x3e7a   :  { %v12203_v20 = vpop.eup %12202 }
0x3e7b   :  { %v7679_v21 = vsel %vm262_vm2, %v12203_v20, 0.0  ;;  %v7922_v13 = vpop.permute.xlu1 %7921 }
0x3e7c   :  { %7680 = vadd.xlane.f32.xlu0 %v7679_v21 }
0x3e7e   :  { %v12205_v29 = vpop.eup %12204 }
0x3e7f   :  { %v7682_v33 = vsel %vm262_vm2, %v12205_v29, 0.0  ;;  %v7920_v47 = vpop.permute.xlu1 %7919 }
0x3e80   :  { %7683 = vadd.xlane.f32.xlu0 %v7682_v33 }
0x3e96   :  { %7841 = vrot.lane.b32.xlu0 %v13478_v27, %s13962_s7 }
0x3f09   :  { %v7681_v30 = vpop.xlane.xlu0 %7680 }
0x3f0a   :  { %12206 = vrcp.f32 %v7681_v30 }
0x3f0d   :  { %v7684_v12 = vpop.xlane.xlu0 %7683 }
0x3f0e   :  { %12208 = vrcp.f32 %v7684_v12 }
0x3f11   :  { %v7842_v31 = vpop.permute.xlu0 %7841 }
0x3f14   :  { %v12207_v37 = vpop.eup %12206 }
0x3f15   :  { %v7687_v41 = vmul.f32 %v12207_v37, %v12203_v20 }
0x3f17   :  { %11656 = vmatmul.mubr.msk.f32.vlgmr.msra.gmra.mrb[96].mxu1 %vm262_vm2, %v7687_v41 }
0x3f18   :  { %v12209_v43 = vpop.eup %12208  ;;  %11664 = vmatpush3.xpose.msk.msra.mxu1 %vm262_vm2, %v7844_v58  ;;  %11665 = vmatprep.mubr.msk.f32.mxu1 %vm12288_vm0, %v12286_v0 }
0x3f19   :  { %v7688_v18 = vmul.f32 %v12209_v43, %v12205_v29  ;;  %11673 = vmatprep.subr.mxu1 %v12286_v0 }
0x3f1b   :  { %11661 = vmatmul.mubr.msk.f32.vlgmr.msra.gmra.mrb[108].mxu0 %vm262_vm2, %v7688_v18  ;;  %11666 = vmatmul.mubr.msk.f32.vlgmr.msra.gmra.mrb[98].mxu1 %vm262_vm2, %v7842_v31 }
0x3f1c   :  { %11669 = vmatpush3.xpose.msk.msra.mxu0 %vm262_vm2, %v7922_v13  ;;  %11670 = vmatprep.mubr.msk.f32.mxu0 %vm12288_vm0, %v12286_v0 }
0x3f1d   :  { %11678 = vmatprep.subr.mxu0 %v12286_v0  ;;  %11675 = vmatprep.mubr.msk.f32.mxu1 %vm12288_vm0, %v12286_v0 }
0x3f1f   :  { %11671 = vmatmul.mubr.msk.f32.vlgmr.msra.gmra.mrb[110].mxu0 %vm262_vm2, %v7920_v47 }
0x3f20   :  { %11680 = vmatprep.mubr.msk.f32.mxu0 %vm12288_vm0, %v12286_v0 }
0x3fea   :  { %v13580_v50 = vpop.f32.mrb[96].mxu1 }
0x3feb   :  { %v11657_v52 = vpop.f32.mrb[97].mxu1 }
0x3fee   :  { %v13582_v55 = vpop.f32.mrb[108].mxu0  ;;  %v7915_v57 = vpop.f32.mrb[98].mxu1 }
0x3fef   :  { %v11954_v42 = vpack.i.bf16 %v13582_v55, %v13580_v50  ;;  %v7997_v61 = vmul.f32 0.35355338, %v7915_v57  ;;  %v11662_v39 = vpop.f32.mrb[109].mxu0  ;;  %v11667_v38 = vpop.f32.mrb[99].mxu1 }
0x3ff1   :  { %v7999_v40 = vadd.f32 %v13499_v35, %v7997_v61 }
0x3ff2   :  { %v7993_v49 = vpop.f32.mrb[110].mxu0 }
0x3ff3   :  { %v7998_v48 = vmul.f32 0.35355338, %v7993_v49  ;;  %v11672_v45 = vpop.f32.mrb[111].mxu0  ;;  %v8001_v36 = vsel %vm262_vm2, %v7999_v40, -inf }
0x3ff4   :  { %8002 = vmax.xlane.f32.xlu0 %v8001_v36 }
0x3ff5   :  { %v8000_v32 = vadd.f32 %v13504_v44, %v7998_v48 }
0x3ff7   :  { %v8004_v26 = vsel %vm262_vm2, %v8000_v32, -inf }
0x3ff8   :  { %8005 = vmax.xlane.f32.xlu1 %v8004_v26 }
0x4009   :  { %8023 = vrot.lane.b32.xlu1 %v13478_v27, %s13963_s1 }
0x400a   :  { %8099 = vrot.lane.b32.xlu0 %v13480_v11, %s13963_s1 }
0x400d   :  { %8177 = vrot.lane.b32.xlu1 %v13478_v27, %s13964_s19 }
0x4011   :  { %8255 = vrot.lane.b32.xlu1 %v13480_v11, %s13964_s19 }
0x4015   :  { %8253 = vrot.lane.b32.xlu1 %v13480_v11, %s13965_s24 }
0x4081   :  { %v8003_v6 = vpop.xlane.xlu0 %8002 }
0x4082   :  { %v8007_v51 = vsub.f32 %v7999_v40, %v8003_v6 }
0x4084   :  { %v8009_v54 = vmul.f32 1.442695, %v8007_v51 }
0x4085   :  { %v8100_v60 = vpop.permute.xlu0 %8099  ;;  %v8006_v62 = vpop.xlane.xlu1 %8005 }
0x4086   :  { %12210 = vpow2.f32 %v8009_v54  ;;  %v8008_v56 = vsub.f32 %v8000_v32, %v8006_v62  ;;  %11679 = vmatpush3.msra.mxu0 %v8100_v60  ;;  %v12023_v32 = vld [vmem:[%s13104_s5 + $0x18] sm:$0xff]  }
0x4087   :  { %11688 = vmatprep.subr.mxu0 %v12286_v0 }
0x4088   :  { %v8011_v1 = vmul.f32 1.442695, %v8008_v56 }
0x4089   :  { %v8024_v2 = vpop.permute.xlu1 %8023 }
0x408a   :  { %12212 = vpow2.f32 %v8011_v1  ;;  %11674 = vmatpush3.msra.mxu1 %v8024_v2 }
0x408b   :  { %11683 = vmatprep.subr.mxu1 %v12286_v0 }
0x408d   :  { %v8178_v19 = vpop.permute.xlu1 %8177 }
0x4090   :  { %v12211_v5 = vpop.eup %12210 }
0x4091   :  { %v8013_v8 = vsel %vm262_vm2, %v12211_v5, 0.0  ;;  %v8256_v24 = vpop.permute.xlu1 %8255 }
0x4092   :  { %8014 = vadd.xlane.f32.xlu0 %v8013_v8 }
0x4094   :  { %v12213_v9 = vpop.eup %12212 }
0x4095   :  { %v8016_v46 = vsel %vm262_vm2, %v12213_v9, 0.0  ;;  %v8254_v25 = vpop.permute.xlu1 %8253 }
0x4096   :  { %8017 = vadd.xlane.f32.xlu0 %v8016_v46 }
0x40ac   :  { %8175 = vrot.lane.b32.xlu0 %v13478_v27, %s13965_s24 }
0x411f   :  { %v8015_v10 = vpop.xlane.xlu0 %8014 }
0x4120   :  { %12214 = vrcp.f32 %v8015_v10 }
0x4123   :  { %v8018_v15 = vpop.xlane.xlu0 %8017 }
0x4124   :  { %12216 = vrcp.f32 %v8018_v15 }
0x4127   :  { %v8176_v16 = vpop.permute.xlu0 %8175 }
0x412a   :  { %v12215_v22 = vpop.eup %12214 }
0x412b   :  { %v8021_v23 = vmul.f32 %v12215_v22, %v12211_v5 }
0x412d   :  { %11676 = vmatmul.mubr.msk.f32.vlgmr.msra.gmra.mrb[100].mxu1 %vm262_vm2, %v8021_v23 }
0x412e   :  { %v12217_v7 = vpop.eup %12216  ;;  %11684 = vmatpush3.xpose.msk.msra.mxu1 %vm262_vm2, %v8178_v19  ;;  %11685 = vmatprep.mubr.msk.f32.mxu1 %vm12288_vm0, %v12286_v0 }
0x412f   :  { %v8022_v34 = vmul.f32 %v12217_v7, %v12213_v9  ;;  %11693 = vmatprep.subr.mxu1 %v12286_v0 }
0x4131   :  { %11681 = vmatmul.mubr.msk.f32.vlgmr.msra.gmra.mrb[112].mxu0 %vm262_vm2, %v8022_v34  ;;  %11686 = vmatmul.mubr.msk.f32.vlgmr.msra.gmra.mrb[102].mxu1 %vm262_vm2, %v8176_v16  ;;  %v12024_v34 = vld [vmem:[%s12557_s8 + $0x10] sm:$0xff]  }
0x4132   :  { %11689 = vmatpush3.xpose.msk.msra.mxu0 %vm262_vm2, %v8256_v24  ;;  %11690 = vmatprep.mubr.msk.f32.mxu0 %vm12288_vm0, %v12286_v0 }
0x4133   :  { %11698 = vmatprep.subr.mxu0 %v12286_v0  ;;  %11695 = vmatprep.mubr.msk.f32.mxu1 %vm12288_vm0, %v12286_v0 }
0x4135   :  { %11691 = vmatmul.mubr.msk.f32.vlgmr.msra.gmra.mrb[114].mxu0 %vm262_vm2, %v8254_v25 }
0x4136   :  { %11700 = vmatprep.mubr.msk.f32.mxu0 %vm12288_vm0, %v12286_v0 }
0x4200   :  { %v8095_v53 = vpop.f32.mrb[100].mxu1 }
0x4201   :  { %v11677_v59 = vpop.f32.mrb[101].mxu1 }
0x4204   :  { %v8171_v17 = vpop.f32.mrb[112].mxu0  ;;  %v8249_v20 = vpop.f32.mrb[102].mxu1 }
0x4205   :  { %v11959_v21 = vpack.i.bf16 %v8171_v17, %v8095_v53  ;;  %v8331_v29 = vmul.f32 0.35355338, %v8249_v20  ;;  %v11682_v33 = vpop.f32.mrb[113].mxu0  ;;  %v11687_v30 = vpop.f32.mrb[103].mxu1 }
0x4207   :  { %v8333_v12 = vadd.f32 %v13499_v35, %v8331_v29 }
0x4208   :  { %v8327_v58 = vpop.f32.mrb[114].mxu0 }
0x4209   :  { %v8332_v37 = vmul.f32 0.35355338, %v8327_v58  ;;  %v11692_v41 = vpop.f32.mrb[115].mxu0  ;;  %v8335_v43 = vsel %vm262_vm2, %v8333_v12, -inf }
0x420a   :  { %8336 = vmax.xlane.f32.xlu0 %v8335_v43 }
0x420b   :  { %v8334_v13 = vadd.f32 %v13504_v44, %v8332_v37  ;;  %v10844_v37 = vld [vmem:[%s13185_s16 + $0x1] ss:$0 sm:$0xff] }
0x420d   :  { %v8338_v18 = vsel %vm262_vm2, %v8334_v13, -inf }
0x420e   :  { %8339 = vmax.xlane.f32.xlu1 %v8338_v18 }
0x421f   :  { %8357 = vrot.lane.b32.xlu1 %v13478_v27, %s13951_s13 }
0x4223   :  { %11955 = vrot.lane.b32.xlu1 %v11954_v42, %s13952_s28 }
0x4227   :  { %11960 = vrot.lane.b32.xlu1 %v11959_v21, %s13953_s3 }
0x4297   :  { %v8337_v35 = vpop.xlane.xlu0 %8336 }
0x4298   :  { %v8341_v31 = vsub.f32 %v8333_v12, %v8337_v35 }
0x429a   :  { %v8343_v47 = vmul.f32 1.442695, %v8341_v31 }
0x429b   :  { %v8340_v52 = vpop.xlane.xlu1 %8339 }
0x429c   :  { %12218 = vpow2.f32 %v8343_v47  ;;  %v8342_v57 = vsub.f32 %v8334_v13, %v8340_v52 }
0x429e   :  { %v8345_v44 = vmul.f32 1.442695, %v8342_v57 }
0x429f   :  { %v8358_v61 = vpop.permute.xlu1 %8357 }
0x42a0   :  { %12220 = vpow2.f32 %v8345_v44  ;;  %11694 = vmatpush3.msra.mxu1 %v8358_v61 }
0x42a1   :  { %11703 = vmatprep.subr.bf16.mxu1 %v12286_v0 }
0x42a3   :  { %v11956_v62 = vpop.permute.xlu1 %11955 }
0x42a4   :  { %v11958_v1 = vunpack.i.h.bf16 %v11956_v62  ;;  %v11957_v2 = vunpack.i.l.bf16 %v11956_v62 }
0x42a6   :  { %v12219_v27 = vpop.eup %12218  ;;  %v8534_v46 = vsel %vm262_vm2, %v13542_v63, %v11958_v1  ;;  %v8533_v10 = vsel %vm262_vm2, %v13540_v28, %v11957_v2  ;;  %v12025_v63 = vld [vmem:[%s12557_s8 + $0x18] sm:$0xff]   ;;  %v10834_v28 = vld [vmem:[%s13128_s10 + $0x1] ss:$0 sm:$0xff]  ;;  %s12335_s8 = smov 37  }
0x42a7   :  { %v8347_v39 = vsel %vm262_vm2, %v12219_v27, 0.0  ;;  %v11961_v56 = vpop.permute.xlu1 %11960  ;;  %v10840_v1 = vld [vmem:[%s13198_s2 + $0x1] ss:$0 sm:$0xff] }
0x42a8   :  { %8348 = vadd.xlane.f32.xlu0 %v8347_v39  ;;  %v11963_v5 = vunpack.i.h.bf16 %v11961_v56  ;;  %v11962_v8 = vunpack.i.l.bf16 %v11961_v56  ;;  %v12027_v39 = vld [vmem:[%s13155_s4 + $0x18] sm:$0xff]  }
0x42aa   :  { %v12221_v50 = vpop.eup %12220  ;;  %v8535_v22 = vsel %vm1632_vm3, %v8533_v10, %v11962_v8  ;;  %v8536_v23 = vsel %vm1632_vm3, %v8534_v46, %v11963_v5 }
0x42ab   :  { %v8350_v55 = vsel %vm262_vm2, %v12221_v50, 0.0 }
0x42ac   :  { %8351 = vadd.xlane.f32.xlu0 %v8350_v55 }
0x42c2   :  { %8433 = vrot.lane.b32.xlu0 %v13480_v11, %s13951_s13  ;;  %v12022_v11 = vld [vmem:[%s13104_s5 + $0x10] sm:$0xff]  }
0x4335   :  { %v8349_v42 = vpop.xlane.xlu0 %8348 }
0x4336   :  { %12222 = vrcp.f32 %v8349_v42 }
0x4339   :  { %v8352_v38 = vpop.xlane.xlu0 %8351 }
0x433a   :  { %12224 = vrcp.f32 %v8352_v38 }
0x433d   :  { %v8434_v40 = vpop.permute.xlu0 %8433 }
0x433e   :  { %11699 = vmatpush3.msra.mxu0 %v8434_v40 }
0x433f   :  { %11711 = vmatprep.subr.bf16.mxu0 %v12286_v0 }
0x4340   :  { %v12223_v49 = vpop.eup %12222 }
0x4341   :  { %v8355_v48 = vmul.f32 %v12223_v49, %v12219_v27  ;;  %v12026_v27 = vld [vmem:[%s13155_s4 + $0x10] sm:$0xff]  }
0x4343   :  { %11696 = vmatmul.mubr.msk.f32.vlgmr.msra.gmra.mrb[104].mxu1 %vm262_vm2, %v8355_v48 }
0x4344   :  { %v12225_v45 = vpop.eup %12224  ;;  %11707 = vmatprep.mubr.msk.bf16.mxu1 %vm12288_vm0, %v12286_v0  ;;  %11704 = vmatpush3.bf16.msra.mxu1 %v12022_v11 }
0x4345   :  { %v8356_v36 = vmul.f32 %v12225_v45, %v12221_v50  ;;  %11705 = vmatprep.subr.bf16.mxu1 %v12286_v0  ;;  %v10838_v45 = vld [vmem:[%s13164_s30 + $0x1] ss:$0 sm:$0xff] }
0x4347   :  { %11701 = vmatmul.mubr.msk.f32.vlgmr.msra.gmra.mrb[116].mxu0 %vm262_vm2, %v8356_v36 }
0x4348   :  { %11715 = vmatprep.mubr.msk.bf16.mxu0 %vm12288_vm0, %v12286_v0  ;;  %11706 = vmatpush3.bf16.msra.mxu1 %v12023_v32 }
0x4349   :  { %11719 = vmatprep.subr.bf16.mxu1 %v12286_v0  ;;  %11712 = vmatpush3.bf16.msra.mxu0 %v12026_v27 }
0x434a   :  { %11713 = vmatprep.subr.bf16.mxu0 %v12286_v0 }
0x434d   :  { %11714 = vmatpush3.bf16.msra.mxu0 %v12027_v39 }
0x434e   :  { %11727 = vmatprep.subr.mxu0 %v12286_v0 }
0x4416   :  { %v8429_v26 = vpop.f32.mrb[104].mxu1 }
0x4417   :  { %v11697_v6 = vpop.f32.mrb[105].mxu1 }
0x4418   :  { %v10839_v6 = vld [vmem:[%s13169_s9 + $0x1] ss:$0 sm:$0xff] }
0x441a   :  { %v8505_v51 = vpop.f32.mrb[116].mxu0 }
0x441b   :  { %v11964_v54 = vpack.i.bf16 %v8505_v51, %v8429_v26  ;;  %v11702_v60 = vpop.f32.mrb[117].mxu0 }
0x441d   :  { %11965 = vrot.lane.b32.xlu0 %v11964_v54, %s13954_s11 }
0x448f   :  { %v11966_v9 = vpop.permute.xlu0 %11965 }
0x4490   :  { %v11968_v15 = vunpack.i.h.bf16 %v11966_v9  ;;  %v11967_v19 = vunpack.i.l.bf16 %v11966_v9 }
0x4492   :  { %v8538_v7 = vsel %vm1635_vm4, %v8536_v23, %v11968_v15  ;;  %v8537_v24 = vsel %vm1635_vm4, %v8535_v22, %v11967_v19  ;;  %v13716_v23 = vld [vmem:[%s12398_s18] ss:$0 sm:$0xff] }
0x4493   :  { %v8539_v16 = vpack.c.bf16 %v8538_v7, %v8537_v24 }
0x4495   :  { %11708 = vmatmul.mubr.msk.bf16.vlgmr.msra.gmra.mrb[108].mxu1 %vm214_vm1, %v8539_v16 }
0x4496   :  { %11720 = vmatpush3.bf16.msra.mxu1 %v12024_v34  ;;  %11723 = vmatprep.mubr.msk.bf16.mxu1 %vm12288_vm0, %v12286_v0 }
0x4497   :  { %11721 = vmatprep.subr.bf16.mxu1 %v12286_v0 }
0x449a   :  { %11722 = vmatpush3.bf16.msra.mxu1 %v12025_v63 }
0x449b   :  { %11737 = vmatprep.subr.mxu1 %v12286_v0 }
0x449d   :  { %11724 = vmatmul.mubr.msk.bf16.vlgmr.msra.gmra.mrb[112].mxu1 %vm214_vm1, %v13146_v14 }
0x449e   :  { %11739 = vmatprep.mubr.msk.f32.mxu1 %vm12288_vm0, %v12286_v0 }
0x4568   :  { %v8595_v25 = vpop.f32.mrb[108].mxu1 }
0x4569   :  { %v8596_v53 = vadd.f32 %v10834_v28, %v8595_v25  ;;  %v11709_v59 = vpop.f32.mrb[109].mxu1 }
0x456a   :  { %v8598_v17 = vpop.f32.mrb[110].mxu1 }
0x456b   :  { %v8602_v20 = vadd.f32 %v8596_v53, %v13468_v3  ;;  %v8599_v21 = vadd.f32 %v10834_v28, %v8598_v17  ;;  %v11710_v29 = vpop.f32.mrb[111].mxu1  ;;  %v13721_v28 = vld [vmem:[%s12398_s18 + $0x1] ss:$0 sm:$0xff]  ;;  %s13966_s18 = sld [smem:[#allocation2_spill]] }
0x456d   :  { %v8603_v33 = vadd.f32 %v8599_v21, %v13470_v4  ;;  %v8604_v30 = vsel %vm214_vm1, %v8602_v20, 0.0 }
0x456e   :  { %8605 = vadd.xlane.f32.xlu1 %v8604_v30 }
0x456f   :  { %v8607_v14 = vsel %vm214_vm1, %v8603_v33, 0.0 }
0x4570   :  { %8608 = vadd.xlane.f32.xlu0 %v8607_v14  ;;  %v8761_v12 = vpop.f32.mrb[112].mxu1 }
0x4571   :  { %v11725_v58 = vpop.f32.mrb[113].mxu1  ;;  %v13691_v56 = vadd.f32 %v10844_v37, %v8761_v12 }
0x4572   :  { %v8764_v41 = vpop.f32.mrb[114].mxu1 }
0x4573   :  { %v13675_v43 = vadd.f32 %v10844_v37, %v8764_v41  ;;  %v11726_v13 = vpop.f32.mrb[115].mxu1 }
0x45fb   :  { %v8606_v3 = vpop.xlane.xlu1 %8605 }
0x45fc   :  { %v8610_v18 = vmul.f32 0.03125, %v8606_v3 }
0x45fd   :  { %v8609_v35 = vpop.xlane.xlu0 %8608 }
0x45fe   :  { %v8612_v31 = vsub.f32 %v8602_v20, %v8610_v18  ;;  %v8611_v4 = vmul.f32 0.03125, %v8609_v35 }
0x4600   :  { %v8613_v47 = vsub.f32 %v8603_v33, %v8611_v4  ;;  %v8614_v52 = vmul.f32 %v8612_v31, %v8612_v31 }
0x4602   :  { %v8616_v57 = vsel %vm214_vm1, %v8614_v52, 0.0  ;;  %v8615_v44 = vmul.f32 %v8613_v47, %v8613_v47 }
0x4603   :  { %8617 = vadd.xlane.f32.xlu0 %v8616_v57 }
0x4604   :  { %v8619_v61 = vsel %vm214_vm1, %v8615_v44, 0.0 }
0x4605   :  { %8620 = vadd.xlane.f32.xlu1 %v8619_v61 }
0x4690   :  { %v8618_v50 = vpop.xlane.xlu0 %8617 }
0x4691   :  { %v8622_v55 = vmul.f32 0.03125, %v8618_v50 }
0x4692   :  { %v8621_v42 = vpop.xlane.xlu1 %8620 }
0x4693   :  { %v8624_v38 = vadd.f32 1e-05, %v8622_v55  ;;  %v8623_v40 = vmul.f32 0.03125, %v8621_v42 }
0x4695   :  { %12226 = vrsqrt.f32 %v8624_v38  ;;  %v8625_v49 = vadd.f32 1e-05, %v8623_v40 }
0x4697   :  { %12228 = vrsqrt.f32 %v8625_v49 }
0x469f   :  { %v12227_v48 = vpop.eup %12226 }
0x46a0   :  { %v8628_v36 = vmul.f32 %v12227_v48, %v8612_v31 }
0x46a1   :  { %v12229_v11 = vpop.eup %12228 }
0x46a2   :  { %v8636_v32 = vmul.f32 %v10838_v45, %v8628_v36  ;;  %v8629_v26 = vmul.f32 %v12229_v11, %v8613_v47 }
0x46a4   :  { %v8637_v51 = vmul.f32 %v10838_v45, %v8629_v26  ;;  %v13685_v54 = vadd.f32 %v10839_v6, %v8636_v32 }
0x46a6   :  { %v13687_v60 = vadd.f32 %v10839_v6, %v8637_v51 }
0x46a8   :  { %v8646_v62 = vpack.c.bf16 %v13687_v60, %v13685_v54 }
0x46aa   :  { %11716 = vmatmul.mubr.msk.bf16.vlgmr.msra.gmra.mrb[120].mxu0 %vm214_vm1, %v8646_v62 }
0x46ab   :  { %11728 = vmatpush3.xpose.msk.msra.mxu0 %vm262_vm2, %v13691_v56  ;;  %11729 = vmatprep.mubr.msk.f32.mxu0 %vm12288_vm0, %v12286_v0 }
0x46ac   :  { %11732 = vmatprep.subr.mxu0 %v12286_v0 }
0x477d   :  { %v8702_v2 = vpop.f32.mrb[120].mxu0 }
0x477e   :  { %v13700_v5 = vadd.f32 %v10840_v1, %v8702_v2  ;;  %v11717_v8 = vpop.f32.mrb[121].mxu0 }
0x477f   :  { %v8705_v9 = vpop.f32.mrb[122].mxu0 }
0x4780   :  { %v11718_v46 = vpop.f32.mrb[123].mxu0  ;;  %11730 = vmatmul.mubr.msk.f32.vlgmr.msra.gmra.mrb[118].mxu0 %vm262_vm2, %v13700_v5  ;;  %v13708_v10 = vadd.f32 %v10840_v1, %v8705_v9 }
0x4781   :  { %11733 = vmatpush3.xpose.msk.msra.mxu0 %vm262_vm2, %v13675_v43  ;;  %11734 = vmatprep.mubr.msk.f32.mxu0 %vm12288_vm0, %v12286_v0 }
0x4782   :  { %11742 = vmatprep.subr.mxu0 %v12286_v0 }
0x4784   :  { %11735 = vmatmul.mubr.msk.f32.vlgmr.msra.gmra.mrb[124].mxu0 %vm262_vm2, %v13708_v10 }
0x4785   :  { %11744 = vmatprep.mubr.msk.f32.mxu0 %vm12288_vm0, %v12286_v0 }
0x4853   :  { %v8840_v15 = vpop.f32.mrb[118].mxu0 }
0x4854   :  { %v8920_v19 = vmul.f32 0.35355338, %v8840_v15  ;;  %v11731_v22 = vpop.f32.mrb[119].mxu0 }
0x4856   :  { %v8922_v7 = vadd.f32 %v13716_v23, %v8920_v19 }
0x4857   :  { %v8916_v24 = vpop.f32.mrb[124].mxu0 }
0x4858   :  { %v8921_v34 = vmul.f32 0.35355338, %v8916_v24  ;;  %v11736_v16 = vpop.f32.mrb[125].mxu0  ;;  %v8924_v63 = vsel %vm262_vm2, %v8922_v7, -inf }
0x4859   :  { %8925 = vmax.xlane.f32.xlu0 %v8924_v63 }
0x485a   :  { %v8923_v25 = vadd.f32 %v13721_v28, %v8921_v34 }
0x485c   :  { %v8927_v53 = vsel %vm262_vm2, %v8923_v25, -inf }
0x485d   :  { %8928 = vmax.xlane.f32.xlu1 %v8927_v53 }
0x486e   :  { %9022 = vrot.lane.b32.xlu1 %v13675_v43, %s13956_s14 }
0x486f   :  { %8946 = vrot.lane.b32.xlu0 %v13691_v56, %s13956_s14 }
0x4872   :  { %9100 = vrot.lane.b32.xlu1 %v13691_v56, %s13959_s29 }
0x4873   :  { %9178 = vrot.lane.b32.xlu0 %v13675_v43, %s13959_s29 }
0x48e6   :  { %v8926_v59 = vpop.xlane.xlu0 %8925 }
0x48e7   :  { %v8930_v17 = vsub.f32 %v8922_v7, %v8926_v59 }
0x48e9   :  { %v8932_v20 = vmul.f32 1.442695, %v8930_v17 }
0x48ea   :  { %v8947_v21 = vpop.permute.xlu0 %8946  ;;  %v8929_v29 = vpop.xlane.xlu1 %8928 }
0x48eb   :  { %12230 = vpow2.f32 %v8932_v20  ;;  %v8931_v33 = vsub.f32 %v8923_v25, %v8929_v29  ;;  %11738 = vmatpush3.msra.mxu1 %v8947_v21 }
0x48ec   :  { %11747 = vmatprep.subr.mxu1 %v12286_v0 }
0x48ed   :  { %v8934_v30 = vmul.f32 1.442695, %v8931_v33 }
0x48ee   :  { %v9023_v14 = vpop.permute.xlu1 %9022  ;;  %v9179_v13 = vpop.permute.xlu0 %9178 }
0x48ef   :  { %12232 = vpow2.f32 %v8934_v30  ;;  %11743 = vmatpush3.msra.mxu0 %v9023_v14 }
0x48f0   :  { %11752 = vmatprep.subr.mxu0 %v12286_v0 }
0x48f2   :  { %v9101_v3 = vpop.permute.xlu1 %9100 }
0x48f5   :  { %v12231_v12 = vpop.eup %12230 }
0x48f6   :  { %v8936_v58 = vsel %vm262_vm2, %v12231_v12, 0.0 }
0x48f7   :  { %8937 = vadd.xlane.f32.xlu0 %v8936_v58 }
0x48f9   :  { %v12233_v37 = vpop.eup %12232 }
0x48fa   :  { %v8939_v41 = vsel %vm262_vm2, %v12233_v37, 0.0 }
0x48fb   :  { %8940 = vadd.xlane.f32.xlu1 %v8939_v41 }
0x490c   :  { %9098 = vrot.lane.b32.xlu1 %v13700_v5, %s13959_s29 }
0x490d   :  { %9176 = vrot.lane.b32.xlu0 %v13708_v10, %s13959_s29 }
0x4984   :  { %v8938_v18 = vpop.xlane.xlu0 %8937 }
0x4985   :  { %12234 = vrcp.f32 %v8938_v18 }
0x4988   :  { %v8941_v35 = vpop.xlane.xlu1 %8940  ;;  %v9177_v44 = vpop.permute.xlu0 %9176 }
0x4989   :  { %12236 = vrcp.f32 %v8941_v35 }
0x498c   :  { %v9099_v57 = vpop.permute.xlu1 %9098 }
0x498f   :  { %v12235_v31 = vpop.eup %12234 }
0x4990   :  { %v8944_v4 = vmul.f32 %v12235_v31, %v12231_v12 }
0x4992   :  { %11740 = vmatmul.mubr.msk.f32.vlgmr.msra.gmra.mrb[106].mxu1 %vm262_vm2, %v8944_v4 }
0x4993   :  { %v12237_v47 = vpop.eup %12236  ;;  %11748 = vmatpush3.xpose.msk.msra.mxu1 %vm262_vm2, %v9101_v3  ;;  %11749 = vmatprep.mubr.msk.f32.mxu1 %vm12288_vm0, %v12286_v0 }
0x4994   :  { %v8945_v52 = vmul.f32 %v12237_v47, %v12233_v37  ;;  %11757 = vmatprep.subr.mxu1 %v12286_v0 }
0x4996   :  { %11745 = vmatmul.mubr.msk.f32.vlgmr.msra.gmra.mrb[126].mxu0 %vm262_vm2, %v8945_v52  ;;  %11750 = vmatmul.mubr.msk.f32.vlgmr.msra.gmra.mrb[116].mxu1 %vm262_vm2, %v9099_v57 }
0x4997   :  { %11753 = vmatpush3.xpose.msk.msra.mxu0 %vm262_vm2, %v9179_v13  ;;  %11754 = vmatprep.mubr.msk.f32.mxu0 %vm12288_vm0, %v12286_v0 }
0x4998   :  { %11762 = vmatprep.subr.mxu0 %v12286_v0  ;;  %11759 = vmatprep.mubr.msk.f32.mxu1 %vm12288_vm0, %v12286_v0 }
0x499a   :  { %11755 = vmatmul.mubr.msk.f32.vlgmr.msra.gmra.mrb[128].mxu0 %vm262_vm2, %v9177_v44 }
0x499b   :  { %11764 = vmatprep.mubr.msk.f32.mxu0 %vm12288_vm0, %v12286_v0 }
0x4a65   :  { %v13757_v61 = vpop.f32.mrb[106].mxu1 }
0x4a66   :  { %v11741_v27 = vpop.f32.mrb[107].mxu1 }
0x4a69   :  { %v13759_v39 = vpop.f32.mrb[126].mxu0  ;;  %v9172_v50 = vpop.f32.mrb[116].mxu1 }
0x4a6a   :  { %v9254_v55 = vmul.f32 0.35355338, %v9172_v50  ;;  %v11746_v42 = vpop.f32.mrb[127].mxu0  ;;  %v11751_v38 = vpop.f32.mrb[117].mxu1 }
0x4a6c   :  { %v9256_v40 = vadd.f32 %v13716_v23, %v9254_v55 }
0x4a6d   :  { %v9250_v49 = vpop.f32.mrb[128].mxu0 }
0x4a6e   :  { %v9255_v48 = vmul.f32 0.35355338, %v9250_v49  ;;  %v11756_v45 = vpop.f32.mrb[129].mxu0  ;;  %v9258_v36 = vsel %vm262_vm2, %v9256_v40, -inf }
0x4a6f   :  { %9259 = vmax.xlane.f32.xlu1 %v9258_v36 }
0x4a70   :  { %v9257_v11 = vadd.f32 %v13721_v28, %v9255_v48 }
0x4a72   :  { %v9261_v32 = vsel %vm262_vm2, %v9257_v11, -inf }
0x4a73   :  { %9262 = vmax.xlane.f32.xlu0 %v9261_v32 }
0x4a80   :  { %9356 = vrot.lane.b32.xlu1 %v13675_v43, %s13958_s6 }
0x4a84   :  { %9434 = vrot.lane.b32.xlu1 %v13691_v56, %s13962_s7 }
0x4a89   :  { %9280 = vrot.lane.b32.xlu0 %v13691_v56, %s13958_s6 }
0x4a8d   :  { %9512 = vrot.lane.b32.xlu0 %v13675_v43, %s13962_s7 }
0x4afc   :  { %v9260_v26 = vpop.xlane.xlu1 %9259 }
0x4afd   :  { %v9264_v6 = vsub.f32 %v9256_v40, %v9260_v26 }
0x4aff   :  { %v9266_v51 = vmul.f32 1.442695, %v9264_v6 }
0x4b00   :  { %v9357_v62 = vpop.permute.xlu1 %9356  ;;  %v9263_v1 = vpop.xlane.xlu0 %9262 }
0x4b01   :  { %12238 = vpow2.f32 %v9266_v51  ;;  %v9265_v2 = vsub.f32 %v9257_v11, %v9263_v1  ;;  %11763 = vmatpush3.msra.mxu0 %v9357_v62 }
0x4b02   :  { %11772 = vmatprep.subr.mxu0 %v12286_v0 }
0x4b03   :  { %v9268_v8 = vmul.f32 1.442695, %v9265_v2 }
0x4b04   :  { %v9281_v9 = vpop.permute.xlu0 %9280  ;;  %v9435_v24 = vpop.permute.xlu1 %9434 }
0x4b05   :  { %12240 = vpow2.f32 %v9268_v8  ;;  %11758 = vmatpush3.msra.mxu1 %v9281_v9 }
0x4b06   :  { %11767 = vmatprep.subr.mxu1 %v12286_v0 }
0x4b08   :  { %v9513_v7 = vpop.permute.xlu0 %9512 }
0x4b0b   :  { %v12239_v46 = vpop.eup %12238 }
0x4b0c   :  { %v9270_v15 = vsel %vm262_vm2, %v12239_v46, 0.0 }
0x4b0d   :  { %9271 = vadd.xlane.f32.xlu0 %v9270_v15 }
0x4b0f   :  { %v12241_v19 = vpop.eup %12240 }
0x4b10   :  { %v9273_v22 = vsel %vm262_vm2, %v12241_v19, 0.0 }
0x4b11   :  { %9274 = vadd.xlane.f32.xlu1 %v9273_v22 }
0x4b22   :  { %9432 = vrot.lane.b32.xlu1 %v13700_v5, %s13962_s7 }
0x4b23   :  { %9510 = vrot.lane.b32.xlu0 %v13708_v10, %s13962_s7 }
0x4b9a   :  { %v9272_v34 = vpop.xlane.xlu0 %9271 }
0x4b9b   :  { %12242 = vrcp.f32 %v9272_v34 }
0x4b9e   :  { %v9275_v16 = vpop.xlane.xlu1 %9274  ;;  %v9511_v20 = vpop.permute.xlu0 %9510 }
0x4b9f   :  { %12244 = vrcp.f32 %v9275_v16 }
0x4ba2   :  { %v9433_v17 = vpop.permute.xlu1 %9432 }
0x4ba5   :  { %v12243_v63 = vpop.eup %12242 }
0x4ba6   :  { %v9278_v25 = vmul.f32 %v12243_v63, %v12239_v46 }
0x4ba8   :  { %11760 = vmatmul.mubr.msk.f32.vlgmr.msra.gmra.mrb[118].mxu1 %vm262_vm2, %v9278_v25 }
0x4ba9   :  { %v12245_v53 = vpop.eup %12244  ;;  %11768 = vmatpush3.xpose.msk.msra.mxu1 %vm262_vm2, %v9435_v24  ;;  %11769 = vmatprep.mubr.msk.f32.mxu1 %vm12288_vm0, %v12286_v0 }
0x4baa   :  { %v9279_v59 = vmul.f32 %v12245_v53, %v12241_v19  ;;  %11777 = vmatprep.subr.mxu1 %v12286_v0 }
0x4bac   :  { %11765 = vmatmul.mubr.msk.f32.vlgmr.msra.gmra.mrb[130].mxu0 %vm262_vm2, %v9279_v59  ;;  %11770 = vmatmul.mubr.msk.f32.vlgmr.msra.gmra.mrb[120].mxu1 %vm262_vm2, %v9433_v17 }
0x4bad   :  { %11773 = vmatpush3.xpose.msk.msra.mxu0 %vm262_vm2, %v9513_v7  ;;  %11774 = vmatprep.mubr.msk.f32.mxu0 %vm12288_vm0, %v12286_v0 }
0x4bae   :  { %11782 = vmatprep.subr.mxu0 %v12286_v0  ;;  %11779 = vmatprep.mubr.msk.f32.mxu1 %vm12288_vm0, %v12286_v0 }
0x4bb0   :  { %11775 = vmatmul.mubr.msk.f32.vlgmr.msra.gmra.mrb[132].mxu0 %vm262_vm2, %v9511_v20 }
0x4bb1   :  { %11784 = vmatprep.mubr.msk.f32.mxu0 %vm12288_vm0, %v12286_v0 }
0x4c7b   :  { %v13797_v21 = vpop.f32.mrb[118].mxu1 }
0x4c7c   :  { %v11761_v29 = vpop.f32.mrb[119].mxu1 }
0x4c7f   :  { %v13799_v33 = vpop.f32.mrb[130].mxu0  ;;  %v9506_v30 = vpop.f32.mrb[120].mxu1 }
0x4c80   :  { %v11969_v14 = vpack.i.bf16 %v13799_v33, %v13797_v21  ;;  %v9588_v12 = vmul.f32 0.35355338, %v9506_v30  ;;  %v11766_v58 = vpop.f32.mrb[131].mxu0  ;;  %v11771_v37 = vpop.f32.mrb[121].mxu1 }
0x4c82   :  { %v9590_v41 = vadd.f32 %v13716_v23, %v9588_v12 }
0x4c83   :  { %v9584_v13 = vpop.f32.mrb[132].mxu0 }
0x4c84   :  { %v9589_v3 = vmul.f32 0.35355338, %v9584_v13  ;;  %v11776_v18 = vpop.f32.mrb[133].mxu0  ;;  %v9592_v35 = vsel %vm262_vm2, %v9590_v41, -inf }
0x4c85   :  { %9593 = vmax.xlane.f32.xlu1 %v9592_v35  ;;  %v12029_v35 = vld [vmem:[%s13366_s17 + $0x18] sm:$0xff]  }
0x4c86   :  { %v9591_v31 = vadd.f32 %v13721_v28, %v9589_v3 }
0x4c88   :  { %v9595_v4 = vsel %vm262_vm2, %v9591_v31, -inf }
0x4c89   :  { %9596 = vmax.xlane.f32.xlu0 %v9595_v4 }
0x4c96   :  { %9690 = vrot.lane.b32.xlu1 %v13675_v43, %s13961_s12 }
0x4c9a   :  { %9768 = vrot.lane.b32.xlu1 %v13691_v56, %s13965_s24 }
0x4c9f   :  { %9614 = vrot.lane.b32.xlu0 %v13691_v56, %s13961_s12 }
0x4ca3   :  { %9846 = vrot.lane.b32.xlu0 %v13675_v43, %s13965_s24 }
0x4d12   :  { %v9594_v47 = vpop.xlane.xlu1 %9593 }
0x4d13   :  { %v9598_v52 = vsub.f32 %v9590_v41, %v9594_v47 }
0x4d15   :  { %v9600_v57 = vmul.f32 1.442695, %v9598_v52 }
0x4d16   :  { %v9691_v44 = vpop.permute.xlu1 %9690  ;;  %v9597_v27 = vpop.xlane.xlu0 %9596 }
0x4d17   :  { %12246 = vpow2.f32 %v9600_v57  ;;  %v9599_v50 = vsub.f32 %v9591_v31, %v9597_v27  ;;  %11783 = vmatpush3.msra.mxu0 %v9691_v44 }
0x4d18   :  { %11792 = vmatprep.subr.mxu0 %v12286_v0 }
0x4d19   :  { %v9602_v55 = vmul.f32 1.442695, %v9599_v50 }
0x4d1a   :  { %v9615_v42 = vpop.permute.xlu0 %9614  ;;  %v9769_v36 = vpop.permute.xlu1 %9768 }
0x4d1b   :  { %12248 = vpow2.f32 %v9602_v55  ;;  %11778 = vmatpush3.msra.mxu1 %v9615_v42 }
0x4d1c   :  { %11787 = vmatprep.subr.mxu1 %v12286_v0 }
0x4d1e   :  { %v9847_v45 = vpop.permute.xlu0 %9846 }
0x4d21   :  { %v12247_v38 = vpop.eup %12246 }
0x4d22   :  { %v9604_v40 = vsel %vm262_vm2, %v12247_v38, 0.0 }
0x4d23   :  { %9605 = vadd.xlane.f32.xlu0 %v9604_v40 }
0x4d25   :  { %v12249_v49 = vpop.eup %12248 }
0x4d26   :  { %v9607_v48 = vsel %vm262_vm2, %v12249_v49, 0.0 }
0x4d27   :  { %9608 = vadd.xlane.f32.xlu1 %v9607_v48 }
0x4d38   :  { %9766 = vrot.lane.b32.xlu1 %v13700_v5, %s13965_s24 }
0x4d39   :  { %9844 = vrot.lane.b32.xlu0 %v13708_v10, %s13965_s24 }
0x4db0   :  { %v9606_v11 = vpop.xlane.xlu0 %9605 }
0x4db1   :  { %12250 = vrcp.f32 %v9606_v11 }
0x4db4   :  { %v9609_v32 = vpop.xlane.xlu1 %9608  ;;  %v9845_v62 = vpop.permute.xlu0 %9844 }
0x4db5   :  { %12252 = vrcp.f32 %v9609_v32 }
0x4db8   :  { %v9767_v10 = vpop.permute.xlu1 %9766 }
0x4dbb   :  { %v12251_v26 = vpop.eup %12250 }
0x4dbc   :  { %v9612_v6 = vmul.f32 %v12251_v26, %v12247_v38 }
0x4dbe   :  { %11780 = vmatmul.mubr.msk.f32.vlgmr.msra.gmra.mrb[122].mxu1 %vm262_vm2, %v9612_v6 }
0x4dbf   :  { %v12253_v51 = vpop.eup %12252  ;;  %11788 = vmatpush3.xpose.msk.msra.mxu1 %vm262_vm2, %v9769_v36  ;;  %11789 = vmatprep.mubr.msk.f32.mxu1 %vm12288_vm0, %v12286_v0 }
0x4dc0   :  { %v9613_v5 = vmul.f32 %v12253_v51, %v12249_v49  ;;  %11797 = vmatprep.subr.mxu1 %v12286_v0 }
0x4dc2   :  { %11785 = vmatmul.mubr.msk.f32.vlgmr.msra.gmra.mrb[134].mxu0 %vm262_vm2, %v9613_v5  ;;  %11790 = vmatmul.mubr.msk.f32.vlgmr.msra.gmra.mrb[124].mxu1 %vm262_vm2, %v9767_v10 }
0x4dc3   :  { %11793 = vmatpush3.xpose.msk.msra.mxu0 %vm262_vm2, %v9847_v45  ;;  %11794 = vmatprep.mubr.msk.f32.mxu0 %vm12288_vm0, %v12286_v0 }
0x4dc4   :  { %11802 = vmatprep.subr.mxu0 %v12286_v0  ;;  %11799 = vmatprep.mubr.msk.f32.mxu1 %vm12288_vm0, %v12286_v0 }
0x4dc6   :  { %11795 = vmatmul.mubr.msk.f32.vlgmr.msra.gmra.mrb[136].mxu0 %vm262_vm2, %v9845_v62 }
0x4dc7   :  { %11804 = vmatprep.mubr.msk.f32.mxu0 %vm12288_vm0, %v12286_v0 }
0x4e91   :  { %v9686_v1 = vpop.f32.mrb[122].mxu1 }
0x4e92   :  { %v11781_v2 = vpop.f32.mrb[123].mxu1 }
0x4e95   :  { %v9762_v8 = vpop.f32.mrb[134].mxu0  ;;  %v9840_v9 = vpop.f32.mrb[124].mxu1 }
0x4e96   :  { %v11974_v46 = vpack.i.bf16 %v9762_v8, %v9686_v1  ;;  %v9922_v15 = vmul.f32 0.35355338, %v9840_v9  ;;  %v11786_v19 = vpop.f32.mrb[135].mxu0  ;;  %v11791_v22 = vpop.f32.mrb[125].mxu1 }
0x4e98   :  { %v9924_v7 = vadd.f32 %v13716_v23, %v9922_v15 }
0x4e99   :  { %v9918_v24 = vpop.f32.mrb[136].mxu0 }
0x4e9a   :  { %v9923_v34 = vmul.f32 0.35355338, %v9918_v24  ;;  %v11796_v16 = vpop.f32.mrb[137].mxu0  ;;  %v9926_v63 = vsel %vm262_vm2, %v9924_v7, -inf }
0x4e9b   :  { %9927 = vmax.xlane.f32.xlu1 %v9926_v63 }
0x4e9c   :  { %v9925_v25 = vadd.f32 %v13721_v28, %v9923_v34 }
0x4e9e   :  { %v9929_v53 = vsel %vm262_vm2, %v9925_v25, -inf }
0x4e9f   :  { %9930 = vmax.xlane.f32.xlu0 %v9929_v53  ;;  %v12030_v53 = vld [vmem:[%s13399_s26 + $0x10] sm:$0xff]  }
0x4f28   :  { %v9928_v59 = vpop.xlane.xlu1 %9927 }
0x4f29   :  { %v9932_v17 = vsub.f32 %v9924_v7, %v9928_v59  ;;  %v12031_v59 = vld [vmem:[%s13399_s26 + $0x18] sm:$0xff]  }
0x4f2b   :  { %v9934_v20 = vmul.f32 1.442695, %v9932_v17  ;;  %v12032_v17 = vld [vmem:[%s13408_s22 + $0x20] sm:$0xff]  }
0x4f2c   :  { %v9931_v29 = vpop.xlane.xlu0 %9930 }
0x4f2d   :  { %12254 = vpow2.f32 %v9934_v20  ;;  %v9933_v30 = vsub.f32 %v9925_v25, %v9931_v29  ;;  %v12033_v20 = vld [vmem:[%s13408_s22 + $0x28] sm:$0xff]  }
0x4f2f   :  { %v9936_v12 = vmul.f32 1.442695, %v9933_v30 }
0x4f31   :  { %12256 = vpow2.f32 %v9936_v12 }
0x4f37   :  { %v12255_v23 = vpop.eup %12254 }
0x4f38   :  { %v9938_v58 = vsel %vm262_vm2, %v12255_v23, 0.0 }
0x4f39   :  { %9939 = vadd.xlane.f32.xlu0 %v9938_v58 }
0x4f3b   :  { %v12257_v37 = vpop.eup %12256 }
0x4f3c   :  { %v9941_v41 = vsel %vm262_vm2, %v12257_v37, 0.0 }
0x4f3d   :  { %9942 = vadd.xlane.f32.xlu1 %v9941_v41 }
0x4f4e   :  { %10024 = vrot.lane.b32.xlu1 %v13675_v43, %s13964_s19 }
0x4f4f   :  { %9948 = vrot.lane.b32.xlu0 %v13691_v56, %s13964_s19 }
0x4f52   :  { %11970 = vrot.lane.b32.xlu1 %v11969_v14, %s13952_s28  ;;  %v12028_v14 = vld [vmem:[%s13366_s17 + $0x10] sm:$0xff]  }
0x4f53   :  { %11975 = vrot.lane.b32.xlu0 %v11974_v46, %s13953_s3  ;;  %s10553_s3 = sld [smem:[%s13921_s0 + %s12335_s8]]  }
0x4fc6   :  { %v9940_v28 = vpop.xlane.xlu0 %9939 }
0x4fc7   :  { %12258 = vrcp.f32 %v9940_v28 }
0x4fca   :  { %v9943_v13 = vpop.xlane.xlu1 %9942  ;;  %v9949_v3 = vpop.permute.xlu0 %9948 }
0x4fcb   :  { %12260 = vrcp.f32 %v9943_v13  ;;  %11798 = vmatpush3.msra.mxu1 %v9949_v3  ;;  %v10876_v13 = vld [vmem:[%s13417_s15 + $0x1] ss:$0 sm:$0xff] }
0x4fcc   :  { %11807 = vmatprep.subr.bf16.mxu1 %v12286_v0 }
0x4fce   :  { %v10025_v43 = vpop.permute.xlu1 %10024  ;;  %v11976_v55 = vpop.permute.xlu0 %11975 }
0x4fcf   :  { %11803 = vmatpush3.msra.mxu0 %v10025_v43  ;;  %v11978_v40 = vunpack.i.h.bf16 %v11976_v55  ;;  %v11977_v49 = vunpack.i.l.bf16 %v11976_v55 }
0x4fd0   :  { %11815 = vmatprep.subr.bf16.mxu0 %v12286_v0 }
0x4fd1   :  { %v12259_v56 = vpop.eup %12258 }
0x4fd2   :  { %v9946_v18 = vmul.f32 %v12259_v56, %v12255_v23  ;;  %v11971_v44 = vpop.permute.xlu1 %11970 }
0x4fd3   :  { %v11973_v27 = vunpack.i.h.bf16 %v11971_v44  ;;  %v11972_v50 = vunpack.i.l.bf16 %v11971_v44 }
0x4fd4   :  { %11800 = vmatmul.mubr.msk.f32.vlgmr.msra.gmra.mrb[126].mxu1 %vm262_vm2, %v9946_v18  ;;  %v10877_v18 = vld [vmem:[%s13422_s20 + $0x1] ss:$0 sm:$0xff]  ;;  %s12334_s20 = smov 36  }
0x4fd5   :  { %v12261_v21 = vpop.eup %12260  ;;  %11811 = vmatprep.mubr.msk.bf16.mxu1 %vm12288_vm0, %v12286_v0  ;;  %11808 = vmatpush3.bf16.msra.mxu1 %v12028_v14  ;;  %v10125_v42 = vsel %vm262_vm2, %v13759_v39, %v11973_v27  ;;  %v10124_v38 = vsel %vm262_vm2, %v13757_v61, %v11972_v50  ;;  %v10872_v61 = vld [vmem:[%s13387_s27 + $0x1] ss:$0 sm:$0xff]  ;;  %s10552_s27 = sld [smem:[%s13921_s0 + %s12334_s20]]  }
0x4fd6   :  { %v9947_v33 = vmul.f32 %v12261_v21, %v12257_v37  ;;  %11809 = vmatprep.subr.bf16.mxu1 %v12286_v0  ;;  %v10126_v11 = vsel %vm1632_vm3, %v10124_v38, %v11977_v49  ;;  %v10127_v32 = vsel %vm1632_vm3, %v10125_v42, %v11978_v40  ;;  %v10882_v49 = vld [vmem:[%s13966_s18 + $0x1] ss:$0 sm:$0xff] }
0x4fd8   :  { %11805 = vmatmul.mubr.msk.f32.vlgmr.msra.gmra.mrb[138].mxu0 %vm262_vm2, %v9947_v33 }
0x4fd9   :  { %11819 = vmatprep.mubr.msk.bf16.mxu0 %vm12288_vm0, %v12286_v0  ;;  %11810 = vmatpush3.bf16.msra.mxu1 %v12029_v35 }
0x4fda   :  { %11823 = vmatprep.subr.bf16.mxu1 %v12286_v0  ;;  %11816 = vmatpush3.bf16.msra.mxu0 %v12030_v53  ;;  %v10888_v53 = vld [vmem:[%s13459_s21 + $0x1] ss:$0 sm:$0xff] }
0x4fdb   :  { %11817 = vmatprep.subr.bf16.mxu0 %v12286_v0 }
0x4fde   :  { %11818 = vmatpush3.bf16.msra.mxu0 %v12031_v59 }
0x4fdf   :  { %11835 = vmatprep.subr.bf16.mxu0 %v12286_v0 }
0x50a7   :  { %v10020_v31 = vpop.f32.mrb[126].mxu1 }
0x50a8   :  { %v11801_v4 = vpop.f32.mrb[127].mxu1 }
0x50a9   :  { %v12035_v4 = vld [vmem:[%s13408_s22 + $0x38] sm:$0xff]  }
0x50ab   :  { %v10096_v47 = vpop.f32.mrb[138].mxu0 }
0x50ac   :  { %v11979_v52 = vpack.i.bf16 %v10096_v47, %v10020_v31  ;;  %v11806_v57 = vpop.f32.mrb[139].mxu0  ;;  %v12034_v31 = vld [vmem:[%s13408_s22 + $0x30] sm:$0xff]   ;;  %v10878_v47 = vld [vmem:[%s13436_s25 + $0x1] ss:$0 sm:$0xff] }
0x50ae   :  { %11980 = vrot.lane.b32.xlu1 %v11979_v52, %s13954_s11  ;;  %s12336_s11 = smov 38  }
0x50af   :  { %s10554_s4 = sld [smem:[%s13921_s0 + %s12336_s11]]  }
0x5120   :  { %v11981_v48 = vpop.permute.xlu1 %11980 }
0x5121   :  { %v11983_v45 = vunpack.i.h.bf16 %v11981_v48  ;;  %v11982_v36 = vunpack.i.l.bf16 %v11981_v48 }
0x5123   :  { %v10129_v26 = vsel %vm1635_vm4, %v10127_v32, %v11983_v45  ;;  %v10128_v6 = vsel %vm1635_vm4, %v10126_v11, %v11982_v36 }
0x5124   :  { %v10130_v51 = vpack.c.bf16 %v10129_v26, %v10128_v6 }
0x5126   :  { %11812 = vmatmul.mubr.msk.bf16.vlgmr.msra.gmra.mrb[128].mxu1 %vm214_vm1, %v10130_v51 }
0x5127   :  { %11831 = vmatprep.mubr.msk.bf16.mxu1 %vm12288_vm0, %v12286_v0  ;;  %11824 = vmatpush3.bf16.msra.mxu1 %v12032_v17 }
0x5128   :  { %11825 = vmatprep.subr.bf16.mxu1 %v12286_v0 }
0x512b   :  { %11826 = vmatpush3.bf16.msra.mxu1 %v12033_v20 }
0x512c   :  { %11827 = vmatprep.subr.bf16.mxu1 %v12286_v0 }
0x512f   :  { %11828 = vmatpush3.bf16.msra.mxu1 %v12034_v31 }
0x5130   :  { %11829 = vmatprep.subr.bf16.mxu1 %v12286_v0 }
0x5133   :  { %11830 = vmatpush3.bf16.msra.mxu1 %v12035_v4 }
0x51f9   :  { %v10186_v39 = vpop.f32.mrb[128].mxu1 }
0x51fa   :  { %v10187_v5 = vadd.f32 %v10872_v61, %v10186_v39  ;;  %v11813_v10 = vpop.f32.mrb[129].mxu1 }
0x51fb   :  { %v10189_v62 = vpop.f32.mrb[130].mxu1 }
0x51fc   :  { %v10193_v1 = vadd.f32 %v10187_v5, %v13685_v54  ;;  %v10190_v2 = vadd.f32 %v10872_v61, %v10189_v62  ;;  %v11814_v8 = vpop.f32.mrb[131].mxu1 }
0x51fe   :  { %v10194_v9 = vadd.f32 %v10190_v2, %v13687_v60  ;;  %v10195_v46 = vsel %vm214_vm1, %v10193_v1, 0.0 }
0x51ff   :  { %10196 = vadd.xlane.f32.xlu0 %v10195_v46 }
0x5200   :  { %v10198_v15 = vsel %vm214_vm1, %v10194_v9, 0.0 }
0x5201   :  { %10199 = vadd.xlane.f32.xlu1 %v10198_v15 }
0x528c   :  { %v10197_v19 = vpop.xlane.xlu0 %10196 }
0x528d   :  { %v10201_v22 = vmul.f32 0.03125, %v10197_v19 }
0x528e   :  { %v10200_v7 = vpop.xlane.xlu1 %10199 }
0x528f   :  { %v10203_v24 = vsub.f32 %v10193_v1, %v10201_v22  ;;  %v10202_v34 = vmul.f32 0.03125, %v10200_v7  ;;  %v12036_v22 = vld [vmem:[%s10552_s27] sm:$0xff]   ;;  %v12037_v7 = vld [vmem:[%s10552_s27 + $0x8] sm:$0xff]  }
0x5291   :  { %v10204_v54 = vsub.f32 %v10194_v9, %v10202_v34  ;;  %v10205_v16 = vmul.f32 %v10203_v24, %v10203_v24 }
0x5293   :  { %v10207_v63 = vsel %vm214_vm1, %v10205_v16, 0.0  ;;  %v10206_v60 = vmul.f32 %v10204_v54, %v10204_v54 }
0x5294   :  { %10208 = vadd.xlane.f32.xlu0 %v10207_v63 }
0x5295   :  { %v10210_v25 = vsel %vm214_vm1, %v10206_v60, 0.0 }
0x5298   :  { %10211 = vadd.xlane.f32.xlu0 %v10210_v25 }
0x5321   :  { %v10209_v29 = vpop.xlane.xlu0 %10208 }
0x5322   :  { %v10213_v30 = vmul.f32 0.03125, %v10209_v29 }
0x5324   :  { %v10215_v12 = vadd.f32 1e-05, %v10213_v30  ;;  %v10889_v30 = vld [vmem:[%s13464_s23 + $0x1] ss:$0 sm:$0xff] }
0x5325   :  { %v10212_v23 = vpop.xlane.xlu0 %10211 }
0x5326   :  { %12262 = vrsqrt.f32 %v10215_v12  ;;  %v10214_v58 = vmul.f32 0.03125, %v10212_v23 }
0x5328   :  { %v10216_v37 = vadd.f32 1e-05, %v10214_v58 }
0x532a   :  { %12264 = vrsqrt.f32 %v10216_v37  ;;  %v10890_v37 = vld [vmem:[%s10553_s3] ss:$0 sm:$0xff] }
0x5330   :  { %v12263_v41 = vpop.eup %12262 }
0x5331   :  { %v10219_v28 = vmul.f32 %v12263_v41, %v10203_v24 }
0x5333   :  { %v10227_v43 = vmul.f32 %v10876_v13, %v10219_v28 }
0x5334   :  { %v12265_v3 = vpop.eup %12264 }
0x5335   :  { %v10220_v56 = vmul.f32 %v12265_v3, %v10204_v54  ;;  %v10235_v33 = vadd.f32 %v10877_v18, %v10227_v43 }
0x5337   :  { %v10228_v21 = vmul.f32 %v10876_v13, %v10220_v56 }
0x5339   :  { %v10236_v14 = vadd.f32 %v10877_v18, %v10228_v21 }
0x533b   :  { %v10237_v35 = vpack.c.bf16 %v10236_v14, %v10235_v33 }
0x533d   :  { %11820 = vmatmul.mubr.msk.bf16.vlgmr.msra.gmra.mrb[140].mxu0 %vm214_vm1, %v10237_v35 }
0x533e   :  { %11839 = vmatprep.mubr.msk.bf16.mxu0 %vm12288_vm0, %v12286_v0  ;;  %11836 = vmatpush3.bf16.msra.mxu0 %v12036_v22 }
0x533f   :  { %11837 = vmatprep.subr.bf16.mxu0 %v12286_v0 }
0x5342   :  { %11838 = vmatpush3.bf16.msra.mxu0 %v12037_v7 }
0x5410   :  { %v10293_v52 = vpop.f32.mrb[140].mxu0 }
0x5411   :  { %v10294_v57 = vadd.f32 %v10878_v47, %v10293_v52  ;;  %v11821_v44 = vpop.f32.mrb[141].mxu0 }
0x5412   :  { %v10296_v27 = vpop.f32.mrb[142].mxu0 }
0x5413   :  { %v10297_v50 = vadd.f32 %v10878_v47, %v10296_v27  ;;  %v11822_v55 = vpop.f32.mrb[143].mxu0  ;;  %v10300_v42 = vmax.f32 %v10294_v57, 0.0 }
0x5415   :  { %v10301_v38 = vmax.f32 %v10297_v50, 0.0 }
0x5417   :  { %v10302_v40 = vpack.c.bf16 %v10301_v38, %v10300_v42 }
0x5419   :  { %11832 = vmatmul.mubr.msk.bf16.vlgmr.msra.gmra.mrb[132].mxu1 %vm1842_vm5, %v10302_v40 }
0x54ec   :  { %v10370_v48 = vpop.f32.mrb[132].mxu1 }
0x54ed   :  { %v10371_v45 = vadd.f32 %v10882_v49, %v10370_v48  ;;  %v11833_v36 = vpop.f32.mrb[133].mxu1 }
0x54ee   :  { %v10373_v11 = vpop.f32.mrb[134].mxu1 }
0x54ef   :  { %v10377_v32 = vadd.f32 %v10371_v45, %v10235_v33  ;;  %v10374_v26 = vadd.f32 %v10882_v49, %v10373_v11  ;;  %v11834_v6 = vpop.f32.mrb[135].mxu1 }
0x54f1   :  { %v10378_v51 = vadd.f32 %v10374_v26, %v10236_v14  ;;  %v10379_v61 = vsel %vm214_vm1, %v10377_v32, 0.0 }
0x54f2   :  { %10380 = vadd.xlane.f32.xlu1 %v10379_v61 }
0x54f3   :  { %v10382_v39 = vsel %vm214_vm1, %v10378_v51, 0.0 }
0x54f4   :  { %10383 = vadd.xlane.f32.xlu0 %v10382_v39 }
0x557f   :  { %v10381_v5 = vpop.xlane.xlu1 %10380 }
0x5580   :  { %v10385_v10 = vmul.f32 0.03125, %v10381_v5 }
0x5581   :  { %v10384_v62 = vpop.xlane.xlu0 %10383 }
0x5582   :  { %v10387_v1 = vsub.f32 %v10377_v32, %v10385_v10  ;;  %v10386_v2 = vmul.f32 0.03125, %v10384_v62 }
0x5584   :  { %v10388_v8 = vsub.f32 %v10378_v51, %v10386_v2  ;;  %v10389_v9 = vmul.f32 %v10387_v1, %v10387_v1 }
0x5586   :  { %v10391_v46 = vsel %vm214_vm1, %v10389_v9, 0.0  ;;  %v10390_v15 = vmul.f32 %v10388_v8, %v10388_v8 }
0x5587   :  { %10392 = vadd.xlane.f32.xlu1 %v10391_v46 }
0x5588   :  { %v10394_v19 = vsel %vm214_vm1, %v10390_v15, 0.0 }
0x5589   :  { %10395 = vadd.xlane.f32.xlu0 %v10394_v19 }
0x5614   :  { %v10393_v24 = vpop.xlane.xlu1 %10392 }
0x5615   :  { %v10397_v34 = vmul.f32 0.03125, %v10393_v24 }
0x5616   :  { %v10396_v54 = vpop.xlane.xlu0 %10395 }
0x5617   :  { %v10399_v16 = vadd.f32 1e-05, %v10397_v34  ;;  %v10398_v63 = vmul.f32 0.03125, %v10396_v54 }
0x5619   :  { %12266 = vrsqrt.f32 %v10399_v16  ;;  %v10400_v60 = vadd.f32 1e-05, %v10398_v63 }
0x561b   :  { %12268 = vrsqrt.f32 %v10400_v60 }
0x5623   :  { %v12267_v25 = vpop.eup %12266 }
0x5624   :  { %v10403_v59 = vmul.f32 %v12267_v25, %v10387_v1 }
0x5625   :  { %v12269_v17 = vpop.eup %12268 }
0x5626   :  { %v10411_v20 = vmul.f32 %v10888_v53, %v10403_v59  ;;  %v10404_v29 = vmul.f32 %v12269_v17, %v10388_v8 }
0x5628   :  { %v10412_v12 = vmul.f32 %v10888_v53, %v10404_v29  ;;  %v10419_v23 = vadd.f32 %v10889_v30, %v10411_v20 }
0x562a   :  { %v10420_v0 = vadd.f32 %v10889_v30, %v10412_v12 }
0x562c   :  { %v10421_v58 = vpack.c.bf16 %v10420_v0, %v10419_v23 }
0x562e   :  { %11840 = vmatmul.mubr.msk.bf16.vlgmr.msra.gmra.mrb[144].mxu0 %vm214_vm1, %v10421_v58 }
0x5701   :  { %v10482_v41 = vpop.f32.mrb[144].mxu0 }
0x5702   :  { %v10483_v28 = vadd.f32 %v10890_v37, %v10482_v41  ;;  %v11841_v13 = vpop.f32.mrb[145].mxu0 }
0x5703   :  { %v10485_v3 = vpop.f32.mrb[146].mxu0 }
0x5704   :  { %v10486_v43 = vadd.f32 %v10890_v37, %v10485_v3  ;;  %10489 = vmax.xlane.f32.xlu1 %v10483_v28  ;;  %v11842_v56 = vpop.f32.mrb[147].mxu0 }
0x5706   :  { %10491 = vmax.xlane.f32.xlu0 %v10486_v43 }
0x5791   :  { %v10490_v18 = vpop.xlane.xlu1 %10489 }
0x5792   :  { %v10493_v21 = vsub.f32 %v10483_v28, %v10490_v18 }
0x5793   :  { %v10492_v33 = vpop.xlane.xlu0 %10491 }
0x5794   :  { %v10495_v14 = vmul.f32 1.442695, %v10493_v21  ;;  %v10494_v35 = vsub.f32 %v10486_v43, %v10492_v33 }
0x5796   :  { %12270 = vpow2.f32 %v10495_v14  ;;  %v10497_v31 = vmul.f32 1.442695, %v10494_v35 }
0x5798   :  { %12272 = vpow2.f32 %v10497_v31 }
0x57a0   :  { %v12271_v4 = vpop.eup %12270 }
0x57a1   :  { %10499 = vadd.xlane.f32.xlu1 %v12271_v4 }
0x57a2   :  { %v12273_v47 = vpop.eup %12272 }
0x57a3   :  { %10501 = vadd.xlane.f32.xlu0 %v12273_v47 }
0x582e   :  { %v10500_v52 = vpop.xlane.xlu1 %10499 }
0x582f   :  { %12274 = vlog2.f32 %v10500_v52 }
0x5830   :  { %v10502_v57 = vpop.xlane.xlu0 %10501 }
0x5831   :  { %12276 = vlog2.f32 %v10502_v57 }
0x5839   :  { %v12275_v44 = vpop.eup %12274 }
0x583a   :  { %v10504_v27 = vmul.f32 0.6931472, %v12275_v44 }
0x583b   :  { %v12277_v50 = vpop.eup %12276 }
0x583c   :  { %v10507_v55 = vadd.f32 %v10504_v27, %v10490_v18  ;;  %v10506_v42 = vmul.f32 0.6931472, %v12277_v50 }
0x583e   :  { %v10509_v38 = vsub.f32 %v10483_v28, %v10507_v55  ;;  %v10508_v40 = vadd.f32 %v10506_v42, %v10492_v33 }
0x5840   :  { %10511 = vst [vmem:[%s10554_s4] sm:$0xff] %v10509_v38  ;;  %v10510_v49 = vsub.f32 %v10486_v43, %v10508_v40 }
0x5842   :  { %10512 = vst [vmem:[%s10554_s4 + $0x8] sm:$0xff] %v10510_v49 }

</bundles_post_ra>
